<compile_context>
chip_gen: v5e
topology: v5e:2x2
jax: 0.10.0
libtpu: 0.0.40
codegen_flags: <defaults>
</compile_context>

<pallas_src>
import numpy as np

import jax
import jax.numpy as jnp
from jax.experimental import pallas as pl
from jax.experimental.pallas import tpu as pltpu


# ----------------------------------------------------------------------------
# Init-time helper: fold a zero-padded Conv2d into a dense GEMM operator.
#   out_nchw_flat = in_nchw_flat @ M,   M: (Cin*H*W, Cout*OH*OW)
# ----------------------------------------------------------------------------
def _conv2d_as_matrix(w_oihw, in_h, in_w, stride, pad):
    cout, cin, kh, kw = w_oihw.shape
    oh = (in_h + 2 * pad - kh) // stride + 1
    ow = (in_w + 2 * pad - kw) // stride + 1
    m = np.zeros((cin * in_h * in_w, cout * oh * ow), np.float32)
    ci = np.arange(cin)
    co = np.arange(cout)
    for dy in range(kh):
        for dx in range(kw):
            tap = w_oihw[:, :, dy, dx].T                   # (Cin, Cout)
            for oy in range(oh):
                iy = oy * stride + dy - pad
                if iy < 0 or iy >= in_h:
                    continue
                for ox in range(ow):
                    ix = ox * stride + dx - pad
                    if ix < 0 or ix >= in_w:
                        continue
                    rows = (ci * in_h + iy) * in_w + ix    # NCHW input index
                    cols = (co * oh + oy) * ow + ox        # NCHW output index
                    m[np.ix_(rows, cols)] = tap
    return m


# ----------------------------------------------------------------------------
# Fused Pallas kernel: entire Audio2Exp forward in one launch.
# ----------------------------------------------------------------------------
def _audio2exp_kernel(x_ref, w1_ref, b1_ref, w2_ref, b2_ref,
                      w3_ref, b3_ref, w4_ref, b4_ref, o_ref):
    def layer(h, w_ref, b_ref, relu):
        acc = jnp.dot(h.astype(jnp.bfloat16), w_ref[...],
                      preferred_element_type=jnp.float32)   # bf16 MXU, f32 acc
        acc = acc + b_ref[...]                               # (1, N) f32 bias
        return jnp.maximum(acc, 0.0) if relu else acc        # f32 epilogue

    h = layer(x_ref[...], w1_ref, b1_ref, True)    # conv1 as GEMM -> (B, 2048)
    h = layer(h, w2_ref, b2_ref, True)             # conv2 as GEMM -> (B, 1024)
    h = layer(h, w3_ref, b3_ref, True)             # fc1           -> (B, 32)
    h = layer(h, w4_ref, b4_ref, False)            # fc2           -> (B, 10)
    o_ref[...] = h.astype(o_ref.dtype)


def _full_spec(shape):
    return pl.BlockSpec(shape, lambda i: (0, 0))


@jax.jit
def lip_trainer_forward(params, audio_nchw):
    """LipTrainer.forward: audio (B,1,16,16) NCHW -> expression PCA (B,10)."""
    B = audio_nchw.shape[0]
    x = audio_nchw.reshape(B, -1).astype(jnp.float32)        # (B, 256) NCHW flat
    operands = (x,
                params["W1"], params["b1"], params["W2"], params["b2"],
                params["W3"], params["b3"], params["W4"], params["b4"])
    n_out = params["W4"].shape[1]
    return pl.pallas_call(
        _audio2exp_kernel,
        out_shape=jax.ShapeDtypeStruct((B, n_out), jnp.float32),
        grid=(1,),
        in_specs=[_full_spec(op.shape) for op in operands],
        out_specs=_full_spec((B, n_out)),
        compiler_params=pltpu.CompilerParams(
            dimension_semantics=("arbitrary",),
            vmem_limit_bytes=32 * 1024 * 1024),
    )(*operands)


# ----------------------------------------------------------------------------
# Parameters (deterministic, synthetic) — all casts / folding done ONCE here.
# ----------------------------------------------------------------------------
def init_params(key):
    ks = jax.random.split(key, 8)
    # Native (PyTorch-layout) parameters of the synthetic Audio2Exp.
    w1 = 0.1 * jax.random.normal(ks[0], (8, 1, 3, 3), jnp.float32)      # OIHW
    b1 = 0.01 * jax.random.normal(ks[1], (8,), jnp.float32)
    w2 = 0.1 * jax.random.normal(ks[2], (16, 8, 3, 3), jnp.float32)     # OIHW
    b2 = 0.01 * jax.random.normal(ks[3], (16,), jnp.float32)
    w3 = 0.05 * jax.random.normal(ks[4], (16 * 8 * 8, 32), jnp.float32)  # NCHW fan-in
    b3 = 0.01 * jax.random.normal(ks[5], (32,), jnp.float32)
    w4 = 0.05 * jax.random.normal(ks[6], (32, 10), jnp.float32)
    b4 = 0.01 * jax.random.normal(ks[7], (10,), jnp.float32)

    # Fold the convolutions into dense GEMM operators (NCHW flatten on both
    # sides -> the flatten before fc1 is already baked into W2's columns).
    m1 = _conv2d_as_matrix(np.asarray(w1), 16, 16, stride=1, pad=1)   # (256, 2048)
    m2 = _conv2d_as_matrix(np.asarray(w2), 16, 16, stride=2, pad=1)   # (2048, 1024)

    return {
        "W1": jnp.asarray(m1, jnp.bfloat16),
        "b1": jnp.repeat(b1, 16 * 16).reshape(1, -1),    # (1, 2048) f32
        "W2": jnp.asarray(m2, jnp.bfloat16),
        "b2": jnp.repeat(b2, 8 * 8).reshape(1, -1),      # (1, 1024) f32
        "W3": w3.astype(jnp.bfloat16),
        "b3": b3.reshape(1, -1),                         # (1, 32)   f32
        "W4": w4.astype(jnp.bfloat16),
        "b4": b4.reshape(1, -1),                         # (1, 10)   f32
    }


# Plain-JAX reference of the identical math (validates the Pallas kernel).
def reference_forward(params, audio_nchw):
    h = audio_nchw.reshape(audio_nchw.shape[0], -1).astype(jnp.float32)
    for w, b, relu in ((params["W1"], params["b1"], True),
                       (params["W2"], params["b2"], True),
                       (params["W3"], params["b3"], True),
                       (params["W4"], params["b4"], False)):
        h = jnp.dot(h.astype(jnp.bfloat16), w,
                    preferred_element_type=jnp.float32) + b
        if relu:
            h = jnp.maximum(h, 0.0)
    return h


if __name__ == "__main__":
    key = jax.random.PRNGKey(0)
    k_param, k_audio = jax.random.split(key)
    params = init_params(k_param)
    audio = jax.random.normal(k_audio, (2, 1, 16, 16), jnp.float32)

    exp_pred = jax.block_until_ready(lip_trainer_forward(params, audio))
    ref = jax.block_until_ready(reference_forward(params, audio))

    assert exp_pred.shape == (2, 10)
    assert exp_pred.dtype == jnp.float32
    assert bool(jnp.all(jnp.isfinite(exp_pred)))
    assert bool(jnp.allclose(exp_pred, ref, rtol=1e-2, atol=1e-3))
    print("KERNEL_OK")
</pallas_src>

<mosaic_0001>
module attributes {stable_mosaic.version = 11 : i64} {
  func.func @_audio2exp_kernel(%arg0: i32, %arg1: memref<2x256xf32, #tpu.memory_space<vmem>>, %arg2: memref<256x2048xbf16, #tpu.memory_space<vmem>>, %arg3: memref<1x2048xf32, #tpu.memory_space<vmem>>, %arg4: memref<2048x1024xbf16, #tpu.memory_space<vmem>>, %arg5: memref<1x1024xf32, #tpu.memory_space<vmem>>, %arg6: memref<1024x32xbf16, #tpu.memory_space<vmem>>, %arg7: memref<1x32xf32, #tpu.memory_space<vmem>>, %arg8: memref<32x10xbf16, #tpu.memory_space<vmem>>, %arg9: memref<1x10xf32, #tpu.memory_space<vmem>>, %arg10: memref<2x10xf32, #tpu.memory_space<vmem>>) attributes {dimension_semantics = [#tpu.dimension_semantics<arbitrary>], iteration_bounds = array<i64: 1>, scalar_prefetch = 0 : i64, scratch_operands = 0 : i64, tpu.core_type = #tpu.core_type<tc>, window_params = [{pipeline_mode = #tpu.pipeline_mode<synchronous>, transform_indices = @transform_0, window_bounds = array<i64: 2, 256>}, {pipeline_mode = #tpu.pipeline_mode<synchronous>, transform_indices = @transform_1, window_bounds = array<i64: 256, 2048>}, {pipeline_mode = #tpu.pipeline_mode<synchronous>, transform_indices = @transform_2, window_bounds = array<i64: 1, 2048>}, {pipeline_mode = #tpu.pipeline_mode<synchronous>, transform_indices = @transform_3, window_bounds = array<i64: 2048, 1024>}, {pipeline_mode = #tpu.pipeline_mode<synchronous>, transform_indices = @transform_4, window_bounds = array<i64: 1, 1024>}, {pipeline_mode = #tpu.pipeline_mode<synchronous>, transform_indices = @transform_5, window_bounds = array<i64: 1024, 32>}, {pipeline_mode = #tpu.pipeline_mode<synchronous>, transform_indices = @transform_6, window_bounds = array<i64: 1, 32>}, {pipeline_mode = #tpu.pipeline_mode<synchronous>, transform_indices = @transform_7, window_bounds = array<i64: 32, 10>}, {pipeline_mode = #tpu.pipeline_mode<synchronous>, transform_indices = @transform_8, window_bounds = array<i64: 1, 10>}, {pipeline_mode = #tpu.pipeline_mode<synchronous>, transform_indices = @transform_9, window_bounds = array<i64: 2, 10>}]} {
    %c0 = arith.constant 0 : index
    %c0_0 = arith.constant 0 : index
    %0 = vector.load %arg1[%c0, %c0_0] : memref<2x256xf32, #tpu.memory_space<vmem>>, vector<2x256xf32>
    %1 = arith.truncf %0 : vector<2x256xf32> to vector<2x256xbf16>
    %c0_1 = arith.constant 0 : index
    %c0_2 = arith.constant 0 : index
    %2 = vector.load %arg2[%c0_1, %c0_2] : memref<256x2048xbf16, #tpu.memory_space<vmem>>, vector<256x2048xbf16>
    %cst = arith.constant dense<0.000000e+00> : vector<2x2048xf32>
    %3 = tpu.matmul %1, %2, %cst {dimension_numbers = #tpu.dot_dimension_numbers<[1], [0], [0], [1], [0, 0, 1, 1], [], []>} : vector<2x256xbf16>, vector<256x2048xbf16>, vector<2x2048xf32> -> vector<2x2048xf32>
    %c0_3 = arith.constant 0 : index
    %c0_4 = arith.constant 0 : index
    %4 = vector.load %arg3[%c0_3, %c0_4] : memref<1x2048xf32, #tpu.memory_space<vmem>>, vector<1x2048xf32>
    %5 = vector.broadcast %4 : vector<1x2048xf32> to vector<2x2048xf32>
    %6 = arith.addf %3, %5 : vector<2x2048xf32>
    %cst_5 = arith.constant 0.000000e+00 : f32
    %7 = vector.broadcast %cst_5 : f32 to vector<2x2048xf32>
    %8 = arith.maximumf %6, %7 : vector<2x2048xf32>
    %9 = arith.truncf %8 : vector<2x2048xf32> to vector<2x2048xbf16>
    %c0_6 = arith.constant 0 : index
    %c0_7 = arith.constant 0 : index
    %10 = vector.load %arg4[%c0_6, %c0_7] : memref<2048x1024xbf16, #tpu.memory_space<vmem>>, vector<2048x1024xbf16>
    %cst_8 = arith.constant dense<0.000000e+00> : vector<2x1024xf32>
    %11 = tpu.matmul %9, %10, %cst_8 {dimension_numbers = #tpu.dot_dimension_numbers<[1], [0], [0], [1], [0, 0, 1, 1], [], []>} : vector<2x2048xbf16>, vector<2048x1024xbf16>, vector<2x1024xf32> -> vector<2x1024xf32>
    %c0_9 = arith.constant 0 : index
    %c0_10 = arith.constant 0 : index
    %12 = vector.load %arg5[%c0_9, %c0_10] : memref<1x1024xf32, #tpu.memory_space<vmem>>, vector<1x1024xf32>
    %13 = vector.broadcast %12 : vector<1x1024xf32> to vector<2x1024xf32>
    %14 = arith.addf %11, %13 : vector<2x1024xf32>
    %cst_11 = arith.constant 0.000000e+00 : f32
    %15 = vector.broadcast %cst_11 : f32 to vector<2x1024xf32>
    %16 = arith.maximumf %14, %15 : vector<2x1024xf32>
    %17 = arith.truncf %16 : vector<2x1024xf32> to vector<2x1024xbf16>
    %c0_12 = arith.constant 0 : index
    %c0_13 = arith.constant 0 : index
    %18 = vector.load %arg6[%c0_12, %c0_13] : memref<1024x32xbf16, #tpu.memory_space<vmem>>, vector<1024x32xbf16>
    %cst_14 = arith.constant dense<0.000000e+00> : vector<2x32xf32>
    %19 = tpu.matmul %17, %18, %cst_14 {dimension_numbers = #tpu.dot_dimension_numbers<[1], [0], [0], [1], [0, 0, 1, 1], [], []>} : vector<2x1024xbf16>, vector<1024x32xbf16>, vector<2x32xf32> -> vector<2x32xf32>
    %c0_15 = arith.constant 0 : index
    %c0_16 = arith.constant 0 : index
    %20 = vector.load %arg7[%c0_15, %c0_16] : memref<1x32xf32, #tpu.memory_space<vmem>>, vector<1x32xf32>
    %21 = vector.broadcast %20 : vector<1x32xf32> to vector<2x32xf32>
    %22 = arith.addf %19, %21 : vector<2x32xf32>
    %cst_17 = arith.constant 0.000000e+00 : f32
    %23 = vector.broadcast %cst_17 : f32 to vector<2x32xf32>
    %24 = arith.maximumf %22, %23 : vector<2x32xf32>
    %25 = arith.truncf %24 : vector<2x32xf32> to vector<2x32xbf16>
    %c0_18 = arith.constant 0 : index
    %c0_19 = arith.constant 0 : index
    %26 = vector.load %arg8[%c0_18, %c0_19] : memref<32x10xbf16, #tpu.memory_space<vmem>>, vector<32x10xbf16>
    %cst_20 = arith.constant dense<0.000000e+00> : vector<2x10xf32>
    %27 = tpu.matmul %25, %26, %cst_20 {dimension_numbers = #tpu.dot_dimension_numbers<[1], [0], [0], [1], [0, 0, 1, 1], [], []>} : vector<2x32xbf16>, vector<32x10xbf16>, vector<2x10xf32> -> vector<2x10xf32>
    %c0_21 = arith.constant 0 : index
    %c0_22 = arith.constant 0 : index
    %28 = vector.load %arg9[%c0_21, %c0_22] : memref<1x10xf32, #tpu.memory_space<vmem>>, vector<1x10xf32>
    %29 = vector.broadcast %28 : vector<1x10xf32> to vector<2x10xf32>
    %30 = arith.addf %27, %29 : vector<2x10xf32>
    %c0_23 = arith.constant 0 : index
    %c0_24 = arith.constant 0 : index
    %31 = vector.load %arg10[%c0_23, %c0_24] : memref<2x10xf32, #tpu.memory_space<vmem>>, vector<2x10xf32>
    tpu.vector_store %arg10[%c0_23, %c0_24], %30 {strides = array<i32>} : memref<2x10xf32, #tpu.memory_space<vmem>>, vector<2x10xf32>,
    return
  }
  func.func @transform_0(%arg0: i32) -> (i32, i32) {
    %c0_i32 = arith.constant 0 : i32
    %c0_i32_0 = arith.constant 0 : i32
    %c0_i32_1 = arith.constant 0 : i32
    return %c0_i32, %c0_i32_0 : i32, i32
  }
  func.func @transform_1(%arg0: i32) -> (i32, i32) {
    %c0_i32 = arith.constant 0 : i32
    %c0_i32_0 = arith.constant 0 : i32
    %c0_i32_1 = arith.constant 0 : i32
    return %c0_i32, %c0_i32_0 : i32, i32
  }
  func.func @transform_2(%arg0: i32) -> (i32, i32) {
    %c0_i32 = arith.constant 0 : i32
    %c0_i32_0 = arith.constant 0 : i32
    %c0_i32_1 = arith.constant 0 : i32
    return %c0_i32, %c0_i32_0 : i32, i32
  }
  func.func @transform_3(%arg0: i32) -> (i32, i32) {
    %c0_i32 = arith.constant 0 : i32
    %c0_i32_0 = arith.constant 0 : i32
    %c0_i32_1 = arith.constant 0 : i32
    return %c0_i32, %c0_i32_0 : i32, i32
  }
  func.func @transform_4(%arg0: i32) -> (i32, i32) {
    %c0_i32 = arith.constant 0 : i32
    %c0_i32_0 = arith.constant 0 : i32
    %c0_i32_1 = arith.constant 0 : i32
    return %c0_i32, %c0_i32_0 : i32, i32
  }
  func.func @transform_5(%arg0: i32) -> (i32, i32) {
    %c0_i32 = arith.constant 0 : i32
    %c0_i32_0 = arith.constant 0 : i32
    %c0_i32_1 = arith.constant 0 : i32
    return %c0_i32, %c0_i32_0 : i32, i32
  }
  func.func @transform_6(%arg0: i32) -> (i32, i32) {
    %c0_i32 = arith.constant 0 : i32
    %c0_i32_0 = arith.constant 0 : i32
    %c0_i32_1 = arith.constant 0 : i32
    return %c0_i32, %c0_i32_0 : i32, i32
  }
  func.func @transform_7(%arg0: i32) -> (i32, i32) {
    %c0_i32 = arith.constant 0 : i32
    %c0_i32_0 = arith.constant 0 : i32
    %c0_i32_1 = arith.constant 0 : i32
    return %c0_i32, %c0_i32_0 : i32, i32
  }
  func.func @transform_8(%arg0: i32) -> (i32, i32) {
    %c0_i32 = arith.constant 0 : i32
    %c0_i32_0 = arith.constant 0 : i32
    %c0_i32_1 = arith.constant 0 : i32
    return %c0_i32, %c0_i32_0 : i32, i32
  }
  func.func @transform_9(%arg0: i32) -> (i32, i32) {
    %c0_i32 = arith.constant 0 : i32
    %c0_i32_0 = arith.constant 0 : i32
    %c0_i32_1 = arith.constant 0 : i32
    return %c0_i32, %c0_i32_0 : i32, i32
  }
}

</mosaic_0001>

<bundles_post_ra>
// kernel: lip_trainer_forward.1
= control target key start
LH: loop header
LB: loop body
LE: loop exit
PB: predicated region body
PF: predicated region fallthrough
CT: control target
= control target key end

     0   :  { %14 = vsyncpa [#allocation3], 0  ;;  %s18246_s0 = inlined_call_operand.vmem [shape: f32[2,256], index: 0, kind: input, shape index: {}]   ;;  %s18247_s1 = inlined_call_operand.hbm [shape: bf16[256,2048], index: 1, kind: input, shape index: {}]   ;;  %s18248_s2 = inlined_call_operand.hbm [shape: f32[1,2048], index: 2, kind: input, shape index: {}]   ;;  %s18249_s3 = inlined_call_operand.hbm [shape: bf16[2048,1024], index: 3, kind: input, shape index: {}]   ;;  %s18250_s4 = inlined_call_operand.hbm [shape: f32[1,1024], index: 4, kind: input, shape index: {}]   ;;  %s18251_s5 = inlined_call_operand.vmem [shape: bf16[1024,32], index: 5, kind: input, shape index: {}]   ;;  %s18252_s6 = inlined_call_operand.hbm [shape: f32[1,32], index: 6, kind: input, shape index: {}]   ;;  %s18253_s7 = inlined_call_operand.vmem [shape: bf16[32,10], index: 7, kind: input, shape index: {}]   ;;  %s18254_s8 = inlined_call_operand.hbm [shape: f32[1,10], index: 8, kind: input, shape index: {}]   ;;  %s18255_s9 = inlined_call_operand.hbm [shape: f32[2,10], index: 9, kind: output, shape index: {}]  }
   0x1   :  { %15 = vsyncpa [#allocation6], 0 }
   0x2   :  { %16 = vsyncpa [#allocation9], 0 }
   0x3   :  { %17 = vsyncpa [#allocation12], 0  ;;  %s39_s11 = sshll.u32 %s18248_s2, 4  ;;  %s40_s11 = int_to_ptr.hbm [resolvable:$true] %s39_s11 }
   0x4   :  { %18 = vsyncpa [#allocation4], 0  ;;  %s17601_s12 = smov [#allocation5]   ;;  %s63_s16 = sshll.u32 %s18250_s4, 4  ;;  %s64_s16 = int_to_ptr.hbm [resolvable:$true] %s63_s16 }
   0x5   :  { %s41_s13 = sshll.u32 %s17601_s12, 4  ;;  %s17602_s17 = smov [#allocation8]   ;;  %s42_s13 = int_to_ptr.vmem [resolvable:$true] %s41_s13 }
   0x6   :  { %44 = dma.hbm_to_vmem [thread:$0]  %s40_s11, 256, %s42_s13, [#allocation6]  }
   0x7   :  { %s65_s18 = sshll.u32 %s17602_s17, 4  ;;  %s25_s21 = sshll.u32 %s18247_s1, 4  ;;  %s66_s18 = int_to_ptr.vmem [resolvable:$true] %s65_s18  ;;  %s26_s21 = int_to_ptr.hbm [resolvable:$true] %s25_s21 }
   0x8   :  { %68 = dma.hbm_to_vmem [thread:$0]  %s64_s16, 128, %s66_s18, [#allocation9]  }
   0x9   :  { %s17603_s2 = smov [#allocation2]   ;;  %s49_s25 = sshll.u32 %s18249_s3, 4  ;;  %s50_s25 = int_to_ptr.hbm [resolvable:$true] %s49_s25 }
   0xa   :  { %s27_s22 = sshll.u32 %s17603_s2, 4  ;;  %s17604_s26 = smov 1024   ;;  %s28_s22 = int_to_ptr.vmem [resolvable:$true] %s27_s22 }
   0xb   :  { %s17605_s4 = smov 64   ;;  %s17606_s27 = smov [#allocation7]  }
   0xc   :  { %33 = dma.hbm_to_vmem [thread:$0]  %s26_s21, 32768, %s28_s22, [#allocation3], %s17604_s26, %s17604_s26, %s17605_s4  }
   0xd   :  { %s51_s28 = sshll.u32 %s17606_s27, 4  ;;  %s17607_s29 = smov 512   ;;  %s52_s28 = int_to_ptr.vmem [resolvable:$true] %s51_s28 }
   0xe   :  { %s17608_s30 = smov 32   ;;  %s76_s11 = sshll.u32 %s18252_s6, 4  ;;  %s77_s11 = int_to_ptr.hbm [resolvable:$true] %s76_s11 }
   0xf   :  { %57 = dma.hbm_to_vmem [thread:$0]  %s50_s25, 131072, %s52_s28, [#allocation6], %s17607_s29, %s17607_s29, %s17608_s30  }
  0x10   :  { %s17609_s12 = smov [#allocation10]   ;;  %s89_s15 = sshll.u32 %s18254_s8, 4  ;;  %s90_s15 = int_to_ptr.hbm [resolvable:$true] %s89_s15 }
  0x11   :  { %s78_s13 = sshll.u32 %s17609_s12, 4  ;;  %s17610_s16 = smov [#allocation11]   ;;  %s79_s13 = int_to_ptr.vmem [resolvable:$true] %s78_s13 }
  0x12   :  { %81 = dma.hbm_to_vmem [thread:$0]  %s77_s11, 16, %s79_s13, [#allocation9]  }
  0x13   :  { %s91_s17 = sshll.u32 %s17610_s16, 4  ;;  %s92_s17 = int_to_ptr.vmem [resolvable:$true] %s91_s17 }
  0x14   :  { %94 = dma.hbm_to_vmem [thread:$0]  %s90_s15, 16, %s92_s17, [#allocation12]  }
  0x15   :  { %17591 = dma.done.wait [#allocation3], 32768  }
  0x16   :  { %17592 = vsyncadd [#allocation3], 4294934528 }
  0x17   :  { %17593 = dma.done.wait [#allocation6], 131328  }
  0x18   :  { %17594 = vsyncadd [#allocation6], 4294835968 }
  0x19   :  { %17595 = dma.done.wait [#allocation9], 144  }
  0x1a   :  { %17596 = vsyncadd [#allocation9], 4294967152 }
  0x1b   :  { %17597 = dma.done.wait [#allocation12], 16  }
  0x1c   :  { %17598 = vsyncadd [#allocation12], 4294967280  ;;  %v11122_v0 = vld [vmem:[#allocation2 + $0x380] sm:$0xf]  ;;  %v16169_v5 = vld [vmem:[#allocation2 + $0x384] sm:$0xf] }
  0x1d   :  { %v16177_v1 = vld [vmem:[#allocation2 + $0x3bc] sm:$0xf0]  ;;  %v11124_v6 = vld [vmem:[#allocation2 + $0x3c0] sm:$0xf0]  ;;  %vm10633_vm0 = vcmask 261120   ;;  %s10659_s3 = sshll.u32 %s18255_s9, 4  ;;  %s10660_s3 = int_to_ptr.hbm [resolvable:$true] %s10659_s3 }
  0x1e   :  { %v11634_v2 = vld [vmem:[#allocation2 + $0x780] sm:$0xf]  ;;  %v11123_v3 = vor.u32 %v16177_v1, %v11122_v0  ;;  %v11127_v8 = vor.u32 %v16169_v5, %v11124_v6  ;;  %v16297_v9 = vld [vmem:[#allocation2 + $0x784] sm:$0xf]  ;;  %vm10650_vm1 = vcmask 74752  }
  0x1f   :  { %v16305_v4 = vld [vmem:[#allocation2 + $0x7bc] sm:$0xf0]  ;;  %v11636_v10 = vld [vmem:[#allocation2 + $0x7c0] sm:$0xf0] }
  0x20   :  { %v11635_v7 = vor.u32 %v16305_v4, %v11634_v2  ;;  %v11058_v11 = vld [vmem:[#allocation2 + $0x300] sm:$0xf]  ;;  %1701 = vmatpush.bf16.msra.mxu0 %v11123_v3  ;;  %v11639_v12 = vor.u32 %v16297_v9, %v11636_v10  ;;  %1727 = vmatpush.bf16.msra.mxu2 %v11127_v8  ;;  %v16153_v18 = vld [vmem:[#allocation2 + $0x304] sm:$0xf] }
  0x21   :  { %v16161_v13 = vld [vmem:[#allocation2 + $0x33c] sm:$0xf0]  ;;  %v11060_v19 = vld [vmem:[#allocation2 + $0x340] sm:$0xf0] }
  0x22   :  { %v11570_v14 = vld [vmem:[#allocation2 + $0x700] sm:$0xf]  ;;  %1714 = vmatpush.bf16.msra.mxu1 %v11635_v7  ;;  %v11059_v16 = vor.u32 %v16161_v13, %v11058_v11  ;;  %v16281_v20 = vld [vmem:[#allocation2 + $0x704] sm:$0xf]  ;;  %1740 = vmatpush.bf16.msra.mxu3 %v11639_v12  ;;  %v11063_v21 = vor.u32 %v16153_v18, %v11060_v19 }
  0x23   :  { %v16289_v15 = vld [vmem:[#allocation2 + $0x73c] sm:$0xf0]  ;;  %v11572_v22 = vld [vmem:[#allocation2 + $0x740] sm:$0xf0] }
  0x24   :  { %v11571_v17 = vor.u32 %v16289_v15, %v11570_v14  ;;  %v10994_v23 = vld [vmem:[#allocation2 + $0x280] sm:$0xf]  ;;  %v11575_v25 = vor.u32 %v16281_v20, %v11572_v22  ;;  %v16137_v28 = vld [vmem:[#allocation2 + $0x284] sm:$0xf]  ;;  %1702 = vmatpush.bf16.msra.mxu0 %v11059_v16  ;;  %1728 = vmatpush.bf16.msra.mxu2 %v11063_v21 }
  0x25   :  { %v16145_v24 = vld [vmem:[#allocation2 + $0x2bc] sm:$0xf0]  ;;  %v10996_v30 = vld [vmem:[#allocation2 + $0x2c0] sm:$0xf0] }
  0x26   :  { %v11506_v26 = vld [vmem:[#allocation2 + $0x680] sm:$0xf]  ;;  %v10995_v29 = vor.u32 %v16145_v24, %v10994_v23  ;;  %v16265_v31 = vld [vmem:[#allocation2 + $0x684] sm:$0xf]  ;;  %1715 = vmatpush.bf16.msra.mxu1 %v11571_v17  ;;  %v10999_v34 = vor.u32 %v16137_v28, %v10996_v30  ;;  %1741 = vmatpush.bf16.msra.mxu3 %v11575_v25  ;;  %v11130_v28 = vld [vmem:[#allocation2 + $0x388] sm:$0xf] }
  0x27   :  { %v16273_v27 = vld [vmem:[#allocation2 + $0x6bc] sm:$0xf0]  ;;  %v11508_v32 = vld [vmem:[#allocation2 + $0x6c0] sm:$0xf0]  ;;  %v11642_v30 = vld [vmem:[#allocation2 + $0x788] sm:$0xf] }
  0x28   :  { %v11507_v33 = vor.u32 %v16273_v27, %v11506_v26  ;;  %v10930_v35 = vld [vmem:[#allocation2 + $0x200] sm:$0xf]  ;;  %v11511_v38 = vor.u32 %v16265_v31, %v11508_v32  ;;  %v16121_v40 = vld [vmem:[#allocation2 + $0x204] sm:$0xf]  ;;  %1703 = vmatpush.bf16.msra.mxu0 %v10995_v29  ;;  %1729 = vmatpush.bf16.msra.mxu2 %v10999_v34  ;;  %v16178_v29 = vld [vmem:[#allocation2 + $0x3c4] sm:$0xf0] }
  0x29   :  { %v16129_v36 = vld [vmem:[#allocation2 + $0x23c] sm:$0xf0]  ;;  %v10932_v41 = vld [vmem:[#allocation2 + $0x240] sm:$0xf0]  ;;  %v16306_v32 = vld [vmem:[#allocation2 + $0x7c4] sm:$0xf0] }
  0x2a   :  { %v11442_v37 = vld [vmem:[#allocation2 + $0x600] sm:$0xf]  ;;  %v16249_v42 = vld [vmem:[#allocation2 + $0x604] sm:$0xf]  ;;  %v10931_v44 = vor.u32 %v16129_v36, %v10930_v35  ;;  %1716 = vmatpush.bf16.msra.mxu1 %v11507_v33  ;;  %v10935_v46 = vor.u32 %v16121_v40, %v10932_v41  ;;  %1742 = vmatpush.bf16.msra.mxu3 %v11511_v38  ;;  %v16170_v33 = vld [vmem:[#allocation2 + $0x38c] sm:$0xf]  ;;  %v11131_v40 = vor.u32 %v16178_v29, %v11130_v28 }
  0x2b   :  { %v16257_v39 = vld [vmem:[#allocation2 + $0x63c] sm:$0xf0]  ;;  %v11444_v43 = vld [vmem:[#allocation2 + $0x640] sm:$0xf0]  ;;  %v11132_v34 = vld [vmem:[#allocation2 + $0x3c8] sm:$0xf0]  ;;  %v11643_v41 = vor.u32 %v16306_v32, %v11642_v30 }
  0x2c   :  { %v11443_v45 = vor.u32 %v16257_v39, %v11442_v37  ;;  %v10866_v47 = vld [vmem:[#allocation2 + $0x180] sm:$0xf]  ;;  %v11447_v50 = vor.u32 %v16249_v42, %v11444_v43  ;;  %v16105_v52 = vld [vmem:[#allocation2 + $0x184] sm:$0xf]  ;;  %1704 = vmatpush.bf16.msra.mxu0 %v10931_v44  ;;  %1730 = vmatpush.bf16.msra.mxu2 %v10935_v46  ;;  %v16298_v37 = vld [vmem:[#allocation2 + $0x78c] sm:$0xf]  ;;  %v11135_v42 = vor.u32 %v16170_v33, %v11132_v34 }
  0x2d   :  { %v16113_v48 = vld [vmem:[#allocation2 + $0x1bc] sm:$0xf0]  ;;  %v10868_v53 = vld [vmem:[#allocation2 + $0x1c0] sm:$0xf0]  ;;  %v11644_v38 = vld [vmem:[#allocation2 + $0x7c8] sm:$0xf0] }
  0x2e   :  { %v11378_v49 = vld [vmem:[#allocation2 + $0x580] sm:$0xf]  ;;  %v16233_v54 = vld [vmem:[#allocation2 + $0x584] sm:$0xf]  ;;  %v10867_v56 = vor.u32 %v16113_v48, %v10866_v47  ;;  %1717 = vmatpush.bf16.msra.mxu1 %v11443_v45  ;;  %v10871_v58 = vor.u32 %v16105_v52, %v10868_v53  ;;  %1743 = vmatpush.bf16.msra.mxu3 %v11447_v50  ;;  %v11066_v43 = vld [vmem:[#allocation2 + $0x308] sm:$0xf]  ;;  %v11647_v46 = vor.u32 %v16298_v37, %v11644_v38 }
  0x2f   :  { %v16241_v51 = vld [vmem:[#allocation2 + $0x5bc] sm:$0xf0]  ;;  %v11380_v55 = vld [vmem:[#allocation2 + $0x5c0] sm:$0xf0]  ;;  %v16162_v44 = vld [vmem:[#allocation2 + $0x344] sm:$0xf0] }
  0x30   :  { %v11379_v57 = vor.u32 %v16241_v51, %v11378_v49  ;;  %v10802_v59 = vld [vmem:[#allocation2 + $0x100] sm:$0xf]  ;;  %v11383_v62 = vor.u32 %v16233_v54, %v11380_v55  ;;  %v16089_v0 = vld [vmem:[#allocation2 + $0x104] sm:$0xf]  ;;  %1705 = vmatpush.bf16.msra.mxu0 %v10867_v56  ;;  %1731 = vmatpush.bf16.msra.mxu2 %v10871_v58  ;;  %v11578_v45 = vld [vmem:[#allocation2 + $0x708] sm:$0xf]  ;;  %v11067_v52 = vor.u32 %v16162_v44, %v11066_v43 }
  0x31   :  { %v16097_v60 = vld [vmem:[#allocation2 + $0x13c] sm:$0xf0]  ;;  %v10804_v1 = vld [vmem:[#allocation2 + $0x140] sm:$0xf0]  ;;  %v16290_v47 = vld [vmem:[#allocation2 + $0x744] sm:$0xf0] }
  0x32   :  { %v11314_v61 = vld [vmem:[#allocation2 + $0x500] sm:$0xf]  ;;  %v16217_v2 = vld [vmem:[#allocation2 + $0x504] sm:$0xf]  ;;  %v10803_v4 = vor.u32 %v16097_v60, %v10802_v59  ;;  %1718 = vmatpush.bf16.msra.mxu1 %v11379_v57  ;;  %v10807_v6 = vor.u32 %v16089_v0, %v10804_v1  ;;  %1744 = vmatpush.bf16.msra.mxu3 %v11383_v62  ;;  %v16154_v48 = vld [vmem:[#allocation2 + $0x30c] sm:$0xf]  ;;  %v11579_v53 = vor.u32 %v16290_v47, %v11578_v45 }
  0x33   :  { %v16225_v63 = vld [vmem:[#allocation2 + $0x53c] sm:$0xf0]  ;;  %v11316_v3 = vld [vmem:[#allocation2 + $0x540] sm:$0xf0]  ;;  %v11068_v49 = vld [vmem:[#allocation2 + $0x348] sm:$0xf0] }
  0x34   :  { %v11315_v5 = vor.u32 %v16225_v63, %v11314_v61  ;;  %v10738_v7 = vld [vmem:[#allocation2 + $0x80] sm:$0xf]  ;;  %v11319_v10 = vor.u32 %v16217_v2, %v11316_v3  ;;  %v16073_v12 = vld [vmem:[#allocation2 + $0x84] sm:$0xf]  ;;  %1706 = vmatpush.bf16.msra.mxu0 %v10803_v4  ;;  %1732 = vmatpush.bf16.msra.mxu2 %v10807_v6  ;;  %v16282_v50 = vld [vmem:[#allocation2 + $0x70c] sm:$0xf]  ;;  %v11071_v54 = vor.u32 %v16154_v48, %v11068_v49 }
  0x35   :  { %v16081_v8 = vld [vmem:[#allocation2 + $0xbc] sm:$0xf0]  ;;  %v10740_v13 = vld [vmem:[#allocation2 + $0xc0] sm:$0xf0]  ;;  %v11580_v51 = vld [vmem:[#allocation2 + $0x748] sm:$0xf0] }
  0x36   :  { %v11250_v9 = vld [vmem:[#allocation2 + $0x480] sm:$0xf]  ;;  %v16201_v14 = vld [vmem:[#allocation2 + $0x484] sm:$0xf]  ;;  %v10739_v16 = vor.u32 %v16081_v8, %v10738_v7  ;;  %1719 = vmatpush.bf16.msra.mxu1 %v11315_v5  ;;  %v10743_v20 = vor.u32 %v16073_v12, %v10740_v13  ;;  %1745 = vmatpush.bf16.msra.mxu3 %v11319_v10  ;;  %v11002_v55 = vld [vmem:[#allocation2 + $0x288] sm:$0xf]  ;;  %v11583_v58 = vor.u32 %v16282_v50, %v11580_v51 }
  0x37   :  { %v16209_v11 = vld [vmem:[#allocation2 + $0x4bc] sm:$0xf0]  ;;  %v11252_v15 = vld [vmem:[#allocation2 + $0x4c0] sm:$0xf0]  ;;  %v16146_v56 = vld [vmem:[#allocation2 + $0x2c4] sm:$0xf0] }
  0x38   :  { %v10674_v17 = vld [vmem:[#allocation2] sm:$0xf]  ;;  %v11251_v19 = vor.u32 %v16209_v11, %v11250_v9  ;;  %v16057_v23 = vld [vmem:[#allocation2 + $0x4] sm:$0xf]  ;;  %v11255_v24 = vor.u32 %v16201_v14, %v11252_v15  ;;  %1707 = vmatpush.bf16.msra.mxu0 %v10739_v16  ;;  %1733 = vmatpush.bf16.msra.mxu2 %v10743_v20  ;;  %v11514_v57 = vld [vmem:[#allocation2 + $0x688] sm:$0xf]  ;;  %v11003_v0 = vor.u32 %v16146_v56, %v11002_v55 }
  0x39   :  { %v16065_v18 = vld [vmem:[#allocation2 + $0x3c] sm:$0xf0]  ;;  %v10676_v25 = vld [vmem:[#allocation2 + $0x40] sm:$0xf0]  ;;  %v16274_v59 = vld [vmem:[#allocation2 + $0x6c4] sm:$0xf0] }
  0x3a   :  { %v11186_v21 = vld [vmem:[#allocation2 + $0x400] sm:$0xf]  ;;  %v16185_v26 = vld [vmem:[#allocation2 + $0x404] sm:$0xf]  ;;  %v10675_v31 = vor.u32 %v16065_v18, %v10674_v17  ;;  %1720 = vmatpush.bf16.msra.mxu1 %v11251_v19  ;;  %v10679_v36 = vor.u32 %v16057_v23, %v10676_v25  ;;  %1746 = vmatpush.bf16.msra.mxu3 %v11255_v24  ;;  %v16138_v60 = vld [vmem:[#allocation2 + $0x28c] sm:$0xf]  ;;  %v11515_v3 = vor.u32 %v16274_v59, %v11514_v57 }
  0x3b   :  { %v16193_v22 = vld [vmem:[#allocation2 + $0x43c] sm:$0xf0]  ;;  %v11188_v27 = vld [vmem:[#allocation2 + $0x440] sm:$0xf0]  ;;  %v11004_v61 = vld [vmem:[#allocation2 + $0x2c8] sm:$0xf0] }
  0x3c   :  { %v11187_v35 = vor.u32 %v16193_v22, %v11186_v21  ;;  %v11191_v39 = vor.u32 %v16185_v26, %v11188_v27  ;;  %1708 = vmatpush.bf16.msra.mxu0 %v10675_v31  ;;  %1734 = vmatpush.bf16.msra.mxu2 %v10679_v36  ;;  %v16266_v62 = vld [vmem:[#allocation2 + $0x68c] sm:$0xf]  ;;  %v10938_v1 = vld [vmem:[#allocation2 + $0x208] sm:$0xf]  ;;  %v120_v2 = vld [vmem:[%s18246_s0] sm:$0xf]  ;;  %v11007_v4 = vor.u32 %v16138_v60, %v11004_v61 }
  0x3d   :  { %v11516_v63 = vld [vmem:[#allocation2 + $0x6c8] sm:$0xf0]  ;;  %v16130_v5 = vld [vmem:[#allocation2 + $0x244] sm:$0xf0]  ;;  %122 = vst [vmem:[#allocation1] ss:$4 sm:$0xff] %v120_v2 }
  0x3e   :  { %1721 = vmatpush.bf16.msra.mxu1 %v11187_v35  ;;  %1747 = vmatpush.bf16.msra.mxu3 %v11191_v39  ;;  %v11450_v6 = vld [vmem:[#allocation2 + $0x608] sm:$0xf]  ;;  %v11519_v7 = vor.u32 %v16266_v62, %v11516_v63  ;;  %v16122_v9 = vld [vmem:[#allocation2 + $0x20c] sm:$0xf]  ;;  %v10939_v13 = vor.u32 %v16130_v5, %v10938_v1  ;;  %v11138_v1 = vld [vmem:[#allocation2 + $0x390] sm:$0xf] }
  0x3f   :  { %v16258_v8 = vld [vmem:[#allocation2 + $0x644] sm:$0xf0]  ;;  %v10940_v10 = vld [vmem:[#allocation2 + $0x248] sm:$0xf0]  ;;  %v16179_v2 = vld [vmem:[#allocation2 + $0x3cc] sm:$0xf0] }
  0x40   :  { %1753 = vmatpush.bf16.msrb.mxu0 %v11131_v40  ;;  %1779 = vmatpush.bf16.msrb.mxu2 %v11135_v42  ;;  %v16250_v11 = vld [vmem:[#allocation2 + $0x60c] sm:$0xf]  ;;  %v10874_v14 = vld [vmem:[#allocation2 + $0x188] sm:$0xf]  ;;  %v11451_v15 = vor.u32 %v16258_v8, %v11450_v6  ;;  %v10943_v16 = vor.u32 %v16122_v9, %v10940_v10  ;;  %v16307_v5 = vld [vmem:[#allocation2 + $0x7cc] sm:$0xf0] }
  0x41   :  { %v11452_v12 = vld [vmem:[#allocation2 + $0x648] sm:$0xf0]  ;;  %v16114_v17 = vld [vmem:[#allocation2 + $0x1c4] sm:$0xf0]  ;;  %v16171_v6 = vld [vmem:[#allocation2 + $0x394] sm:$0xf] }
  0x42   :  { %1766 = vmatpush.bf16.msrb.mxu1 %v11643_v41  ;;  %1792 = vmatpush.bf16.msrb.mxu3 %v11647_v46  ;;  %v11386_v18 = vld [vmem:[#allocation2 + $0x588] sm:$0xf]  ;;  %v11455_v20 = vor.u32 %v16250_v11, %v11452_v12  ;;  %v16106_v21 = vld [vmem:[#allocation2 + $0x18c] sm:$0xf]  ;;  %v10875_v25 = vor.u32 %v16114_v17, %v10874_v14  ;;  %v16299_v10 = vld [vmem:[#allocation2 + $0x794] sm:$0xf] }
  0x43   :  { %v16242_v19 = vld [vmem:[#allocation2 + $0x5c4] sm:$0xf0]  ;;  %v10876_v22 = vld [vmem:[#allocation2 + $0x1c8] sm:$0xf0]  ;;  %v11652_v11 = vld [vmem:[#allocation2 + $0x7d0] sm:$0xf0] }
  0x44   :  { %1754 = vmatpush.bf16.msrb.mxu0 %v11067_v52  ;;  %1780 = vmatpush.bf16.msrb.mxu2 %v11071_v54  ;;  %v16234_v23 = vld [vmem:[#allocation2 + $0x58c] sm:$0xf]  ;;  %v11387_v26 = vor.u32 %v16242_v19, %v11386_v18  ;;  %v123_v27 = vld.sshfl [vmem:[#allocation1] sm:$0xff pattern:$0x73625140]  ;;  %v10879_v29 = vor.u32 %v16106_v21, %v10876_v22  ;;  %v11655_v19 = vor.u32 %v16299_v10, %v11652_v11 }
  0x45   :  { %v11388_v24 = vld [vmem:[#allocation2 + $0x5c8] sm:$0xf0]  ;;  %v124_v28 = vld.sshfl [vmem:[#allocation1 + $0x8] sm:$0xff pattern:$0x73625140]  ;;  %v17683_v33 = vpack.c.bf16 %v123_v27, %v123_v27 }
  0x46   :  { %1767 = vmatpush.bf16.msrb.mxu1 %v11579_v53  ;;  %1793 = vmatpush.bf16.msrb.mxu3 %v11583_v58  ;;  %v10810_v30 = vld [vmem:[#allocation2 + $0x108] sm:$0xf]  ;;  %v17685_v34 = vpack.c.bf16 %v124_v28, %v124_v28  ;;  %v11391_v35 = vor.u32 %v16234_v23, %v11388_v24  ;;  %v16090_v37 = vld [vmem:[#allocation2 + $0x10c] sm:$0xf]  ;;  %v16163_v17 = vld [vmem:[#allocation2 + $0x34c] sm:$0xf0] }
  0x47   :  { %v16098_v31 = vld [vmem:[#allocation2 + $0x144] sm:$0xf0]  ;;  %v10812_v38 = vld [vmem:[#allocation2 + $0x148] sm:$0xf0]  ;;  %1735 = vmatmul.bf16.vlgmr.msra.gmra.mxu2 %v17683_v33  ;;  %1709 = vmatmul.bf16.vlgmr.msra.gmra.mxu0 %v17683_v33  ;;  %v11586_v18 = vld [vmem:[#allocation2 + $0x710] sm:$0xf] }
  0x48   :  { %1755 = vmatpush.bf16.msrb.mxu0 %v11003_v0  ;;  %1781 = vmatpush.bf16.msrb.mxu2 %v11007_v4  ;;  %v11322_v32 = vld [vmem:[#allocation2 + $0x508] sm:$0xf]  ;;  %v16218_v39 = vld [vmem:[#allocation2 + $0x50c] sm:$0xf]  ;;  %v10811_v41 = vor.u32 %v16098_v31, %v10810_v30  ;;  %v10815_v43 = vor.u32 %v16090_v37, %v10812_v38  ;;  %v16155_v21 = vld [vmem:[#allocation2 + $0x314] sm:$0xf] }
  0x49   :  { %v16226_v36 = vld [vmem:[#allocation2 + $0x544] sm:$0xf0]  ;;  %v11324_v40 = vld [vmem:[#allocation2 + $0x548] sm:$0xf0]  ;;  %1748 = vmatmul.bf16.vlgmr.msra.gmra.mxu3 %v17685_v34  ;;  %1722 = vmatmul.bf16.vlgmr.msra.gmra.mxu1 %v17685_v34  ;;  %v11076_v22 = vld [vmem:[#allocation2 + $0x350] sm:$0xf0] }
  0x4a   :  { %1768 = vmatpush.bf16.msrb.mxu1 %v11515_v3  ;;  %1794 = vmatpush.bf16.msrb.mxu3 %v11519_v7  ;;  %v11323_v42 = vor.u32 %v16226_v36, %v11322_v32  ;;  %v10746_v44 = vld [vmem:[#allocation2 + $0x88] sm:$0xf]  ;;  %v11327_v47 = vor.u32 %v16218_v39, %v11324_v40  ;;  %v16074_v49 = vld [vmem:[#allocation2 + $0x8c] sm:$0xf]  ;;  %v11650_v3 = vld [vmem:[#allocation2 + $0x790] sm:$0xf]  ;;  %v11079_v27 = vor.u32 %v16155_v21, %v11076_v22 }
  0x4b   :  { %v16082_v45 = vld [vmem:[#allocation2 + $0xc4] sm:$0xf0]  ;;  %v10748_v50 = vld [vmem:[#allocation2 + $0xc8] sm:$0xf0]  ;;  %v11140_v7 = vld [vmem:[#allocation2 + $0x3d0] sm:$0xf0]  ;;  %v11651_v14 = vor.u32 %v16307_v5, %v11650_v3 }
  0x4c   :  { %1756 = vmatpush.bf16.msrb.mxu0 %v10939_v13  ;;  %1782 = vmatpush.bf16.msrb.mxu2 %v10943_v16  ;;  %v11258_v46 = vld [vmem:[#allocation2 + $0x488] sm:$0xf]  ;;  %v16202_v51 = vld [vmem:[#allocation2 + $0x48c] sm:$0xf]  ;;  %v10747_v53 = vor.u32 %v16082_v45, %v10746_v44  ;;  %v10751_v57 = vor.u32 %v16074_v49, %v10748_v50  ;;  %v11139_v13 = vor.u32 %v16179_v2, %v11138_v1  ;;  %v11074_v16 = vld [vmem:[#allocation2 + $0x310] sm:$0xf] }
  0x4d   :  { %v16210_v48 = vld [vmem:[#allocation2 + $0x4c4] sm:$0xf0]  ;;  %v11260_v52 = vld [vmem:[#allocation2 + $0x4c8] sm:$0xf0]  ;;  %v16283_v23 = vld [vmem:[#allocation2 + $0x714] sm:$0xf] }
  0x4e   :  { %1769 = vmatpush.bf16.msrb.mxu1 %v11451_v15  ;;  %1795 = vmatpush.bf16.msrb.mxu3 %v11455_v20  ;;  %v10682_v54 = vld [vmem:[#allocation2 + $0x8] sm:$0xf]  ;;  %v11259_v56 = vor.u32 %v16210_v48, %v11258_v46  ;;  %v16058_v60 = vld [vmem:[#allocation2 + $0xc] sm:$0xf]  ;;  %v11263_v61 = vor.u32 %v16202_v51, %v11260_v52  ;;  %v11143_v15 = vor.u32 %v16171_v6, %v11140_v7  ;;  %v16291_v20 = vld [vmem:[#allocation2 + $0x74c] sm:$0xf0] }
  0x4f   :  { %v16066_v55 = vld [vmem:[#allocation2 + $0x44] sm:$0xf0]  ;;  %v10684_v62 = vld [vmem:[#allocation2 + $0x48] sm:$0xf0]  ;;  %v11588_v24 = vld [vmem:[#allocation2 + $0x750] sm:$0xf0] }
  0x50   :  { %1757 = vmatpush.bf16.msrb.mxu0 %v10875_v25  ;;  %1783 = vmatpush.bf16.msrb.mxu2 %v10879_v29  ;;  %v11194_v58 = vld [vmem:[#allocation2 + $0x408] sm:$0xf]  ;;  %v16186_v63 = vld [vmem:[#allocation2 + $0x40c] sm:$0xf]  ;;  %v10683_v4 = vor.u32 %v16066_v55, %v10682_v54  ;;  %v10687_v9 = vor.u32 %v16058_v60, %v10684_v62  ;;  %v11075_v25 = vor.u32 %v16163_v17, %v11074_v16  ;;  %v11010_v28 = vld [vmem:[#allocation2 + $0x290] sm:$0xf] }
  0x51   :  { %v16194_v59 = vld [vmem:[#allocation2 + $0x444] sm:$0xf0]  ;;  %v11196_v0 = vld [vmem:[#allocation2 + $0x448] sm:$0xf0]  ;;  %v16147_v29 = vld [vmem:[#allocation2 + $0x2cc] sm:$0xf0]  ;;  %v11591_v31 = vor.u32 %v16283_v23, %v11588_v24 }
  0x52   :  { %1770 = vmatpush.bf16.msrb.mxu1 %v11387_v26  ;;  %1796 = vmatpush.bf16.msrb.mxu3 %v11391_v35  ;;  %v11195_v8 = vor.u32 %v16194_v59, %v11194_v58  ;;  %v11199_v12 = vor.u32 %v16186_v63, %v11196_v0  ;;  %v11587_v26 = vor.u32 %v16291_v20, %v11586_v18  ;;  %v11522_v30 = vld [vmem:[#allocation2 + $0x690] sm:$0xf]  ;;  %v16139_v35 = vld [vmem:[#allocation2 + $0x294] sm:$0xf] }
  0x53   :  { %v16275_v32 = vld [vmem:[#allocation2 + $0x6cc] sm:$0xf0]  ;;  %v11012_v36 = vld [vmem:[#allocation2 + $0x2d0] sm:$0xf0]  ;;  %v11011_v39 = vor.u32 %v16147_v29, %v11010_v28 }
  0x54   :  { %1758 = vmatpush.bf16.msrb.mxu0 %v10811_v41  ;;  %1784 = vmatpush.bf16.msrb.mxu2 %v10815_v43  ;;  %v16267_v37 = vld [vmem:[#allocation2 + $0x694] sm:$0xf]  ;;  %v11523_v40 = vor.u32 %v16275_v32, %v11522_v30  ;;  %v11015_v41 = vor.u32 %v16139_v35, %v11012_v36  ;;  %v16131_v43 = vld [vmem:[#allocation2 + $0x24c] sm:$0xf0] }
  0x55   :  { %v11524_v38 = vld [vmem:[#allocation2 + $0x6d0] sm:$0xf0]  ;;  %v11458_v44 = vld [vmem:[#allocation2 + $0x610] sm:$0xf] }
  0x56   :  { %1771 = vmatpush.bf16.msrb.mxu1 %v11323_v42  ;;  %1797 = vmatpush.bf16.msrb.mxu3 %v11327_v47  ;;  %v10946_v42 = vld [vmem:[#allocation2 + $0x210] sm:$0xf]  ;;  %v11527_v45 = vor.u32 %v16267_v37, %v11524_v38  ;;  %v16123_v47 = vld [vmem:[#allocation2 + $0x214] sm:$0xf]  ;;  %v11146_v37 = vld [vmem:[#allocation2 + $0x398] sm:$0xf] }
  0x57   :  { %v16259_v46 = vld [vmem:[#allocation2 + $0x64c] sm:$0xf0]  ;;  %v10948_v48 = vld [vmem:[#allocation2 + $0x250] sm:$0xf0]  ;;  %v10947_v51 = vor.u32 %v16131_v43, %v10946_v42  ;;  %v16180_v38 = vld [vmem:[#allocation2 + $0x3d4] sm:$0xf0] }
  0x58   :  { %1759 = vmatpush.bf16.msrb.mxu0 %v10747_v53  ;;  %1785 = vmatpush.bf16.msrb.mxu2 %v10751_v57  ;;  %v16251_v49 = vld [vmem:[#allocation2 + $0x614] sm:$0xf]  ;;  %v11459_v52 = vor.u32 %v16259_v46, %v11458_v44  ;;  %v10951_v53 = vor.u32 %v16123_v47, %v10948_v48  ;;  %v10882_v54 = vld [vmem:[#allocation2 + $0x190] sm:$0xf]  ;;  %v16172_v42 = vld [vmem:[#allocation2 + $0x39c] sm:$0xf] }
  0x59   :  { %v11460_v50 = vld [vmem:[#allocation2 + $0x650] sm:$0xf0]  ;;  %v16115_v55 = vld [vmem:[#allocation2 + $0x1cc] sm:$0xf0]  ;;  %v11148_v43 = vld [vmem:[#allocation2 + $0x3d8] sm:$0xf0] }
  0x5a   :  { %1772 = vmatpush.bf16.msrb.mxu1 %v11259_v56  ;;  %1798 = vmatpush.bf16.msrb.mxu3 %v11263_v61  ;;  %v11394_v56 = vld [vmem:[#allocation2 + $0x590] sm:$0xf]  ;;  %v11463_v57 = vor.u32 %v16251_v49, %v11460_v50  ;;  %v16107_v59 = vld [vmem:[#allocation2 + $0x194] sm:$0xf]  ;;  %v10883_v63 = vor.u32 %v16115_v55, %v10882_v54  ;;  %v16300_v46 = vld [vmem:[#allocation2 + $0x79c] sm:$0xf]  ;;  %v11147_v49 = vor.u32 %v16180_v38, %v11146_v37 }
  0x5b   :  { %v16243_v58 = vld [vmem:[#allocation2 + $0x5cc] sm:$0xf0]  ;;  %v10884_v60 = vld [vmem:[#allocation2 + $0x1d0] sm:$0xf0]  ;;  %v11660_v47 = vld [vmem:[#allocation2 + $0x7d8] sm:$0xf0] }
  0x5c   :  { %1760 = vmatpush.bf16.msrb.mxu0 %v10683_v4  ;;  %1786 = vmatpush.bf16.msrb.mxu2 %v10687_v9  ;;  %v16235_v61 = vld [vmem:[#allocation2 + $0x594] sm:$0xf]  ;;  %v11395_v0 = vor.u32 %v16243_v58, %v11394_v56  ;;  %v10887_v1 = vor.u32 %v16107_v59, %v10884_v60  ;;  %v10818_v2 = vld [vmem:[#allocation2 + $0x110] sm:$0xf]  ;;  %v11594_v54 = vld [vmem:[#allocation2 + $0x718] sm:$0xf]  ;;  %v11663_v55 = vor.u32 %v16300_v46, %v11660_v47 }
  0x5d   :  { %v11396_v62 = vld [vmem:[#allocation2 + $0x5d0] sm:$0xf0]  ;;  %v16099_v3 = vld [vmem:[#allocation2 + $0x14c] sm:$0xf0]  ;;  %v16292_v56 = vld [vmem:[#allocation2 + $0x754] sm:$0xf0] }
  0x5e   :  { %1773 = vmatpush.bf16.msrb.mxu1 %v11195_v8  ;;  %1799 = vmatpush.bf16.msrb.mxu3 %v11199_v12  ;;  %v11330_v4 = vld [vmem:[#allocation2 + $0x510] sm:$0xf]  ;;  %v11399_v5 = vor.u32 %v16235_v61, %v11396_v62  ;;  %v16091_v7 = vld [vmem:[#allocation2 + $0x114] sm:$0xf]  ;;  %v10819_v11 = vor.u32 %v16099_v3, %v10818_v2  ;;  %v11084_v58 = vld [vmem:[#allocation2 + $0x358] sm:$0xf0]  ;;  %v11595_v62 = vor.u32 %v16292_v56, %v11594_v54 }
  0x5f   :  { %1787 = vmatmul.bf16.vlgmr.msrb.gmra.mxu2 %v17683_v33  ;;  %1761 = vmatmul.bf16.vlgmr.msrb.gmra.mxu0 %v17683_v33  ;;  %v16227_v6 = vld [vmem:[#allocation2 + $0x54c] sm:$0xf0]  ;;  %v10820_v8 = vld [vmem:[#allocation2 + $0x150] sm:$0xf0]  ;;  %v16284_v59 = vld [vmem:[#allocation2 + $0x71c] sm:$0xf] }
  0x60   :  { %1805 = vmatpush.bf16.msra.mxu0 %v11139_v13  ;;  %1831 = vmatpush.bf16.msra.mxu2 %v11143_v15  ;;  %v16219_v9 = vld [vmem:[#allocation2 + $0x514] sm:$0xf]  ;;  %v11331_v12 = vor.u32 %v16227_v6, %v11330_v4  ;;  %v10823_v13 = vor.u32 %v16091_v7, %v10820_v8  ;;  %v16083_v15 = vld [vmem:[#allocation2 + $0xcc] sm:$0xf0]  ;;  %v11596_v60 = vld [vmem:[#allocation2 + $0x758] sm:$0xf0] }
  0x61   :  { %1800 = vmatmul.bf16.vlgmr.msrb.gmra.mxu3 %v17685_v34  ;;  %1774 = vmatmul.bf16.vlgmr.msrb.gmra.mxu1 %v17685_v34  ;;  %v11332_v10 = vld [vmem:[#allocation2 + $0x550] sm:$0xf0]  ;;  %v11266_v16 = vld [vmem:[#allocation2 + $0x490] sm:$0xf]  ;;  %v11530_v2 = vld [vmem:[#allocation2 + $0x698] sm:$0xf]  ;;  %v11599_v3 = vor.u32 %v16284_v59, %v11596_v60 }
  0x62   :  { %1818 = vmatpush.bf16.msra.mxu1 %v11651_v14  ;;  %1844 = vmatpush.bf16.msra.mxu3 %v11655_v19  ;;  %v10754_v14 = vld [vmem:[#allocation2 + $0x90] sm:$0xf]  ;;  %v11335_v17 = vor.u32 %v16219_v9, %v11332_v10  ;;  %v16075_v19 = vld [vmem:[#allocation2 + $0x94] sm:$0xf]  ;;  %v16276_v4 = vld [vmem:[#allocation2 + $0x6d4] sm:$0xf0] }
  0x63   :  { %v16211_v18 = vld [vmem:[#allocation2 + $0x4cc] sm:$0xf0]  ;;  %v10756_v20 = vld [vmem:[#allocation2 + $0xd0] sm:$0xf0]  ;;  %v10755_v23 = vor.u32 %v16083_v15, %v10754_v14  ;;  %v11020_v6 = vld [vmem:[#allocation2 + $0x2d8] sm:$0xf0]  ;;  %v11531_v10 = vor.u32 %v16276_v4, %v11530_v2 }
  0x64   :  { %1806 = vmatpush.bf16.msra.mxu0 %v11075_v25  ;;  %1832 = vmatpush.bf16.msra.mxu2 %v11079_v27  ;;  %v16203_v21 = vld [vmem:[#allocation2 + $0x494] sm:$0xf]  ;;  %v10690_v24 = vld [vmem:[#allocation2 + $0x10] sm:$0xf]  ;;  %v10759_v27 = vor.u32 %v16075_v19, %v10756_v20  ;;  %v16268_v7 = vld [vmem:[#allocation2 + $0x69c] sm:$0xf] }
  0x65   :  { %v11268_v22 = vld [vmem:[#allocation2 + $0x4d0] sm:$0xf0]  ;;  %v16067_v25 = vld [vmem:[#allocation2 + $0x4c] sm:$0xf0]  ;;  %v11532_v8 = vld [vmem:[#allocation2 + $0x6d8] sm:$0xf0] }
  0x66   :  { %1819 = vmatpush.bf16.msra.mxu1 %v11587_v26  ;;  %1845 = vmatpush.bf16.msra.mxu3 %v11591_v31  ;;  %v11267_v26 = vor.u32 %v16211_v18, %v11266_v16  ;;  %v11202_v28 = vld [vmem:[#allocation2 + $0x410] sm:$0xf]  ;;  %v16059_v30 = vld [vmem:[#allocation2 + $0x14] sm:$0xf]  ;;  %v11271_v31 = vor.u32 %v16203_v21, %v11268_v22  ;;  %v11466_v14 = vld [vmem:[#allocation2 + $0x618] sm:$0xf]  ;;  %v11535_v15 = vor.u32 %v16268_v7, %v11532_v8 }
  0x67   :  { %v16195_v29 = vld [vmem:[#allocation2 + $0x44c] sm:$0xf0]  ;;  %v10692_v32 = vld [vmem:[#allocation2 + $0x50] sm:$0xf0]  ;;  %v16260_v16 = vld [vmem:[#allocation2 + $0x654] sm:$0xf0] }
  0x68   :  { %1807 = vmatpush.bf16.msra.mxu0 %v11011_v39  ;;  %1833 = vmatpush.bf16.msra.mxu2 %v11015_v41  ;;  %v16187_v35 = vld [vmem:[#allocation2 + $0x414] sm:$0xf]  ;;  %v11658_v39 = vld [vmem:[#allocation2 + $0x798] sm:$0xf]  ;;  %v11203_v44 = vor.u32 %v16195_v29, %v11202_v28  ;;  %v10956_v18 = vld [vmem:[#allocation2 + $0x258] sm:$0xf0]  ;;  %v11467_v22 = vor.u32 %v16260_v16, %v11466_v14 }
  0x69   :  { %v11204_v36 = vld [vmem:[#allocation2 + $0x450] sm:$0xf0]  ;;  %v16308_v41 = vld [vmem:[#allocation2 + $0x7d4] sm:$0xf0]  ;;  %v16252_v19 = vld [vmem:[#allocation2 + $0x61c] sm:$0xf] }
  0x6a   :  { %1820 = vmatpush.bf16.msra.mxu1 %v11523_v40  ;;  %1846 = vmatpush.bf16.msra.mxu3 %v11527_v45  ;;  %v10691_v40 = vor.u32 %v16067_v25, %v10690_v24  ;;  %v10695_v45 = vor.u32 %v16059_v30, %v10692_v32  ;;  %v11207_v48 = vor.u32 %v16187_v35, %v11204_v36  ;;  %v11468_v20 = vld [vmem:[#allocation2 + $0x658] sm:$0xf0]  ;;  %v10890_v24 = vld [vmem:[#allocation2 + $0x198] sm:$0xf]  ;;  %v11154_v7 = vld [vmem:[#allocation2 + $0x3a0] sm:$0xf] }
  0x6b   :  { %v11659_v50 = vor.u32 %v16308_v41, %v11658_v39  ;;  %v16116_v25 = vld [vmem:[#allocation2 + $0x1d4] sm:$0xf0]  ;;  %v16108_v29 = vld [vmem:[#allocation2 + $0x19c] sm:$0xf]  ;;  %v16181_v8 = vld [vmem:[#allocation2 + $0x3dc] sm:$0xf0] }
  0x6c   :  { %1808 = vmatpush.bf16.msra.mxu0 %v10947_v51  ;;  %1834 = vmatpush.bf16.msra.mxu2 %v10951_v53  ;;  %v11151_v51 = vor.u32 %v16172_v42, %v11148_v43  ;;  %v16164_v53 = vld [vmem:[#allocation2 + $0x354] sm:$0xf0]  ;;  %v10892_v30 = vld [vmem:[#allocation2 + $0x1d8] sm:$0xf0]  ;;  %v10891_v35 = vor.u32 %v16116_v25, %v10890_v24  ;;  %v16301_v16 = vld [vmem:[#allocation2 + $0x7a4] sm:$0xf] }
  0x6d   :  { %v16244_v28 = vld [vmem:[#allocation2 + $0x5d4] sm:$0xf0]  ;;  %v11404_v32 = vld [vmem:[#allocation2 + $0x5d8] sm:$0xf0]  ;;  %v10895_v37 = vor.u32 %v16108_v29, %v10892_v30  ;;  %v11602_v24 = vld [vmem:[#allocation2 + $0x720] sm:$0xf] }
  0x6e   :  { %1821 = vmatpush.bf16.msra.mxu1 %v11459_v52  ;;  %1847 = vmatpush.bf16.msra.mxu3 %v11463_v57  ;;  %v11082_v52 = vld [vmem:[#allocation2 + $0x318] sm:$0xf]  ;;  %v16156_v57 = vld [vmem:[#allocation2 + $0x31c] sm:$0xf]  ;;  %v16285_v29 = vld [vmem:[#allocation2 + $0x724] sm:$0xf] }
  0x6f   :  { %v11083_v61 = vor.u32 %v16164_v53, %v11082_v52  ;;  %v10826_v38 = vld [vmem:[#allocation2 + $0x118] sm:$0xf]  ;;  %v16092_v43 = vld [vmem:[#allocation2 + $0x11c] sm:$0xf]  ;;  %v11604_v30 = vld [vmem:[#allocation2 + $0x760] sm:$0xf0] }
  0x70   :  { %1809 = vmatpush.bf16.msra.mxu0 %v10883_v63  ;;  %1835 = vmatpush.bf16.msra.mxu2 %v10887_v1  ;;  %v11087_v63 = vor.u32 %v16156_v57, %v11084_v58  ;;  %v16148_v1 = vld [vmem:[#allocation2 + $0x2d4] sm:$0xf0]  ;;  %v11340_v46 = vld [vmem:[#allocation2 + $0x558] sm:$0xf0] }
  0x71   :  { %v16100_v39 = vld [vmem:[#allocation2 + $0x154] sm:$0xf0]  ;;  %v10764_v56 = vld [vmem:[#allocation2 + $0xd8] sm:$0xf0] }
  0x72   :  { %1822 = vmatpush.bf16.msra.mxu1 %v11395_v0  ;;  %1848 = vmatpush.bf16.msra.mxu3 %v11399_v5  ;;  %v11018_v0 = vld [vmem:[#allocation2 + $0x298] sm:$0xf]  ;;  %v16140_v5 = vld [vmem:[#allocation2 + $0x29c] sm:$0xf]  ;;  %v10827_v47 = vor.u32 %v16100_v39, %v10826_v38  ;;  %v11538_v38 = vld [vmem:[#allocation2 + $0x6a0] sm:$0xf]  ;;  %v11607_v39 = vor.u32 %v16285_v29, %v11604_v30 }
  0x73   :  { %v11019_v9 = vor.u32 %v16148_v1, %v11018_v0  ;;  %v16228_v42 = vld [vmem:[#allocation2 + $0x554] sm:$0xf0]  ;;  %v16204_v57 = vld [vmem:[#allocation2 + $0x49c] sm:$0xf]  ;;  %v10706_v30 = vld [vmem:[#allocation2 + $0x20] sm:$0xf] }
  0x74   :  { %1810 = vmatpush.bf16.msra.mxu0 %v10819_v11  ;;  %1836 = vmatpush.bf16.msra.mxu2 %v10823_v13  ;;  %v11023_v11 = vor.u32 %v16140_v5, %v11020_v6  ;;  %v16132_v13 = vld [vmem:[#allocation2 + $0x254] sm:$0xf0]  ;;  %v11276_v58 = vld [vmem:[#allocation2 + $0x4d8] sm:$0xf0] }
  0x75   :  { %v11274_v52 = vld [vmem:[#allocation2 + $0x498] sm:$0xf]  ;;  %v16060_v2 = vld [vmem:[#allocation2 + $0x1c] sm:$0xf] }
  0x76   :  { %1823 = vmatpush.bf16.msra.mxu1 %v11331_v12  ;;  %1849 = vmatpush.bf16.msra.mxu3 %v11335_v17  ;;  %v10954_v12 = vld [vmem:[#allocation2 + $0x218] sm:$0xf]  ;;  %v16124_v17 = vld [vmem:[#allocation2 + $0x21c] sm:$0xf] }
  0x77   :  { %v10955_v21 = vor.u32 %v16132_v13, %v10954_v12  ;;  %v16212_v54 = vld [vmem:[#allocation2 + $0x4d4] sm:$0xf0]  ;;  %v10700_v4 = vld [vmem:[#allocation2 + $0x58] sm:$0xf0]  ;;  %v16173_v12 = vld [vmem:[#allocation2 + $0x3a4] sm:$0xf] }
  0x78   :  { %1811 = vmatpush.bf16.msra.mxu0 %v10755_v23  ;;  %1837 = vmatpush.bf16.msra.mxu2 %v10759_v27  ;;  %v10959_v23 = vor.u32 %v16124_v17, %v10956_v18  ;;  %v11471_v27 = vor.u32 %v16252_v19, %v11468_v20  ;;  %v10698_v60 = vld [vmem:[#allocation2 + $0x18] sm:$0xf]  ;;  %v16188_v5 = vld [vmem:[#allocation2 + $0x41c] sm:$0xf]  ;;  %v11156_v13 = vld [vmem:[#allocation2 + $0x3e0] sm:$0xf0]  ;;  %v11155_v19 = vor.u32 %v16181_v8, %v11154_v7 }
  0x79   :  { %v11210_v0 = vld [vmem:[#allocation2 + $0x418] sm:$0xf]  ;;  %v11212_v6 = vld [vmem:[#allocation2 + $0x458] sm:$0xf0]  ;;  %v11668_v17 = vld [vmem:[#allocation2 + $0x7e0] sm:$0xf0] }
  0x7a   :  { %1824 = vmatpush.bf16.msra.mxu1 %v11267_v26  ;;  %1850 = vmatpush.bf16.msra.mxu3 %v11271_v31  ;;  %v11402_v26 = vld [vmem:[#allocation2 + $0x598] sm:$0xf]  ;;  %v16236_v31 = vld [vmem:[#allocation2 + $0x59c] sm:$0xf]  ;;  %v11215_v18 = vor.u32 %v16188_v5, %v11212_v6  ;;  %v11671_v25 = vor.u32 %v16301_v16, %v11668_v17  ;;  %v10834_v8 = vld [vmem:[#allocation2 + $0x120] sm:$0xf] }
  0x7b   :  { %v11403_v36 = vor.u32 %v16244_v28, %v11402_v26  ;;  %v11407_v41 = vor.u32 %v16236_v31, %v11404_v32  ;;  %v16196_v1 = vld [vmem:[#allocation2 + $0x454] sm:$0xf0]  ;;  %v16293_v26 = vld [vmem:[#allocation2 + $0x75c] sm:$0xf0]  ;;  %v11092_v28 = vld [vmem:[#allocation2 + $0x360] sm:$0xf0] }
  0x7c   :  { %1812 = vmatpush.bf16.msra.mxu0 %v10691_v40  ;;  %1838 = vmatpush.bf16.msra.mxu2 %v10695_v45  ;;  %v11338_v40 = vld [vmem:[#allocation2 + $0x518] sm:$0xf]  ;;  %v16220_v45 = vld [vmem:[#allocation2 + $0x51c] sm:$0xf]  ;;  %v11211_v14 = vor.u32 %v16196_v1, %v11210_v0  ;;  %v11603_v32 = vor.u32 %v16293_v26, %v11602_v24  ;;  %v16245_v0 = vld [vmem:[#allocation2 + $0x5dc] sm:$0xf0] }
  0x7d   :  { %v11343_v53 = vor.u32 %v16220_v45, %v11340_v46  ;;  %v16109_v1 = vld [vmem:[#allocation2 + $0x1a4] sm:$0xf]  ;;  %v16213_v24 = vld [vmem:[#allocation2 + $0x4dc] sm:$0xf0] }
  0x7e   :  { %1825 = vmatpush.bf16.msra.mxu1 %v11203_v44  ;;  %1851 = vmatpush.bf16.msra.mxu3 %v11207_v48  ;;  %v10828_v44 = vld [vmem:[#allocation2 + $0x158] sm:$0xf0]  ;;  %v11339_v48 = vor.u32 %v16228_v42, %v11338_v40  ;;  %v16277_v40 = vld [vmem:[#allocation2 + $0x6dc] sm:$0xf0]  ;;  %v11028_v42 = vld [vmem:[#allocation2 + $0x2e0] sm:$0xf0] }
  0x7f   :  { %1839 = vmatmul.bf16.vlgmr.msra.gmra.mxu2 %v17683_v33  ;;  %1813 = vmatmul.bf16.vlgmr.msra.gmra.mxu0 %v17683_v33  ;;  %v11539_v46 = vor.u32 %v16277_v40, %v11538_v38  ;;  %v11348_v16 = vld [vmem:[#allocation2 + $0x560] sm:$0xf0] }
  0x80   :  { %1857 = vmatpush.bf16.msrb.mxu0 %v11147_v49  ;;  %1883 = vmatpush.bf16.msrb.mxu2 %v11151_v51  ;;  %v10831_v49 = vor.u32 %v16092_v43, %v10828_v44  ;;  %v16084_v51 = vld [vmem:[#allocation2 + $0xd4] sm:$0xf0]  ;;  %v16269_v43 = vld [vmem:[#allocation2 + $0x6a4] sm:$0xf] }
  0x81   :  { %1852 = vmatmul.bf16.vlgmr.msra.gmra.mxu3 %v17685_v34  ;;  %1826 = vmatmul.bf16.vlgmr.msra.gmra.mxu1 %v17685_v34  ;;  %v11540_v44 = vld [vmem:[#allocation2 + $0x6e0] sm:$0xf0] }
  0x82   :  { %1870 = vmatpush.bf16.msrb.mxu1 %v11659_v50  ;;  %1896 = vmatpush.bf16.msrb.mxu3 %v11663_v55  ;;  %v10762_v50 = vld [vmem:[#allocation2 + $0x98] sm:$0xf]  ;;  %v16076_v55 = vld [vmem:[#allocation2 + $0x9c] sm:$0xf]  ;;  %v10772_v26 = vld [vmem:[#allocation2 + $0xe0] sm:$0xf0] }
  0x83   :  { %v10763_v59 = vor.u32 %v16084_v51, %v10762_v50  ;;  %v11474_v50 = vld [vmem:[#allocation2 + $0x620] sm:$0xf]  ;;  %v11543_v51 = vor.u32 %v16269_v43, %v11540_v44  ;;  %v16061_v38 = vld [vmem:[#allocation2 + $0x24] sm:$0xf]  ;;  %v11162_v43 = vld [vmem:[#allocation2 + $0x3a8] sm:$0xf] }
  0x84   :  { %1858 = vmatpush.bf16.msrb.mxu0 %v11083_v61  ;;  %1884 = vmatpush.bf16.msrb.mxu2 %v11087_v63  ;;  %v16068_v61 = vld [vmem:[#allocation2 + $0x54] sm:$0xf0]  ;;  %v10767_v63 = vor.u32 %v16076_v55, %v10764_v56  ;;  %v16253_v55 = vld [vmem:[#allocation2 + $0x624] sm:$0xf]  ;;  %v16182_v44 = vld [vmem:[#allocation2 + $0x3e4] sm:$0xf0] }
  0x85   :  { %v11476_v56 = vld [vmem:[#allocation2 + $0x660] sm:$0xf0] }
  0x86   :  { %1871 = vmatpush.bf16.msrb.mxu1 %v11595_v62  ;;  %1897 = vmatpush.bf16.msrb.mxu3 %v11599_v3  ;;  %v11275_v62 = vor.u32 %v16212_v54, %v11274_v52  ;;  %v11279_v3 = vor.u32 %v16204_v57, %v11276_v58  ;;  %v16261_v52 = vld [vmem:[#allocation2 + $0x65c] sm:$0xf0]  ;;  %v10964_v54 = vld [vmem:[#allocation2 + $0x260] sm:$0xf0] }
  0x87   :  { %v11475_v58 = vor.u32 %v16261_v52, %v11474_v50  ;;  %v10708_v40 = vld [vmem:[#allocation2 + $0x60] sm:$0xf0]  ;;  %v16302_v52 = vld [vmem:[#allocation2 + $0x7ac] sm:$0xf] }
  0x88   :  { %1859 = vmatpush.bf16.msrb.mxu0 %v11019_v9  ;;  %1885 = vmatpush.bf16.msrb.mxu2 %v11023_v11  ;;  %v11666_v9 = vld [vmem:[#allocation2 + $0x7a0] sm:$0xf] }
  0x89   :  { %v16309_v11 = vld [vmem:[#allocation2 + $0x7dc] sm:$0xf0] }
  0x8a   :  { %1872 = vmatpush.bf16.msrb.mxu1 %v11531_v10  ;;  %1898 = vmatpush.bf16.msrb.mxu3 %v11535_v15  ;;  %v10699_v10 = vor.u32 %v16068_v61, %v10698_v60  ;;  %v10703_v15 = vor.u32 %v16060_v2, %v10700_v4  ;;  %v11667_v20 = vor.u32 %v16309_v11, %v11666_v9  ;;  %v10898_v60 = vld [vmem:[#allocation2 + $0x1a0] sm:$0xf]  ;;  %v10900_v2 = vld [vmem:[#allocation2 + $0x1e0] sm:$0xf0] }
  0x8b   :  { %v16117_v61 = vld [vmem:[#allocation2 + $0x1dc] sm:$0xf0]  ;;  %v11412_v4 = vld [vmem:[#allocation2 + $0x5e0] sm:$0xf0]  ;;  %v10903_v7 = vor.u32 %v16109_v1, %v10900_v2  ;;  %v16286_v1 = vld [vmem:[#allocation2 + $0x72c] sm:$0xf] }
  0x8c   :  { %1860 = vmatpush.bf16.msrb.mxu0 %v10955_v21  ;;  %1886 = vmatpush.bf16.msrb.mxu2 %v10959_v23  ;;  %v11159_v21 = vor.u32 %v16173_v12, %v11156_v13  ;;  %v16165_v23 = vld [vmem:[#allocation2 + $0x35c] sm:$0xf0]  ;;  %v10899_v5 = vor.u32 %v16117_v61, %v10898_v60  ;;  %v16093_v13 = vld [vmem:[#allocation2 + $0x124] sm:$0xf]  ;;  %v11610_v60 = vld [vmem:[#allocation2 + $0x728] sm:$0xf] }
  0x8d   :  { %v16101_v9 = vld [vmem:[#allocation2 + $0x15c] sm:$0xf0]  ;;  %v11612_v2 = vld [vmem:[#allocation2 + $0x768] sm:$0xf0] }
  0x8e   :  { %1873 = vmatpush.bf16.msrb.mxu1 %v11467_v22  ;;  %1899 = vmatpush.bf16.msrb.mxu3 %v11471_v27  ;;  %v11090_v22 = vld [vmem:[#allocation2 + $0x320] sm:$0xf]  ;;  %v16157_v27 = vld [vmem:[#allocation2 + $0x324] sm:$0xf]  ;;  %v10835_v17 = vor.u32 %v16101_v9, %v10834_v8  ;;  %v11546_v8 = vld [vmem:[#allocation2 + $0x6a8] sm:$0xf]  ;;  %v11615_v9 = vor.u32 %v16286_v1, %v11612_v2 }
  0x8f   :  { %v11091_v31 = vor.u32 %v16165_v23, %v11090_v22  ;;  %v16229_v12 = vld [vmem:[#allocation2 + $0x55c] sm:$0xf0]  ;;  %v16206_v1 = vld [vmem:[#allocation2 + $0x4ac] sm:$0xf] }
  0x90   :  { %1861 = vmatpush.bf16.msrb.mxu0 %v10891_v35  ;;  %1887 = vmatpush.bf16.msrb.mxu2 %v10895_v37  ;;  %v11095_v35 = vor.u32 %v16157_v27, %v11092_v28  ;;  %v16149_v37 = vld [vmem:[#allocation2 + $0x2dc] sm:$0xf0]  ;;  %v16205_v27 = vld [vmem:[#allocation2 + $0x4a4] sm:$0xf]  ;;  %v11292_v2 = vld [vmem:[#allocation2 + $0x4e8] sm:$0xf0] }
  0x91   :  { %v11282_v22 = vld [vmem:[#allocation2 + $0x4a0] sm:$0xf]  ;;  %v11284_v28 = vld [vmem:[#allocation2 + $0x4e0] sm:$0xf0] }
  0x92   :  { %1874 = vmatpush.bf16.msrb.mxu1 %v11403_v36  ;;  %1900 = vmatpush.bf16.msrb.mxu3 %v11407_v41  ;;  %v11026_v36 = vld [vmem:[#allocation2 + $0x2a0] sm:$0xf]  ;;  %v16141_v41 = vld [vmem:[#allocation2 + $0x2a4] sm:$0xf] }
  0x93   :  { %v11027_v45 = vor.u32 %v16149_v37, %v11026_v36  ;;  %v11218_v36 = vld [vmem:[#allocation2 + $0x420] sm:$0xf] }
  0x94   :  { %1862 = vmatpush.bf16.msrb.mxu0 %v10827_v47  ;;  %1888 = vmatpush.bf16.msrb.mxu2 %v10831_v49  ;;  %v11031_v47 = vor.u32 %v16141_v41, %v11028_v42  ;;  %v16133_v49 = vld [vmem:[#allocation2 + $0x25c] sm:$0xf0]  ;;  %v16189_v41 = vld [vmem:[#allocation2 + $0x424] sm:$0xf] }
  0x95   :  { %v16197_v37 = vld [vmem:[#allocation2 + $0x45c] sm:$0xf0]  ;;  %v11220_v42 = vld [vmem:[#allocation2 + $0x460] sm:$0xf0] }
  0x96   :  { %1875 = vmatpush.bf16.msrb.mxu1 %v11339_v48  ;;  %1901 = vmatpush.bf16.msrb.mxu3 %v11343_v53  ;;  %v10962_v48 = vld [vmem:[#allocation2 + $0x220] sm:$0xf]  ;;  %v16125_v53 = vld [vmem:[#allocation2 + $0x224] sm:$0xf]  ;;  %v11219_v50 = vor.u32 %v16197_v37, %v11218_v36  ;;  %v16246_v36 = vld [vmem:[#allocation2 + $0x5e4] sm:$0xf0] }
  0x97   :  { %v10963_v57 = vor.u32 %v16133_v49, %v10962_v48  ;;  %v16174_v48 = vld [vmem:[#allocation2 + $0x3ac] sm:$0xf] }
  0x98   :  { %1863 = vmatpush.bf16.msrb.mxu0 %v10763_v59  ;;  %1889 = vmatpush.bf16.msrb.mxu2 %v10767_v63  ;;  %v10967_v59 = vor.u32 %v16125_v53, %v10964_v54  ;;  %v11479_v63 = vor.u32 %v16253_v55, %v11476_v56  ;;  %v11164_v49 = vld [vmem:[#allocation2 + $0x3e8] sm:$0xf0]  ;;  %v11223_v54 = vor.u32 %v16189_v41, %v11220_v42  ;;  %v10842_v42 = vld [vmem:[#allocation2 + $0x128] sm:$0xf] }
  0x99   :  { %v11676_v53 = vld [vmem:[#allocation2 + $0x7e8] sm:$0xf0]  ;;  %v11163_v55 = vor.u32 %v16182_v44, %v11162_v43 }
  0x9a   :  { %1876 = vmatpush.bf16.msrb.mxu1 %v11275_v62  ;;  %1902 = vmatpush.bf16.msrb.mxu3 %v11279_v3  ;;  %v11410_v62 = vld [vmem:[#allocation2 + $0x5a0] sm:$0xf]  ;;  %v16237_v3 = vld [vmem:[#allocation2 + $0x5a4] sm:$0xf]  ;;  %v11679_v61 = vor.u32 %v16302_v52, %v11676_v53  ;;  %v16110_v37 = vld [vmem:[#allocation2 + $0x1ac] sm:$0xf] }
  0x9b   :  { %v11411_v6 = vor.u32 %v16245_v0, %v11410_v62  ;;  %v11415_v11 = vor.u32 %v16237_v3, %v11412_v4  ;;  %v16294_v62 = vld [vmem:[#allocation2 + $0x764] sm:$0xf0]  ;;  %v11100_v0 = vld [vmem:[#allocation2 + $0x368] sm:$0xf0] }
  0x9c   :  { %1864 = vmatpush.bf16.msrb.mxu0 %v10699_v10  ;;  %1890 = vmatpush.bf16.msrb.mxu2 %v10703_v15  ;;  %v11346_v10 = vld [vmem:[#allocation2 + $0x520] sm:$0xf]  ;;  %v16221_v15 = vld [vmem:[#allocation2 + $0x524] sm:$0xf]  ;;  %v11611_v4 = vor.u32 %v16294_v62, %v11610_v60  ;;  %v16222_v52 = vld [vmem:[#allocation2 + $0x52c] sm:$0xf] }
  0x9d   :  { %v11351_v23 = vor.u32 %v16221_v15, %v11348_v16  ;;  %v11356_v53 = vld [vmem:[#allocation2 + $0x568] sm:$0xf0]  ;;  %v16214_v62 = vld [vmem:[#allocation2 + $0x4e4] sm:$0xf0] }
  0x9e   :  { %1877 = vmatpush.bf16.msrb.mxu1 %v11211_v14  ;;  %1903 = vmatpush.bf16.msrb.mxu3 %v11215_v18  ;;  %v10836_v14 = vld [vmem:[#allocation2 + $0x160] sm:$0xf0]  ;;  %v11347_v18 = vor.u32 %v16229_v12, %v11346_v10  ;;  %v16278_v10 = vld [vmem:[#allocation2 + $0x6e4] sm:$0xf0]  ;;  %v11036_v12 = vld [vmem:[#allocation2 + $0x2e8] sm:$0xf0] }
  0x9f   :  { %1891 = vmatmul.bf16.vlgmr.msrb.gmra.mxu2 %v17683_v33  ;;  %1865 = vmatmul.bf16.vlgmr.msrb.gmra.mxu0 %v17683_v33  ;;  %v11547_v16 = vor.u32 %v16278_v10, %v11546_v8  ;;  %v16198_v10 = vld [vmem:[#allocation2 + $0x464] sm:$0xf0] }
  0xa0   :  { %1909 = vmatpush.bf16.msra.mxu0 %v11155_v19  ;;  %1935 = vmatpush.bf16.msra.mxu2 %v11159_v21  ;;  %v10839_v19 = vor.u32 %v16093_v13, %v10836_v14  ;;  %v16085_v21 = vld [vmem:[#allocation2 + $0xdc] sm:$0xf0]  ;;  %v16270_v13 = vld [vmem:[#allocation2 + $0x6ac] sm:$0xf] }
  0xa1   :  { %1904 = vmatmul.bf16.vlgmr.msrb.gmra.mxu3 %v17685_v34  ;;  %1878 = vmatmul.bf16.vlgmr.msrb.gmra.mxu1 %v17685_v34  ;;  %v11548_v14 = vld [vmem:[#allocation2 + $0x6e8] sm:$0xf0] }
  0xa2   :  { %1922 = vmatpush.bf16.msra.mxu1 %v11667_v20  ;;  %1948 = vmatpush.bf16.msra.mxu3 %v11671_v25  ;;  %v10770_v20 = vld [vmem:[#allocation2 + $0xa0] sm:$0xf]  ;;  %v16077_v25 = vld [vmem:[#allocation2 + $0xa4] sm:$0xf] }
  0xa3   :  { %v10771_v29 = vor.u32 %v16085_v21, %v10770_v20  ;;  %v11482_v20 = vld [vmem:[#allocation2 + $0x628] sm:$0xf]  ;;  %v11551_v21 = vor.u32 %v16270_v13, %v11548_v14  ;;  %v11295_v14 = vor.u32 %v16206_v1, %v11292_v2  ;;  %v10978_v2 = vld [vmem:[#allocation2 + $0x230] sm:$0xf] }
  0xa4   :  { %1910 = vmatpush.bf16.msra.mxu0 %v11091_v31  ;;  %1936 = vmatpush.bf16.msra.mxu2 %v11095_v35  ;;  %v16069_v31 = vld [vmem:[#allocation2 + $0x5c] sm:$0xf0]  ;;  %v10775_v35 = vor.u32 %v16077_v25, %v10772_v26  ;;  %v16254_v25 = vld [vmem:[#allocation2 + $0x62c] sm:$0xf] }
  0xa5   :  { %v11484_v26 = vld [vmem:[#allocation2 + $0x668] sm:$0xf0] }
  0xa6   :  { %1923 = vmatpush.bf16.msra.mxu1 %v11603_v32  ;;  %1949 = vmatpush.bf16.msra.mxu3 %v11607_v39  ;;  %v11283_v32 = vor.u32 %v16213_v24, %v11282_v22  ;;  %v11287_v39 = vor.u32 %v16205_v27, %v11284_v28  ;;  %v16262_v22 = vld [vmem:[#allocation2 + $0x664] sm:$0xf0]  ;;  %v10972_v24 = vld [vmem:[#allocation2 + $0x268] sm:$0xf0] }
  0xa7   :  { %v11483_v28 = vor.u32 %v16262_v22, %v11482_v20 }
  0xa8   :  { %1911 = vmatpush.bf16.msra.mxu0 %v11027_v45  ;;  %1937 = vmatpush.bf16.msra.mxu2 %v11031_v47  ;;  %v11674_v45 = vld [vmem:[#allocation2 + $0x7a8] sm:$0xf] }
  0xa9   :  { %v16310_v47 = vld [vmem:[#allocation2 + $0x7e4] sm:$0xf0] }
  0xaa   :  { %1924 = vmatpush.bf16.msra.mxu1 %v11539_v46  ;;  %1950 = vmatpush.bf16.msra.mxu3 %v11543_v51  ;;  %v10707_v46 = vor.u32 %v16069_v31, %v10706_v30  ;;  %v10711_v51 = vor.u32 %v16061_v38, %v10708_v40  ;;  %v11675_v56 = vor.u32 %v16310_v47, %v11674_v45  ;;  %v10906_v30 = vld [vmem:[#allocation2 + $0x1a8] sm:$0xf]  ;;  %v10908_v38 = vld [vmem:[#allocation2 + $0x1e8] sm:$0xf0] }
  0xab   :  { %v16118_v31 = vld [vmem:[#allocation2 + $0x1e4] sm:$0xf0]  ;;  %v11420_v40 = vld [vmem:[#allocation2 + $0x5e8] sm:$0xf0]  ;;  %v10911_v44 = vor.u32 %v16110_v37, %v10908_v38  ;;  %v11106_v38 = vld [vmem:[#allocation2 + $0x330] sm:$0xf] }
  0xac   :  { %1912 = vmatpush.bf16.msra.mxu0 %v10963_v57  ;;  %1938 = vmatpush.bf16.msra.mxu2 %v10967_v59  ;;  %v11167_v57 = vor.u32 %v16174_v48, %v11164_v49  ;;  %v16166_v59 = vld [vmem:[#allocation2 + $0x364] sm:$0xf0]  ;;  %v10907_v41 = vor.u32 %v16118_v31, %v10906_v30  ;;  %v16094_v49 = vld [vmem:[#allocation2 + $0x12c] sm:$0xf]  ;;  %v11684_v30 = vld [vmem:[#allocation2 + $0x7f0] sm:$0xf0] }
  0xad   :  { %v16102_v45 = vld [vmem:[#allocation2 + $0x164] sm:$0xf0] }
  0xae   :  { %1925 = vmatpush.bf16.msra.mxu1 %v11475_v58  ;;  %1951 = vmatpush.bf16.msra.mxu3 %v11479_v63  ;;  %v11098_v58 = vld [vmem:[#allocation2 + $0x328] sm:$0xf]  ;;  %v16158_v63 = vld [vmem:[#allocation2 + $0x32c] sm:$0xf] }
  0xaf   :  { %v11099_v3 = vor.u32 %v16166_v59, %v11098_v58  ;;  %v16230_v47 = vld [vmem:[#allocation2 + $0x564] sm:$0xf0] }
  0xb0   :  { %1913 = vmatpush.bf16.msra.mxu0 %v10899_v5  ;;  %1939 = vmatpush.bf16.msra.mxu2 %v10903_v7  ;;  %v11103_v5 = vor.u32 %v16158_v63, %v11100_v0  ;;  %v16150_v7 = vld [vmem:[#allocation2 + $0x2e4] sm:$0xf0]  ;;  %v16078_v63 = vld [vmem:[#allocation2 + $0xac] sm:$0xf] }
  0xb1   :  { %v16086_v58 = vld [vmem:[#allocation2 + $0xe4] sm:$0xf0]  ;;  %v10780_v0 = vld [vmem:[#allocation2 + $0xe8] sm:$0xf0] }
  0xb2   :  { %1926 = vmatpush.bf16.msra.mxu1 %v11411_v6  ;;  %1952 = vmatpush.bf16.msra.mxu3 %v11415_v11  ;;  %v11034_v6 = vld [vmem:[#allocation2 + $0x2a8] sm:$0xf]  ;;  %v16142_v11 = vld [vmem:[#allocation2 + $0x2ac] sm:$0xf] }
  0xb3   :  { %v11035_v15 = vor.u32 %v16150_v7, %v11034_v6  ;;  %v11290_v59 = vld [vmem:[#allocation2 + $0x4a8] sm:$0xf] }
  0xb4   :  { %1914 = vmatpush.bf16.msra.mxu0 %v10835_v17  ;;  %1940 = vmatpush.bf16.msra.mxu2 %v10839_v19  ;;  %v11039_v17 = vor.u32 %v16142_v11, %v11036_v12  ;;  %v16134_v19 = vld [vmem:[#allocation2 + $0x264] sm:$0xf0]  ;;  %v11291_v8 = vor.u32 %v16214_v62, %v11290_v59  ;;  %v16062_v11 = vld [vmem:[#allocation2 + $0x2c] sm:$0xf]  ;;  %v11044_v62 = vld [vmem:[#allocation2 + $0x2f0] sm:$0xf0] }
  0xb5   :  { %v11226_v6 = vld [vmem:[#allocation2 + $0x428] sm:$0xf]  ;;  %v10716_v12 = vld [vmem:[#allocation2 + $0x68] sm:$0xf0] }
  0xb6   :  { %1927 = vmatpush.bf16.msra.mxu1 %v11347_v18  ;;  %1953 = vmatpush.bf16.msra.mxu3 %v11351_v23  ;;  %v10970_v18 = vld [vmem:[#allocation2 + $0x228] sm:$0xf]  ;;  %v16126_v23 = vld [vmem:[#allocation2 + $0x22c] sm:$0xf] }
  0xb7   :  { %v10971_v27 = vor.u32 %v16134_v19, %v10970_v18  ;;  %v16183_v18 = vld [vmem:[#allocation2 + $0x3ec] sm:$0xf0] }
  0xb8   :  { %1915 = vmatpush.bf16.msra.mxu0 %v10771_v29  ;;  %1941 = vmatpush.bf16.msra.mxu2 %v10775_v35  ;;  %v10975_v29 = vor.u32 %v16126_v23, %v10972_v24  ;;  %v11487_v35 = vor.u32 %v16254_v25, %v11484_v26  ;;  %v11682_v19 = vld [vmem:[#allocation2 + $0x7b0] sm:$0xf]  ;;  %v16175_v24 = vld [vmem:[#allocation2 + $0x3b4] sm:$0xf] }
  0xb9   :  { %v16311_v23 = vld [vmem:[#allocation2 + $0x7ec] sm:$0xf0]  ;;  %v11172_v25 = vld [vmem:[#allocation2 + $0x3f0] sm:$0xf0] }
  0xba   :  { %1928 = vmatpush.bf16.msra.mxu1 %v11283_v32  ;;  %1954 = vmatpush.bf16.msra.mxu3 %v11287_v39  ;;  %v11418_v32 = vld [vmem:[#allocation2 + $0x5a8] sm:$0xf]  ;;  %v16238_v39 = vld [vmem:[#allocation2 + $0x5ac] sm:$0xf]  ;;  %v11175_v37 = vor.u32 %v16175_v24, %v11172_v25 }
  0xbb   :  { %v11419_v43 = vor.u32 %v16246_v36, %v11418_v32  ;;  %v11423_v48 = vor.u32 %v16238_v39, %v11420_v40  ;;  %v11683_v36 = vor.u32 %v16311_v23, %v11682_v19  ;;  %v16167_v39 = vld [vmem:[#allocation2 + $0x36c] sm:$0xf0] }
  0xbc   :  { %1916 = vmatpush.bf16.msra.mxu0 %v10707_v46  ;;  %1942 = vmatpush.bf16.msra.mxu2 %v10711_v51  ;;  %v11354_v46 = vld [vmem:[#allocation2 + $0x528] sm:$0xf]  ;;  %v17707_v51 = vld [vmem:[#allocation5] sm:$0xff]  ;;  %v11618_v40 = vld [vmem:[#allocation2 + $0x730] sm:$0xf] }
  0xbd   :  { %v389_v60 = vperm.slane %v17707_v51, 0  ;;  %v16247_v23 = vld [vmem:[#allocation2 + $0x5ec] sm:$0xf0] }
  0xbe   :  { %1929 = vmatpush.bf16.msra.mxu1 %v11219_v50  ;;  %1955 = vmatpush.bf16.msra.mxu3 %v11223_v54  ;;  %v10844_v50 = vld [vmem:[#allocation2 + $0x168] sm:$0xf0]  ;;  %v10843_v54 = vor.u32 %v16102_v45, %v10842_v42  ;;  %v16159_v45 = vld [vmem:[#allocation2 + $0x334] sm:$0xf] }
  0xbf   :  { %1943 = vmatmul.bf16.vlgmr.msra.gmra.mxu2 %v17683_v33  ;;  %1917 = vmatmul.bf16.vlgmr.msra.gmra.mxu0 %v17683_v33 }
  0xc0   :  { %1961 = vmatpush.bf16.msrb.mxu0 %v11163_v55  ;;  %1987 = vmatpush.bf16.msrb.mxu2 %v11167_v57  ;;  %v10778_v55 = vld [vmem:[#allocation2 + $0xa8] sm:$0xf]  ;;  %v10847_v57 = vor.u32 %v16094_v49, %v10844_v50  ;;  %v11620_v49 = vld [vmem:[#allocation2 + $0x770] sm:$0xf0] }
  0xc1   :  { %1956 = vmatmul.bf16.vlgmr.msra.gmra.mxu3 %v17685_v34  ;;  %1930 = vmatmul.bf16.vlgmr.msra.gmra.mxu1 %v17685_v34 }
  0xc2   :  { %1974 = vmatpush.bf16.msrb.mxu1 %v11675_v56  ;;  %2000 = vmatpush.bf16.msrb.mxu3 %v11679_v61  ;;  %v11355_v56 = vor.u32 %v16230_v47, %v11354_v46  ;;  %v11359_v61 = vor.u32 %v16222_v52, %v11356_v53  ;;  %v11108_v46 = vld [vmem:[#allocation2 + $0x370] sm:$0xf0]  ;;  %v11107_v52 = vor.u32 %v16167_v39, %v11106_v38  ;;  %v10850_v39 = vld [vmem:[#allocation2 + $0x130] sm:$0xf] }
  0xc4   :  { %1962 = vmatpush.bf16.msrb.mxu0 %v11099_v3  ;;  %1988 = vmatpush.bf16.msrb.mxu2 %v11103_v5  ;;  %v10779_v3 = vor.u32 %v16086_v58, %v10778_v55  ;;  %v16070_v5 = vld [vmem:[#allocation2 + $0x64] sm:$0xf0]  ;;  %v1710_v7 = vpop.f32.mrf.mxu0  ;;  %v11042_v55 = vld [vmem:[#allocation2 + $0x2b0] sm:$0xf] }
  0xc5   :  { %v1711_v13 = vadd.f32 %v1710_v7, %v389_v60  ;;  %v16279_v60 = vld [vmem:[#allocation2 + $0x6ec] sm:$0xf0] }
  0xc6   :  { %1975 = vmatpush.bf16.msrb.mxu1 %v11611_v4  ;;  %2001 = vmatpush.bf16.msrb.mxu3 %v11615_v9  ;;  %v10714_v4 = vld [vmem:[#allocation2 + $0x28] sm:$0xf]  ;;  %v10783_v9 = vor.u32 %v16078_v63, %v10780_v0  ;;  %v1723_v20 = vpop.f32.mrf.mxu1  ;;  %v16271_v63 = vld [vmem:[#allocation2 + $0x6b4] sm:$0xf]  ;;  %v11490_v7 = vld [vmem:[#allocation2 + $0x630] sm:$0xf] }
  0xc7   :  { %v10715_v22 = vor.u32 %v16070_v5, %v10714_v4  ;;  %v17711_v26 = vadd.f32 %v1723_v20, %v1711_v13  ;;  %v11556_v0 = vld [vmem:[#allocation2 + $0x6f0] sm:$0xf0] }
  0xc8   :  { %1963 = vmatpush.bf16.msrb.mxu0 %v11035_v15  ;;  %1989 = vmatpush.bf16.msrb.mxu2 %v11039_v17  ;;  %v16190_v15 = vld [vmem:[#allocation2 + $0x42c] sm:$0xf]  ;;  %v11170_v17 = vld [vmem:[#allocation2 + $0x3b0] sm:$0xf]  ;;  %v10980_v13 = vld [vmem:[#allocation2 + $0x270] sm:$0xf0] }
  0xc9   :  { %v11171_v32 = vor.u32 %v16183_v18, %v11170_v17  ;;  %v10914_v17 = vld [vmem:[#allocation2 + $0x1b0] sm:$0xf] }
  0xca   :  { %1976 = vmatpush.bf16.msrb.mxu1 %v11547_v16  ;;  %2002 = vmatpush.bf16.msrb.mxu3 %v11551_v21  ;;  %v11228_v16 = vld [vmem:[#allocation2 + $0x468] sm:$0xf0]  ;;  %v390_v21 = vperm.slane %v17707_v51, 1 }
  0xcb   :  { %v11231_v31 = vor.u32 %v16190_v15, %v11228_v16  ;;  %v11492_v15 = vld [vmem:[#allocation2 + $0x670] sm:$0xf0] }
  0xcc   :  { %1964 = vmatpush.bf16.msrb.mxu0 %v10971_v27  ;;  %1990 = vmatpush.bf16.msrb.mxu2 %v10975_v29  ;;  %v11227_v27 = vor.u32 %v16198_v10, %v11226_v6  ;;  %v16303_v29 = vld [vmem:[#allocation2 + $0x7b4] sm:$0xf]  ;;  %v1749_v42 = vpop.f32.mrf.mxu3  ;;  %v1712_v47 = vpop.f32.mrf.mxu0  ;;  %v16135_v6 = vld [vmem:[#allocation2 + $0x26c] sm:$0xf0]  ;;  %v11559_v10 = vor.u32 %v16271_v63, %v11556_v0 }
  0xcd   :  { %v10979_v16 = vor.u32 %v16135_v6, %v10978_v2  ;;  %v16215_v63 = vld [vmem:[#allocation2 + $0x4ec] sm:$0xf0]  ;;  %v16079_v0 = vld [vmem:[#allocation2 + $0xb4] sm:$0xf] }
  0xce   :  { %1977 = vmatpush.bf16.msrb.mxu1 %v11483_v28  ;;  %2003 = vmatpush.bf16.msrb.mxu3 %v11487_v35  ;;  %v10719_v28 = vor.u32 %v16062_v11, %v10716_v12  ;;  %v1736_v35 = vpop.f32.mrf.mxu2  ;;  %v1725_v58 = vpop.f32.mrf.mxu1  ;;  %v16263_v11 = vld [vmem:[#allocation2 + $0x66c] sm:$0xf0]  ;;  %v16127_v12 = vld [vmem:[#allocation2 + $0x234] sm:$0xf] }
  0xcf   :  { %v11491_v19 = vor.u32 %v16263_v11, %v11490_v7  ;;  %v10983_v20 = vor.u32 %v16127_v12, %v10980_v13  ;;  %v10786_v58 = vld [vmem:[#allocation2 + $0xb0] sm:$0xf]  ;;  %v16207_v2 = vld [vmem:[#allocation2 + $0x4b4] sm:$0xf] }
  0xd0   :  { %1965 = vmatpush.bf16.msrb.mxu0 %v10907_v41  ;;  %1991 = vmatpush.bf16.msrb.mxu2 %v10911_v44  ;;  %v1737_v41 = vadd.f32 %v1736_v35, %v390_v21  ;;  %v16295_v44 = vld [vmem:[#allocation2 + $0x76c] sm:$0xf0]  ;;  %v16063_v11 = vld [vmem:[#allocation2 + $0x34] sm:$0xf] }
  0xd1   :  { %v11619_v53 = vor.u32 %v16295_v44, %v11618_v40  ;;  %v16119_v21 = vld [vmem:[#allocation2 + $0x1ec] sm:$0xf0] }
  0xd2   :  { %1978 = vmatpush.bf16.msrb.mxu1 %v11419_v43  ;;  %2004 = vmatpush.bf16.msrb.mxu3 %v11423_v48  ;;  %v11687_v43 = vor.u32 %v16303_v29, %v11684_v30  ;;  %v16287_v48 = vld [vmem:[#allocation2 + $0x734] sm:$0xf]  ;;  %v17713_v50 = vadd.f32 %v1749_v42, %v1737_v41  ;;  %v392_v30 = vperm.slane %v17707_v51, 3  ;;  %v16103_v40 = vld [vmem:[#allocation2 + $0x16c] sm:$0xf0] }
  0xd3   :  { %v11623_v59 = vor.u32 %v16287_v48, %v11620_v49  ;;  %v10916_v29 = vld [vmem:[#allocation2 + $0x1f0] sm:$0xf0]  ;;  %v11362_v41 = vld [vmem:[#allocation2 + $0x530] sm:$0xf] }
  0xd4   :  { %1966 = vmatpush.bf16.msrb.mxu0 %v10843_v54  ;;  %1992 = vmatpush.bf16.msrb.mxu2 %v10847_v57  ;;  %v11111_v54 = vor.u32 %v16159_v45, %v11108_v46  ;;  %v11554_v57 = vld [vmem:[#allocation2 + $0x6b0] sm:$0xf]  ;;  %v16095_v45 = vld [vmem:[#allocation2 + $0x134] sm:$0xf] }
  0xd5   :  { %v11555_v4 = vor.u32 %v16279_v60, %v11554_v57  ;;  %v16231_v44 = vld [vmem:[#allocation2 + $0x56c] sm:$0xf0]  ;;  %v10852_v46 = vld [vmem:[#allocation2 + $0x170] sm:$0xf0] }
  0xd6   :  { %1979 = vmatpush.bf16.msrb.mxu1 %v11355_v56  ;;  %2005 = vmatpush.bf16.msrb.mxu3 %v11359_v61  ;;  %v16151_v56 = vld [vmem:[#allocation2 + $0x2ec] sm:$0xf0]  ;;  %v16143_v61 = vld [vmem:[#allocation2 + $0x2b4] sm:$0xf]  ;;  %v10855_v57 = vor.u32 %v16095_v45, %v10852_v46  ;;  %v11628_v45 = vld [vmem:[#allocation2 + $0x778] sm:$0xf0] }
  0xd7   :  { %v11043_v1 = vor.u32 %v16151_v56, %v11042_v55  ;;  %v11047_v5 = vor.u32 %v16143_v61, %v11044_v62  ;;  %v16223_v49 = vld [vmem:[#allocation2 + $0x534] sm:$0xf]  ;;  %v11363_v56 = vor.u32 %v16231_v44, %v11362_v41  ;;  %v11298_v60 = vld [vmem:[#allocation2 + $0x4b0] sm:$0xf]  ;;  %v16296_v41 = vld [vmem:[#allocation2 + $0x774] sm:$0xf0] }
  0xd8   :  { %1967 = vmatpush.bf16.msrb.mxu0 %v10779_v3  ;;  %1993 = vmatpush.bf16.msrb.mxu2 %v10783_v9  ;;  %v1738_v3 = vpop.f32.mrf.mxu2  ;;  %v391_v9 = vperm.slane %v17707_v51, 2  ;;  %v16071_v6 = vld [vmem:[#allocation2 + $0x6c] sm:$0xf0]  ;;  %v11299_v7 = vor.u32 %v16215_v63, %v11298_v60  ;;  %v16288_v44 = vld [vmem:[#allocation2 + $0x73c] sm:$0xf] }
  0xd9   :  { %v11300_v3 = vld [vmem:[#allocation2 + $0x4f0] sm:$0xf0]  ;;  %v11564_v60 = vld [vmem:[#allocation2 + $0x6f8] sm:$0xf0] }
  0xda   :  { %1980 = vmatpush.bf16.msrb.mxu1 %v11291_v8  ;;  %2006 = vmatpush.bf16.msrb.mxu3 %v11295_v14  ;;  %v1751_v8 = vpop.f32.mrf.mxu3  ;;  %v16255_v14 = vld [vmem:[#allocation2 + $0x634] sm:$0xf]  ;;  %v11303_v13 = vor.u32 %v16207_v2, %v11300_v3  ;;  %v11498_v2 = vld [vmem:[#allocation2 + $0x638] sm:$0xf]  ;;  %v393_v3 = vperm.slane %v17707_v51, 4 }
  0xdc   :  { %1968 = vmatpush.bf16.msrb.mxu0 %v10715_v22  ;;  %1994 = vmatpush.bf16.msrb.mxu2 %v10719_v28  ;;  %v1762_v18 = vpop.f32.mrf.mxu0  ;;  %v11426_v22 = vld [vmem:[#allocation2 + $0x5b0] sm:$0xf]  ;;  %v16111_v28 = vld [vmem:[#allocation2 + $0x1b4] sm:$0xf] }
  0xdd   :  { %v1763_v24 = vadd.f32 %v1762_v18, %v391_v9  ;;  %v10919_v38 = vor.u32 %v16111_v28, %v10916_v29  ;;  %v11234_v9 = vld [vmem:[#allocation2 + $0x430] sm:$0xf]  ;;  %v11178_v18 = vld [vmem:[#allocation2 + $0x3b8] sm:$0xf]  ;;  %v16304_v28 = vld [vmem:[#allocation2 + $0x7bc] sm:$0xf] }
  0xde   :  { %1981 = vmatpush.bf16.msrb.mxu1 %v11227_v27  ;;  %2007 = vmatpush.bf16.msrb.mxu3 %v11231_v31  ;;  %v1775_v25 = vpop.f32.mrf.mxu1  ;;  %v11495_v27 = vor.u32 %v16255_v14, %v11492_v15  ;;  %v16239_v31 = vld [vmem:[#allocation2 + $0x5b4] sm:$0xf]  ;;  %v11692_v29 = vld [vmem:[#allocation2 + $0x7f8] sm:$0xf0] }
  0xdf   :  { %1995 = vmatmul.bf16.vlgmr.msrb.gmra.mxu2 %v17683_v33  ;;  %1969 = vmatmul.bf16.vlgmr.msrb.gmra.mxu0 %v17683_v33  ;;  %v17721_v35 = vadd.f32 %v1775_v25, %v1763_v24  ;;  %v10724_v14 = vld [vmem:[#allocation2 + $0x70] sm:$0xf0]  ;;  %v11180_v24 = vld [vmem:[#allocation2 + $0x3f8] sm:$0xf0] }
  0xe0   :  { %2013 = vmatpush.bf16.msra.mxu0 %v11171_v32  ;;  %2039 = vmatpush.bf16.msra.mxu2 %v11175_v37  ;;  %v11428_v32 = vld [vmem:[#allocation2 + $0x5f0] sm:$0xf0]  ;;  %v11427_v37 = vor.u32 %v16247_v23, %v11426_v22  ;;  %v16312_v22 = vld [vmem:[#allocation2 + $0x7f4] sm:$0xf0]  ;;  %v16176_v23 = vld [vmem:[#allocation2 + $0x3bc] sm:$0xf] }
  0xe1   :  { %2008 = vmatmul.bf16.vlgmr.msrb.gmra.mxu3 %v17685_v34  ;;  %1982 = vmatmul.bf16.vlgmr.msrb.gmra.mxu1 %v17685_v34  ;;  %v16191_v15 = vld [vmem:[#allocation2 + $0x434] sm:$0xf] }
  0xe2   :  { %2026 = vmatpush.bf16.msra.mxu1 %v11683_v36  ;;  %2052 = vmatpush.bf16.msra.mxu3 %v11687_v43  ;;  %v10915_v36 = vor.u32 %v16119_v21, %v10914_v17  ;;  %v1788_v42 = vpop.f32.mrf.mxu2  ;;  %v11431_v43 = vor.u32 %v16239_v31, %v11428_v32 }
  0xe3   :  { %v1789_v47 = vadd.f32 %v1788_v42, %v392_v30  ;;  %v16160_v42 = vld [vmem:[#allocation2 + $0x33c] sm:$0xf] }
  0xe4   :  { %2014 = vmatpush.bf16.msra.mxu0 %v11107_v52  ;;  %2040 = vmatpush.bf16.msra.mxu2 %v11111_v54  ;;  %v1801_v48 = vpop.f32.mrf.mxu3  ;;  %v11364_v52 = vld [vmem:[#allocation2 + $0x570] sm:$0xf0]  ;;  %v1764_v55 = vpop.f32.mrf.mxu0 }
  0xe5   :  { %v17723_v54 = vadd.f32 %v1801_v48, %v1789_v47  ;;  %v11367_v62 = vor.u32 %v16223_v49, %v11364_v52  ;;  %v11050_v49 = vld [vmem:[#allocation2 + $0x2b8] sm:$0xf]  ;;  %v11631_v55 = vor.u32 %v16288_v44, %v11628_v45  ;;  %v11372_v44 = vld [vmem:[#allocation2 + $0x578] sm:$0xf0] }
  0xe6   :  { %2027 = vmatpush.bf16.msra.mxu1 %v11619_v53  ;;  %2053 = vmatpush.bf16.msra.mxu3 %v11623_v59  ;;  %v10851_v53 = vor.u32 %v16103_v40, %v10850_v39  ;;  %v16087_v59 = vld [vmem:[#allocation2 + $0xec] sm:$0xf0]  ;;  %v1777_v61 = vpop.f32.mrf.mxu1  ;;  %v11626_v39 = vld [vmem:[#allocation2 + $0x738] sm:$0xf]  ;;  %v11695_v40 = vor.u32 %v16304_v28, %v11692_v29 }
  0xe7   :  { %v11627_v47 = vor.u32 %v16296_v41, %v11626_v39  ;;  %v16152_v52 = vld [vmem:[#allocation2 + $0x2f4] sm:$0xf0]  ;;  %v10860_v41 = vld [vmem:[#allocation2 + $0x178] sm:$0xf0] }
  0xe8   :  { %2015 = vmatpush.bf16.msra.mxu0 %v11043_v1  ;;  %2041 = vmatpush.bf16.msra.mxu2 %v11047_v5  ;;  %v10788_v1 = vld [vmem:[#allocation2 + $0xf0] sm:$0xf0]  ;;  %v10722_v5 = vld [vmem:[#allocation2 + $0x30] sm:$0xf]  ;;  %v11051_v61 = vor.u32 %v16152_v52, %v11050_v49  ;;  %v16232_v39 = vld [vmem:[#allocation2 + $0x574] sm:$0xf0] }
  0xe9   :  { %v10791_v8 = vor.u32 %v16079_v0, %v10788_v1  ;;  %v10723_v21 = vor.u32 %v16071_v6, %v10722_v5  ;;  %v16136_v1 = vld [vmem:[#allocation2 + $0x274] sm:$0xf0]  ;;  %v16128_v6 = vld [vmem:[#allocation2 + $0x23c] sm:$0xf] }
  0xea   :  { %2028 = vmatpush.bf16.msra.mxu1 %v11555_v4  ;;  %2054 = vmatpush.bf16.msra.mxu3 %v11559_v10  ;;  %v10787_v4 = vor.u32 %v16087_v59, %v10786_v58  ;;  %v16199_v10 = vld [vmem:[#allocation2 + $0x46c] sm:$0xf0]  ;;  %v1790_v12 = vpop.f32.mrf.mxu2  ;;  %v11052_v58 = vld [vmem:[#allocation2 + $0x2f8] sm:$0xf0]  ;;  %v16264_v5 = vld [vmem:[#allocation2 + $0x674] sm:$0xf0] }
  0xeb   :  { %v11235_v25 = vor.u32 %v16199_v10, %v11234_v9  ;;  %v16272_v59 = vld [vmem:[#allocation2 + $0x6bc] sm:$0xf]  ;;  %v10794_v52 = vld [vmem:[#allocation2 + $0xb8] sm:$0xf] }
  0xec   :  { %2016 = vmatpush.bf16.msra.mxu0 %v10979_v16  ;;  %2042 = vmatpush.bf16.msra.mxu2 %v10983_v20  ;;  %v11236_v16 = vld [vmem:[#allocation2 + $0x470] sm:$0xf0]  ;;  %v1803_v17 = vpop.f32.mrf.mxu3  ;;  %v11690_v20 = vld [vmem:[#allocation2 + $0x7b8] sm:$0xf]  ;;  %v11500_v9 = vld [vmem:[#allocation2 + $0x678] sm:$0xf0] }
  0xed   :  { %v11239_v30 = vor.u32 %v16191_v15, %v11236_v16  ;;  %v11691_v32 = vor.u32 %v16312_v22, %v11690_v20  ;;  %v16120_v15 = vld [vmem:[#allocation2 + $0x1f4] sm:$0xf0]  ;;  %v10924_v22 = vld [vmem:[#allocation2 + $0x1f8] sm:$0xf0] }
  0xee   :  { %2029 = vmatpush.bf16.msra.mxu1 %v11491_v19  ;;  %2055 = vmatpush.bf16.msra.mxu3 %v11495_v27  ;;  %v16184_v19 = vld [vmem:[#allocation2 + $0x3f4] sm:$0xf0]  ;;  %v10727_v27 = vor.u32 %v16063_v11, %v10724_v14 }
  0xef   :  { %v11179_v31 = vor.u32 %v16184_v19, %v11178_v18  ;;  %v10922_v11 = vld [vmem:[#allocation2 + $0x1b8] sm:$0xf] }
  0xf0   :  { %2017 = vmatpush.bf16.msra.mxu0 %v10915_v36  ;;  %2043 = vmatpush.bf16.msra.mxu2 %v10919_v38  ;;  %v11183_v36 = vor.u32 %v16176_v23, %v11180_v24  ;;  %v16168_v38 = vld [vmem:[#allocation2 + $0x374] sm:$0xf0]  ;;  %v394_v23 = vperm.slane %v17707_v51, 5  ;;  %v16240_v24 = vld [vmem:[#allocation2 + $0x5bc] sm:$0xf]  ;;  %v10923_v28 = vor.u32 %v16120_v15, %v10922_v11 }
  0xf1   :  { %v11434_v16 = vld [vmem:[#allocation2 + $0x5b8] sm:$0xf]  ;;  %v11244_v11 = vld [vmem:[#allocation2 + $0x478] sm:$0xf0]  ;;  %v12178_v15 = vld [vmem:[#allocation7 + $0x3c0] sm:$0xf] }
  0xf2   :  { %2030 = vmatpush.bf16.msra.mxu1 %v11427_v37  ;;  %2056 = vmatpush.bf16.msra.mxu3 %v11431_v43  ;;  %v11114_v37 = vld [vmem:[#allocation2 + $0x338] sm:$0xf]  ;;  %v11116_v43 = vld [vmem:[#allocation2 + $0x378] sm:$0xf0] }
  0xf3   :  { %v11115_v46 = vor.u32 %v16168_v38, %v11114_v37  ;;  %v11119_v48 = vor.u32 %v16160_v42, %v11116_v43  ;;  %v16248_v17 = vld [vmem:[#allocation2 + $0x5f4] sm:$0xf0]  ;;  %v16224_v43 = vld [vmem:[#allocation2 + $0x53c] sm:$0xf] }
  0xf4   :  { %2018 = vmatpush.bf16.msra.mxu0 %v10851_v53  ;;  %2044 = vmatpush.bf16.msra.mxu2 %v10855_v57  ;;  %v11562_v53 = vld [vmem:[#allocation2 + $0x6b8] sm:$0xf]  ;;  %v16144_v57 = vld [vmem:[#allocation2 + $0x2bc] sm:$0xf]  ;;  %v11435_v29 = vor.u32 %v16248_v17, %v11434_v16  ;;  %v16437_v17 = vld [vmem:[#allocation7 + $0x3dc] sm:$0xf0] }
  0xf5   :  { %v11055_v0 = vor.u32 %v16144_v57, %v11052_v58  ;;  %v11375_v57 = vor.u32 %v16224_v43, %v11372_v44  ;;  %v16216_v58 = vld [vmem:[#allocation2 + $0x4f4] sm:$0xf0]  ;;  %v11858_v44 = vld [vmem:[#allocation7 + $0x140] sm:$0xf] }
  0xf6   :  { %2031 = vmatpush.bf16.msra.mxu1 %v11363_v56  ;;  %2057 = vmatpush.bf16.msra.mxu3 %v11367_v62  ;;  %v16280_v56 = vld [vmem:[#allocation2 + $0x6f4] sm:$0xf0] }
  0xf7   :  { %v10986_v62 = vld [vmem:[#allocation2 + $0x238] sm:$0xf]  ;;  %v11563_v63 = vor.u32 %v16280_v56, %v11562_v53 }
  0xf8   :  { %2019 = vmatpush.bf16.msra.mxu0 %v10787_v4  ;;  %2045 = vmatpush.bf16.msra.mxu2 %v10791_v8  ;;  %v11567_v4 = vor.u32 %v16272_v59, %v11564_v60  ;;  %v16256_v8 = vld [vmem:[#allocation2 + $0x63c] sm:$0xf]  ;;  %v10987_v10 = vor.u32 %v16136_v1, %v10986_v62  ;;  %v16088_v53 = vld [vmem:[#allocation2 + $0xf4] sm:$0xf0] }
  0xf9   :  { %v11503_v20 = vor.u32 %v16256_v8, %v11500_v9  ;;  %v16080_v59 = vld [vmem:[#allocation2 + $0xbc] sm:$0xf]  ;;  %v16072_v1 = vld [vmem:[#allocation2 + $0x74] sm:$0xf0] }
  0xfa   :  { %2032 = vmatpush.bf16.msra.mxu1 %v11299_v7  ;;  %2058 = vmatpush.bf16.msra.mxu3 %v11303_v13  ;;  %v10988_v7 = vld [vmem:[#allocation2 + $0x278] sm:$0xf0]  ;;  %v11499_v13 = vor.u32 %v16264_v5, %v11498_v2  ;;  %v16200_v5 = vld [vmem:[#allocation2 + $0x474] sm:$0xf0] }
  0xfb   :  { %v10991_v14 = vor.u32 %v16128_v6, %v10988_v7  ;;  %v10796_v60 = vld [vmem:[#allocation2 + $0xf8] sm:$0xf0] }
  0xfc   :  { %2020 = vmatpush.bf16.msra.mxu0 %v10723_v21  ;;  %2046 = vmatpush.bf16.msra.mxu2 %v10727_v27  ;;  %v1814_v12 = vpop.f32.mrf.mxu0  ;;  %v16112_v21 = vld [vmem:[#allocation2 + $0x1bc] sm:$0xf] }
  0xfd   :  { %v1815_v18 = vadd.f32 %v1814_v12, %v393_v3  ;;  %v11308_v62 = vld [vmem:[#allocation2 + $0x4f8] sm:$0xf0]  ;;  %v10799_v3 = vor.u32 %v16080_v59, %v10796_v60  ;;  %v11826_v60 = vld [vmem:[#allocation7 + $0x100] sm:$0xf] }
  0xfe   :  { %2033 = vmatpush.bf16.msra.mxu1 %v11235_v25  ;;  %2059 = vmatpush.bf16.msra.mxu3 %v11239_v30  ;;  %v1827_v19 = vpop.f32.mrf.mxu1  ;;  %v11436_v25 = vld [vmem:[#allocation2 + $0x5f8] sm:$0xf0]  ;;  %v10927_v30 = vor.u32 %v16112_v21, %v10924_v22  ;;  %v12690_v22 = vld [vmem:[#allocation7 + $0x7c0] sm:$0xf] }
  0xff   :  { %2047 = vmatmul.bf16.vlgmr.msra.gmra.mxu2 %v17683_v33  ;;  %2021 = vmatmul.bf16.vlgmr.msra.gmra.mxu0 %v17683_v33  ;;  %v17731_v27 = vadd.f32 %v1827_v19, %v1815_v18  ;;  %v11439_v38 = vor.u32 %v16240_v24, %v11436_v25  ;;  %v16064_v6 = vld [vmem:[#allocation2 + $0x3c] sm:$0xf]  ;;  %v12434_v18 = vld [vmem:[#allocation7 + $0x5c0] sm:$0xf] }
 0x100   :  { %2065 = vmatpush.bf16.msrb.mxu0 %v11179_v31  ;;  %2091 = vmatpush.bf16.msrb.mxu2 %v11183_v36  ;;  %v10858_v31 = vld [vmem:[#allocation2 + $0x138] sm:$0xf]  ;;  %v10732_v9 = vld [vmem:[#allocation2 + $0x78] sm:$0xf0]  ;;  %v16501_v19 = vld [vmem:[#allocation7 + $0x5dc] sm:$0xf0] }
 0x101   :  { %2060 = vmatmul.bf16.vlgmr.msra.gmra.mxu3 %v17685_v34  ;;  %2034 = vmatmul.bf16.vlgmr.msra.gmra.mxu1 %v17685_v34  ;;  %v11370_v36 = vld [vmem:[#allocation2 + $0x538] sm:$0xf]  ;;  %v10735_v21 = vor.u32 %v16064_v6, %v10732_v9  ;;  %v12050_v9 = vld [vmem:[#allocation7 + $0x2c0] sm:$0xf] }
 0x102   :  { %2078 = vmatpush.bf16.msrb.mxu1 %v11691_v32  ;;  %2104 = vmatpush.bf16.msrb.mxu3 %v11695_v40  ;;  %v16104_v32 = vld [vmem:[#allocation2 + $0x174] sm:$0xf0]  ;;  %v1840_v37 = vpop.f32.mrf.mxu2  ;;  %v16096_v40 = vld [vmem:[#allocation2 + $0x13c] sm:$0xf] }
 0x103   :  { %v1841_v51 = vadd.f32 %v1840_v37, %v394_v23  ;;  %v10859_v45 = vor.u32 %v16104_v32, %v10858_v31  ;;  %v10863_v49 = vor.u32 %v16096_v40, %v10860_v41  ;;  %v16565_v23 = vld [vmem:[#allocation7 + $0x7dc] sm:$0xf0] }
 0x104   :  { %2066 = vmatpush.bf16.msrb.mxu0 %v11115_v46  ;;  %2092 = vmatpush.bf16.msrb.mxu2 %v11119_v48  ;;  %v1853_v42 = vpop.f32.mrf.mxu3  ;;  %v11371_v48 = vor.u32 %v16232_v39, %v11370_v36  ;;  %v16365_v31 = vld [vmem:[#allocation7 + $0x19c] sm:$0xf0]  ;;  %v12691_v36 = vor.u32 %v16565_v23, %v12690_v22 }
 0x105   :  { %v17733_v46 = vadd.f32 %v1853_v42, %v1841_v51  ;;  %v12146_v32 = vld [vmem:[#allocation7 + $0x380] sm:$0xf] }
 0x106   :  { %2079 = vmatpush.bf16.msrb.mxu1 %v11627_v47  ;;  %2105 = vmatpush.bf16.msrb.mxu3 %v11631_v55  ;;  %v1816_v47 = vpop.f32.mrf.mxu0  ;;  %v11306_v55 = vld [vmem:[#allocation2 + $0x4b8] sm:$0xf]  ;;  %v1829_v56 = vpop.f32.mrf.mxu1  ;;  %v16429_v37 = vld [vmem:[#allocation7 + $0x39c] sm:$0xf0] }
 0x107   :  { %v11307_v2 = vor.u32 %v16216_v58, %v11306_v55  ;;  %v16493_v39 = vld [vmem:[#allocation7 + $0x59c] sm:$0xf0]  ;;  %v12147_v42 = vor.u32 %v16429_v37, %v12146_v32 }
 0x108   :  { %2067 = vmatpush.bf16.msrb.mxu0 %v11051_v61  ;;  %2093 = vmatpush.bf16.msrb.mxu2 %v11055_v0  ;;  %v16208_v61 = vld [vmem:[#allocation2 + $0x4bc] sm:$0xf]  ;;  %v10730_v0 = vld [vmem:[#allocation2 + $0x38] sm:$0xf]  ;;  %v12658_v40 = vld [vmem:[#allocation7 + $0x780] sm:$0xf] }
 0x109   :  { %v11311_v8 = vor.u32 %v16208_v61, %v11308_v62  ;;  %v10731_v16 = vor.u32 %v16072_v1, %v10730_v0  ;;  %v16557_v41 = vld [vmem:[#allocation7 + $0x79c] sm:$0xf0] }
 0x10a   :  { %2080 = vmatpush.bf16.msrb.mxu1 %v11563_v63  ;;  %2106 = vmatpush.bf16.msrb.mxu3 %v11567_v4  ;;  %v10795_v63 = vor.u32 %v16088_v53, %v10794_v52  ;;  %v11242_v4 = vld [vmem:[#allocation2 + $0x438] sm:$0xf]  ;;  %v1842_v7 = vpop.f32.mrf.mxu2  ;;  %v12114_v47 = vld [vmem:[#allocation7 + $0x340] sm:$0xf] }
 0x10b   :  { %v12370_v52 = vld [vmem:[#allocation7 + $0x540] sm:$0xf] }
 0x10c   :  { %2068 = vmatpush.bf16.msrb.mxu0 %v10987_v10  ;;  %2094 = vmatpush.bf16.msrb.mxu2 %v10991_v14  ;;  %v16192_v10 = vld [vmem:[#allocation2 + $0x43c] sm:$0xf]  ;;  %v1855_v12 = vpop.f32.mrf.mxu3  ;;  %v16373_v14 = vld [vmem:[#allocation7 + $0x1dc] sm:$0xf0] }
 0x10d   :  { %v11247_v24 = vor.u32 %v16192_v10, %v11244_v11  ;;  %v16485_v53 = vld [vmem:[#allocation7 + $0x55c] sm:$0xf0] }
 0x10e   :  { %2081 = vmatpush.bf16.msrb.mxu1 %v11499_v13  ;;  %2107 = vmatpush.bf16.msrb.mxu3 %v11503_v20  ;;  %v11922_v13 = vld [vmem:[#allocation7 + $0x1c0] sm:$0xf]  ;;  %v11243_v20 = vor.u32 %v16200_v5, %v11242_v4  ;;  %v12371_v59 = vor.u32 %v16485_v53, %v12370_v52 }
 0x10f   :  { %v11923_v25 = vor.u32 %v16373_v14, %v11922_v13  ;;  %v12626_v55 = vld [vmem:[#allocation7 + $0x740] sm:$0xf] }
 0x110   :  { %2069 = vmatpush.bf16.msrb.mxu0 %v10923_v28  ;;  %2095 = vmatpush.bf16.msrb.mxu2 %v10927_v30  ;;  %v12179_v28 = vor.u32 %v16437_v17, %v12178_v15  ;;  %v11890_v30 = vld [vmem:[#allocation7 + $0x180] sm:$0xf] }
 0x111   :  { %v11891_v51 = vor.u32 %v16365_v31, %v11890_v30  ;;  %v16549_v56 = vld [vmem:[#allocation7 + $0x75c] sm:$0xf0] }
 0x112   :  { %2082 = vmatpush.bf16.msrb.mxu1 %v11435_v29  ;;  %2108 = vmatpush.bf16.msrb.mxu3 %v11439_v38  ;;  %v12435_v29 = vor.u32 %v16501_v19, %v12434_v18  ;;  %v12402_v38 = vld [vmem:[#allocation7 + $0x580] sm:$0xf] }
 0x113   :  { %v12403_v43 = vor.u32 %v16493_v39, %v12402_v38  ;;  %v16349_v61 = vld [vmem:[#allocation7 + $0x11c] sm:$0xf0] }
 0x114   :  { %2070 = vmatpush.bf16.msrb.mxu0 %v10859_v45  ;;  %2096 = vmatpush.bf16.msrb.mxu2 %v10863_v49  ;;  %v16357_v45 = vld [vmem:[#allocation7 + $0x15c] sm:$0xf0]  ;;  %v11827_v4 = vor.u32 %v16349_v61, %v11826_v60 }
 0x115   :  { %v16421_v49 = vld [vmem:[#allocation7 + $0x35c] sm:$0xf0] }
 0x116   :  { %2083 = vmatpush.bf16.msrb.mxu1 %v11371_v48  ;;  %2109 = vmatpush.bf16.msrb.mxu3 %v11375_v57  ;;  %v12659_v48 = vor.u32 %v16557_v41, %v12658_v40  ;;  %v11859_v57 = vor.u32 %v16357_v45, %v11858_v44  ;;  %v12115_v58 = vor.u32 %v16421_v49, %v12114_v47  ;;  %v12082_v62 = vld [vmem:[#allocation7 + $0x300] sm:$0xf] }
 0x117   :  { %v16413_v0 = vld [vmem:[#allocation7 + $0x31c] sm:$0xf0] }
 0x118   :  { %2071 = vmatpush.bf16.msrb.mxu0 %v10795_v63  ;;  %2097 = vmatpush.bf16.msrb.mxu2 %v10799_v3  ;;  %v12627_v63 = vor.u32 %v16549_v56, %v12626_v55  ;;  %v12338_v1 = vld [vmem:[#allocation7 + $0x500] sm:$0xf] }
 0x119   :  { %v16541_v3 = vld [vmem:[#allocation7 + $0x71c] sm:$0xf0] }
 0x11a   :  { %2084 = vmatpush.bf16.msrb.mxu1 %v11307_v2  ;;  %2110 = vmatpush.bf16.msrb.mxu3 %v11311_v8  ;;  %v12594_v2 = vld [vmem:[#allocation7 + $0x700] sm:$0xf] }
 0x11b   :  { %v11794_v7 = vld [vmem:[#allocation7 + $0xc0] sm:$0xf]  ;;  %v12595_v11 = vor.u32 %v16541_v3, %v12594_v2 }
 0x11c   :  { %2072 = vmatpush.bf16.msrb.mxu0 %v10731_v16  ;;  %2098 = vmatpush.bf16.msrb.mxu2 %v10735_v21  ;;  %v17739_v5 = vpop.f32.mrf.mxu0  ;;  %v16341_v8 = vld [vmem:[#allocation7 + $0xdc] sm:$0xf0] }
 0x11d   :  { %v16405_v12 = vld [vmem:[#allocation7 + $0x2dc] sm:$0xf0]  ;;  %v11795_v17 = vor.u32 %v16341_v8, %v11794_v7 }
 0x11e   :  { %2085 = vmatpush.bf16.msrb.mxu1 %v11243_v20  ;;  %2111 = vmatpush.bf16.msrb.mxu3 %v11247_v24  ;;  %v17741_v10 = vpop.f32.mrf.mxu1  ;;  %v12306_v13 = vld [vmem:[#allocation7 + $0x4c0] sm:$0xf]  ;;  %v12051_v18 = vor.u32 %v16405_v12, %v12050_v9  ;;  %v2117_v9 = vmax.f32 %v17711_v26, 0.0 }
 0x11f   :  { %2073 = vmatmul.bf16.vlgmr.msrb.gmra.mxu0 %v17683_v33  ;;  %2099 = vmatmul.bf16.vlgmr.msrb.gmra.mxu2 %v17683_v33  ;;  %v16477_v33 = vld [vmem:[#allocation7 + $0x51c] sm:$0xf0] }
 0x120   :  { %8311 = vmatpush.bf16.msra.mxu0 %v11923_v25  ;;  %8337 = vmatpush.bf16.msra.mxu2 %v12435_v29  ;;  %v12339_v6 = vor.u32 %v16477_v33, %v12338_v1  ;;  %v16469_v14 = vld [vmem:[#allocation7 + $0x4dc] sm:$0xf0] }
 0x121   :  { %2112 = vmatmul.bf16.vlgmr.msrb.gmra.mxu3 %v17685_v34  ;;  %2086 = vmatmul.bf16.vlgmr.msrb.gmra.mxu1 %v17685_v34  ;;  %v12083_v34 = vor.u32 %v16413_v0, %v12082_v62  ;;  %v12562_v15 = vld [vmem:[#allocation7 + $0x6c0] sm:$0xf]  ;;  %v12307_v19 = vor.u32 %v16469_v14, %v12306_v13 }
 0x122   :  { %8324 = vmatpush.bf16.msra.mxu1 %v12179_v28  ;;  %8350 = vmatpush.bf16.msra.mxu3 %v12691_v36  ;;  %v16533_v16 = vld [vmem:[#allocation7 + $0x6dc] sm:$0xf0]  ;;  %v17743_v23 = vpop.f32.mrf.mxu2 }
 0x123   :  { %v11762_v20 = vld [vmem:[#allocation7 + $0x80] sm:$0xf]  ;;  %v12563_v24 = vor.u32 %v16533_v16, %v12562_v15  ;;  %v2119_v16 = vmax.f32 %v17721_v35, 0.0  ;;  %v17751_v35 = vpack.c.bf16 %v2117_v9, %v2117_v9 }
 0x124   :  { %8312 = vmatpush.bf16.msra.mxu0 %v11891_v51  ;;  %8338 = vmatpush.bf16.msra.mxu2 %v12403_v43  ;;  %v16333_v21 = vld [vmem:[#allocation7 + $0x9c] sm:$0xf0]  ;;  %v17745_v30 = vpop.f32.mrf.mxu3  ;;  %v1868_v37 = vpop.f32.mrf.mxu0 }
 0x125   :  { %v12018_v22 = vld [vmem:[#allocation7 + $0x280] sm:$0xf]  ;;  %v11763_v36 = vor.u32 %v16333_v21, %v11762_v20  ;;  %v17755_v37 = vpack.c.bf16 %v2119_v16, %v2119_v16 }
 0x126   :  { %8325 = vmatpush.bf16.msra.mxu1 %v12147_v42  ;;  %8351 = vmatpush.bf16.msra.mxu3 %v12659_v48  ;;  %v16397_v25 = vld [vmem:[#allocation7 + $0x29c] sm:$0xf0]  ;;  %v1881_v42 = vpop.f32.mrf.mxu1 }
 0x127   :  { %v12274_v28 = vld [vmem:[#allocation7 + $0x480] sm:$0xf]  ;;  %v12019_v38 = vor.u32 %v16397_v25, %v12018_v22 }
 0x128   :  { %8313 = vmatpush.bf16.msra.mxu0 %v11859_v57  ;;  %8339 = vmatpush.bf16.msra.mxu2 %v12371_v59  ;;  %v16461_v29 = vld [vmem:[#allocation7 + $0x49c] sm:$0xf0] }
 0x129   :  { %v12530_v31 = vld [vmem:[#allocation7 + $0x680] sm:$0xf]  ;;  %v12275_v39 = vor.u32 %v16461_v29, %v12274_v28 }
 0x12a   :  { %8326 = vmatpush.bf16.msra.mxu1 %v12115_v58  ;;  %8352 = vmatpush.bf16.msra.mxu3 %v12627_v63  ;;  %v16525_v32 = vld [vmem:[#allocation7 + $0x69c] sm:$0xf0]  ;;  %v1894_v61 = vpop.f32.mrf.mxu2 }
 0x12b   :  { %v11730_v40 = vld [vmem:[#allocation7 + $0x40] sm:$0xf]  ;;  %v12531_v43 = vor.u32 %v16525_v32, %v12530_v31 }
 0x12c   :  { %8314 = vmatpush.bf16.msra.mxu0 %v11827_v4  ;;  %8340 = vmatpush.bf16.msra.mxu2 %v12339_v6  ;;  %v16325_v41 = vld [vmem:[#allocation7 + $0x5c] sm:$0xf0]  ;;  %v1907_v33 = vpop.f32.mrf.mxu3 }
 0x12d   :  { %v11986_v51 = vld [vmem:[#allocation7 + $0x240] sm:$0xf]  ;;  %v11731_v52 = vor.u32 %v16325_v41, %v11730_v40 }
 0x12e   :  { %8327 = vmatpush.bf16.msra.mxu1 %v12083_v34  ;;  %8353 = vmatpush.bf16.msra.mxu3 %v12595_v11  ;;  %v16389_v44 = vld [vmem:[#allocation7 + $0x25c] sm:$0xf0]  ;;  %v2118_v11 = vmax.f32 %v17713_v50, 0.0 }
 0x12f   :  { %v12242_v45 = vld [vmem:[#allocation7 + $0x440] sm:$0xf]  ;;  %v11987_v56 = vor.u32 %v16389_v44, %v11986_v51 }
 0x130   :  { %8315 = vmatpush.bf16.msra.mxu0 %v11795_v17  ;;  %8341 = vmatpush.bf16.msra.mxu2 %v12307_v19  ;;  %v16453_v47 = vld [vmem:[#allocation7 + $0x45c] sm:$0xf0]  ;;  %v2120_v17 = vmax.f32 %v17723_v54, 0.0  ;;  %v17753_v54 = vpack.c.bf16 %v2118_v11, %v2118_v11 }
 0x131   :  { %v12498_v48 = vld [vmem:[#allocation7 + $0x640] sm:$0xf]  ;;  %v12243_v57 = vor.u32 %v16453_v47, %v12242_v45 }
 0x132   :  { %8328 = vmatpush.bf16.msra.mxu1 %v12051_v18  ;;  %8354 = vmatpush.bf16.msra.mxu3 %v12563_v24  ;;  %v16517_v49 = vld [vmem:[#allocation7 + $0x65c] sm:$0xf0]  ;;  %v17757_v42 = vpack.c.bf16 %v2120_v17, %v2120_v17 }
 0x133   :  { %v11698_v53 = vld [vmem:[#allocation7] sm:$0xf]  ;;  %v12499_v62 = vor.u32 %v16517_v49, %v12498_v48 }
 0x134   :  { %8316 = vmatpush.bf16.msra.mxu0 %v11763_v36  ;;  %v16317_v55 = vld [vmem:[#allocation7 + $0x1c] sm:$0xf0]  ;;  %8342 = vmatpush.bf16.msra.mxu2 %v12275_v39 }
 0x135   :  { %v11954_v58 = vld [vmem:[#allocation7 + $0x200] sm:$0xf]  ;;  %v11699_v34 = vor.u32 %v16317_v55, %v11698_v53 }
 0x136   :  { %8329 = vmatpush.bf16.msra.mxu1 %v12019_v38  ;;  %v16381_v59 = vld [vmem:[#allocation7 + $0x21c] sm:$0xf0]  ;;  %8355 = vmatpush.bf16.msra.mxu3 %v12531_v43 }
 0x137   :  { %v12210_v60 = vld [vmem:[#allocation7 + $0x400] sm:$0xf]  ;;  %v11955_v12 = vor.u32 %v16381_v59, %v11954_v58 }
 0x138   :  { %v16445_v63 = vld [vmem:[#allocation7 + $0x41c] sm:$0xf0]  ;;  %8317 = vmatpush.bf16.msra.mxu0 %v11731_v52  ;;  %8343 = vmatpush.bf16.msra.mxu2 %v12243_v57 }
 0x139   :  { %v12466_v0 = vld [vmem:[#allocation7 + $0x600] sm:$0xf]  ;;  %v12211_v13 = vor.u32 %v16445_v63, %v12210_v60 }
 0x13a   :  { %v16509_v1 = vld [vmem:[#allocation7 + $0x61c] sm:$0xf0]  ;;  %8330 = vmatpush.bf16.msra.mxu1 %v11987_v56  ;;  %8356 = vmatpush.bf16.msra.mxu3 %v12499_v62 }
 0x13b   :  { %v12946_v2 = vld [vmem:[#allocation7 + $0x9c0] sm:$0xf]  ;;  %v12467_v18 = vor.u32 %v16509_v1, %v12466_v0 }
 0x13c   :  { %v16629_v3 = vld [vmem:[#allocation7 + $0x9dc] sm:$0xf0]  ;;  %8318 = vmatpush.bf16.msra.mxu0 %v11699_v34  ;;  %8344 = vmatpush.bf16.msra.mxu2 %v12211_v13  ;;  %v17763_v33 = vpop.f32.mrf.mxu0 }
 0x13d   :  { %v13202_v4 = vld [vmem:[#allocation7 + $0xbc0] sm:$0xf]  ;;  %v12947_v19 = vor.u32 %v16629_v3, %v12946_v2 }
 0x13e   :  { %v16693_v6 = vld [vmem:[#allocation7 + $0xbdc] sm:$0xf0]  ;;  %8331 = vmatpush.bf16.msra.mxu1 %v11955_v12  ;;  %8357 = vmatpush.bf16.msra.mxu3 %v12467_v18 }
 0x13f   :  { %v13458_v7 = vld [vmem:[#allocation7 + $0xdc0] sm:$0xf]  ;;  %v13203_v20 = vor.u32 %v16693_v6, %v13202_v4  ;;  %8319 = vmatmul.bf16.vlgmr.msra.gmra.mxu0 %v17751_v35  ;;  %8345 = vmatmul.bf16.vlgmr.msra.gmra.mxu2 %v17755_v37 }
 0x140   :  { %v16757_v8 = vld [vmem:[#allocation7 + $0xddc] sm:$0xf0]  ;;  %8363 = vmatpush.bf16.msrb.mxu0 %v12947_v19 }
 0x141   :  { %v13714_v14 = vld [vmem:[#allocation7 + $0xfc0] sm:$0xf]  ;;  %v13459_v21 = vor.u32 %v16757_v8, %v13458_v7  ;;  %8332 = vmatmul.bf16.vlgmr.msra.gmra.mxu1 %v17753_v54  ;;  %8358 = vmatmul.bf16.vlgmr.msra.gmra.mxu3 %v17757_v42  ;;  %v17765_v7 = vpop.f32.mrf.mxu1 }
 0x142   :  { %v16821_v15 = vld [vmem:[#allocation7 + $0xfdc] sm:$0xf0]  ;;  %8376 = vmatpush.bf16.msrb.mxu1 %v13203_v20 }
 0x143   :  { %v12914_v22 = vld [vmem:[#allocation7 + $0x980] sm:$0xf]  ;;  %v13715_v50 = vor.u32 %v16821_v15, %v13714_v14  ;;  %8389 = vmatpush.bf16.msrb.mxu2 %v13459_v21  ;;  %v17416_v15 = vld [vmem:[#allocation5] sm:$0xff] }
 0x144   :  { %v16621_v24 = vld [vmem:[#allocation7 + $0x99c] sm:$0xf0]  ;;  %v395_v16 = vperm.slane %v17416_v15, 6  ;;  %v396_v17 = vperm.slane %v17416_v15, 7 }
 0x145   :  { %v13170_v26 = vld [vmem:[#allocation7 + $0xb80] sm:$0xf]  ;;  %v12915_v36 = vor.u32 %v16621_v24, %v12914_v22  ;;  %8402 = vmatpush.bf16.msrb.mxu3 %v13715_v50 }
 0x146   :  { %v16685_v25 = vld [vmem:[#allocation7 + $0xb9c] sm:$0xf0] }
 0x147   :  { %v13426_v28 = vld [vmem:[#allocation7 + $0xd80] sm:$0xf]  ;;  %v13171_v38 = vor.u32 %v16685_v25, %v13170_v26  ;;  %8364 = vmatpush.bf16.msrb.mxu0 %v12915_v36  ;;  %v17767_v26 = vpop.f32.mrf.mxu2 }
 0x148   :  { %v16749_v29 = vld [vmem:[#allocation7 + $0xd9c] sm:$0xf0] }
 0x149   :  { %v13682_v31 = vld [vmem:[#allocation7 + $0xf80] sm:$0xf]  ;;  %v13427_v39 = vor.u32 %v16749_v29, %v13426_v28  ;;  %8377 = vmatpush.bf16.msrb.mxu1 %v13171_v38 }
 0x14a   :  { %v16813_v32 = vld [vmem:[#allocation7 + $0xf9c] sm:$0xf0] }
 0x14b   :  { %v12882_v40 = vld [vmem:[#allocation7 + $0x940] sm:$0xf]  ;;  %v13683_v43 = vor.u32 %v16813_v32, %v13682_v31  ;;  %8390 = vmatpush.bf16.msrb.mxu2 %v13427_v39  ;;  %v17769_v31 = vpop.f32.mrf.mxu3  ;;  %v1920_v39 = vpop.f32.mrf.mxu0 }
 0x14c   :  { %v16613_v41 = vld [vmem:[#allocation7 + $0x95c] sm:$0xf0] }
 0x14d   :  { %v13138_v51 = vld [vmem:[#allocation7 + $0xb40] sm:$0xf]  ;;  %v12883_v52 = vor.u32 %v16613_v41, %v12882_v40  ;;  %8403 = vmatpush.bf16.msrb.mxu3 %v13683_v43 }
 0x14e   :  { %v16677_v44 = vld [vmem:[#allocation7 + $0xb5c] sm:$0xf0] }
 0x14f   :  { %v13394_v45 = vld [vmem:[#allocation7 + $0xd40] sm:$0xf]  ;;  %v13139_v53 = vor.u32 %v16677_v44, %v13138_v51  ;;  %8365 = vmatpush.bf16.msrb.mxu0 %v12883_v52 }
 0x150   :  { %v16741_v47 = vld [vmem:[#allocation7 + $0xd5c] sm:$0xf0] }
 0x151   :  { %v13650_v48 = vld [vmem:[#allocation7 + $0xf40] sm:$0xf]  ;;  %v13395_v55 = vor.u32 %v16741_v47, %v13394_v45  ;;  %8378 = vmatpush.bf16.msrb.mxu1 %v13139_v53  ;;  %v1933_v45 = vpop.f32.mrf.mxu1  ;;  %v1867_v47 = vadd.f32 %v17739_v5, %v395_v16 }
 0x152   :  { %v16805_v49 = vld [vmem:[#allocation7 + $0xf5c] sm:$0xf0] }
 0x153   :  { %v12850_v56 = vld [vmem:[#allocation7 + $0x900] sm:$0xf]  ;;  %v13651_v59 = vor.u32 %v16805_v49, %v13650_v48  ;;  %8391 = vmatpush.bf16.msrb.mxu2 %v13395_v55  ;;  %v1893_v48 = vadd.f32 %v17743_v23, %v396_v17  ;;  %v1880_v23 = vadd.f32 %v17741_v10, %v1867_v47  ;;  %v2121_v17 = vmax.f32 %v17731_v27, 0.0 }
 0x154   :  { %v16605_v57 = vld [vmem:[#allocation7 + $0x91c] sm:$0xf0]  ;;  %v2122_v10 = vmax.f32 %v17733_v46, 0.0 }
 0x155   :  { %v13106_v58 = vld [vmem:[#allocation7 + $0xb00] sm:$0xf]  ;;  %v12851_v1 = vor.u32 %v16605_v57, %v12850_v56  ;;  %8404 = vmatpush.bf16.msrb.mxu3 %v13651_v59 }
 0x156   :  { %v16669_v60 = vld [vmem:[#allocation7 + $0xb1c] sm:$0xf0] }
 0x157   :  { %v13362_v61 = vld [vmem:[#allocation7 + $0xd00] sm:$0xf]  ;;  %v13107_v2 = vor.u32 %v16669_v60, %v13106_v58  ;;  %8366 = vmatpush.bf16.msrb.mxu0 %v12851_v1  ;;  %v1946_v1 = vpop.f32.mrf.mxu2 }
 0x158   :  { %v16733_v62 = vld [vmem:[#allocation7 + $0xd1c] sm:$0xf0] }
 0x159   :  { %v13618_v63 = vld [vmem:[#allocation7 + $0xf00] sm:$0xf]  ;;  %v13363_v3 = vor.u32 %v16733_v62, %v13362_v61  ;;  %8379 = vmatpush.bf16.msrb.mxu1 %v13107_v2  ;;  %v1906_v2 = vadd.f32 %v17745_v30, %v1893_v48 }
 0x15a   :  { %v16797_v0 = vld [vmem:[#allocation7 + $0xf1c] sm:$0xf0] }
 0x15b   :  { %v12818_v4 = vld [vmem:[#allocation7 + $0x8c0] sm:$0xf]  ;;  %v13619_v8 = vor.u32 %v16797_v0, %v13618_v63  ;;  %8392 = vmatpush.bf16.msrb.mxu2 %v13363_v3 }
 0x15c   :  { %v16597_v34 = vld [vmem:[#allocation7 + $0x8dc] sm:$0xf0] }
 0x15d   :  { %v13074_v6 = vld [vmem:[#allocation7 + $0xac0] sm:$0xf]  ;;  %v12819_v18 = vor.u32 %v16597_v34, %v12818_v4  ;;  %8405 = vmatpush.bf16.msrb.mxu3 %v13619_v8  ;;  %v1959_v8 = vpop.f32.mrf.mxu3 }
 0x15e   :  { %v16661_v9 = vld [vmem:[#allocation7 + $0xadc] sm:$0xf0] }
 0x15f   :  { %v13330_v11 = vld [vmem:[#allocation7 + $0xcc0] sm:$0xf]  ;;  %v13075_v19 = vor.u32 %v16661_v9, %v13074_v6  ;;  %8367 = vmatpush.bf16.msrb.mxu0 %v12819_v18 }
 0x160   :  { %v16725_v12 = vld [vmem:[#allocation7 + $0xcdc] sm:$0xf0] }
 0x161   :  { %v13586_v13 = vld [vmem:[#allocation7 + $0xec0] sm:$0xf]  ;;  %v13331_v20 = vor.u32 %v16725_v12, %v13330_v11  ;;  %8380 = vmatpush.bf16.msrb.mxu1 %v13075_v19 }
 0x162   :  { %v16789_v14 = vld [vmem:[#allocation7 + $0xedc] sm:$0xf0] }
 0x163   :  { %v12786_v21 = vld [vmem:[#allocation7 + $0x880] sm:$0xf]  ;;  %v13587_v50 = vor.u32 %v16789_v14, %v13586_v13  ;;  %8393 = vmatpush.bf16.msrb.mxu2 %v13331_v20 }
 0x164   :  { %v16589_v22 = vld [vmem:[#allocation7 + $0x89c] sm:$0xf0] }
 0x165   :  { %v13042_v24 = vld [vmem:[#allocation7 + $0xa80] sm:$0xf]  ;;  %v12787_v38 = vor.u32 %v16589_v22, %v12786_v21  ;;  %8406 = vmatpush.bf16.msrb.mxu3 %v13587_v50  ;;  %v2123_v21 = vmax.f32 %v1880_v23, 0.0  ;;  %v2124_v22 = vmax.f32 %v1906_v2, 0.0 }
 0x166   :  { %v16653_v25 = vld [vmem:[#allocation7 + $0xa9c] sm:$0xf0] }
 0x167   :  { %v13298_v28 = vld [vmem:[#allocation7 + $0xc80] sm:$0xf]  ;;  %v13043_v40 = vor.u32 %v16653_v25, %v13042_v24  ;;  %8368 = vmatpush.bf16.msrb.mxu0 %v12787_v38  ;;  %v17781_v45 = vpack.c.bf16 %v2123_v21, %v2123_v21 }
 0x168   :  { %v16717_v29 = vld [vmem:[#allocation7 + $0xc9c] sm:$0xf0] }
 0x169   :  { %v13554_v32 = vld [vmem:[#allocation7 + $0xe80] sm:$0xf]  ;;  %v13299_v41 = vor.u32 %v16717_v29, %v13298_v28  ;;  %8381 = vmatpush.bf16.msrb.mxu1 %v13043_v40 }
 0x16a   :  { %v16781_v36 = vld [vmem:[#allocation7 + $0xe9c] sm:$0xf0] }
 0x16b   :  { %v12754_v51 = vld [vmem:[#allocation7 + $0x840] sm:$0xf]  ;;  %v13555_v49 = vor.u32 %v16781_v36, %v13554_v32  ;;  %8394 = vmatpush.bf16.msrb.mxu2 %v13299_v41 }
 0x16c   :  { %v16581_v43 = vld [vmem:[#allocation7 + $0x85c] sm:$0xf0] }
 0x16d   :  { %v13010_v44 = vld [vmem:[#allocation7 + $0xa40] sm:$0xf]  ;;  %v12755_v58 = vor.u32 %v16581_v43, %v12754_v51  ;;  %8407 = vmatpush.bf16.msrb.mxu3 %v13555_v49  ;;  %v17777_v51 = vpack.c.bf16 %v2121_v17, %v2121_v17  ;;  %v17779_v43 = vpack.c.bf16 %v2122_v10, %v2122_v10  ;;  %v1983_v10 = vpop.f32.mrf.mxu1 }
 0x16e   :  { %v16645_v52 = vld [vmem:[#allocation7 + $0xa5c] sm:$0xf0] }
 0x16f   :  { %v13266_v53 = vld [vmem:[#allocation7 + $0xc40] sm:$0xf]  ;;  %v13011_v61 = vor.u32 %v16645_v52, %v13010_v44  ;;  %8369 = vmatpush.bf16.msrb.mxu0 %v12755_v58 }
 0x170   :  { %v16709_v55 = vld [vmem:[#allocation7 + $0xc5c] sm:$0xf0] }
 0x171   :  { %v13522_v56 = vld [vmem:[#allocation7 + $0xe40] sm:$0xf]  ;;  %v13267_v62 = vor.u32 %v16709_v55, %v13266_v53  ;;  %8382 = vmatpush.bf16.msrb.mxu1 %v13011_v61  ;;  %v17783_v55 = vpack.c.bf16 %v2124_v22, %v2124_v22 }
 0x172   :  { %v16773_v57 = vld [vmem:[#allocation7 + $0xe5c] sm:$0xf0] }
 0x173   :  { %v12722_v59 = vld [vmem:[#allocation7 + $0x800] sm:$0xf]  ;;  %v13523_v3 = vor.u32 %v16773_v57, %v13522_v56  ;;  %8395 = vmatpush.bf16.msrb.mxu2 %v13267_v62 }
 0x174   :  { %v16573_v60 = vld [vmem:[#allocation7 + $0x81c] sm:$0xf0] }
 0x175   :  { %v12978_v63 = vld [vmem:[#allocation7 + $0xa00] sm:$0xf]  ;;  %v12723_v13 = vor.u32 %v16573_v60, %v12722_v59  ;;  %8408 = vmatpush.bf16.msrb.mxu3 %v13523_v3 }
 0x176   :  { %v16637_v0 = vld [vmem:[#allocation7 + $0xa1c] sm:$0xf0] }
 0x177   :  { %v13234_v5 = vld [vmem:[#allocation7 + $0xc00] sm:$0xf]  ;;  %v12979_v30 = vor.u32 %v16637_v0, %v12978_v63  ;;  %8370 = vmatpush.bf16.msrb.mxu0 %v12723_v13 }
 0x178   :  { %v16701_v4 = vld [vmem:[#allocation7 + $0xc1c] sm:$0xf0] }
 0x179   :  { %v13490_v34 = vld [vmem:[#allocation7 + $0xe00] sm:$0xf]  ;;  %v13235_v18 = vor.u32 %v16701_v4, %v13234_v5  ;;  %8383 = vmatpush.bf16.msrb.mxu1 %v12979_v30 }
 0x17a   :  { %v16765_v6 = vld [vmem:[#allocation7 + $0xe1c] sm:$0xf0]  ;;  %8371 = vmatmul.bf16.vlgmr.msrb.gmra.mxu0 %v17777_v51 }
 0x17b   :  { %v13970_v9 = vld [vmem:[#allocation7 + $0x11c0] sm:$0xf]  ;;  %v13491_v24 = vor.u32 %v16765_v6, %v13490_v34  ;;  %8396 = vmatpush.bf16.msrb.mxu2 %v13235_v18 }
 0x17c   :  { %v16885_v11 = vld [vmem:[#allocation7 + $0x11dc] sm:$0xf0]  ;;  %8384 = vmatmul.bf16.vlgmr.msrb.gmra.mxu1 %v17779_v43 }
 0x17d   :  { %v14226_v12 = vld [vmem:[#allocation7 + $0x13c0] sm:$0xf]  ;;  %v13971_v50 = vor.u32 %v16885_v11, %v13970_v9  ;;  %8409 = vmatpush.bf16.msrb.mxu3 %v13491_v24  ;;  %v17789_v9 = vld [vmem:[#allocation5 + $0x8] sm:$0xff] }
 0x17e   :  { %v16949_v14 = vld [vmem:[#allocation7 + $0x13dc] sm:$0xf0]  ;;  %8397 = vmatmul.bf16.vlgmr.msrb.gmra.mxu2 %v17781_v45  ;;  %v397_v24 = vperm.slane %v17789_v9, 0 }
 0x17f   :  { %v14482_v15 = vld [vmem:[#allocation7 + $0x15c0] sm:$0xf]  ;;  %v14227_v25 = vor.u32 %v16949_v14, %v14226_v12  ;;  %8415 = vmatpush.bf16.msra.mxu0 %v13971_v50  ;;  %v1970_v12 = vpop.f32.mrf.mxu0 }
 0x180   :  { %v17013_v16 = vld [vmem:[#allocation7 + $0x15dc] sm:$0xf0]  ;;  %8410 = vmatmul.bf16.vlgmr.msrb.gmra.mxu3 %v17783_v55 }
 0x181   :  { %v14738_v19 = vld [vmem:[#allocation7 + $0x17c0] sm:$0xf]  ;;  %v14483_v28 = vor.u32 %v17013_v16, %v14482_v15  ;;  %8428 = vmatpush.bf16.msra.mxu1 %v14227_v25 }
 0x182   :  { %v17077_v20 = vld [vmem:[#allocation7 + $0x17dc] sm:$0xf0] }
 0x183   :  { %v13938_v29 = vld [vmem:[#allocation7 + $0x1180] sm:$0xf]  ;;  %v14739_v27 = vor.u32 %v17077_v20, %v14738_v19  ;;  %8441 = vmatpush.bf16.msra.mxu2 %v14483_v28 }
 0x184   :  { %v16877_v32 = vld [vmem:[#allocation7 + $0x119c] sm:$0xf0] }
 0x185   :  { %v14194_v36 = vld [vmem:[#allocation7 + $0x1380] sm:$0xf]  ;;  %v13939_v44 = vor.u32 %v16877_v32, %v13938_v29  ;;  %8454 = vmatpush.bf16.msra.mxu3 %v14739_v27 }
 0x186   :  { %v16941_v38 = vld [vmem:[#allocation7 + $0x139c] sm:$0xf0] }
 0x187   :  { %v14450_v46 = vld [vmem:[#allocation7 + $0x1580] sm:$0xf]  ;;  %v14195_v47 = vor.u32 %v16941_v38, %v14194_v36  ;;  %8416 = vmatpush.bf16.msra.mxu0 %v13939_v44  ;;  %v399_v38 = vperm.slane %v17789_v9, 2 }
 0x188   :  { %v17005_v39 = vld [vmem:[#allocation7 + $0x159c] sm:$0xf0] }
 0x189   :  { %v14706_v40 = vld [vmem:[#allocation7 + $0x1780] sm:$0xf]  ;;  %v14451_v48 = vor.u32 %v17005_v39, %v14450_v46  ;;  %8429 = vmatpush.bf16.msra.mxu1 %v14195_v47  ;;  %v1996_v46 = vpop.f32.mrf.mxu2  ;;  %v398_v39 = vperm.slane %v17789_v9, 1  ;;  %v400_v47 = vperm.slane %v17789_v9, 3 }
 0x18a   :  { %v17069_v41 = vld [vmem:[#allocation7 + $0x179c] sm:$0xf0] }
 0x18b   :  { %v13906_v49 = vld [vmem:[#allocation7 + $0x1140] sm:$0xf]  ;;  %v14707_v56 = vor.u32 %v17069_v41, %v14706_v40  ;;  %8442 = vmatpush.bf16.msra.mxu2 %v14451_v48  ;;  %v2009_v48 = vpop.f32.mrf.mxu3 }
 0x18c   :  { %v16869_v52 = vld [vmem:[#allocation7 + $0x115c] sm:$0xf0] }
 0x18d   :  { %v14162_v53 = vld [vmem:[#allocation7 + $0x1340] sm:$0xf]  ;;  %v13907_v62 = vor.u32 %v16869_v52, %v13906_v49  ;;  %8455 = vmatpush.bf16.msra.mxu3 %v14707_v56 }
 0x18e   :  { %v16933_v57 = vld [vmem:[#allocation7 + $0x135c] sm:$0xf0] }
 0x18f   :  { %v14418_v58 = vld [vmem:[#allocation7 + $0x1540] sm:$0xf]  ;;  %v14163_v63 = vor.u32 %v16933_v57, %v14162_v53  ;;  %8417 = vmatpush.bf16.msra.mxu0 %v13907_v62  ;;  %v1919_v53 = vadd.f32 %v17763_v33, %v397_v24  ;;  %v1972_v57 = vpop.f32.mrf.mxu0 }
 0x190   :  { %v16997_v59 = vld [vmem:[#allocation7 + $0x155c] sm:$0xf0] }
 0x191   :  { %v14674_v60 = vld [vmem:[#allocation7 + $0x1740] sm:$0xf]  ;;  %v14419_v0 = vor.u32 %v16997_v59, %v14418_v58  ;;  %8430 = vmatpush.bf16.msra.mxu1 %v14163_v63 }
 0x192   :  { %v17061_v61 = vld [vmem:[#allocation7 + $0x175c] sm:$0xf0] }
 0x193   :  { %v13874_v5 = vld [vmem:[#allocation7 + $0x1100] sm:$0xf]  ;;  %v14675_v2 = vor.u32 %v17061_v61, %v14674_v60  ;;  %8443 = vmatpush.bf16.msra.mxu2 %v14419_v0  ;;  %v1971_v60 = vadd.f32 %v1970_v12, %v399_v38  ;;  %v1985_v0 = vpop.f32.mrf.mxu1  ;;  %v2011_v24 = vpop.f32.mrf.mxu3 }
 0x194   :  { %v16861_v1 = vld [vmem:[#allocation7 + $0x111c] sm:$0xf0] }
 0x195   :  { %v14130_v23 = vld [vmem:[#allocation7 + $0x1300] sm:$0xf]  ;;  %v13875_v11 = vor.u32 %v16861_v1, %v13874_v5  ;;  %8456 = vmatpush.bf16.msra.mxu3 %v14675_v2  ;;  %v1945_v5 = vadd.f32 %v17767_v26, %v398_v39 }
 0x196   :  { %v16925_v3 = vld [vmem:[#allocation7 + $0x131c] sm:$0xf0] }
 0x197   :  { %v14386_v4 = vld [vmem:[#allocation7 + $0x1500] sm:$0xf]  ;;  %v14131_v13 = vor.u32 %v16925_v3, %v14130_v23  ;;  %8418 = vmatpush.bf16.msra.mxu0 %v13875_v11  ;;  %v1997_v23 = vadd.f32 %v1996_v46, %v400_v47 }
 0x198   :  { %v16989_v34 = vld [vmem:[#allocation7 + $0x151c] sm:$0xf0] }
 0x199   :  { %v14642_v6 = vld [vmem:[#allocation7 + $0x1700] sm:$0xf]  ;;  %v14387_v14 = vor.u32 %v16989_v34, %v14386_v4  ;;  %8431 = vmatpush.bf16.msra.mxu1 %v14131_v13  ;;  %v1984_v13 = vadd.f32 %v1983_v10, %v1971_v60 }
 0x19a   :  { %v17053_v8 = vld [vmem:[#allocation7 + $0x171c] sm:$0xf0] }
 0x19b   :  { %v13842_v15 = vld [vmem:[#allocation7 + $0x10c0] sm:$0xf]  ;;  %v14643_v30 = vor.u32 %v17053_v8, %v14642_v6  ;;  %8444 = vmatpush.bf16.msra.mxu2 %v14387_v14  ;;  %v1932_v6 = vadd.f32 %v17765_v7, %v1919_v53  ;;  %v2127_v38 = vmax.f32 %v1984_v13, 0.0 }
 0x19c   :  { %v16853_v16 = vld [vmem:[#allocation7 + $0x10dc] sm:$0xf0] }
 0x19d   :  { %v14098_v17 = vld [vmem:[#allocation7 + $0x12c0] sm:$0xf]  ;;  %v13843_v50 = vor.u32 %v16853_v16, %v13842_v15  ;;  %8457 = vmatpush.bf16.msra.mxu3 %v14643_v30  ;;  %v1998_v30 = vpop.f32.mrf.mxu2 }
 0x19e   :  { %v16917_v18 = vld [vmem:[#allocation7 + $0x12dc] sm:$0xf0] }
 0x19f   :  { %v14354_v19 = vld [vmem:[#allocation7 + $0x14c0] sm:$0xf]  ;;  %v14099_v29 = vor.u32 %v16917_v18, %v14098_v17  ;;  %8419 = vmatpush.bf16.msra.mxu0 %v13843_v50  ;;  %v1958_v18 = vadd.f32 %v17769_v31, %v1945_v5 }
 0x1a0   :  { %v16981_v20 = vld [vmem:[#allocation7 + $0x14dc] sm:$0xf0] }
 0x1a1   :  { %v14610_v21 = vld [vmem:[#allocation7 + $0x16c0] sm:$0xf]  ;;  %v14355_v32 = vor.u32 %v16981_v20, %v14354_v19  ;;  %8432 = vmatpush.bf16.msra.mxu1 %v14099_v29  ;;  %v2010_v20 = vadd.f32 %v2009_v48, %v1997_v23 }
 0x1a2   :  { %v17045_v22 = vld [vmem:[#allocation7 + $0x16dc] sm:$0xf0] }
 0x1a3   :  { %v13810_v25 = vld [vmem:[#allocation7 + $0x1080] sm:$0xf]  ;;  %v14611_v40 = vor.u32 %v17045_v22, %v14610_v21  ;;  %8445 = vmatpush.bf16.msra.mxu2 %v14355_v32 }
 0x1a4   :  { %v16845_v28 = vld [vmem:[#allocation7 + $0x109c] sm:$0xf0] }
 0x1a5   :  { %v14066_v36 = vld [vmem:[#allocation7 + $0x1280] sm:$0xf]  ;;  %v13811_v56 = vor.u32 %v16845_v28, %v13810_v25  ;;  %8458 = vmatpush.bf16.msra.mxu3 %v14611_v40 }
 0x1a6   :  { %v16909_v27 = vld [vmem:[#allocation7 + $0x129c] sm:$0xf0] }
 0x1a7   :  { %v14322_v41 = vld [vmem:[#allocation7 + $0x1480] sm:$0xf]  ;;  %v14067_v58 = vor.u32 %v16909_v27, %v14066_v36  ;;  %8420 = vmatpush.bf16.msra.mxu0 %v13811_v56  ;;  %v2125_v27 = vmax.f32 %v1932_v6, 0.0 }
 0x1a8   :  { %v16973_v44 = vld [vmem:[#allocation7 + $0x149c] sm:$0xf0] }
 0x1a9   :  { %v14578_v49 = vld [vmem:[#allocation7 + $0x1680] sm:$0xf]  ;;  %v14323_v59 = vor.u32 %v16973_v44, %v14322_v41  ;;  %8433 = vmatpush.bf16.msra.mxu1 %v14067_v58  ;;  %v2126_v41 = vmax.f32 %v1958_v18, 0.0  ;;  %v2128_v44 = vmax.f32 %v2010_v20, 0.0  ;;  %v17801_v5 = vpack.c.bf16 %v2125_v27, %v2125_v27 }
 0x1aa   :  { %v17037_v52 = vld [vmem:[#allocation7 + $0x169c] sm:$0xf0] }
 0x1ab   :  { %v13778_v61 = vld [vmem:[#allocation7 + $0x1040] sm:$0xf]  ;;  %v14579_v1 = vor.u32 %v17037_v52, %v14578_v49  ;;  %8446 = vmatpush.bf16.msra.mxu2 %v14323_v59 }
 0x1ac   :  { %v16837_v62 = vld [vmem:[#allocation7 + $0x105c] sm:$0xf0] }
 0x1ad   :  { %v14034_v63 = vld [vmem:[#allocation7 + $0x1240] sm:$0xf]  ;;  %v13779_v8 = vor.u32 %v16837_v62, %v13778_v61  ;;  %8459 = vmatpush.bf16.msra.mxu3 %v14579_v1  ;;  %v17799_v62 = vpack.c.bf16 %v2127_v38, %v2127_v38  ;;  %v17803_v1 = vpack.c.bf16 %v2128_v44, %v2128_v44  ;;  %v2035_v38 = vpop.f32.mrf.mxu1 }
 0x1ae   :  { %v16901_v2 = vld [vmem:[#allocation7 + $0x125c] sm:$0xf0] }
 0x1af   :  { %v14290_v3 = vld [vmem:[#allocation7 + $0x1440] sm:$0xf]  ;;  %v14035_v14 = vor.u32 %v16901_v2, %v14034_v63  ;;  %8421 = vmatpush.bf16.msra.mxu0 %v13779_v8  ;;  %v17805_v2 = vpack.c.bf16 %v2126_v41, %v2126_v41 }
 0x1b0   :  { %v16965_v33 = vld [vmem:[#allocation7 + $0x145c] sm:$0xf0] }
 0x1b1   :  { %v14546_v4 = vld [vmem:[#allocation7 + $0x1640] sm:$0xf]  ;;  %v14291_v15 = vor.u32 %v16965_v33, %v14290_v3  ;;  %8434 = vmatpush.bf16.msra.mxu1 %v14035_v14 }
 0x1b2   :  { %v17029_v34 = vld [vmem:[#allocation7 + $0x165c] sm:$0xf0] }
 0x1b3   :  { %v13746_v11 = vld [vmem:[#allocation7 + $0x1000] sm:$0xf]  ;;  %v14547_v19 = vor.u32 %v17029_v34, %v14546_v4  ;;  %8447 = vmatpush.bf16.msra.mxu2 %v14291_v15 }
 0x1b4   :  { %v16829_v12 = vld [vmem:[#allocation7 + $0x101c] sm:$0xf0] }
 0x1b5   :  { %v14002_v26 = vld [vmem:[#allocation7 + $0x1200] sm:$0xf]  ;;  %v13747_v10 = vor.u32 %v16829_v12, %v13746_v11  ;;  %8460 = vmatpush.bf16.msra.mxu3 %v14547_v19 }
 0x1b6   :  { %v16893_v16 = vld [vmem:[#allocation7 + $0x121c] sm:$0xf0] }
 0x1b7   :  { %v14258_v17 = vld [vmem:[#allocation7 + $0x1400] sm:$0xf]  ;;  %v14003_v31 = vor.u32 %v16893_v16, %v14002_v26  ;;  %8422 = vmatpush.bf16.msra.mxu0 %v13747_v10 }
 0x1b8   :  { %v16957_v21 = vld [vmem:[#allocation7 + $0x141c] sm:$0xf0] }
 0x1b9   :  { %v14514_v7 = vld [vmem:[#allocation7 + $0x1600] sm:$0xf]  ;;  %v14259_v46 = vor.u32 %v16957_v21, %v14258_v17  ;;  %8435 = vmatpush.bf16.msra.mxu1 %v14003_v31 }
 0x1ba   :  { %v17021_v22 = vld [vmem:[#allocation7 + $0x161c] sm:$0xf0]  ;;  %8423 = vmatmul.bf16.vlgmr.msra.gmra.mxu0 %v17801_v5 }
 0x1bb   :  { %v14994_v50 = vld [vmem:[#allocation7 + $0x19c0] sm:$0xf]  ;;  %v14515_v47 = vor.u32 %v17021_v22, %v14514_v7  ;;  %8448 = vmatpush.bf16.msra.mxu2 %v14259_v46 }
 0x1bc   :  { %v17141_v25 = vld [vmem:[#allocation7 + $0x19dc] sm:$0xf0]  ;;  %8436 = vmatmul.bf16.vlgmr.msra.gmra.mxu1 %v17805_v2 }
 0x1bd   :  { %v15250_v28 = vld [vmem:[#allocation7 + $0x1bc0] sm:$0xf]  ;;  %v14995_v48 = vor.u32 %v17141_v25, %v14994_v50  ;;  %8461 = vmatpush.bf16.msra.mxu3 %v14515_v47 }
 0x1be   :  { %v17205_v29 = vld [vmem:[#allocation7 + $0x1bdc] sm:$0xf0]  ;;  %8449 = vmatmul.bf16.vlgmr.msra.gmra.mxu2 %v17799_v62 }
 0x1bf   :  { %v15506_v32 = vld [vmem:[#allocation7 + $0x1dc0] sm:$0xf]  ;;  %v15251_v49 = vor.u32 %v17205_v29, %v15250_v28  ;;  %8467 = vmatpush.bf16.msrb.mxu0 %v14995_v48  ;;  %v2022_v28 = vpop.f32.mrf.mxu0 }
 0x1c0   :  { %v17269_v36 = vld [vmem:[#allocation7 + $0x1ddc] sm:$0xf0]  ;;  %8462 = vmatmul.bf16.vlgmr.msra.gmra.mxu3 %v17803_v1 }
 0x1c1   :  { %v15762_v39 = vld [vmem:[#allocation7 + $0x1fc0] sm:$0xf]  ;;  %v15507_v52 = vor.u32 %v17269_v36, %v15506_v32  ;;  %8480 = vmatpush.bf16.msrb.mxu1 %v15251_v49  ;;  %v401_v49 = vperm.slane %v17789_v9, 4 }
 0x1c2   :  { %v17333_v40 = vld [vmem:[#allocation7 + $0x1fdc] sm:$0xf0] }
 0x1c3   :  { %v14962_v53 = vld [vmem:[#allocation7 + $0x1980] sm:$0xf]  ;;  %v15763_v58 = vor.u32 %v17333_v40, %v15762_v39  ;;  %8493 = vmatpush.bf16.msrb.mxu2 %v15507_v52 }
 0x1c4   :  { %v17133_v56 = vld [vmem:[#allocation7 + $0x199c] sm:$0xf0] }
 0x1c5   :  { %v15218_v57 = vld [vmem:[#allocation7 + $0x1b80] sm:$0xf]  ;;  %v14963_v23 = vor.u32 %v17133_v56, %v14962_v53  ;;  %8506 = vmatpush.bf16.msrb.mxu3 %v15763_v58  ;;  %v402_v58 = vperm.slane %v17789_v9, 5 }
 0x1c6   :  { %v17197_v59 = vld [vmem:[#allocation7 + $0x1b9c] sm:$0xf0] }
 0x1c7   :  { %v15474_v60 = vld [vmem:[#allocation7 + $0x1d80] sm:$0xf]  ;;  %v15219_v3 = vor.u32 %v17197_v59, %v15218_v57  ;;  %8468 = vmatpush.bf16.msrb.mxu0 %v14963_v23  ;;  %v2048_v59 = vpop.f32.mrf.mxu2  ;;  %v2061_v23 = vpop.f32.mrf.mxu3 }
 0x1c8   :  { %v17261_v61 = vld [vmem:[#allocation7 + $0x1d9c] sm:$0xf0] }
 0x1c9   :  { %v15730_v63 = vld [vmem:[#allocation7 + $0x1f80] sm:$0xf]  ;;  %v15475_v33 = vor.u32 %v17261_v61, %v15474_v60  ;;  %8481 = vmatpush.bf16.msrb.mxu1 %v15219_v3 }
 0x1ca   :  { %v17325_v0 = vld [vmem:[#allocation7 + $0x1f9c] sm:$0xf0] }
 0x1cb   :  { %v14930_v4 = vld [vmem:[#allocation7 + $0x1940] sm:$0xf]  ;;  %v15731_v8 = vor.u32 %v17325_v0, %v15730_v63  ;;  %8494 = vmatpush.bf16.msrb.mxu2 %v15475_v33 }
 0x1cc   :  { %v17125_v34 = vld [vmem:[#allocation7 + $0x195c] sm:$0xf0] }
 0x1cd   :  { %v15186_v6 = vld [vmem:[#allocation7 + $0x1b40] sm:$0xf]  ;;  %v14931_v26 = vor.u32 %v17125_v34, %v14930_v4  ;;  %8507 = vmatpush.bf16.msrb.mxu3 %v15731_v8  ;;  %v2023_v34 = vadd.f32 %v2022_v28, %v401_v49 }
 0x1ce   :  { %v17189_v11 = vld [vmem:[#allocation7 + $0x1b5c] sm:$0xf0] }
 0x1cf   :  { %v15442_v12 = vld [vmem:[#allocation7 + $0x1d40] sm:$0xf]  ;;  %v15187_v16 = vor.u32 %v17189_v11, %v15186_v6  ;;  %8469 = vmatpush.bf16.msrb.mxu0 %v14931_v26  ;;  %v2024_v6 = vpop.f32.mrf.mxu0  ;;  %v2037_v26 = vpop.f32.mrf.mxu1 }
 0x1d0   :  { %v17253_v13 = vld [vmem:[#allocation7 + $0x1d5c] sm:$0xf0] }
 0x1d1   :  { %v15698_v14 = vld [vmem:[#allocation7 + $0x1f40] sm:$0xf]  ;;  %v15443_v17 = vor.u32 %v17253_v13, %v15442_v12  ;;  %8482 = vmatpush.bf16.msrb.mxu1 %v15187_v16  ;;  %v2049_v12 = vadd.f32 %v2048_v59, %v402_v58  ;;  %v16561_v59 = vld [vmem:[#allocation7 + $0x7c4] sm:$0xf] }
 0x1d2   :  { %v17317_v15 = vld [vmem:[#allocation7 + $0x1f5c] sm:$0xf0] }
 0x1d3   :  { %v14898_v30 = vld [vmem:[#allocation7 + $0x1900] sm:$0xf]  ;;  %v15699_v20 = vor.u32 %v17317_v15, %v15698_v14  ;;  %8495 = vmatpush.bf16.msrb.mxu2 %v15443_v17 }
 0x1d4   :  { %v17117_v18 = vld [vmem:[#allocation7 + $0x191c] sm:$0xf0] }
 0x1d5   :  { %v15154_v19 = vld [vmem:[#allocation7 + $0x1b00] sm:$0xf]  ;;  %v14899_v25 = vor.u32 %v17117_v18, %v14898_v30  ;;  %8508 = vmatpush.bf16.msrb.mxu3 %v15699_v20 }
 0x1d6   :  { %v17181_v21 = vld [vmem:[#allocation7 + $0x1b1c] sm:$0xf0] }
 0x1d7   :  { %v15410_v7 = vld [vmem:[#allocation7 + $0x1d00] sm:$0xf]  ;;  %v15155_v10 = vor.u32 %v17181_v21, %v15154_v19  ;;  %8470 = vmatpush.bf16.msrb.mxu0 %v14899_v25  ;;  %v2036_v21 = vadd.f32 %v2035_v38, %v2023_v34  ;;  %v11924_v38 = vld [vmem:[#allocation7 + $0x1e0] sm:$0xf0] }
 0x1d8   :  { %v17245_v22 = vld [vmem:[#allocation7 + $0x1d1c] sm:$0xf0] }
 0x1d9   :  { %v15666_v24 = vld [vmem:[#allocation7 + $0x1f00] sm:$0xf]  ;;  %v15411_v29 = vor.u32 %v17245_v22, %v15410_v7  ;;  %8483 = vmatpush.bf16.msrb.mxu1 %v15155_v10  ;;  %v2062_v10 = vadd.f32 %v2061_v23, %v2049_v12  ;;  %v12404_v12 = vld [vmem:[#allocation7 + $0x5a0] sm:$0xf0] }
 0x1da   :  { %v17309_v50 = vld [vmem:[#allocation7 + $0x1f1c] sm:$0xf0] }
 0x1db   :  { %v14866_v32 = vld [vmem:[#allocation7 + $0x18c0] sm:$0xf]  ;;  %v15667_v31 = vor.u32 %v17309_v50, %v15666_v24  ;;  %8496 = vmatpush.bf16.msrb.mxu2 %v15411_v29 }
 0x1dc   :  { %v17109_v36 = vld [vmem:[#allocation7 + $0x18dc] sm:$0xf0] }
 0x1dd   :  { %v15122_v27 = vld [vmem:[#allocation7 + $0x1ac0] sm:$0xf]  ;;  %v14867_v47 = vor.u32 %v17109_v36, %v14866_v32  ;;  %8509 = vmatpush.bf16.msrb.mxu3 %v15667_v31 }
 0x1de   :  { %v17173_v46 = vld [vmem:[#allocation7 + $0x1adc] sm:$0xf0] }
 0x1df   :  { %v15378_v39 = vld [vmem:[#allocation7 + $0x1cc0] sm:$0xf]  ;;  %v15123_v52 = vor.u32 %v17173_v46, %v15122_v27  ;;  %8471 = vmatpush.bf16.msrb.mxu0 %v14867_v47  ;;  %v2050_v27 = vpop.f32.mrf.mxu2  ;;  %v12180_v47 = vld [vmem:[#allocation7 + $0x3e0] sm:$0xf0] }
 0x1e0   :  { %v17237_v40 = vld [vmem:[#allocation7 + $0x1cdc] sm:$0xf0]  ;;  %v16409_v27 = vld [vmem:[#allocation7 + $0x304] sm:$0xf] }
 0x1e1   :  { %v15634_v41 = vld [vmem:[#allocation7 + $0x1ec0] sm:$0xf]  ;;  %v15379_v53 = vor.u32 %v17237_v40, %v15378_v39  ;;  %8484 = vmatpush.bf16.msrb.mxu1 %v15123_v52  ;;  %v16369_v40 = vld [vmem:[#allocation7 + $0x1c4] sm:$0xf] }
 0x1e2   :  { %v17301_v44 = vld [vmem:[#allocation7 + $0x1edc] sm:$0xf0]  ;;  %v16497_v52 = vld [vmem:[#allocation7 + $0x5c4] sm:$0xf] }
 0x1e3   :  { %v14834_v48 = vld [vmem:[#allocation7 + $0x1880] sm:$0xf]  ;;  %v15635_v60 = vor.u32 %v17301_v44, %v15634_v41  ;;  %8497 = vmatpush.bf16.msrb.mxu2 %v15379_v53  ;;  %v2063_v41 = vpop.f32.mrf.mxu3  ;;  %v16433_v44 = vld [vmem:[#allocation7 + $0x3c4] sm:$0xf] }
 0x1e4   :  { %v17101_v56 = vld [vmem:[#allocation7 + $0x189c] sm:$0xf0]  ;;  %v12436_v53 = vld [vmem:[#allocation7 + $0x5e0] sm:$0xf0]  ;;  %v2074_v41 = vpop.f32.mrf.mxu0 }
 0x1e5   :  { %v15090_v57 = vld [vmem:[#allocation7 + $0x1a80] sm:$0xf]  ;;  %v14835_v4 = vor.u32 %v17101_v56, %v14834_v48  ;;  %8510 = vmatpush.bf16.msrb.mxu3 %v15635_v60  ;;  %v2129_v48 = vmax.f32 %v2036_v21, 0.0  ;;  %v2130_v56 = vmax.f32 %v2062_v10, 0.0  ;;  %v12692_v60 = vld [vmem:[#allocation7 + $0x7e0] sm:$0xf0]  ;;  %v12439_v23 = vor.u32 %v16497_v52, %v12436_v53  ;;  %v2087_v53 = vpop.f32.mrf.mxu1 }
 0x1e6   :  { %v17165_v61 = vld [vmem:[#allocation7 + $0x1a9c] sm:$0xf0]  ;;  %v12695_v6 = vor.u32 %v16561_v59, %v12692_v60  ;;  %v12116_v21 = vld [vmem:[#allocation7 + $0x360] sm:$0xf0] }
 0x1e7   :  { %v15346_v63 = vld [vmem:[#allocation7 + $0x1c80] sm:$0xf]  ;;  %v15091_v8 = vor.u32 %v17165_v61, %v15090_v57  ;;  %8472 = vmatpush.bf16.msrb.mxu0 %v14835_v4  ;;  %v16425_v4 = vld [vmem:[#allocation7 + $0x384] sm:$0xf]  ;;  %v17813_v34 = vpack.c.bf16 %v2129_v48, %v2129_v48 }
 0x1e8   :  { %v17229_v0 = vld [vmem:[#allocation7 + $0x1c9c] sm:$0xf0] }
 0x1e9   :  { %v15602_v3 = vld [vmem:[#allocation7 + $0x1e80] sm:$0xf]  ;;  %v15347_v11 = vor.u32 %v17229_v0, %v15346_v63  ;;  %8485 = vmatpush.bf16.msrb.mxu1 %v15091_v8  ;;  %v11927_v63 = vor.u32 %v16369_v40, %v11924_v38  ;;  %v12183_v0 = vor.u32 %v16433_v44, %v12180_v47  ;;  %v12148_v8 = vld [vmem:[#allocation7 + $0x3a0] sm:$0xf0] }
 0x1ea   :  { %v17293_v33 = vld [vmem:[#allocation7 + $0x1e9c] sm:$0xf0]  ;;  %v12340_v40 = vld [vmem:[#allocation7 + $0x520] sm:$0xf0] }
 0x1eb   :  { %v14802_v13 = vld [vmem:[#allocation7 + $0x1840] sm:$0xf]  ;;  %v15603_v16 = vor.u32 %v17293_v33, %v15602_v3  ;;  %8498 = vmatpush.bf16.msrb.mxu2 %v15347_v11  ;;  %v16361_v3 = vld [vmem:[#allocation7 + $0x184] sm:$0xf] }
 0x1ec   :  { %v17093_v14 = vld [vmem:[#allocation7 + $0x185c] sm:$0xf0]  ;;  %v11892_v33 = vld [vmem:[#allocation7 + $0x1a0] sm:$0xf0] }
 0x1ed   :  { %v15058_v15 = vld [vmem:[#allocation7 + $0x1a40] sm:$0xf]  ;;  %v14803_v7 = vor.u32 %v17093_v14, %v14802_v13  ;;  %8511 = vmatpush.bf16.msrb.mxu3 %v15603_v16  ;;  %v16489_v11 = vld [vmem:[#allocation7 + $0x584] sm:$0xf]  ;;  %v17815_v13 = vpack.c.bf16 %v2130_v56, %v2130_v56  ;;  %v11895_v26 = vor.u32 %v16361_v3, %v11892_v33  ;;  %v12151_v16 = vor.u32 %v16425_v4, %v12148_v8 }
 0x1ee   :  { %v17157_v17 = vld [vmem:[#allocation7 + $0x1a5c] sm:$0xf0]  ;;  %v16553_v14 = vld [vmem:[#allocation7 + $0x784] sm:$0xf]  ;;  %v404_v33 = vperm.slane %v17789_v9, 7 }
 0x1ef   :  { %v15314_v30 = vld [vmem:[#allocation7 + $0x1c40] sm:$0xf]  ;;  %v15059_v25 = vor.u32 %v17157_v17, %v15058_v15  ;;  %8473 = vmatpush.bf16.msrb.mxu0 %v14803_v7  ;;  %v12660_v15 = vld [vmem:[#allocation7 + $0x7a0] sm:$0xf0]  ;;  %v12407_v17 = vor.u32 %v16489_v11, %v12404_v12 }
 0x1f0   :  { %v17221_v18 = vld [vmem:[#allocation7 + $0x1c5c] sm:$0xf0]  ;;  %v16481_v7 = vld [vmem:[#allocation7 + $0x544] sm:$0xf] }
 0x1f1   :  { %v15570_v19 = vld [vmem:[#allocation7 + $0x1e40] sm:$0xf]  ;;  %v15315_v28 = vor.u32 %v17221_v18, %v15314_v30  ;;  %8486 = vmatpush.bf16.msrb.mxu1 %v15059_v25  ;;  %v16353_v30 = vld [vmem:[#allocation7 + $0x144] sm:$0xf] }
 0x1f2   :  { %v17285_v20 = vld [vmem:[#allocation7 + $0x1e5c] sm:$0xf0]  ;;  %v11860_v18 = vld [vmem:[#allocation7 + $0x160] sm:$0xf0] }
 0x1f3   :  { %v14770_v22 = vld [vmem:[#allocation7 + $0x1800] sm:$0xf]  ;;  %v15571_v31 = vor.u32 %v17285_v20, %v15570_v19  ;;  %8499 = vmatpush.bf16.msrb.mxu2 %v15315_v28  ;;  %v16417_v19 = vld [vmem:[#allocation7 + $0x344] sm:$0xf]  ;;  %v12663_v20 = vor.u32 %v16553_v14, %v12660_v15  ;;  %v11863_v25 = vor.u32 %v16353_v30, %v11860_v18  ;;  %v403_v28 = vperm.slane %v17789_v9, 6  ;;  %v2113_v30 = vpop.f32.mrf.mxu3 }
 0x1f4   :  { %v17085_v24 = vld [vmem:[#allocation7 + $0x181c] sm:$0xf0]  ;;  %v12119_v10 = vor.u32 %v16417_v19, %v12116_v21  ;;  %v16537_v38 = vld [vmem:[#allocation7 + $0x704] sm:$0xf]  ;;  %v2076_v21 = vpop.f32.mrf.mxu0 }
 0x1f5   :  { %v15026_v50 = vld [vmem:[#allocation7 + $0x1a00] sm:$0xf]  ;;  %v14771_v49 = vor.u32 %v17085_v24, %v14770_v22  ;;  %8512 = vmatpush.bf16.msrb.mxu3 %v15571_v31  ;;  %v12372_v22 = vld [vmem:[#allocation7 + $0x560] sm:$0xf0]  ;;  %v2075_v47 = vadd.f32 %v2074_v41, %v403_v28 }
 0x1f6   :  { %v17149_v29 = vld [vmem:[#allocation7 + $0x1a1c] sm:$0xf0]  ;;  %v16545_v24 = vld [vmem:[#allocation7 + $0x744] sm:$0xf] }
 0x1f7   :  { %v15282_v32 = vld [vmem:[#allocation7 + $0x1c00] sm:$0xf]  ;;  %v15027_v57 = vor.u32 %v17149_v29, %v15026_v50  ;;  %8474 = vmatpush.bf16.msrb.mxu0 %v14771_v49  ;;  %v12628_v50 = vld [vmem:[#allocation7 + $0x760] sm:$0xf0]  ;;  %v12375_v29 = vor.u32 %v16481_v7, %v12372_v22  ;;  %v2088_v60 = vadd.f32 %v2087_v53, %v2075_v47 }
 0x1f8   :  { %v17213_v36 = vld [vmem:[#allocation7 + $0x1c1c] sm:$0xf0]  ;;  %v12631_v31 = vor.u32 %v16545_v24, %v12628_v50  ;;  %v12596_v44 = vld [vmem:[#allocation7 + $0x720] sm:$0xf0] }
 0x1f9   :  { %v15538_v46 = vld [vmem:[#allocation7 + $0x1e00] sm:$0xf]  ;;  %v15283_v58 = vor.u32 %v17213_v36, %v15282_v32  ;;  %8487 = vmatpush.bf16.msrb.mxu1 %v15027_v57  ;;  %v16345_v32 = vld [vmem:[#allocation7 + $0x104] sm:$0xf]  ;;  %v12599_v59 = vor.u32 %v16537_v38, %v12596_v44  ;;  %v2131_v4 = vmax.f32 %v2088_v60, 0.0 }
 0x1fa   :  { %v17277_v39 = vld [vmem:[#allocation7 + $0x1e1c] sm:$0xf0]  ;;  %8475 = vmatmul.bf16.vlgmr.msrb.gmra.mxu0 %v17813_v34  ;;  %v11828_v36 = vld [vmem:[#allocation7 + $0x120] sm:$0xf0] }
 0x1fb   :  { %v15539_v61 = vor.u32 %v17277_v39, %v15538_v46  ;;  %8500 = vmatpush.bf16.msrb.mxu2 %v15283_v58  ;;  %8519 = vmatpush.bf16.msra.mxu0 %v11927_v63  ;;  %v12084_v46 = vld [vmem:[#allocation7 + $0x320] sm:$0xf0]  ;;  %v11831_v48 = vor.u32 %v16345_v32, %v11828_v36 }
 0x1fc   :  { %8488 = vmatmul.bf16.vlgmr.msrb.gmra.mxu1 %v17815_v13  ;;  %v16473_v39 = vld [vmem:[#allocation7 + $0x504] sm:$0xf]  ;;  %v12087_v49 = vor.u32 %v16409_v27, %v12084_v46 }
 0x1fd   :  { %8513 = vmatpush.bf16.msrb.mxu3 %v15539_v61  ;;  %8532 = vmatpush.bf16.msra.mxu1 %v12183_v0  ;;  %v12343_v52 = vor.u32 %v16473_v39, %v12340_v40  ;;  %v16337_v56 = vld [vmem:[#allocation7 + $0xc4] sm:$0xf] }
 0x1fe   :  { %v11796_v57 = vld [vmem:[#allocation7 + $0xe0] sm:$0xf0] }
 0x1ff   :  { %8545 = vmatpush.bf16.msra.mxu2 %v12439_v23  ;;  %8520 = vmatpush.bf16.msra.mxu0 %v11895_v26  ;;  %v16401_v58 = vld [vmem:[#allocation7 + $0x2c4] sm:$0xf]  ;;  %v17821_v26 = vpack.c.bf16 %v2131_v4, %v2131_v4 }
 0x200   :  { %v12052_v61 = vld [vmem:[#allocation7 + $0x2e0] sm:$0xf0] }
 0x201   :  { %8558 = vmatpush.bf16.msra.mxu3 %v12695_v6  ;;  %8533 = vmatpush.bf16.msra.mxu1 %v12151_v16  ;;  %v16465_v63 = vld [vmem:[#allocation7 + $0x4c4] sm:$0xf]  ;;  %v11799_v6 = vor.u32 %v16337_v56, %v11796_v57  ;;  %v12055_v8 = vor.u32 %v16401_v58, %v12052_v61  ;;  %v2115_v61 = vpop.f32.mrf.mxu3 }
 0x202   :  { %v12308_v0 = vld [vmem:[#allocation7 + $0x4e0] sm:$0xf0]  ;;  %8501 = vmatmul.bf16.vlgmr.msrb.gmra.mxu2 %v17821_v26 }
 0x203   :  { %8546 = vmatpush.bf16.msra.mxu2 %v12407_v17  ;;  %8521 = vmatpush.bf16.msra.mxu0 %v11863_v25  ;;  %v16529_v23 = vld [vmem:[#allocation7 + $0x6c4] sm:$0xf]  ;;  %v12311_v11 = vor.u32 %v16465_v63, %v12308_v0  ;;  %v2100_v17 = vpop.f32.mrf.mxu2 }
 0x204   :  { %v12564_v3 = vld [vmem:[#allocation7 + $0x6e0] sm:$0xf0]  ;;  %v2101_v9 = vadd.f32 %v2100_v17, %v404_v33 }
 0x205   :  { %8559 = vmatpush.bf16.msra.mxu3 %v12663_v20  ;;  %8534 = vmatpush.bf16.msra.mxu1 %v12119_v10  ;;  %v16329_v12 = vld [vmem:[#allocation7 + $0x84] sm:$0xf]  ;;  %v12567_v16 = vor.u32 %v16529_v23, %v12564_v3  ;;  %v2089_v10 = vpop.f32.mrf.mxu1 }
 0x206   :  { %v11764_v14 = vld [vmem:[#allocation7 + $0xa0] sm:$0xf0]  ;;  %v2114_v50 = vadd.f32 %v2113_v30, %v2101_v9 }
 0x207   :  { %8547 = vmatpush.bf16.msra.mxu2 %v12375_v29  ;;  %8522 = vmatpush.bf16.msra.mxu0 %v11831_v48  ;;  %v16393_v15 = vld [vmem:[#allocation7 + $0x284] sm:$0xf]  ;;  %v11767_v24 = vor.u32 %v16329_v12, %v11764_v14 }
 0x208   :  { %v12020_v18 = vld [vmem:[#allocation7 + $0x2a0] sm:$0xf0]  ;;  %v2132_v40 = vmax.f32 %v2114_v50, 0.0 }
 0x209   :  { %8560 = vmatpush.bf16.msra.mxu3 %v12631_v31  ;;  %8535 = vmatpush.bf16.msra.mxu1 %v12087_v49  ;;  %v16457_v19 = vld [vmem:[#allocation7 + $0x484] sm:$0xf]  ;;  %v12023_v25 = vor.u32 %v16393_v15, %v12020_v18 }
 0x20a   :  { %v12276_v20 = vld [vmem:[#allocation7 + $0x4a0] sm:$0xf0]  ;;  %v17824_v49 = vpack.c.bf16 %v2132_v40, %v2132_v40 }
 0x20b   :  { %8548 = vmatpush.bf16.msra.mxu2 %v12343_v52  ;;  %v16521_v7 = vld [vmem:[#allocation7 + $0x684] sm:$0xf]  ;;  %8523 = vmatpush.bf16.msra.mxu0 %v11799_v6  ;;  %v12279_v28 = vor.u32 %v16457_v19, %v12276_v20  ;;  %v2102_v60 = vpop.f32.mrf.mxu2 }
 0x20c   :  { %v12532_v22 = vld [vmem:[#allocation7 + $0x6a0] sm:$0xf0]  ;;  %8514 = vmatmul.bf16.vlgmr.msrb.gmra.mxu3 %v17824_v49 }
 0x20d   :  { %8561 = vmatpush.bf16.msra.mxu3 %v12599_v59  ;;  %8536 = vmatpush.bf16.msra.mxu1 %v12055_v8  ;;  %v16321_v29 = vld [vmem:[#allocation7 + $0x44] sm:$0xf]  ;;  %v12535_v27 = vor.u32 %v16521_v7, %v12532_v22 }
 0x20e   :  { %v11732_v32 = vld [vmem:[#allocation7 + $0x60] sm:$0xf0] }
 0x20f   :  { %8549 = vmatpush.bf16.msra.mxu2 %v12311_v11  ;;  %v16385_v36 = vld [vmem:[#allocation7 + $0x244] sm:$0xf]  ;;  %8524 = vmatpush.bf16.msra.mxu0 %v11767_v24  ;;  %v11735_v44 = vor.u32 %v16321_v29, %v11732_v32 }
 0x210   :  { %v11988_v31 = vld [vmem:[#allocation7 + $0x260] sm:$0xf0] }
 0x211   :  { %8562 = vmatpush.bf16.msra.mxu3 %v12567_v16  ;;  %v16449_v46 = vld [vmem:[#allocation7 + $0x444] sm:$0xf]  ;;  %8537 = vmatpush.bf16.msra.mxu1 %v12023_v25  ;;  %v11991_v52 = vor.u32 %v16385_v36, %v11988_v31 }
 0x212   :  { %v12244_v39 = vld [vmem:[#allocation7 + $0x460] sm:$0xf0] }
 0x213   :  { %v16513_v41 = vld [vmem:[#allocation7 + $0x644] sm:$0xf]  ;;  %8550 = vmatpush.bf16.msra.mxu2 %v12279_v28  ;;  %v12247_v53 = vor.u32 %v16449_v46, %v12244_v39  ;;  %8525 = vmatpush.bf16.msra.mxu0 %v11735_v44 }
 0x214   :  { %v12500_v38 = vld [vmem:[#allocation7 + $0x660] sm:$0xf0] }
 0x215   :  { %v16313_v47 = vld [vmem:[#allocation7 + $0x4] sm:$0xf]  ;;  %8563 = vmatpush.bf16.msra.mxu3 %v12535_v27  ;;  %v12503_v59 = vor.u32 %v16513_v41, %v12500_v38  ;;  %8538 = vmatpush.bf16.msra.mxu1 %v11991_v52 }
 0x216   :  { %v11700_v48 = vld [vmem:[#allocation7 + $0x20] sm:$0xf0] }
 0x217   :  { %v16377_v56 = vld [vmem:[#allocation7 + $0x204] sm:$0xf]  ;;  %v11703_v6 = vor.u32 %v16313_v47, %v11700_v48  ;;  %8551 = vmatpush.bf16.msra.mxu2 %v12247_v53 }
 0x218   :  { %v11956_v57 = vld [vmem:[#allocation7 + $0x220] sm:$0xf0] }
 0x219   :  { %v16441_v58 = vld [vmem:[#allocation7 + $0x404] sm:$0xf]  ;;  %v11959_v14 = vor.u32 %v16377_v56, %v11956_v57  ;;  %8564 = vmatpush.bf16.msra.mxu3 %v12503_v59  ;;  %8526 = vmatpush.bf16.msra.mxu0 %v11703_v6 }
 0x21a   :  { %v12212_v63 = vld [vmem:[#allocation7 + $0x420] sm:$0xf0] }
 0x21b   :  { %v16505_v0 = vld [vmem:[#allocation7 + $0x604] sm:$0xf]  ;;  %v12215_v15 = vor.u32 %v16441_v58, %v12212_v63  ;;  %8539 = vmatpush.bf16.msra.mxu1 %v11959_v14 }
 0x21c   :  { %v12468_v23 = vld [vmem:[#allocation7 + $0x620] sm:$0xf0]  ;;  %8527 = vmatmul.bf16.vlgmr.msra.gmra.mxu0 %v17751_v35 }
 0x21d   :  { %v16625_v3 = vld [vmem:[#allocation7 + $0x9c4] sm:$0xf]  ;;  %v12471_v30 = vor.u32 %v16505_v0, %v12468_v23  ;;  %8552 = vmatpush.bf16.msra.mxu2 %v12215_v15 }
 0x21e   :  { %v12948_v33 = vld [vmem:[#allocation7 + $0x9e0] sm:$0xf0]  ;;  %8540 = vmatmul.bf16.vlgmr.msra.gmra.mxu1 %v17753_v54 }
 0x21f   :  { %v16689_v4 = vld [vmem:[#allocation7 + $0xbc4] sm:$0xf]  ;;  %v12951_v18 = vor.u32 %v16625_v3, %v12948_v33  ;;  %8565 = vmatpush.bf16.msra.mxu3 %v12471_v30  ;;  %v8320_v3 = vpop.f32.mrf.mxu0 }
 0x220   :  { %v13204_v8 = vld [vmem:[#allocation7 + $0xbe0] sm:$0xf0]  ;;  %8553 = vmatmul.bf16.vlgmr.msra.gmra.mxu2 %v17755_v37 }
 0x221   :  { %v16753_v11 = vld [vmem:[#allocation7 + $0xdc4] sm:$0xf]  ;;  %v13207_v19 = vor.u32 %v16689_v4, %v13204_v8  ;;  %8571 = vmatpush.bf16.msrb.mxu0 %v12951_v18  ;;  %v8333_v8 = vpop.f32.mrf.mxu1 }
 0x222   :  { %v13460_v12 = vld [vmem:[#allocation7 + $0xde0] sm:$0xf0]  ;;  %8566 = vmatmul.bf16.vlgmr.msra.gmra.mxu3 %v17757_v42 }
 0x223   :  { %v16817_v16 = vld [vmem:[#allocation7 + $0xfc4] sm:$0xf]  ;;  %v13463_v20 = vor.u32 %v16753_v11, %v13460_v12  ;;  %8584 = vmatpush.bf16.msrb.mxu1 %v13207_v19 }
 0x224   :  { %v13716_v17 = vld [vmem:[#allocation7 + $0xfe0] sm:$0xf0] }
 0x225   :  { %v16617_v9 = vld [vmem:[#allocation7 + $0x984] sm:$0xf]  ;;  %v13719_v22 = vor.u32 %v16817_v16, %v13716_v17  ;;  %8597 = vmatpush.bf16.msrb.mxu2 %v13463_v20 }
 0x226   :  { %v12916_v21 = vld [vmem:[#allocation7 + $0x9a0] sm:$0xf0] }
 0x227   :  { %v16681_v7 = vld [vmem:[#allocation7 + $0xb84] sm:$0xf]  ;;  %v12919_v29 = vor.u32 %v16617_v9, %v12916_v21  ;;  %8610 = vmatpush.bf16.msrb.mxu3 %v13719_v22 }
 0x228   :  { %v13172_v24 = vld [vmem:[#allocation7 + $0xba0] sm:$0xf0] }
 0x229   :  { %v16745_v50 = vld [vmem:[#allocation7 + $0xd84] sm:$0xf]  ;;  %v13175_v36 = vor.u32 %v16681_v7, %v13172_v24  ;;  %8572 = vmatpush.bf16.msrb.mxu0 %v12919_v29 }
 0x22a   :  { %v13428_v25 = vld [vmem:[#allocation7 + $0xda0] sm:$0xf0] }
 0x22b   :  { %v16809_v28 = vld [vmem:[#allocation7 + $0xf84] sm:$0xf]  ;;  %v13431_v27 = vor.u32 %v16745_v50, %v13428_v25  ;;  %8585 = vmatpush.bf16.msrb.mxu1 %v13175_v36 }
 0x22c   :  { %v13684_v10 = vld [vmem:[#allocation7 + $0xfa0] sm:$0xf0] }
 0x22d   :  { %v16609_v32 = vld [vmem:[#allocation7 + $0x944] sm:$0xf]  ;;  %v13687_v40 = vor.u32 %v16809_v28, %v13684_v10  ;;  %8598 = vmatpush.bf16.msrb.mxu2 %v13431_v27 }
 0x22e   :  { %v12884_v31 = vld [vmem:[#allocation7 + $0x960] sm:$0xf0] }
 0x22f   :  { %v16673_v46 = vld [vmem:[#allocation7 + $0xb44] sm:$0xf]  ;;  %v12887_v52 = vor.u32 %v16609_v32, %v12884_v31  ;;  %8611 = vmatpush.bf16.msrb.mxu3 %v13687_v40  ;;  %v8346_v32 = vpop.f32.mrf.mxu2  ;;  %v8322_v40 = vpop.f32.mrf.mxu0 }
 0x230   :  { %v3173_v39 = vld [vmem:[#allocation8] sm:$0xff] }
 0x231   :  { %v13140_v41 = vld [vmem:[#allocation7 + $0xb60] sm:$0xf0]  ;;  %v3175_v53 = vperm.slane %v3173_v39, 0  ;;  %8573 = vmatpush.bf16.msrb.mxu0 %v12887_v52  ;;  %v8359_v39 = vpop.f32.mrf.mxu3 }
 0x232   :  { %v16737_v38 = vld [vmem:[#allocation7 + $0xd44] sm:$0xf]  ;;  %v13143_v56 = vor.u32 %v16673_v46, %v13140_v41 }
 0x233   :  { %v13396_v44 = vld [vmem:[#allocation7 + $0xd60] sm:$0xf0]  ;;  %v8321_v6 = vadd.f32 %v8320_v3, %v3175_v53 }
 0x234   :  { %v16801_v47 = vld [vmem:[#allocation7 + $0xf44] sm:$0xf]  ;;  %v13399_v57 = vor.u32 %v16737_v38, %v13396_v44  ;;  %8586 = vmatpush.bf16.msrb.mxu1 %v13143_v56  ;;  %v8335_v44 = vpop.f32.mrf.mxu1 }
 0x235   :  { %v13652_v48 = vld [vmem:[#allocation7 + $0xf60] sm:$0xf0]  ;;  %v8334_v30 = vadd.f32 %v8333_v8, %v8321_v6 }
 0x236   :  { %v16601_v58 = vld [vmem:[#allocation7 + $0x904] sm:$0xf]  ;;  %v13655_v61 = vor.u32 %v16801_v47, %v13652_v48  ;;  %8599 = vmatpush.bf16.msrb.mxu2 %v13399_v57 }
 0x237   :  { %v12852_v59 = vld [vmem:[#allocation7 + $0x920] sm:$0xf0]  ;;  %v8347_v46 = vadd.f32 %v8346_v32, %v8334_v30 }
 0x238   :  { %v16665_v60 = vld [vmem:[#allocation7 + $0xb04] sm:$0xf]  ;;  %v12855_v11 = vor.u32 %v16601_v58, %v12852_v59  ;;  %8612 = vmatpush.bf16.msrb.mxu3 %v13655_v61 }
 0x239   :  { %v13108_v63 = vld [vmem:[#allocation7 + $0xb20] sm:$0xf0]  ;;  %v17831_v48 = vadd.f32 %v8359_v39, %v8347_v46 }
 0x23a   :  { %v16729_v0 = vld [vmem:[#allocation7 + $0xd04] sm:$0xf]  ;;  %v13111_v12 = vor.u32 %v16665_v60, %v13108_v63  ;;  %8574 = vmatpush.bf16.msrb.mxu0 %v12855_v11 }
 0x23b   :  { %v13364_v23 = vld [vmem:[#allocation7 + $0xd20] sm:$0xf0] }
 0x23c   :  { %v16793_v33 = vld [vmem:[#allocation7 + $0xf04] sm:$0xf]  ;;  %v13367_v14 = vor.u32 %v16729_v0, %v13364_v23  ;;  %8587 = vmatpush.bf16.msrb.mxu1 %v13111_v12 }
 0x23d   :  { %v13620_v4 = vld [vmem:[#allocation7 + $0xf20] sm:$0xf0] }
 0x23e   :  { %v16593_v15 = vld [vmem:[#allocation7 + $0x8c4] sm:$0xf]  ;;  %v13623_v18 = vor.u32 %v16793_v33, %v13620_v4  ;;  %8600 = vmatpush.bf16.msrb.mxu2 %v13367_v14 }
 0x23f   :  { %v12820_v16 = vld [vmem:[#allocation7 + $0x8e0] sm:$0xf0] }
 0x240   :  { %v16657_v17 = vld [vmem:[#allocation7 + $0xac4] sm:$0xf]  ;;  %v12823_v22 = vor.u32 %v16593_v15, %v12820_v16  ;;  %8613 = vmatpush.bf16.msrb.mxu3 %v13623_v18  ;;  %v8348_v16 = vpop.f32.mrf.mxu2 }
 0x241   :  { %v13076_v19 = vld [vmem:[#allocation7 + $0xae0] sm:$0xf0] }
 0x242   :  { %v16721_v20 = vld [vmem:[#allocation7 + $0xcc4] sm:$0xf]  ;;  %v13079_v24 = vor.u32 %v16657_v17, %v13076_v19  ;;  %8575 = vmatpush.bf16.msrb.mxu0 %v12823_v22  ;;  %v8361_v19 = vpop.f32.mrf.mxu3 }
 0x243   :  { %v13332_v9 = vld [vmem:[#allocation7 + $0xce0] sm:$0xf0]  ;;  %v8372_v19 = vpop.f32.mrf.mxu0 }
 0x244   :  { %v16785_v21 = vld [vmem:[#allocation7 + $0xec4] sm:$0xf]  ;;  %v13335_v50 = vor.u32 %v16721_v20, %v13332_v9  ;;  %8588 = vmatpush.bf16.msrb.mxu1 %v13079_v24 }
 0x245   :  { %v13588_v7 = vld [vmem:[#allocation7 + $0xee0] sm:$0xf0] }
 0x246   :  { %v16585_v25 = vld [vmem:[#allocation7 + $0x884] sm:$0xf]  ;;  %v13591_v29 = vor.u32 %v16785_v21, %v13588_v7  ;;  %8601 = vmatpush.bf16.msrb.mxu2 %v13335_v50 }
 0x247   :  { %v12788_v28 = vld [vmem:[#allocation7 + $0x8a0] sm:$0xf0] }
 0x248   :  { %v16649_v10 = vld [vmem:[#allocation7 + $0xa84] sm:$0xf]  ;;  %v12791_v47 = vor.u32 %v16585_v25, %v12788_v28  ;;  %8614 = vmatpush.bf16.msrb.mxu3 %v13591_v29 }
 0x249   :  { %v13044_v36 = vld [vmem:[#allocation7 + $0xaa0] sm:$0xf0] }
 0x24a   :  { %v16713_v27 = vld [vmem:[#allocation7 + $0xc84] sm:$0xf]  ;;  %v13047_v52 = vor.u32 %v16649_v10, %v13044_v36  ;;  %8576 = vmatpush.bf16.msrb.mxu0 %v12791_v47 }
 0x24b   :  { %v13300_v31 = vld [vmem:[#allocation7 + $0xca0] sm:$0xf0] }
 0x24c   :  { %v16777_v41 = vld [vmem:[#allocation7 + $0xe84] sm:$0xf]  ;;  %v13303_v53 = vor.u32 %v16713_v27, %v13300_v31  ;;  %8589 = vmatpush.bf16.msrb.mxu1 %v13047_v52 }
 0x24d   :  { %v13556_v38 = vld [vmem:[#allocation7 + $0xea0] sm:$0xf0] }
 0x24e   :  { %v16577_v56 = vld [vmem:[#allocation7 + $0x844] sm:$0xf]  ;;  %v13559_v59 = vor.u32 %v16777_v41, %v13556_v38  ;;  %8602 = vmatpush.bf16.msrb.mxu2 %v13303_v53 }
 0x24f   :  { %v12756_v57 = vld [vmem:[#allocation7 + $0x860] sm:$0xf0] }
 0x250   :  { %v16641_v58 = vld [vmem:[#allocation7 + $0xa44] sm:$0xf]  ;;  %v12759_v3 = vor.u32 %v16577_v56, %v12756_v57  ;;  %8615 = vmatpush.bf16.msrb.mxu3 %v13559_v59 }
 0x251   :  { %v13012_v60 = vld [vmem:[#allocation7 + $0xa60] sm:$0xf0] }
 0x252   :  { %v16705_v61 = vld [vmem:[#allocation7 + $0xc44] sm:$0xf]  ;;  %v13015_v6 = vor.u32 %v16641_v58, %v13012_v60  ;;  %8577 = vmatpush.bf16.msrb.mxu0 %v12759_v3 }
 0x253   :  { %v13268_v63 = vld [vmem:[#allocation7 + $0xc60] sm:$0xf0] }
 0x254   :  { %v16769_v0 = vld [vmem:[#allocation7 + $0xe44] sm:$0xf]  ;;  %v13271_v8 = vor.u32 %v16705_v61, %v13268_v63  ;;  %8590 = vmatpush.bf16.msrb.mxu1 %v13015_v6 }
 0x255   :  { %v13524_v23 = vld [vmem:[#allocation7 + $0xe60] sm:$0xf0] }
 0x256   :  { %v16569_v33 = vld [vmem:[#allocation7 + $0x804] sm:$0xf]  ;;  %v13527_v15 = vor.u32 %v16769_v0, %v13524_v23  ;;  %8603 = vmatpush.bf16.msrb.mxu2 %v13271_v8 }
 0x257   :  { %v12724_v4 = vld [vmem:[#allocation7 + $0x820] sm:$0xf0] }
 0x258   :  { %v16633_v11 = vld [vmem:[#allocation7 + $0xa04] sm:$0xf]  ;;  %v12727_v7 = vor.u32 %v16569_v33, %v12724_v4  ;;  %8616 = vmatpush.bf16.msrb.mxu3 %v13527_v15 }
 0x259   :  { %v12980_v12 = vld [vmem:[#allocation7 + $0xa20] sm:$0xf0] }
 0x25a   :  { %v16697_v14 = vld [vmem:[#allocation7 + $0xc04] sm:$0xf]  ;;  %v12983_v25 = vor.u32 %v16633_v11, %v12980_v12  ;;  %8578 = vmatpush.bf16.msrb.mxu0 %v12727_v7  ;;  %v8385_v7 = vpop.f32.mrf.mxu1 }
 0x25b   :  { %v13236_v17 = vld [vmem:[#allocation7 + $0xc20] sm:$0xf0] }
 0x25c   :  { %v16761_v30 = vld [vmem:[#allocation7 + $0xe04] sm:$0xf]  ;;  %v13239_v28 = vor.u32 %v16697_v14, %v13236_v17  ;;  %8591 = vmatpush.bf16.msrb.mxu1 %v12983_v25 }
 0x25d   :  { %v13492_v18 = vld [vmem:[#allocation7 + $0xe20] sm:$0xf0]  ;;  %8579 = vmatmul.bf16.vlgmr.msrb.gmra.mxu0 %v17777_v51 }
 0x25e   :  { %v16881_v20 = vld [vmem:[#allocation7 + $0x11c4] sm:$0xf]  ;;  %v13495_v32 = vor.u32 %v16761_v30, %v13492_v18  ;;  %8604 = vmatpush.bf16.msrb.mxu2 %v13239_v28 }
 0x25f   :  { %v13972_v9 = vld [vmem:[#allocation7 + $0x11e0] sm:$0xf0]  ;;  %8592 = vmatmul.bf16.vlgmr.msrb.gmra.mxu1 %v17779_v43 }
 0x260   :  { %v16945_v21 = vld [vmem:[#allocation7 + $0x13c4] sm:$0xf]  ;;  %v13975_v36 = vor.u32 %v16881_v20, %v13972_v9  ;;  %8617 = vmatpush.bf16.msrb.mxu3 %v13495_v32 }
 0x261   :  { %v14228_v22 = vld [vmem:[#allocation7 + $0x13e0] sm:$0xf0]  ;;  %8605 = vmatmul.bf16.vlgmr.msrb.gmra.mxu2 %v17781_v45 }
 0x262   :  { %v17009_v24 = vld [vmem:[#allocation7 + $0x15c4] sm:$0xf]  ;;  %v14231_v27 = vor.u32 %v16945_v21, %v14228_v22  ;;  %8623 = vmatpush.bf16.msra.mxu0 %v13975_v36  ;;  %v8373_v21 = vadd.f32 %v8372_v19, %v17831_v48 }
 0x263   :  { %v14484_v50 = vld [vmem:[#allocation7 + $0x15e0] sm:$0xf0]  ;;  %8618 = vmatmul.bf16.vlgmr.msrb.gmra.mxu3 %v17783_v55 }
 0x264   :  { %v17073_v10 = vld [vmem:[#allocation7 + $0x17c4] sm:$0xf]  ;;  %v14487_v31 = vor.u32 %v17009_v24, %v14484_v50  ;;  %8636 = vmatpush.bf16.msra.mxu1 %v14231_v27 }
 0x265   :  { %v14740_v29 = vld [vmem:[#allocation7 + $0x17e0] sm:$0xf0] }
 0x266   :  { %v16873_v46 = vld [vmem:[#allocation7 + $0x1184] sm:$0xf]  ;;  %v14743_v41 = vor.u32 %v17073_v10, %v14740_v29  ;;  %8649 = vmatpush.bf16.msra.mxu2 %v14487_v31  ;;  %v8386_v29 = vadd.f32 %v8385_v7, %v8373_v21 }
 0x267   :  { %v13940_v39 = vld [vmem:[#allocation7 + $0x11a0] sm:$0xf0] }
 0x268   :  { %v16937_v40 = vld [vmem:[#allocation7 + $0x1384] sm:$0xf]  ;;  %v13943_v56 = vor.u32 %v16873_v46, %v13940_v39  ;;  %8662 = vmatpush.bf16.msra.mxu3 %v14743_v41 }
 0x269   :  { %v14196_v38 = vld [vmem:[#allocation7 + $0x13a0] sm:$0xf0] }
 0x26a   :  { %v17001_v44 = vld [vmem:[#allocation7 + $0x1584] sm:$0xf]  ;;  %v14199_v57 = vor.u32 %v16937_v40, %v14196_v38  ;;  %8624 = vmatpush.bf16.msra.mxu0 %v13943_v56 }
 0x26b   :  { %v14452_v47 = vld [vmem:[#allocation7 + $0x15a0] sm:$0xf0] }
 0x26c   :  { %v17065_v52 = vld [vmem:[#allocation7 + $0x1784] sm:$0xf]  ;;  %v14455_v58 = vor.u32 %v17001_v44, %v14452_v47  ;;  %8637 = vmatpush.bf16.msra.mxu1 %v14199_v57 }
 0x26d   :  { %v14708_v53 = vld [vmem:[#allocation7 + $0x17a0] sm:$0xf0] }
 0x26e   :  { %v16865_v59 = vld [vmem:[#allocation7 + $0x1144] sm:$0xf]  ;;  %v14711_v63 = vor.u32 %v17065_v52, %v14708_v53  ;;  %8650 = vmatpush.bf16.msra.mxu2 %v14455_v58  ;;  %v8398_v53 = vpop.f32.mrf.mxu2 }
 0x26f   :  { %v13908_v60 = vld [vmem:[#allocation7 + $0x1160] sm:$0xf0] }
 0x270   :  { %v16929_v61 = vld [vmem:[#allocation7 + $0x1344] sm:$0xf]  ;;  %v13911_v6 = vor.u32 %v16865_v59, %v13908_v60  ;;  %8663 = vmatpush.bf16.msra.mxu3 %v14711_v63  ;;  %v8399_v59 = vadd.f32 %v8398_v53, %v8386_v29  ;;  %v8411_v60 = vpop.f32.mrf.mxu3 }
 0x271   :  { %v14164_v0 = vld [vmem:[#allocation7 + $0x1360] sm:$0xf0] }
 0x272   :  { %v16993_v23 = vld [vmem:[#allocation7 + $0x1544] sm:$0xf]  ;;  %v14167_v8 = vor.u32 %v16929_v61, %v14164_v0  ;;  %8625 = vmatpush.bf16.msra.mxu0 %v13911_v6  ;;  %v8374_v61 = vpop.f32.mrf.mxu0 }
 0x273   :  { %v14420_v3 = vld [vmem:[#allocation7 + $0x1560] sm:$0xf0] }
 0x274   :  { %v17057_v33 = vld [vmem:[#allocation7 + $0x1744] sm:$0xf]  ;;  %v14423_v11 = vor.u32 %v16993_v23, %v14420_v3  ;;  %8638 = vmatpush.bf16.msra.mxu1 %v14167_v8  ;;  %v8387_v23 = vpop.f32.mrf.mxu1 }
 0x275   :  { %v14676_v4 = vld [vmem:[#allocation7 + $0x1760] sm:$0xf0] }
 0x276   :  { %v16857_v12 = vld [vmem:[#allocation7 + $0x1104] sm:$0xf]  ;;  %v14679_v16 = vor.u32 %v17057_v33, %v14676_v4  ;;  %8651 = vmatpush.bf16.msra.mxu2 %v14423_v11  ;;  %v17838_v33 = vadd.f32 %v8411_v60, %v8399_v59 }
 0x277   :  { %v13876_v14 = vld [vmem:[#allocation7 + $0x1120] sm:$0xf0] }
 0x278   :  { %v16921_v15 = vld [vmem:[#allocation7 + $0x1304] sm:$0xf]  ;;  %v13879_v22 = vor.u32 %v16857_v12, %v13876_v14  ;;  %8664 = vmatpush.bf16.msra.mxu3 %v14679_v16 }
 0x279   :  { %v14132_v17 = vld [vmem:[#allocation7 + $0x1320] sm:$0xf0] }
 0x27a   :  { %v16985_v30 = vld [vmem:[#allocation7 + $0x1504] sm:$0xf]  ;;  %v14135_v24 = vor.u32 %v16921_v15, %v14132_v17  ;;  %8626 = vmatpush.bf16.msra.mxu0 %v13879_v22 }
 0x27b   :  { %v14388_v18 = vld [vmem:[#allocation7 + $0x1520] sm:$0xf0] }
 0x27c   :  { %v17049_v20 = vld [vmem:[#allocation7 + $0x1704] sm:$0xf]  ;;  %v14391_v50 = vor.u32 %v16985_v30, %v14388_v18  ;;  %8639 = vmatpush.bf16.msra.mxu1 %v14135_v24 }
 0x27d   :  { %v14644_v9 = vld [vmem:[#allocation7 + $0x1720] sm:$0xf0] }
 0x27e   :  { %v16849_v25 = vld [vmem:[#allocation7 + $0x10c4] sm:$0xf]  ;;  %v14647_v32 = vor.u32 %v17049_v20, %v14644_v9  ;;  %8652 = vmatpush.bf16.msra.mxu2 %v14391_v50 }
 0x27f   :  { %v13844_v28 = vld [vmem:[#allocation7 + $0x10e0] sm:$0xf0] }
 0x280   :  { %v16913_v10 = vld [vmem:[#allocation7 + $0x12c4] sm:$0xf]  ;;  %v13847_v40 = vor.u32 %v16849_v25, %v13844_v28  ;;  %8665 = vmatpush.bf16.msra.mxu3 %v14647_v32  ;;  %v8400_v28 = vpop.f32.mrf.mxu2 }
 0x281   :  { %v14100_v36 = vld [vmem:[#allocation7 + $0x12e0] sm:$0xf0] }
 0x282   :  { %v16977_v27 = vld [vmem:[#allocation7 + $0x14c4] sm:$0xf]  ;;  %v14103_v48 = vor.u32 %v16913_v10, %v14100_v36  ;;  %8627 = vmatpush.bf16.msra.mxu0 %v13847_v40  ;;  %v8413_v36 = vpop.f32.mrf.mxu3 }
 0x283   :  { %v14356_v31 = vld [vmem:[#allocation7 + $0x14e0] sm:$0xf0]  ;;  %v8424_v36 = vpop.f32.mrf.mxu0 }
 0x284   :  { %v17041_v46 = vld [vmem:[#allocation7 + $0x16c4] sm:$0xf]  ;;  %v14359_v41 = vor.u32 %v16977_v27, %v14356_v31  ;;  %8640 = vmatpush.bf16.msra.mxu1 %v14103_v48 }
 0x285   :  { %v14612_v39 = vld [vmem:[#allocation7 + $0x16e0] sm:$0xf0] }
 0x286   :  { %v16841_v38 = vld [vmem:[#allocation7 + $0x1084] sm:$0xf]  ;;  %v14615_v52 = vor.u32 %v17041_v46, %v14612_v39  ;;  %8653 = vmatpush.bf16.msra.mxu2 %v14359_v41 }
 0x287   :  { %v13812_v44 = vld [vmem:[#allocation7 + $0x10a0] sm:$0xf0] }
 0x288   :  { %v16905_v47 = vld [vmem:[#allocation7 + $0x1284] sm:$0xf]  ;;  %v13815_v3 = vor.u32 %v16841_v38, %v13812_v44  ;;  %8666 = vmatpush.bf16.msra.mxu3 %v14615_v52 }
 0x289   :  { %v14068_v56 = vld [vmem:[#allocation7 + $0x12a0] sm:$0xf0] }
 0x28a   :  { %v16969_v57 = vld [vmem:[#allocation7 + $0x1484] sm:$0xf]  ;;  %v14071_v4 = vor.u32 %v16905_v47, %v14068_v56  ;;  %8628 = vmatpush.bf16.msra.mxu0 %v13815_v3 }
 0x28b   :  { %v14324_v58 = vld [vmem:[#allocation7 + $0x14a0] sm:$0xf0] }
 0x28c   :  { %v17033_v63 = vld [vmem:[#allocation7 + $0x1684] sm:$0xf]  ;;  %v14327_v6 = vor.u32 %v16969_v57, %v14324_v58  ;;  %8641 = vmatpush.bf16.msra.mxu1 %v14071_v4 }
 0x28d   :  { %v14580_v0 = vld [vmem:[#allocation7 + $0x16a0] sm:$0xf0] }
 0x28e   :  { %v16833_v8 = vld [vmem:[#allocation7 + $0x1044] sm:$0xf]  ;;  %v14583_v14 = vor.u32 %v17033_v63, %v14580_v0  ;;  %8654 = vmatpush.bf16.msra.mxu2 %v14327_v6 }
 0x28f   :  { %v13780_v11 = vld [vmem:[#allocation7 + $0x1060] sm:$0xf0] }
 0x290   :  { %v16897_v12 = vld [vmem:[#allocation7 + $0x1244] sm:$0xf]  ;;  %v13783_v19 = vor.u32 %v16833_v8, %v13780_v11  ;;  %8667 = vmatpush.bf16.msra.mxu3 %v14583_v14 }
 0x291   :  { %v14036_v15 = vld [vmem:[#allocation7 + $0x1260] sm:$0xf0] }
 0x292   :  { %v16961_v16 = vld [vmem:[#allocation7 + $0x1444] sm:$0xf]  ;;  %v14039_v21 = vor.u32 %v16897_v12, %v14036_v15  ;;  %8629 = vmatpush.bf16.msra.mxu0 %v13783_v19 }
 0x293   :  { %v14292_v17 = vld [vmem:[#allocation7 + $0x1460] sm:$0xf0] }
 0x294   :  { %v17025_v30 = vld [vmem:[#allocation7 + $0x1644] sm:$0xf]  ;;  %v14295_v7 = vor.u32 %v16961_v16, %v14292_v17  ;;  %8642 = vmatpush.bf16.msra.mxu1 %v14039_v21 }
 0x295   :  { %v14548_v18 = vld [vmem:[#allocation7 + $0x1660] sm:$0xf0] }
 0x296   :  { %v16825_v20 = vld [vmem:[#allocation7 + $0x1004] sm:$0xf]  ;;  %v14551_v25 = vor.u32 %v17025_v30, %v14548_v18  ;;  %8655 = vmatpush.bf16.msra.mxu2 %v14295_v7 }
 0x297   :  { %v13748_v9 = vld [vmem:[#allocation7 + $0x1020] sm:$0xf0] }
 0x298   :  { %v16889_v22 = vld [vmem:[#allocation7 + $0x1204] sm:$0xf]  ;;  %v13751_v39 = vor.u32 %v16825_v20, %v13748_v9  ;;  %8668 = vmatpush.bf16.msra.mxu3 %v14551_v25 }
 0x299   :  { %v14004_v24 = vld [vmem:[#allocation7 + $0x1220] sm:$0xf0] }
 0x29a   :  { %v16953_v50 = vld [vmem:[#allocation7 + $0x1404] sm:$0xf]  ;;  %v14007_v38 = vor.u32 %v16889_v22, %v14004_v24  ;;  %8630 = vmatpush.bf16.msra.mxu0 %v13751_v39  ;;  %v8437_v39 = vpop.f32.mrf.mxu1 }
 0x29b   :  { %v14260_v10 = vld [vmem:[#allocation7 + $0x1420] sm:$0xf0] }
 0x29c   :  { %v17017_v29 = vld [vmem:[#allocation7 + $0x1604] sm:$0xf]  ;;  %v14263_v44 = vor.u32 %v16953_v50, %v14260_v10  ;;  %8643 = vmatpush.bf16.msra.mxu1 %v14007_v38 }
 0x29d   :  { %v14516_v32 = vld [vmem:[#allocation7 + $0x1620] sm:$0xf0]  ;;  %8631 = vmatmul.bf16.vlgmr.msra.gmra.mxu0 %v17801_v5 }
 0x29e   :  { %v17137_v27 = vld [vmem:[#allocation7 + $0x19c4] sm:$0xf]  ;;  %v14519_v53 = vor.u32 %v17017_v29, %v14516_v32  ;;  %8656 = vmatpush.bf16.msra.mxu2 %v14263_v44 }
 0x29f   :  { %v14996_v31 = vld [vmem:[#allocation7 + $0x19e0] sm:$0xf0]  ;;  %8644 = vmatmul.bf16.vlgmr.msra.gmra.mxu1 %v17805_v2 }
 0x2a0   :  { %v17201_v46 = vld [vmem:[#allocation7 + $0x1bc4] sm:$0xf]  ;;  %v14999_v56 = vor.u32 %v17137_v27, %v14996_v31  ;;  %8669 = vmatpush.bf16.msra.mxu3 %v14519_v53 }
 0x2a1   :  { %v15252_v40 = vld [vmem:[#allocation7 + $0x1be0] sm:$0xf0]  ;;  %8657 = vmatmul.bf16.vlgmr.msra.gmra.mxu2 %v17799_v62 }
 0x2a2   :  { %v17265_v48 = vld [vmem:[#allocation7 + $0x1dc4] sm:$0xf]  ;;  %v15255_v57 = vor.u32 %v17201_v46, %v15252_v40  ;;  %8675 = vmatpush.bf16.msrb.mxu0 %v14999_v56  ;;  %v8425_v46 = vadd.f32 %v8424_v36, %v17838_v33 }
 0x2a3   :  { %v15508_v41 = vld [vmem:[#allocation7 + $0x1de0] sm:$0xf0]  ;;  %8670 = vmatmul.bf16.vlgmr.msra.gmra.mxu3 %v17803_v1 }
 0x2a4   :  { %v17329_v47 = vld [vmem:[#allocation7 + $0x1fc4] sm:$0xf]  ;;  %v15511_v58 = vor.u32 %v17265_v48, %v15508_v41  ;;  %8688 = vmatpush.bf16.msrb.mxu1 %v15255_v57 }
 0x2a5   :  { %v15764_v52 = vld [vmem:[#allocation7 + $0x1fe0] sm:$0xf0] }
 0x2a6   :  { %v17129_v59 = vld [vmem:[#allocation7 + $0x1984] sm:$0xf]  ;;  %v15767_v63 = vor.u32 %v17329_v47, %v15764_v52  ;;  %8701 = vmatpush.bf16.msrb.mxu2 %v15511_v58  ;;  %v8438_v52 = vadd.f32 %v8437_v39, %v8425_v46 }
 0x2a7   :  { %v14964_v60 = vld [vmem:[#allocation7 + $0x19a0] sm:$0xf0] }
 0x2a8   :  { %v17193_v61 = vld [vmem:[#allocation7 + $0x1b84] sm:$0xf]  ;;  %v14967_v8 = vor.u32 %v17129_v59, %v14964_v60  ;;  %8714 = vmatpush.bf16.msrb.mxu3 %v15767_v63 }
 0x2a9   :  { %v15220_v0 = vld [vmem:[#allocation7 + $0x1ba0] sm:$0xf0] }
 0x2aa   :  { %v17257_v23 = vld [vmem:[#allocation7 + $0x1d84] sm:$0xf]  ;;  %v15223_v11 = vor.u32 %v17193_v61, %v15220_v0  ;;  %8676 = vmatpush.bf16.msrb.mxu0 %v14967_v8 }
 0x2ab   :  { %v15476_v3 = vld [vmem:[#allocation7 + $0x1da0] sm:$0xf0] }
 0x2ac   :  { %v17321_v4 = vld [vmem:[#allocation7 + $0x1f84] sm:$0xf]  ;;  %v15479_v12 = vor.u32 %v17257_v23, %v15476_v3  ;;  %8689 = vmatpush.bf16.msrb.mxu1 %v15223_v11 }
 0x2ad   :  { %v15732_v6 = vld [vmem:[#allocation7 + $0x1fa0] sm:$0xf0] }
 0x2ae   :  { %v17121_v14 = vld [vmem:[#allocation7 + $0x1944] sm:$0xf]  ;;  %v15735_v17 = vor.u32 %v17321_v4, %v15732_v6  ;;  %8702 = vmatpush.bf16.msrb.mxu2 %v15479_v12  ;;  %v8450_v6 = vpop.f32.mrf.mxu2 }
 0x2af   :  { %v14932_v15 = vld [vmem:[#allocation7 + $0x1960] sm:$0xf0] }
 0x2b0   :  { %v17185_v16 = vld [vmem:[#allocation7 + $0x1b44] sm:$0xf]  ;;  %v14935_v21 = vor.u32 %v17121_v14, %v14932_v15  ;;  %8715 = vmatpush.bf16.msrb.mxu3 %v15735_v17  ;;  %v8451_v14 = vadd.f32 %v8450_v6, %v8438_v52  ;;  %v8426_v15 = vpop.f32.mrf.mxu0 }
 0x2b1   :  { %v15188_v30 = vld [vmem:[#allocation7 + $0x1b60] sm:$0xf0]  ;;  %v16366_v15 = vld [vmem:[#allocation7 + $0x1a4] sm:$0xf0] }
 0x2b2   :  { %v17249_v18 = vld [vmem:[#allocation7 + $0x1d44] sm:$0xf]  ;;  %v15191_v7 = vor.u32 %v17185_v16, %v15188_v30  ;;  %8677 = vmatpush.bf16.msrb.mxu0 %v14935_v21  ;;  %v8463_v16 = vpop.f32.mrf.mxu3 }
 0x2b3   :  { %v15444_v19 = vld [vmem:[#allocation7 + $0x1d60] sm:$0xf0] }
 0x2b4   :  { %v17313_v20 = vld [vmem:[#allocation7 + $0x1f44] sm:$0xf]  ;;  %v15447_v22 = vor.u32 %v17249_v18, %v15444_v19  ;;  %8690 = vmatpush.bf16.msrb.mxu1 %v15191_v7  ;;  %v8439_v18 = vpop.f32.mrf.mxu1 }
 0x2b5   :  { %v15700_v9 = vld [vmem:[#allocation7 + $0x1f60] sm:$0xf0]  ;;  %v12410_v18 = vld [vmem:[#allocation7 + $0x588] sm:$0xf] }
 0x2b6   :  { %v17113_v24 = vld [vmem:[#allocation7 + $0x1904] sm:$0xf]  ;;  %v15703_v28 = vor.u32 %v17313_v20, %v15700_v9  ;;  %8703 = vmatpush.bf16.msrb.mxu2 %v15447_v22  ;;  %v17845_v20 = vadd.f32 %v8463_v16, %v8451_v14  ;;  %v11898_v14 = vld [vmem:[#allocation7 + $0x188] sm:$0xf] }
 0x2b7   :  { %v14900_v50 = vld [vmem:[#allocation7 + $0x1920] sm:$0xf0]  ;;  %v12154_v16 = vld [vmem:[#allocation7 + $0x388] sm:$0xf] }
 0x2b8   :  { %v17177_v25 = vld [vmem:[#allocation7 + $0x1b04] sm:$0xf]  ;;  %v14903_v40 = vor.u32 %v17113_v24, %v14900_v50  ;;  %8716 = vmatpush.bf16.msrb.mxu3 %v15703_v28 }
 0x2b9   :  { %v15156_v10 = vld [vmem:[#allocation7 + $0x1b20] sm:$0xf0] }
 0x2ba   :  { %v17241_v29 = vld [vmem:[#allocation7 + $0x1d04] sm:$0xf]  ;;  %v15159_v48 = vor.u32 %v17177_v25, %v15156_v10  ;;  %8678 = vmatpush.bf16.msrb.mxu0 %v14903_v40 }
 0x2bb   :  { %v15412_v32 = vld [vmem:[#allocation7 + $0x1d20] sm:$0xf0] }
 0x2bc   :  { %v17305_v27 = vld [vmem:[#allocation7 + $0x1f04] sm:$0xf]  ;;  %v15415_v41 = vor.u32 %v17241_v29, %v15412_v32  ;;  %8691 = vmatpush.bf16.msrb.mxu1 %v15159_v48 }
 0x2bd   :  { %v15668_v31 = vld [vmem:[#allocation7 + $0x1f20] sm:$0xf0] }
 0x2be   :  { %v17105_v38 = vld [vmem:[#allocation7 + $0x18c4] sm:$0xf]  ;;  %v15671_v53 = vor.u32 %v17305_v27, %v15668_v31  ;;  %8704 = vmatpush.bf16.msrb.mxu2 %v15415_v41 }
 0x2bf   :  { %v14868_v44 = vld [vmem:[#allocation7 + $0x18e0] sm:$0xf0] }
 0x2c0   :  { %v17169_v47 = vld [vmem:[#allocation7 + $0x1ac4] sm:$0xf]  ;;  %v14871_v61 = vor.u32 %v17105_v38, %v14868_v44  ;;  %8717 = vmatpush.bf16.msrb.mxu3 %v15671_v53  ;;  %v8452_v53 = vpop.f32.mrf.mxu2 }
 0x2c1   :  { %v15124_v56 = vld [vmem:[#allocation7 + $0x1ae0] sm:$0xf0]  ;;  %v16478_v53 = vld [vmem:[#allocation7 + $0x524] sm:$0xf0] }
 0x2c2   :  { %v17233_v57 = vld [vmem:[#allocation7 + $0x1cc4] sm:$0xf]  ;;  %v15127_v33 = vor.u32 %v17169_v47, %v15124_v56  ;;  %8679 = vmatpush.bf16.msrb.mxu0 %v14871_v61  ;;  %v11930_v56 = vld [vmem:[#allocation7 + $0x1c8] sm:$0xf] }
 0x2c3   :  { %v15380_v58 = vld [vmem:[#allocation7 + $0x1ce0] sm:$0xf0]  ;;  %v16438_v61 = vld [vmem:[#allocation7 + $0x3e4] sm:$0xf0] }
 0x2c4   :  { %v17297_v59 = vld [vmem:[#allocation7 + $0x1ec4] sm:$0xf]  ;;  %v15383_v63 = vor.u32 %v17233_v57, %v15380_v58  ;;  %8692 = vmatpush.bf16.msrb.mxu1 %v15127_v33  ;;  %v16374_v57 = vld [vmem:[#allocation7 + $0x1e4] sm:$0xf0] }
 0x2c5   :  { %v15636_v60 = vld [vmem:[#allocation7 + $0x1ee0] sm:$0xf0]  ;;  %v12186_v58 = vld [vmem:[#allocation7 + $0x3c8] sm:$0xf] }
 0x2c6   :  { %v17097_v0 = vld [vmem:[#allocation7 + $0x1884] sm:$0xf]  ;;  %v15639_v4 = vor.u32 %v17297_v59, %v15636_v60  ;;  %8705 = vmatpush.bf16.msrb.mxu2 %v15383_v63  ;;  %v8465_v59 = vpop.f32.mrf.mxu3  ;;  %v12442_v33 = vld [vmem:[#allocation7 + $0x5c8] sm:$0xf] }
 0x2c7   :  { %v14836_v23 = vld [vmem:[#allocation7 + $0x18a0] sm:$0xf0]  ;;  %v16502_v63 = vld [vmem:[#allocation7 + $0x5e4] sm:$0xf0] }
 0x2c8   :  { %v17161_v3 = vld [vmem:[#allocation7 + $0x1a84] sm:$0xf]  ;;  %v14839_v19 = vor.u32 %v17097_v0, %v14836_v23  ;;  %8718 = vmatpush.bf16.msrb.mxu3 %v15639_v4  ;;  %v16566_v4 = vld [vmem:[#allocation7 + $0x7e4] sm:$0xf0] }
 0x2c9   :  { %v15092_v8 = vld [vmem:[#allocation7 + $0x1aa0] sm:$0xf0] }
 0x2ca   :  { %v17225_v11 = vld [vmem:[#allocation7 + $0x1c84] sm:$0xf]  ;;  %v15095_v9 = vor.u32 %v17161_v3, %v15092_v8  ;;  %8680 = vmatpush.bf16.msrb.mxu0 %v14839_v19  ;;  %v12698_v3 = vld [vmem:[#allocation7 + $0x7c8] sm:$0xf]  ;;  %v11931_v8 = vor.u32 %v16374_v57, %v11930_v56  ;;  %v8476_v56 = vpop.f32.mrf.mxu0 }
 0x2cb   :  { %v15348_v12 = vld [vmem:[#allocation7 + $0x1ca0] sm:$0xf0]  ;;  %v16494_v19 = vld [vmem:[#allocation7 + $0x5a4] sm:$0xf0]  ;;  %v8477_v59 = vadd.f32 %v8476_v56, %v17845_v20 }
 0x2cc   :  { %v17289_v17 = vld [vmem:[#allocation7 + $0x1e84] sm:$0xf]  ;;  %v15351_v21 = vor.u32 %v17225_v11, %v15348_v12  ;;  %8693 = vmatpush.bf16.msrb.mxu1 %v15095_v9  ;;  %v12187_v11 = vor.u32 %v16438_v61, %v12186_v58  ;;  %v12443_v12 = vor.u32 %v16502_v63, %v12442_v33  ;;  %v12666_v9 = vld [vmem:[#allocation7 + $0x788] sm:$0xf]  ;;  %v8489_v61 = vpop.f32.mrf.mxu1 }
 0x2cd   :  { %v15604_v30 = vld [vmem:[#allocation7 + $0x1ea0] sm:$0xf0]  ;;  %v12602_v57 = vld [vmem:[#allocation7 + $0x708] sm:$0xf] }
 0x2ce   :  { %v17089_v7 = vld [vmem:[#allocation7 + $0x1844] sm:$0xf]  ;;  %v15607_v50 = vor.u32 %v17289_v17, %v15604_v30  ;;  %8706 = vmatpush.bf16.msrb.mxu2 %v15351_v21  ;;  %v12699_v17 = vor.u32 %v16566_v4, %v12698_v3  ;;  %v16430_v30 = vld [vmem:[#allocation7 + $0x3a4] sm:$0xf0] }
 0x2cf   :  { %v14804_v22 = vld [vmem:[#allocation7 + $0x1860] sm:$0xf0]  ;;  %v16558_v21 = vld [vmem:[#allocation7 + $0x7a4] sm:$0xf0] }
 0x2d0   :  { %v17153_v24 = vld [vmem:[#allocation7 + $0x1a44] sm:$0xf]  ;;  %v14807_v36 = vor.u32 %v17089_v7, %v14804_v22  ;;  %8719 = vmatpush.bf16.msrb.mxu3 %v15607_v50  ;;  %v11899_v7 = vor.u32 %v16366_v15, %v11898_v14  ;;  %v12155_v22 = vor.u32 %v16430_v30, %v12154_v16  ;;  %v11866_v50 = vld [vmem:[#allocation7 + $0x148] sm:$0xf] }
 0x2d1   :  { %v15060_v25 = vld [vmem:[#allocation7 + $0x1a60] sm:$0xf0]  ;;  %v16542_v58 = vld [vmem:[#allocation7 + $0x724] sm:$0xf0] }
 0x2d2   :  { %v17217_v28 = vld [vmem:[#allocation7 + $0x1c44] sm:$0xf]  ;;  %v15063_v46 = vor.u32 %v17153_v24, %v15060_v25  ;;  %8681 = vmatpush.bf16.msrb.mxu0 %v14807_v36  ;;  %v12411_v24 = vor.u32 %v16494_v19, %v12410_v18  ;;  %v16358_v25 = vld [vmem:[#allocation7 + $0x164] sm:$0xf0]  ;;  %v12603_v4 = vor.u32 %v16542_v58, %v12602_v57 }
 0x2d3   :  { %v15316_v10 = vld [vmem:[#allocation7 + $0x1c60] sm:$0xf0]  ;;  %v16486_v36 = vld [vmem:[#allocation7 + $0x564] sm:$0xf0] }
 0x2d4   :  { %v17281_v29 = vld [vmem:[#allocation7 + $0x1e44] sm:$0xf]  ;;  %v15319_v39 = vor.u32 %v17217_v28, %v15316_v10  ;;  %8694 = vmatpush.bf16.msrb.mxu1 %v15063_v46  ;;  %v12122_v28 = vld [vmem:[#allocation7 + $0x348] sm:$0xf]  ;;  %v12667_v10 = vor.u32 %v16558_v21, %v12666_v9  ;;  %v11867_v46 = vor.u32 %v16358_v25, %v11866_v50  ;;  %v8478_v25 = vpop.f32.mrf.mxu0 }
 0x2d5   :  { %v15572_v32 = vld [vmem:[#allocation7 + $0x1e60] sm:$0xf0]  ;;  %v12058_v3 = vld [vmem:[#allocation7 + $0x2c8] sm:$0xf] }
 0x2d6   :  { %v17081_v27 = vld [vmem:[#allocation7 + $0x1804] sm:$0xf]  ;;  %v15575_v38 = vor.u32 %v17281_v29, %v15572_v32  ;;  %8707 = vmatpush.bf16.msrb.mxu2 %v15319_v39  ;;  %v16422_v29 = vld [vmem:[#allocation7 + $0x364] sm:$0xf0] }
 0x2d7   :  { %v14772_v31 = vld [vmem:[#allocation7 + $0x1820] sm:$0xf0]  ;;  %v12378_v32 = vld [vmem:[#allocation7 + $0x548] sm:$0xf]  ;;  %v12123_v39 = vor.u32 %v16422_v29, %v12122_v28 }
 0x2d8   :  { %v17145_v40 = vld [vmem:[#allocation7 + $0x1a04] sm:$0xf]  ;;  %v14775_v60 = vor.u32 %v17081_v27, %v14772_v31  ;;  %8720 = vmatpush.bf16.msrb.mxu3 %v15575_v38  ;;  %v12634_v27 = vld [vmem:[#allocation7 + $0x748] sm:$0xf] }
 0x2d9   :  { %v15028_v48 = vld [vmem:[#allocation7 + $0x1a20] sm:$0xf0]  ;;  %v16550_v31 = vld [vmem:[#allocation7 + $0x764] sm:$0xf0] }
 0x2da   :  { %v17209_v41 = vld [vmem:[#allocation7 + $0x1c04] sm:$0xf]  ;;  %v15031_v0 = vor.u32 %v17145_v40, %v15028_v48  ;;  %8682 = vmatpush.bf16.msrb.mxu0 %v14775_v60  ;;  %v12379_v40 = vor.u32 %v16486_v36, %v12378_v32  ;;  %v11834_v48 = vld [vmem:[#allocation7 + $0x108] sm:$0xf] }
 0x2db   :  { %v15284_v44 = vld [vmem:[#allocation7 + $0x1c20] sm:$0xf0]  ;;  %v12090_v38 = vld [vmem:[#allocation7 + $0x308] sm:$0xf] }
 0x2dc   :  { %v17273_v47 = vld [vmem:[#allocation7 + $0x1e04] sm:$0xf]  ;;  %v15287_v23 = vor.u32 %v17209_v41, %v15284_v44  ;;  %8695 = vmatpush.bf16.msrb.mxu1 %v15031_v0  ;;  %v16350_v41 = vld [vmem:[#allocation7 + $0x124] sm:$0xf0]  ;;  %v12635_v44 = vor.u32 %v16550_v31, %v12634_v27 }
 0x2dd   :  { %v15540_v52 = vld [vmem:[#allocation7 + $0x1e20] sm:$0xf0]  ;;  %8683 = vmatmul.bf16.vlgmr.msrb.gmra.mxu0 %v17813_v34  ;;  %v11835_v60 = vor.u32 %v16350_v41, %v11834_v48  ;;  %v11802_v0 = vld [vmem:[#allocation7 + $0xc8] sm:$0xf] }
 0x2de   :  { %v15543_v6 = vor.u32 %v17273_v47, %v15540_v52  ;;  %8708 = vmatpush.bf16.msrb.mxu2 %v15287_v23  ;;  %8727 = vmatpush.bf16.msra.mxu0 %v11931_v8  ;;  %v16414_v47 = vld [vmem:[#allocation7 + $0x324] sm:$0xf0] }
 0x2df   :  { %8696 = vmatmul.bf16.vlgmr.msrb.gmra.mxu1 %v17815_v13  ;;  %v12346_v52 = vld [vmem:[#allocation7 + $0x508] sm:$0xf]  ;;  %v12091_v33 = vor.u32 %v16414_v47, %v12090_v38 }
 0x2e0   :  { %8721 = vmatpush.bf16.msrb.mxu3 %v15543_v6  ;;  %8740 = vmatpush.bf16.msra.mxu1 %v12187_v11  ;;  %v12347_v63 = vor.u32 %v16478_v53, %v12346_v52  ;;  %v16342_v23 = vld [vmem:[#allocation7 + $0xe4] sm:$0xf0]  ;;  %v17852_v6 = vadd.f32 %v8489_v61, %v8477_v59 }
 0x2e1   :  { %8709 = vmatmul.bf16.vlgmr.msrb.gmra.mxu2 %v17821_v26  ;;  %v16406_v8 = vld [vmem:[#allocation7 + $0x2e4] sm:$0xf0]  ;;  %v11803_v20 = vor.u32 %v16342_v23, %v11802_v0 }
 0x2e2   :  { %8753 = vmatpush.bf16.msra.mxu2 %v12443_v12  ;;  %8728 = vmatpush.bf16.msra.mxu0 %v11899_v7  ;;  %v12314_v11 = vld [vmem:[#allocation7 + $0x4c8] sm:$0xf]  ;;  %v12059_v16 = vor.u32 %v16406_v8, %v12058_v3 }
 0x2e3   :  { %8722 = vmatmul.bf16.vlgmr.msrb.gmra.mxu3 %v17824_v49  ;;  %v16470_v12 = vld [vmem:[#allocation7 + $0x4e4] sm:$0xf0] }
 0x2e4   :  { %8766 = vmatpush.bf16.msra.mxu3 %v12699_v17  ;;  %8741 = vmatpush.bf16.msra.mxu1 %v12155_v22  ;;  %v12570_v14 = vld [vmem:[#allocation7 + $0x6c8] sm:$0xf]  ;;  %v12315_v17 = vor.u32 %v16470_v12, %v12314_v11 }
 0x2e5   :  { %v16534_v15 = vld [vmem:[#allocation7 + $0x6e4] sm:$0xf0] }
 0x2e6   :  { %8754 = vmatpush.bf16.msra.mxu2 %v12411_v24  ;;  %8729 = vmatpush.bf16.msra.mxu0 %v11867_v46  ;;  %v11770_v30 = vld [vmem:[#allocation7 + $0x88] sm:$0xf]  ;;  %v12571_v9 = vor.u32 %v16534_v15, %v12570_v14 }
 0x2e7   :  { %v16334_v18 = vld [vmem:[#allocation7 + $0xa4] sm:$0xf0] }
 0x2e8   :  { %8767 = vmatpush.bf16.msra.mxu3 %v12667_v10  ;;  %8742 = vmatpush.bf16.msra.mxu1 %v12123_v39  ;;  %v12026_v19 = vld [vmem:[#allocation7 + $0x288] sm:$0xf]  ;;  %v11771_v28 = vor.u32 %v16334_v18, %v11770_v30  ;;  %v8491_v10 = vpop.f32.mrf.mxu1 }
 0x2e9   :  { %v16398_v21 = vld [vmem:[#allocation7 + $0x2a4] sm:$0xf0] }
 0x2ea   :  { %8755 = vmatpush.bf16.msra.mxu2 %v12379_v40  ;;  %8730 = vmatpush.bf16.msra.mxu0 %v11835_v60  ;;  %v12282_v7 = vld [vmem:[#allocation7 + $0x488] sm:$0xf]  ;;  %v12027_v29 = vor.u32 %v16398_v21, %v12026_v19 }
 0x2eb   :  { %v16462_v22 = vld [vmem:[#allocation7 + $0x4a4] sm:$0xf0] }
 0x2ec   :  { %8768 = vmatpush.bf16.msra.mxu3 %v12635_v44  ;;  %8743 = vmatpush.bf16.msra.mxu1 %v12091_v33  ;;  %v12538_v24 = vld [vmem:[#allocation7 + $0x688] sm:$0xf]  ;;  %v12283_v32 = vor.u32 %v16462_v22, %v12282_v7  ;;  %v8502_v22 = vpop.f32.mrf.mxu2 }
 0x2ed   :  { %v16526_v50 = vld [vmem:[#allocation7 + $0x6a4] sm:$0xf0]  ;;  %v8503_v10 = vadd.f32 %v8502_v22, %v17852_v6 }
 0x2ee   :  { %8756 = vmatpush.bf16.msra.mxu2 %v12347_v63  ;;  %8731 = vmatpush.bf16.msra.mxu0 %v11803_v20  ;;  %v11738_v36 = vld [vmem:[#allocation7 + $0x48] sm:$0xf]  ;;  %v12539_v46 = vor.u32 %v16526_v50, %v12538_v24 }
 0x2ef   :  { %v16326_v27 = vld [vmem:[#allocation7 + $0x64] sm:$0xf0] }
 0x2f0   :  { %8769 = vmatpush.bf16.msra.mxu3 %v12603_v4  ;;  %8744 = vmatpush.bf16.msra.mxu1 %v12059_v16  ;;  %v11994_v31 = vld [vmem:[#allocation7 + $0x248] sm:$0xf]  ;;  %v11739_v44 = vor.u32 %v16326_v27, %v11738_v36 }
 0x2f1   :  { %v16390_v39 = vld [vmem:[#allocation7 + $0x264] sm:$0xf0] }
 0x2f2   :  { %8757 = vmatpush.bf16.msra.mxu2 %v12315_v17  ;;  %v12250_v40 = vld [vmem:[#allocation7 + $0x448] sm:$0xf]  ;;  %8732 = vmatpush.bf16.msra.mxu0 %v11771_v28  ;;  %v11995_v53 = vor.u32 %v16390_v39, %v11994_v31 }
 0x2f3   :  { %v16454_v48 = vld [vmem:[#allocation7 + $0x464] sm:$0xf0] }
 0x2f4   :  { %8770 = vmatpush.bf16.msra.mxu3 %v12571_v9  ;;  %v12506_v41 = vld [vmem:[#allocation7 + $0x648] sm:$0xf]  ;;  %8745 = vmatpush.bf16.msra.mxu1 %v12027_v29  ;;  %v12251_v56 = vor.u32 %v16454_v48, %v12250_v40 }
 0x2f5   :  { %v16518_v38 = vld [vmem:[#allocation7 + $0x664] sm:$0xf0] }
 0x2f6   :  { %v11706_v47 = vld [vmem:[#allocation7 + $0x8] sm:$0xf]  ;;  %8758 = vmatpush.bf16.msra.mxu2 %v12283_v32  ;;  %v12507_v60 = vor.u32 %v16518_v38, %v12506_v41  ;;  %8733 = vmatpush.bf16.msra.mxu0 %v11739_v44 }
 0x2f7   :  { %v16318_v52 = vld [vmem:[#allocation7 + $0x24] sm:$0xf0] }
 0x2f8   :  { %v11962_v57 = vld [vmem:[#allocation7 + $0x208] sm:$0xf]  ;;  %8771 = vmatpush.bf16.msra.mxu3 %v12539_v46  ;;  %v11707_v4 = vor.u32 %v16318_v52, %v11706_v47  ;;  %8746 = vmatpush.bf16.msra.mxu1 %v11995_v53  ;;  %v17417_v53 = vld [vmem:[#allocation8] sm:$0xff] }
 0x2f9   :  { %v16382_v58 = vld [vmem:[#allocation7 + $0x224] sm:$0xf0] }
 0x2fa   :  { %v12218_v59 = vld [vmem:[#allocation7 + $0x408] sm:$0xf]  ;;  %8759 = vmatpush.bf16.msra.mxu2 %v12251_v56  ;;  %v11963_v14 = vor.u32 %v16382_v58, %v11962_v57  ;;  %8734 = vmatpush.bf16.msra.mxu0 %v11707_v4  ;;  %v3176_v56 = vperm.slane %v17417_v53, 1  ;;  %v8515_v57 = vpop.f32.mrf.mxu3 }
 0x2fb   :  { %v16446_v61 = vld [vmem:[#allocation7 + $0x424] sm:$0xf0] }
 0x2fc   :  { %v12474_v33 = vld [vmem:[#allocation7 + $0x608] sm:$0xf]  ;;  %v12219_v15 = vor.u32 %v16446_v61, %v12218_v59  ;;  %8772 = vmatpush.bf16.msra.mxu3 %v12507_v60  ;;  %8747 = vmatpush.bf16.msra.mxu1 %v11963_v14  ;;  %v17859_v60 = vadd.f32 %v8515_v57, %v8503_v10 }
 0x2fd   :  { %v16510_v63 = vld [vmem:[#allocation7 + $0x624] sm:$0xf0]  ;;  %8735 = vmatmul.bf16.vlgmr.msra.gmra.mxu0 %v17751_v35 }
 0x2fe   :  { %v12954_v0 = vld [vmem:[#allocation7 + $0x9c8] sm:$0xf]  ;;  %v12475_v17 = vor.u32 %v16510_v63, %v12474_v33  ;;  %8760 = vmatpush.bf16.msra.mxu2 %v12219_v15 }
 0x2ff   :  { %v16630_v23 = vld [vmem:[#allocation7 + $0x9e4] sm:$0xf0]  ;;  %8748 = vmatmul.bf16.vlgmr.msra.gmra.mxu1 %v17753_v54 }
 0x300   :  { %v13210_v3 = vld [vmem:[#allocation7 + $0xbc8] sm:$0xf]  ;;  %v12955_v30 = vor.u32 %v16630_v23, %v12954_v0  ;;  %8773 = vmatpush.bf16.msra.mxu3 %v12475_v17  ;;  %v8504_v0 = vpop.f32.mrf.mxu2 }
 0x301   :  { %v16694_v8 = vld [vmem:[#allocation7 + $0xbe4] sm:$0xf0]  ;;  %8761 = vmatmul.bf16.vlgmr.msra.gmra.mxu2 %v17755_v37 }
 0x302   :  { %v13466_v11 = vld [vmem:[#allocation7 + $0xdc8] sm:$0xf]  ;;  %v13211_v18 = vor.u32 %v16694_v8, %v13210_v3  ;;  %8779 = vmatpush.bf16.msrb.mxu0 %v12955_v30 }
 0x303   :  { %v16758_v12 = vld [vmem:[#allocation7 + $0xde4] sm:$0xf0]  ;;  %8774 = vmatmul.bf16.vlgmr.msra.gmra.mxu3 %v17757_v42 }
 0x304   :  { %v13722_v20 = vld [vmem:[#allocation7 + $0xfc8] sm:$0xf]  ;;  %v13467_v19 = vor.u32 %v16758_v12, %v13466_v11  ;;  %8792 = vmatpush.bf16.msrb.mxu1 %v13211_v18  ;;  %v8528_v11 = vpop.f32.mrf.mxu0 }
 0x305   :  { %v16822_v16 = vld [vmem:[#allocation7 + $0xfe4] sm:$0xf0]  ;;  %v8529_v15 = vadd.f32 %v8528_v11, %v3176_v56 }
 0x306   :  { %v12922_v9 = vld [vmem:[#allocation7 + $0x988] sm:$0xf]  ;;  %v13723_v24 = vor.u32 %v16822_v16, %v13722_v20  ;;  %8805 = vmatpush.bf16.msrb.mxu2 %v13467_v19  ;;  %v8541_v20 = vpop.f32.mrf.mxu1 }
 0x307   :  { %v16622_v21 = vld [vmem:[#allocation7 + $0x9a4] sm:$0xf0] }
 0x308   :  { %v13178_v7 = vld [vmem:[#allocation7 + $0xb88] sm:$0xf]  ;;  %v12923_v36 = vor.u32 %v16622_v21, %v12922_v9  ;;  %8818 = vmatpush.bf16.msrb.mxu3 %v13723_v24  ;;  %v8542_v21 = vadd.f32 %v8541_v20, %v8529_v15 }
 0x309   :  { %v16686_v50 = vld [vmem:[#allocation7 + $0xba4] sm:$0xf0] }
 0x30a   :  { %v13434_v25 = vld [vmem:[#allocation7 + $0xd88] sm:$0xf]  ;;  %v13179_v27 = vor.u32 %v16686_v50, %v13178_v7  ;;  %8780 = vmatpush.bf16.msrb.mxu0 %v12923_v36 }
 0x30b   :  { %v16750_v28 = vld [vmem:[#allocation7 + $0xda4] sm:$0xf0] }
 0x30c   :  { %v13690_v29 = vld [vmem:[#allocation7 + $0xf88] sm:$0xf]  ;;  %v13435_v31 = vor.u32 %v16750_v28, %v13434_v25  ;;  %8793 = vmatpush.bf16.msrb.mxu1 %v13179_v27 }
 0x30d   :  { %v16814_v32 = vld [vmem:[#allocation7 + $0xfa4] sm:$0xf0] }
 0x30e   :  { %v12890_v46 = vld [vmem:[#allocation7 + $0x948] sm:$0xf]  ;;  %v13691_v48 = vor.u32 %v16814_v32, %v13690_v29  ;;  %8806 = vmatpush.bf16.msrb.mxu2 %v13435_v31  ;;  %v8517_v29 = vpop.f32.mrf.mxu3  ;;  %v8543_v53 = vpop.f32.mrf.mxu1 }
 0x30f   :  { %v16614_v39 = vld [vmem:[#allocation7 + $0x964] sm:$0xf0] }
 0x310   :  { %v13146_v40 = vld [vmem:[#allocation7 + $0xb48] sm:$0xf]  ;;  %v12891_v52 = vor.u32 %v16614_v39, %v12890_v46  ;;  %8819 = vmatpush.bf16.msrb.mxu3 %v13691_v48 }
 0x311   :  { %v16678_v41 = vld [vmem:[#allocation7 + $0xb64] sm:$0xf0] }
 0x312   :  { %v13402_v6 = vld [vmem:[#allocation7 + $0xd48] sm:$0xf]  ;;  %v13147_v58 = vor.u32 %v16678_v41, %v13146_v40  ;;  %8781 = vmatpush.bf16.msrb.mxu0 %v12891_v52 }
 0x313   :  { %v16742_v38 = vld [vmem:[#allocation7 + $0xd64] sm:$0xf0] }
 0x314   :  { %v13658_v44 = vld [vmem:[#allocation7 + $0xf48] sm:$0xf]  ;;  %v13403_v59 = vor.u32 %v16742_v38, %v13402_v6  ;;  %8794 = vmatpush.bf16.msrb.mxu1 %v13147_v58  ;;  %v8554_v6 = vpop.f32.mrf.mxu2  ;;  %v8530_v38 = vpop.f32.mrf.mxu0 }
 0x315   :  { %v16806_v47 = vld [vmem:[#allocation7 + $0xf64] sm:$0xf0]  ;;  %v8555_v52 = vadd.f32 %v8554_v6, %v8542_v21 }
 0x316   :  { %v12858_v61 = vld [vmem:[#allocation7 + $0x908] sm:$0xf]  ;;  %v13659_v23 = vor.u32 %v16806_v47, %v13658_v44  ;;  %8807 = vmatpush.bf16.msrb.mxu2 %v13403_v59 }
 0x317   :  { %v16606_v33 = vld [vmem:[#allocation7 + $0x924] sm:$0xf0] }
 0x318   :  { %v13114_v63 = vld [vmem:[#allocation7 + $0xb08] sm:$0xf]  ;;  %v12859_v16 = vor.u32 %v16606_v33, %v12858_v61  ;;  %8820 = vmatpush.bf16.msrb.mxu3 %v13659_v23 }
 0x319   :  { %v16670_v3 = vld [vmem:[#allocation7 + $0xb24] sm:$0xf0] }
 0x31a   :  { %v13370_v4 = vld [vmem:[#allocation7 + $0xd08] sm:$0xf]  ;;  %v13115_v17 = vor.u32 %v16670_v3, %v13114_v63  ;;  %8782 = vmatpush.bf16.msrb.mxu0 %v12859_v16 }
 0x31b   :  { %v16734_v8 = vld [vmem:[#allocation7 + $0xd24] sm:$0xf0] }
 0x31c   :  { %v13626_v12 = vld [vmem:[#allocation7 + $0xf08] sm:$0xf]  ;;  %v13371_v30 = vor.u32 %v16734_v8, %v13370_v4  ;;  %8795 = vmatpush.bf16.msrb.mxu1 %v13115_v17 }
 0x31d   :  { %v16798_v14 = vld [vmem:[#allocation7 + $0xf24] sm:$0xf0] }
 0x31e   :  { %v12826_v18 = vld [vmem:[#allocation7 + $0x8c8] sm:$0xf]  ;;  %v13627_v7 = vor.u32 %v16798_v14, %v13626_v12  ;;  %8808 = vmatpush.bf16.msrb.mxu2 %v13371_v30 }
 0x31f   :  { %v16598_v19 = vld [vmem:[#allocation7 + $0x8e4] sm:$0xf0] }
 0x320   :  { %v13082_v9 = vld [vmem:[#allocation7 + $0xac8] sm:$0xf]  ;;  %v12827_v10 = vor.u32 %v16598_v19, %v12826_v18  ;;  %8821 = vmatpush.bf16.msrb.mxu3 %v13627_v7  ;;  %v8567_v19 = vpop.f32.mrf.mxu3 }
 0x321   :  { %v16662_v22 = vld [vmem:[#allocation7 + $0xae4] sm:$0xf0] }
 0x322   :  { %v13338_v24 = vld [vmem:[#allocation7 + $0xcc8] sm:$0xf]  ;;  %v13083_v32 = vor.u32 %v16662_v22, %v13082_v9  ;;  %8783 = vmatpush.bf16.msrb.mxu0 %v12827_v10  ;;  %v8556_v22 = vpop.f32.mrf.mxu2 }
 0x323   :  { %v16726_v50 = vld [vmem:[#allocation7 + $0xce4] sm:$0xf0] }
 0x324   :  { %v13594_v25 = vld [vmem:[#allocation7 + $0xec8] sm:$0xf]  ;;  %v13339_v36 = vor.u32 %v16726_v50, %v13338_v24  ;;  %8796 = vmatpush.bf16.msrb.mxu1 %v13083_v32  ;;  %v17861_v24 = vadd.f32 %v8567_v19, %v8555_v52 }
 0x325   :  { %v16790_v28 = vld [vmem:[#allocation7 + $0xee4] sm:$0xf0] }
 0x326   :  { %v12794_v27 = vld [vmem:[#allocation7 + $0x888] sm:$0xf]  ;;  %v13595_v39 = vor.u32 %v16790_v28, %v13594_v25  ;;  %8809 = vmatpush.bf16.msrb.mxu2 %v13339_v36 }
 0x327   :  { %v16590_v31 = vld [vmem:[#allocation7 + $0x8a4] sm:$0xf0] }
 0x328   :  { %v13050_v46 = vld [vmem:[#allocation7 + $0xa88] sm:$0xf]  ;;  %v12795_v56 = vor.u32 %v16590_v31, %v12794_v27  ;;  %8822 = vmatpush.bf16.msrb.mxu3 %v13595_v39 }
 0x329   :  { %v16654_v40 = vld [vmem:[#allocation7 + $0xaa4] sm:$0xf0] }
 0x32a   :  { %v13306_v48 = vld [vmem:[#allocation7 + $0xc88] sm:$0xf]  ;;  %v13051_v57 = vor.u32 %v16654_v40, %v13050_v46  ;;  %8784 = vmatpush.bf16.msrb.mxu0 %v12795_v56 }
 0x32b   :  { %v16718_v41 = vld [vmem:[#allocation7 + $0xca4] sm:$0xf0] }
 0x32c   :  { %v13562_v44 = vld [vmem:[#allocation7 + $0xe88] sm:$0xf]  ;;  %v13307_v58 = vor.u32 %v16718_v41, %v13306_v48  ;;  %8797 = vmatpush.bf16.msrb.mxu1 %v13051_v57 }
 0x32d   :  { %v16782_v47 = vld [vmem:[#allocation7 + $0xea4] sm:$0xf0] }
 0x32e   :  { %v12762_v59 = vld [vmem:[#allocation7 + $0x848] sm:$0xf]  ;;  %v13563_v63 = vor.u32 %v16782_v47, %v13562_v44  ;;  %8810 = vmatpush.bf16.msrb.mxu2 %v13307_v58 }
 0x32f   :  { %v16582_v61 = vld [vmem:[#allocation7 + $0x864] sm:$0xf0] }
 0x330   :  { %v13018_v33 = vld [vmem:[#allocation7 + $0xa48] sm:$0xf]  ;;  %v12763_v11 = vor.u32 %v16582_v61, %v12762_v59  ;;  %8823 = vmatpush.bf16.msrb.mxu3 %v13563_v63 }
 0x331   :  { %v16646_v0 = vld [vmem:[#allocation7 + $0xa64] sm:$0xf0] }
 0x332   :  { %v13274_v23 = vld [vmem:[#allocation7 + $0xc48] sm:$0xf]  ;;  %v13019_v15 = vor.u32 %v16646_v0, %v13018_v33  ;;  %8785 = vmatpush.bf16.msrb.mxu0 %v12763_v11  ;;  %v8569_v33 = vpop.f32.mrf.mxu3 }
 0x333   :  { %v16710_v3 = vld [vmem:[#allocation7 + $0xc64] sm:$0xf0]  ;;  %v8606_v33 = vpop.f32.mrf.mxu2 }
 0x334   :  { %v13530_v4 = vld [vmem:[#allocation7 + $0xe48] sm:$0xf]  ;;  %v13275_v20 = vor.u32 %v16710_v3, %v13274_v23  ;;  %8798 = vmatpush.bf16.msrb.mxu1 %v13019_v15 }
 0x335   :  { %v16774_v8 = vld [vmem:[#allocation7 + $0xe64] sm:$0xf0] }
 0x336   :  { %v12730_v12 = vld [vmem:[#allocation7 + $0x808] sm:$0xf]  ;;  %v13531_v18 = vor.u32 %v16774_v8, %v13530_v4  ;;  %8811 = vmatpush.bf16.msrb.mxu2 %v13275_v20 }
 0x337   :  { %v16574_v14 = vld [vmem:[#allocation7 + $0x824] sm:$0xf0] }
 0x338   :  { %v12986_v16 = vld [vmem:[#allocation7 + $0xa08] sm:$0xf]  ;;  %v12731_v10 = vor.u32 %v16574_v14, %v12730_v12  ;;  %8824 = vmatpush.bf16.msrb.mxu3 %v13531_v18 }
 0x339   :  { %v16638_v17 = vld [vmem:[#allocation7 + $0xa24] sm:$0xf0] }
 0x33a   :  { %v13242_v30 = vld [vmem:[#allocation7 + $0xc08] sm:$0xf]  ;;  %v12987_v27 = vor.u32 %v16638_v17, %v12986_v16  ;;  %8786 = vmatpush.bf16.msrb.mxu0 %v12731_v10 }
 0x33b   :  { %v16702_v9 = vld [vmem:[#allocation7 + $0xc24] sm:$0xf0] }
 0x33c   :  { %v13498_v21 = vld [vmem:[#allocation7 + $0xe08] sm:$0xf]  ;;  %v13243_v31 = vor.u32 %v16702_v9, %v13242_v30  ;;  %8799 = vmatpush.bf16.msrb.mxu1 %v12987_v27 }
 0x33d   :  { %v16766_v7 = vld [vmem:[#allocation7 + $0xe24] sm:$0xf0]  ;;  %8787 = vmatmul.bf16.vlgmr.msrb.gmra.mxu0 %v17777_v51 }
 0x33e   :  { %v13978_v50 = vld [vmem:[#allocation7 + $0x11c8] sm:$0xf]  ;;  %v13499_v40 = vor.u32 %v16766_v7, %v13498_v21  ;;  %8812 = vmatpush.bf16.msrb.mxu2 %v13243_v31 }
 0x33f   :  { %v16886_v25 = vld [vmem:[#allocation7 + $0x11e4] sm:$0xf0]  ;;  %8800 = vmatmul.bf16.vlgmr.msrb.gmra.mxu1 %v17779_v43 }
 0x340   :  { %v14234_v28 = vld [vmem:[#allocation7 + $0x13c8] sm:$0xf]  ;;  %v13979_v48 = vor.u32 %v16886_v25, %v13978_v50  ;;  %8825 = vmatpush.bf16.msrb.mxu3 %v13499_v40  ;;  %v8580_v25 = vpop.f32.mrf.mxu0 }
 0x341   :  { %v16950_v29 = vld [vmem:[#allocation7 + $0x13e4] sm:$0xf0]  ;;  %8813 = vmatmul.bf16.vlgmr.msrb.gmra.mxu2 %v17781_v45 }
 0x342   :  { %v14490_v32 = vld [vmem:[#allocation7 + $0x15c8] sm:$0xf]  ;;  %v14235_v41 = vor.u32 %v16950_v29, %v14234_v28  ;;  %8831 = vmatpush.bf16.msra.mxu0 %v13979_v48  ;;  %v8581_v29 = vadd.f32 %v8580_v25, %v17861_v24 }
 0x343   :  { %v17014_v36 = vld [vmem:[#allocation7 + $0x15e4] sm:$0xf0]  ;;  %8826 = vmatmul.bf16.vlgmr.msrb.gmra.mxu3 %v17783_v55 }
 0x344   :  { %v14746_v46 = vld [vmem:[#allocation7 + $0x17c8] sm:$0xf]  ;;  %v14491_v6 = vor.u32 %v17014_v36, %v14490_v32  ;;  %8844 = vmatpush.bf16.msra.mxu1 %v14235_v41  ;;  %v8593_v32 = vpop.f32.mrf.mxu1 }
 0x345   :  { %v17078_v39 = vld [vmem:[#allocation7 + $0x17e4] sm:$0xf0]  ;;  %v8594_v48 = vadd.f32 %v8593_v32, %v8581_v29 }
 0x346   :  { %v13946_v38 = vld [vmem:[#allocation7 + $0x1188] sm:$0xf]  ;;  %v14747_v52 = vor.u32 %v17078_v39, %v14746_v46  ;;  %8857 = vmatpush.bf16.msra.mxu2 %v14491_v6 }
 0x347   :  { %v16878_v44 = vld [vmem:[#allocation7 + $0x11a4] sm:$0xf0] }
 0x348   :  { %v14202_v47 = vld [vmem:[#allocation7 + $0x1388] sm:$0xf]  ;;  %v13947_v61 = vor.u32 %v16878_v44, %v13946_v38  ;;  %8870 = vmatpush.bf16.msra.mxu3 %v14747_v52 }
 0x349   :  { %v16942_v53 = vld [vmem:[#allocation7 + $0x13a4] sm:$0xf0] }
 0x34a   :  { %v14458_v56 = vld [vmem:[#allocation7 + $0x1588] sm:$0xf]  ;;  %v14203_v63 = vor.u32 %v16942_v53, %v14202_v47  ;;  %8832 = vmatpush.bf16.msra.mxu0 %v13947_v61 }
 0x34b   :  { %v17006_v57 = vld [vmem:[#allocation7 + $0x15a4] sm:$0xf0] }
 0x34c   :  { %v14714_v58 = vld [vmem:[#allocation7 + $0x1788] sm:$0xf]  ;;  %v14459_v0 = vor.u32 %v17006_v57, %v14458_v56  ;;  %8845 = vmatpush.bf16.msra.mxu1 %v14203_v63 }
 0x34d   :  { %v17070_v59 = vld [vmem:[#allocation7 + $0x17a4] sm:$0xf0] }
 0x34e   :  { %v13914_v23 = vld [vmem:[#allocation7 + $0x1148] sm:$0xf]  ;;  %v14715_v8 = vor.u32 %v17070_v59, %v14714_v58  ;;  %8858 = vmatpush.bf16.msra.mxu2 %v14459_v0 }
 0x34f   :  { %v16870_v3 = vld [vmem:[#allocation7 + $0x1164] sm:$0xf0] }
 0x350   :  { %v14170_v4 = vld [vmem:[#allocation7 + $0x1348] sm:$0xf]  ;;  %v13915_v16 = vor.u32 %v16870_v3, %v13914_v23  ;;  %8871 = vmatpush.bf16.msra.mxu3 %v14715_v8  ;;  %v8607_v3 = vadd.f32 %v8606_v33, %v8594_v48  ;;  %v8582_v8 = vpop.f32.mrf.mxu0 }
 0x351   :  { %v16934_v11 = vld [vmem:[#allocation7 + $0x1364] sm:$0xf0] }
 0x352   :  { %v14426_v12 = vld [vmem:[#allocation7 + $0x1548] sm:$0xf]  ;;  %v14171_v17 = vor.u32 %v16934_v11, %v14170_v4  ;;  %8833 = vmatpush.bf16.msra.mxu0 %v13915_v16  ;;  %v8619_v4 = vpop.f32.mrf.mxu3 }
 0x353   :  { %v16998_v14 = vld [vmem:[#allocation7 + $0x1564] sm:$0xf0] }
 0x354   :  { %v14682_v15 = vld [vmem:[#allocation7 + $0x1748] sm:$0xf]  ;;  %v14427_v30 = vor.u32 %v16998_v14, %v14426_v12  ;;  %8846 = vmatpush.bf16.msra.mxu1 %v14171_v17  ;;  %v8595_v14 = vpop.f32.mrf.mxu1 }
 0x355   :  { %v17062_v20 = vld [vmem:[#allocation7 + $0x1764] sm:$0xf0] }
 0x356   :  { %v13882_v18 = vld [vmem:[#allocation7 + $0x1108] sm:$0xf]  ;;  %v14683_v21 = vor.u32 %v17062_v20, %v14682_v15  ;;  %8859 = vmatpush.bf16.msra.mxu2 %v14427_v30  ;;  %v17868_v20 = vadd.f32 %v8619_v4, %v8607_v3 }
 0x357   :  { %v16862_v19 = vld [vmem:[#allocation7 + $0x1124] sm:$0xf0] }
 0x358   :  { %v14138_v9 = vld [vmem:[#allocation7 + $0x1308] sm:$0xf]  ;;  %v13883_v36 = vor.u32 %v16862_v19, %v13882_v18  ;;  %8872 = vmatpush.bf16.msra.mxu3 %v14683_v21 }
 0x359   :  { %v16926_v7 = vld [vmem:[#allocation7 + $0x1324] sm:$0xf0] }
 0x35a   :  { %v14394_v22 = vld [vmem:[#allocation7 + $0x1508] sm:$0xf]  ;;  %v14139_v27 = vor.u32 %v16926_v7, %v14138_v9  ;;  %8834 = vmatpush.bf16.msra.mxu0 %v13883_v36 }
 0x35b   :  { %v16990_v50 = vld [vmem:[#allocation7 + $0x1524] sm:$0xf0] }
 0x35c   :  { %v14650_v28 = vld [vmem:[#allocation7 + $0x1708] sm:$0xf]  ;;  %v14395_v31 = vor.u32 %v16990_v50, %v14394_v22  ;;  %8847 = vmatpush.bf16.msra.mxu1 %v14139_v27 }
 0x35d   :  { %v17054_v10 = vld [vmem:[#allocation7 + $0x1724] sm:$0xf0] }
 0x35e   :  { %v13850_v46 = vld [vmem:[#allocation7 + $0x10c8] sm:$0xf]  ;;  %v14651_v41 = vor.u32 %v17054_v10, %v14650_v28  ;;  %8860 = vmatpush.bf16.msra.mxu2 %v14395_v31 }
 0x35f   :  { %v16854_v39 = vld [vmem:[#allocation7 + $0x10e4] sm:$0xf0] }
 0x360   :  { %v14106_v40 = vld [vmem:[#allocation7 + $0x12c8] sm:$0xf]  ;;  %v13851_v53 = vor.u32 %v16854_v39, %v13850_v46  ;;  %8873 = vmatpush.bf16.msra.mxu3 %v14651_v41 }
 0x361   :  { %v16918_v6 = vld [vmem:[#allocation7 + $0x12e4] sm:$0xf0] }
 0x362   :  { %v14362_v38 = vld [vmem:[#allocation7 + $0x14c8] sm:$0xf]  ;;  %v14107_v24 = vor.u32 %v16918_v6, %v14106_v40  ;;  %8835 = vmatpush.bf16.msra.mxu0 %v13851_v53  ;;  %v8608_v40 = vpop.f32.mrf.mxu2 }
 0x363   :  { %v16982_v44 = vld [vmem:[#allocation7 + $0x14e4] sm:$0xf0] }
 0x364   :  { %v14618_v47 = vld [vmem:[#allocation7 + $0x16c8] sm:$0xf]  ;;  %v14363_v56 = vor.u32 %v16982_v44, %v14362_v38  ;;  %8848 = vmatpush.bf16.msra.mxu1 %v14107_v24  ;;  %v8621_v38 = vpop.f32.mrf.mxu3 }
 0x365   :  { %v17046_v52 = vld [vmem:[#allocation7 + $0x16e4] sm:$0xf0] }
 0x366   :  { %v13818_v57 = vld [vmem:[#allocation7 + $0x1088] sm:$0xf]  ;;  %v14619_v61 = vor.u32 %v17046_v52, %v14618_v47  ;;  %8861 = vmatpush.bf16.msra.mxu2 %v14363_v56 }
 0x367   :  { %v16846_v58 = vld [vmem:[#allocation7 + $0x10a4] sm:$0xf0] }
 0x368   :  { %v14074_v59 = vld [vmem:[#allocation7 + $0x1288] sm:$0xf]  ;;  %v13819_v15 = vor.u32 %v16846_v58, %v13818_v57  ;;  %8874 = vmatpush.bf16.msra.mxu3 %v14619_v61 }
 0x369   :  { %v16910_v63 = vld [vmem:[#allocation7 + $0x12a4] sm:$0xf0] }
 0x36a   :  { %v14330_v0 = vld [vmem:[#allocation7 + $0x1488] sm:$0xf]  ;;  %v14075_v16 = vor.u32 %v16910_v63, %v14074_v59  ;;  %8836 = vmatpush.bf16.msra.mxu0 %v13819_v15 }
 0x36b   :  { %v16974_v23 = vld [vmem:[#allocation7 + $0x14a4] sm:$0xf0] }
 0x36c   :  { %v14586_v11 = vld [vmem:[#allocation7 + $0x1688] sm:$0xf]  ;;  %v14331_v17 = vor.u32 %v16974_v23, %v14330_v0  ;;  %8849 = vmatpush.bf16.msra.mxu1 %v14075_v16 }
 0x36d   :  { %v17038_v12 = vld [vmem:[#allocation7 + $0x16a4] sm:$0xf0] }
 0x36e   :  { %v13786_v30 = vld [vmem:[#allocation7 + $0x1048] sm:$0xf]  ;;  %v14587_v9 = vor.u32 %v17038_v12, %v14586_v11  ;;  %8862 = vmatpush.bf16.msra.mxu2 %v14331_v17 }
 0x36f   :  { %v16838_v18 = vld [vmem:[#allocation7 + $0x1064] sm:$0xf0] }
 0x370   :  { %v14042_v19 = vld [vmem:[#allocation7 + $0x1248] sm:$0xf]  ;;  %v13787_v28 = vor.u32 %v16838_v18, %v13786_v30  ;;  %8875 = vmatpush.bf16.msra.mxu3 %v14587_v9 }
 0x371   :  { %v16902_v21 = vld [vmem:[#allocation7 + $0x1264] sm:$0xf0] }
 0x372   :  { %v14298_v7 = vld [vmem:[#allocation7 + $0x1448] sm:$0xf]  ;;  %v14043_v32 = vor.u32 %v16902_v21, %v14042_v19  ;;  %8837 = vmatpush.bf16.msra.mxu0 %v13787_v28 }
 0x373   :  { %v16966_v22 = vld [vmem:[#allocation7 + $0x1464] sm:$0xf0] }
 0x374   :  { %v14554_v50 = vld [vmem:[#allocation7 + $0x1648] sm:$0xf]  ;;  %v14299_v36 = vor.u32 %v16966_v22, %v14298_v7  ;;  %8850 = vmatpush.bf16.msra.mxu1 %v14043_v32 }
 0x375   :  { %v17030_v25 = vld [vmem:[#allocation7 + $0x1664] sm:$0xf0] }
 0x376   :  { %v13754_v10 = vld [vmem:[#allocation7 + $0x1008] sm:$0xf]  ;;  %v14555_v39 = vor.u32 %v17030_v25, %v14554_v50  ;;  %8863 = vmatpush.bf16.msra.mxu2 %v14299_v36 }
 0x377   :  { %v16830_v29 = vld [vmem:[#allocation7 + $0x1024] sm:$0xf0] }
 0x378   :  { %v14010_v27 = vld [vmem:[#allocation7 + $0x1208] sm:$0xf]  ;;  %v13755_v53 = vor.u32 %v16830_v29, %v13754_v10  ;;  %8876 = vmatpush.bf16.msra.mxu3 %v14555_v39 }
 0x379   :  { %v16894_v31 = vld [vmem:[#allocation7 + $0x1224] sm:$0xf0] }
 0x37a   :  { %v14266_v46 = vld [vmem:[#allocation7 + $0x1408] sm:$0xf]  ;;  %v14011_v58 = vor.u32 %v16894_v31, %v14010_v27  ;;  %8838 = vmatpush.bf16.msra.mxu0 %v13755_v53 }
 0x37b   :  { %v16958_v48 = vld [vmem:[#allocation7 + $0x1424] sm:$0xf0] }
 0x37c   :  { %v14522_v41 = vld [vmem:[#allocation7 + $0x1608] sm:$0xf]  ;;  %v14267_v59 = vor.u32 %v16958_v48, %v14266_v46  ;;  %8851 = vmatpush.bf16.msra.mxu1 %v14011_v58 }
 0x37d   :  { %v17022_v6 = vld [vmem:[#allocation7 + $0x1624] sm:$0xf0]  ;;  %8839 = vmatmul.bf16.vlgmr.msra.gmra.mxu0 %v17801_v5 }
 0x37e   :  { %v15002_v44 = vld [vmem:[#allocation7 + $0x19c8] sm:$0xf]  ;;  %v14523_v63 = vor.u32 %v17022_v6, %v14522_v41  ;;  %8864 = vmatpush.bf16.msra.mxu2 %v14267_v59 }
 0x37f   :  { %v17142_v47 = vld [vmem:[#allocation7 + $0x19e4] sm:$0xf0]  ;;  %8852 = vmatmul.bf16.vlgmr.msra.gmra.mxu1 %v17805_v2 }
 0x380   :  { %v15258_v52 = vld [vmem:[#allocation7 + $0x1bc8] sm:$0xf]  ;;  %v15003_v0 = vor.u32 %v17142_v47, %v15002_v44  ;;  %8877 = vmatpush.bf16.msra.mxu3 %v14523_v63  ;;  %v8632_v44 = vpop.f32.mrf.mxu0 }
 0x381   :  { %v17206_v24 = vld [vmem:[#allocation7 + $0x1be4] sm:$0xf0]  ;;  %8865 = vmatmul.bf16.vlgmr.msra.gmra.mxu2 %v17799_v62  ;;  %v8633_v53 = vadd.f32 %v8632_v44, %v17868_v20 }
 0x382   :  { %v15514_v56 = vld [vmem:[#allocation7 + $0x1dc8] sm:$0xf]  ;;  %v15259_v23 = vor.u32 %v17206_v24, %v15258_v52  ;;  %8883 = vmatpush.bf16.msrb.mxu0 %v15003_v0  ;;  %v8645_v24 = vpop.f32.mrf.mxu1 }
 0x383   :  { %v17270_v57 = vld [vmem:[#allocation7 + $0x1de4] sm:$0xf0]  ;;  %8878 = vmatmul.bf16.vlgmr.msra.gmra.mxu3 %v17803_v1  ;;  %v8646_v63 = vadd.f32 %v8645_v24, %v8633_v53 }
 0x384   :  { %v15770_v61 = vld [vmem:[#allocation7 + $0x1fc8] sm:$0xf]  ;;  %v15515_v3 = vor.u32 %v17270_v57, %v15514_v56  ;;  %8896 = vmatpush.bf16.msrb.mxu1 %v15259_v23 }
 0x385   :  { %v17334_v33 = vld [vmem:[#allocation7 + $0x1fe4] sm:$0xf0] }
 0x386   :  { %v14970_v4 = vld [vmem:[#allocation7 + $0x1988] sm:$0xf]  ;;  %v15771_v12 = vor.u32 %v17334_v33, %v15770_v61  ;;  %8909 = vmatpush.bf16.msrb.mxu2 %v15515_v3 }
 0x387   :  { %v17134_v8 = vld [vmem:[#allocation7 + $0x19a4] sm:$0xf0] }
 0x388   :  { %v15226_v11 = vld [vmem:[#allocation7 + $0x1b88] sm:$0xf]  ;;  %v14971_v18 = vor.u32 %v17134_v8, %v14970_v4  ;;  %8922 = vmatpush.bf16.msrb.mxu3 %v15771_v12 }
 0x389   :  { %v17198_v14 = vld [vmem:[#allocation7 + $0x1ba4] sm:$0xf0] }
 0x38a   :  { %v15482_v15 = vld [vmem:[#allocation7 + $0x1d88] sm:$0xf]  ;;  %v15227_v19 = vor.u32 %v17198_v14, %v15226_v11  ;;  %8884 = vmatpush.bf16.msrb.mxu0 %v14971_v18  ;;  %v8658_v18 = vpop.f32.mrf.mxu2 }
 0x38b   :  { %v17262_v16 = vld [vmem:[#allocation7 + $0x1da4] sm:$0xf0] }
 0x38c   :  { %v15738_v17 = vld [vmem:[#allocation7 + $0x1f88] sm:$0xf]  ;;  %v15483_v9 = vor.u32 %v17262_v16, %v15482_v15  ;;  %8897 = vmatpush.bf16.msrb.mxu1 %v15227_v19 }
 0x38d   :  { %v17326_v30 = vld [vmem:[#allocation7 + $0x1fa4] sm:$0xf0] }
 0x38e   :  { %v14938_v21 = vld [vmem:[#allocation7 + $0x1948] sm:$0xf]  ;;  %v15739_v50 = vor.u32 %v17326_v30, %v15738_v17  ;;  %8910 = vmatpush.bf16.msrb.mxu2 %v15483_v9 }
 0x38f   :  { %v17126_v7 = vld [vmem:[#allocation7 + $0x1964] sm:$0xf0] }
 0x390   :  { %v15194_v22 = vld [vmem:[#allocation7 + $0x1b48] sm:$0xf]  ;;  %v14939_v36 = vor.u32 %v17126_v7, %v14938_v21  ;;  %8923 = vmatpush.bf16.msrb.mxu3 %v15739_v50  ;;  %v8659_v7 = vadd.f32 %v8658_v18, %v8646_v63  ;;  %v8634_v50 = vpop.f32.mrf.mxu0  ;;  %v12700_v18 = vld [vmem:[#allocation7 + $0x7e8] sm:$0xf0] }
 0x391   :  { %v17190_v25 = vld [vmem:[#allocation7 + $0x1b64] sm:$0xf0]  ;;  %v11900_v50 = vld [vmem:[#allocation7 + $0x1a8] sm:$0xf0] }
 0x392   :  { %v15450_v28 = vld [vmem:[#allocation7 + $0x1d48] sm:$0xf]  ;;  %v15195_v27 = vor.u32 %v17190_v25, %v15194_v22  ;;  %8885 = vmatpush.bf16.msrb.mxu0 %v14939_v36  ;;  %v8671_v22 = vpop.f32.mrf.mxu3 }
 0x393   :  { %v17254_v10 = vld [vmem:[#allocation7 + $0x1d64] sm:$0xf0] }
 0x394   :  { %v15706_v29 = vld [vmem:[#allocation7 + $0x1f48] sm:$0xf]  ;;  %v15451_v31 = vor.u32 %v17254_v10, %v15450_v28  ;;  %8898 = vmatpush.bf16.msrb.mxu1 %v15195_v27  ;;  %v8647_v10 = vpop.f32.mrf.mxu1 }
 0x395   :  { %v17318_v32 = vld [vmem:[#allocation7 + $0x1f64] sm:$0xf0]  ;;  %v12156_v10 = vld [vmem:[#allocation7 + $0x3a8] sm:$0xf0] }
 0x396   :  { %v14906_v46 = vld [vmem:[#allocation7 + $0x1908] sm:$0xf]  ;;  %v15707_v48 = vor.u32 %v17318_v32, %v15706_v29  ;;  %8911 = vmatpush.bf16.msrb.mxu2 %v15451_v31  ;;  %v17875_v32 = vadd.f32 %v8671_v22, %v8659_v7  ;;  %v16362_v22 = vld [vmem:[#allocation7 + $0x18c] sm:$0xf] }
 0x397   :  { %v17118_v39 = vld [vmem:[#allocation7 + $0x1924] sm:$0xf0] }
 0x398   :  { %v15162_v40 = vld [vmem:[#allocation7 + $0x1b08] sm:$0xf]  ;;  %v14907_v56 = vor.u32 %v17118_v39, %v14906_v46  ;;  %8924 = vmatpush.bf16.msrb.mxu3 %v15707_v48 }
 0x399   :  { %v17182_v41 = vld [vmem:[#allocation7 + $0x1b24] sm:$0xf0] }
 0x39a   :  { %v15418_v6 = vld [vmem:[#allocation7 + $0x1d08] sm:$0xf]  ;;  %v15163_v57 = vor.u32 %v17182_v41, %v15162_v40  ;;  %8886 = vmatpush.bf16.msrb.mxu0 %v14907_v56 }
 0x39b   :  { %v17246_v38 = vld [vmem:[#allocation7 + $0x1d24] sm:$0xf0] }
 0x39c   :  { %v15674_v47 = vld [vmem:[#allocation7 + $0x1f08] sm:$0xf]  ;;  %v15419_v58 = vor.u32 %v17246_v38, %v15418_v6  ;;  %8899 = vmatpush.bf16.msrb.mxu1 %v15163_v57 }
 0x39d   :  { %v17310_v52 = vld [vmem:[#allocation7 + $0x1f24] sm:$0xf0] }
 0x39e   :  { %v14874_v59 = vld [vmem:[#allocation7 + $0x18c8] sm:$0xf]  ;;  %v15675_v0 = vor.u32 %v17310_v52, %v15674_v47  ;;  %8912 = vmatpush.bf16.msrb.mxu2 %v15419_v58 }
 0x39f   :  { %v17110_v61 = vld [vmem:[#allocation7 + $0x18e4] sm:$0xf0] }
 0x3a0   :  { %v15130_v33 = vld [vmem:[#allocation7 + $0x1ac8] sm:$0xf]  ;;  %v14875_v12 = vor.u32 %v17110_v61, %v14874_v59  ;;  %8925 = vmatpush.bf16.msrb.mxu3 %v15675_v0 }
 0x3a1   :  { %v17174_v23 = vld [vmem:[#allocation7 + $0x1ae4] sm:$0xf0] }
 0x3a2   :  { %v15386_v3 = vld [vmem:[#allocation7 + $0x1cc8] sm:$0xf]  ;;  %v15131_v20 = vor.u32 %v17174_v23, %v15130_v33  ;;  %8887 = vmatpush.bf16.msrb.mxu0 %v14875_v12  ;;  %v8660_v33 = vpop.f32.mrf.mxu2 }
 0x3a3   :  { %v17238_v4 = vld [vmem:[#allocation7 + $0x1ce4] sm:$0xf0]  ;;  %v16410_v33 = vld [vmem:[#allocation7 + $0x30c] sm:$0xf] }
 0x3a4   :  { %v15642_v8 = vld [vmem:[#allocation7 + $0x1ec8] sm:$0xf]  ;;  %v15387_v14 = vor.u32 %v17238_v4, %v15386_v3  ;;  %8900 = vmatpush.bf16.msrb.mxu1 %v15131_v20  ;;  %v8673_v3 = vpop.f32.mrf.mxu3  ;;  %v16370_v4 = vld [vmem:[#allocation7 + $0x1cc] sm:$0xf] }
 0x3a5   :  { %v17302_v11 = vld [vmem:[#allocation7 + $0x1ee4] sm:$0xf0]  ;;  %v12188_v20 = vld [vmem:[#allocation7 + $0x3e8] sm:$0xf0] }
 0x3a6   :  { %v14842_v15 = vld [vmem:[#allocation7 + $0x1888] sm:$0xf]  ;;  %v15643_v30 = vor.u32 %v17302_v11, %v15642_v8  ;;  %8913 = vmatpush.bf16.msrb.mxu2 %v15387_v14  ;;  %v11932_v8 = vld [vmem:[#allocation7 + $0x1e8] sm:$0xf0] }
 0x3a7   :  { %v17102_v16 = vld [vmem:[#allocation7 + $0x18a4] sm:$0xf0]  ;;  %v16434_v11 = vld [vmem:[#allocation7 + $0x3cc] sm:$0xf] }
 0x3a8   :  { %v15098_v17 = vld [vmem:[#allocation7 + $0x1a88] sm:$0xf]  ;;  %v14843_v29 = vor.u32 %v17102_v16, %v14842_v15  ;;  %8926 = vmatpush.bf16.msrb.mxu3 %v15643_v30  ;;  %v16498_v14 = vld [vmem:[#allocation7 + $0x5cc] sm:$0xf] }
 0x3a9   :  { %v17166_v19 = vld [vmem:[#allocation7 + $0x1aa4] sm:$0xf0]  ;;  %v12444_v15 = vld [vmem:[#allocation7 + $0x5e8] sm:$0xf0] }
 0x3aa   :  { %v15354_v9 = vld [vmem:[#allocation7 + $0x1c88] sm:$0xf]  ;;  %v15099_v36 = vor.u32 %v17166_v19, %v15098_v17  ;;  %8888 = vmatpush.bf16.msrb.mxu0 %v14843_v29  ;;  %v16562_v30 = vld [vmem:[#allocation7 + $0x7cc] sm:$0xf]  ;;  %v12447_v7 = vor.u32 %v16498_v14, %v12444_v15 }
 0x3ab   :  { %v17230_v21 = vld [vmem:[#allocation7 + $0x1ca4] sm:$0xf0]  ;;  %v16490_v29 = vld [vmem:[#allocation7 + $0x58c] sm:$0xf] }
 0x3ac   :  { %v15610_v25 = vld [vmem:[#allocation7 + $0x1e88] sm:$0xf]  ;;  %v15355_v27 = vor.u32 %v17230_v21, %v15354_v9  ;;  %8901 = vmatpush.bf16.msrb.mxu1 %v15099_v36  ;;  %v11935_v9 = vor.u32 %v16370_v4, %v11932_v8  ;;  %v12191_v21 = vor.u32 %v16434_v11, %v12188_v20  ;;  %v12412_v36 = vld [vmem:[#allocation7 + $0x5a8] sm:$0xf0]  ;;  %v8684_v4 = vpop.f32.mrf.mxu0  ;;  %v8697_v20 = vpop.f32.mrf.mxu1 }
 0x3ad   :  { %v17294_v28 = vld [vmem:[#allocation7 + $0x1ea4] sm:$0xf0]  ;;  %v12348_v3 = vld [vmem:[#allocation7 + $0x528] sm:$0xf0] }
 0x3ae   :  { %v14810_v31 = vld [vmem:[#allocation7 + $0x1848] sm:$0xf]  ;;  %v15611_v40 = vor.u32 %v17294_v28, %v15610_v25  ;;  %8914 = vmatpush.bf16.msrb.mxu2 %v15355_v27  ;;  %v16426_v25 = vld [vmem:[#allocation7 + $0x38c] sm:$0xf]  ;;  %v12703_v28 = vor.u32 %v16562_v30, %v12700_v18 }
 0x3af   :  { %v17094_v46 = vld [vmem:[#allocation7 + $0x1864] sm:$0xf0]  ;;  %v16554_v27 = vld [vmem:[#allocation7 + $0x78c] sm:$0xf] }
 0x3b0   :  { %v15066_v39 = vld [vmem:[#allocation7 + $0x1a48] sm:$0xf]  ;;  %v14811_v47 = vor.u32 %v17094_v46, %v14810_v31  ;;  %8927 = vmatpush.bf16.msrb.mxu3 %v15611_v40  ;;  %v12668_v31 = vld [vmem:[#allocation7 + $0x7a8] sm:$0xf0]  ;;  %v11903_v46 = vor.u32 %v16362_v22, %v11900_v50  ;;  %v12415_v40 = vor.u32 %v16490_v29, %v12412_v36 }
 0x3b1   :  { %v17158_v48 = vld [vmem:[#allocation7 + $0x1a64] sm:$0xf0]  ;;  %v16538_v8 = vld [vmem:[#allocation7 + $0x70c] sm:$0xf] }
 0x3b2   :  { %v15322_v41 = vld [vmem:[#allocation7 + $0x1c48] sm:$0xf]  ;;  %v15067_v24 = vor.u32 %v17158_v48, %v15066_v39  ;;  %8889 = vmatpush.bf16.msrb.mxu0 %v14811_v47  ;;  %v12159_v39 = vor.u32 %v16426_v25, %v12156_v10  ;;  %v16354_v48 = vld [vmem:[#allocation7 + $0x14c] sm:$0xf] }
 0x3b3   :  { %v17222_v6 = vld [vmem:[#allocation7 + $0x1c64] sm:$0xf0]  ;;  %v16482_v47 = vld [vmem:[#allocation7 + $0x54c] sm:$0xf] }
 0x3b4   :  { %v15578_v38 = vld [vmem:[#allocation7 + $0x1e48] sm:$0xf]  ;;  %v15323_v56 = vor.u32 %v17222_v6, %v15322_v41  ;;  %8902 = vmatpush.bf16.msrb.mxu1 %v15067_v24  ;;  %v11868_v41 = vld [vmem:[#allocation7 + $0x168] sm:$0xf0] }
 0x3b5   :  { %v17286_v44 = vld [vmem:[#allocation7 + $0x1e64] sm:$0xf0]  ;;  %v16418_v6 = vld [vmem:[#allocation7 + $0x34c] sm:$0xf] }
 0x3b6   :  { %v14778_v52 = vld [vmem:[#allocation7 + $0x1808] sm:$0xf]  ;;  %v15579_v61 = vor.u32 %v17286_v44, %v15578_v38  ;;  %8915 = vmatpush.bf16.msrb.mxu2 %v15323_v56  ;;  %v12671_v38 = vor.u32 %v16554_v27, %v12668_v31  ;;  %v12124_v44 = vld [vmem:[#allocation7 + $0x368] sm:$0xf0]  ;;  %v11871_v56 = vor.u32 %v16354_v48, %v11868_v41 }
 0x3b7   :  { %v17086_v53 = vld [vmem:[#allocation7 + $0x1824] sm:$0xf0]  ;;  %v12636_v24 = vld [vmem:[#allocation7 + $0x768] sm:$0xf0] }
 0x3b8   :  { %v15034_v57 = vld [vmem:[#allocation7 + $0x1a08] sm:$0xf]  ;;  %v14779_v12 = vor.u32 %v17086_v53, %v14778_v52  ;;  %8928 = vmatpush.bf16.msrb.mxu3 %v15579_v61  ;;  %v12380_v52 = vld [vmem:[#allocation7 + $0x568] sm:$0xf0] }
 0x3b9   :  { %v17150_v58 = vld [vmem:[#allocation7 + $0x1a24] sm:$0xf0]  ;;  %v16546_v53 = vld [vmem:[#allocation7 + $0x74c] sm:$0xf] }
 0x3ba   :  { %v15290_v59 = vld [vmem:[#allocation7 + $0x1c08] sm:$0xf]  ;;  %v15035_v16 = vor.u32 %v17150_v58, %v15034_v57  ;;  %8890 = vmatpush.bf16.msrb.mxu0 %v14779_v12  ;;  %v12127_v57 = vor.u32 %v16418_v6, %v12124_v44  ;;  %v12383_v58 = vor.u32 %v16482_v47, %v12380_v52  ;;  %v11836_v61 = vld [vmem:[#allocation7 + $0x128] sm:$0xf0]  ;;  %v8685_v12 = vadd.f32 %v8684_v4, %v17875_v32  ;;  %v8723_v6 = vpop.f32.mrf.mxu3  ;;  %v8699_v52 = vpop.f32.mrf.mxu1 }
 0x3bb   :  { %v17214_v63 = vld [vmem:[#allocation7 + $0x1c24] sm:$0xf0]  ;;  %v12604_v11 = vld [vmem:[#allocation7 + $0x728] sm:$0xf0] }
 0x3bc   :  { %v15546_v0 = vld [vmem:[#allocation7 + $0x1e08] sm:$0xf]  ;;  %v15291_v17 = vor.u32 %v17214_v63, %v15290_v59  ;;  %8903 = vmatpush.bf16.msrb.mxu1 %v15035_v16  ;;  %v16346_v59 = vld [vmem:[#allocation7 + $0x10c] sm:$0xf]  ;;  %v12639_v63 = vor.u32 %v16546_v53, %v12636_v24 }
 0x3bd   :  { %v17278_v23 = vld [vmem:[#allocation7 + $0x1e24] sm:$0xf0]  ;;  %8891 = vmatmul.bf16.vlgmr.msrb.gmra.mxu0 %v17813_v34  ;;  %v11839_v14 = vor.u32 %v16346_v59, %v11836_v61  ;;  %v11804_v30 = vld [vmem:[#allocation7 + $0xe8] sm:$0xf0] }
 0x3be   :  { %v15547_v19 = vor.u32 %v17278_v23, %v15546_v0  ;;  %8916 = vmatpush.bf16.msrb.mxu2 %v15291_v17  ;;  %8935 = vmatpush.bf16.msra.mxu0 %v11935_v9  ;;  %v12092_v0 = vld [vmem:[#allocation7 + $0x328] sm:$0xf0]  ;;  %v12607_v9 = vor.u32 %v16538_v8, %v12604_v11 }
 0x3bf   :  { %8904 = vmatmul.bf16.vlgmr.msrb.gmra.mxu1 %v17815_v13  ;;  %v16474_v23 = vld [vmem:[#allocation7 + $0x50c] sm:$0xf]  ;;  %v12095_v15 = vor.u32 %v16410_v33, %v12092_v0 }
 0x3c0   :  { %8929 = vmatpush.bf16.msrb.mxu3 %v15547_v19  ;;  %8948 = vmatpush.bf16.msra.mxu1 %v12191_v21  ;;  %v12351_v16 = vor.u32 %v16474_v23, %v12348_v3  ;;  %v16338_v17 = vld [vmem:[#allocation7 + $0xcc] sm:$0xf]  ;;  %v8698_v19 = vadd.f32 %v8697_v20, %v8685_v12 }
 0x3c1   :  { %8917 = vmatmul.bf16.vlgmr.msrb.gmra.mxu2 %v17821_v26  ;;  %v16402_v18 = vld [vmem:[#allocation7 + $0x2cc] sm:$0xf] }
 0x3c2   :  { %8961 = vmatpush.bf16.msra.mxu2 %v12447_v7  ;;  %8936 = vmatpush.bf16.msra.mxu0 %v11903_v46  ;;  %v12060_v21 = vld [vmem:[#allocation7 + $0x2e8] sm:$0xf0]  ;;  %v8710_v46 = vpop.f32.mrf.mxu2 }
 0x3c3   :  { %8930 = vmatmul.bf16.vlgmr.msrb.gmra.mxu3 %v17824_v49  ;;  %v16466_v7 = vld [vmem:[#allocation7 + $0x4cc] sm:$0xf]  ;;  %v12063_v32 = vor.u32 %v16402_v18, %v12060_v21  ;;  %v8711_v41 = vadd.f32 %v8710_v46, %v8698_v19 }
 0x3c4   :  { %8974 = vmatpush.bf16.msra.mxu3 %v12703_v28  ;;  %8949 = vmatpush.bf16.msra.mxu1 %v12159_v39  ;;  %v12316_v22 = vld [vmem:[#allocation7 + $0x4e8] sm:$0xf0]  ;;  %v11807_v28 = vor.u32 %v16338_v17, %v11804_v30 }
 0x3c5   :  { %v16530_v50 = vld [vmem:[#allocation7 + $0x6cc] sm:$0xf]  ;;  %v12319_v10 = vor.u32 %v16466_v7, %v12316_v22  ;;  %v17882_v24 = vadd.f32 %v8723_v6, %v8711_v41  ;;  %v8725_v7 = vpop.f32.mrf.mxu3 }
 0x3c6   :  { %8962 = vmatpush.bf16.msra.mxu2 %v12415_v40  ;;  %8937 = vmatpush.bf16.msra.mxu0 %v11871_v56  ;;  %v12572_v25 = vld [vmem:[#allocation7 + $0x6e8] sm:$0xf0] }
 0x3c7   :  { %v16330_v29 = vld [vmem:[#allocation7 + $0x8c] sm:$0xf]  ;;  %v12575_v31 = vor.u32 %v16530_v50, %v12572_v25 }
 0x3c8   :  { %8975 = vmatpush.bf16.msra.mxu3 %v12671_v38  ;;  %8950 = vmatpush.bf16.msra.mxu1 %v12127_v57  ;;  %v11772_v36 = vld [vmem:[#allocation7 + $0xa8] sm:$0xf0]  ;;  %v8686_v38 = vpop.f32.mrf.mxu0 }
 0x3c9   :  { %v16394_v27 = vld [vmem:[#allocation7 + $0x28c] sm:$0xf]  ;;  %v11775_v53 = vor.u32 %v16330_v29, %v11772_v36 }
 0x3ca   :  { %8963 = vmatpush.bf16.msra.mxu2 %v12383_v58  ;;  %8938 = vmatpush.bf16.msra.mxu0 %v11839_v14  ;;  %v12028_v39 = vld [vmem:[#allocation7 + $0x2a8] sm:$0xf0]  ;;  %v8712_v18 = vpop.f32.mrf.mxu2 }
 0x3cb   :  { %v16458_v40 = vld [vmem:[#allocation7 + $0x48c] sm:$0xf]  ;;  %v12031_v56 = vor.u32 %v16394_v27, %v12028_v39 }
 0x3cc   :  { %8976 = vmatpush.bf16.msra.mxu3 %v12639_v63  ;;  %8951 = vmatpush.bf16.msra.mxu1 %v12095_v15  ;;  %v12284_v48 = vld [vmem:[#allocation7 + $0x4a8] sm:$0xf0] }
 0x3cd   :  { %v16522_v44 = vld [vmem:[#allocation7 + $0x68c] sm:$0xf]  ;;  %v12287_v57 = vor.u32 %v16458_v40, %v12284_v48 }
 0x3ce   :  { %8964 = vmatpush.bf16.msra.mxu2 %v12351_v16  ;;  %v12540_v47 = vld [vmem:[#allocation7 + $0x6a8] sm:$0xf0]  ;;  %8939 = vmatpush.bf16.msra.mxu0 %v11807_v28 }
 0x3cf   :  { %v16322_v58 = vld [vmem:[#allocation7 + $0x4c] sm:$0xf]  ;;  %v12543_v33 = vor.u32 %v16522_v44, %v12540_v47 }
 0x3d0   :  { %8977 = vmatpush.bf16.msra.mxu3 %v12607_v9  ;;  %8952 = vmatpush.bf16.msra.mxu1 %v12063_v32  ;;  %v11740_v59 = vld [vmem:[#allocation7 + $0x68] sm:$0xf0] }
 0x3d1   :  { %v16386_v61 = vld [vmem:[#allocation7 + $0x24c] sm:$0xf]  ;;  %v11743_v8 = vor.u32 %v16322_v58, %v11740_v59 }
 0x3d2   :  { %8965 = vmatpush.bf16.msra.mxu2 %v12319_v10  ;;  %v11996_v63 = vld [vmem:[#allocation7 + $0x268] sm:$0xf0]  ;;  %8940 = vmatpush.bf16.msra.mxu0 %v11775_v53 }
 0x3d3   :  { %v16450_v0 = vld [vmem:[#allocation7 + $0x44c] sm:$0xf]  ;;  %v11999_v20 = vor.u32 %v16386_v61, %v11996_v63 }
 0x3d4   :  { %8978 = vmatpush.bf16.msra.mxu3 %v12575_v31  ;;  %v12252_v23 = vld [vmem:[#allocation7 + $0x468] sm:$0xf0]  ;;  %8953 = vmatpush.bf16.msra.mxu1 %v12031_v56 }
 0x3d5   :  { %v16514_v3 = vld [vmem:[#allocation7 + $0x64c] sm:$0xf]  ;;  %v12255_v14 = vor.u32 %v16450_v0, %v12252_v23 }
 0x3d6   :  { %v12508_v4 = vld [vmem:[#allocation7 + $0x668] sm:$0xf0]  ;;  %8966 = vmatpush.bf16.msra.mxu2 %v12287_v57  ;;  %8941 = vmatpush.bf16.msra.mxu0 %v11743_v8 }
 0x3d7   :  { %v16314_v11 = vld [vmem:[#allocation7 + $0xc] sm:$0xf]  ;;  %v12511_v30 = vor.u32 %v16514_v3, %v12508_v4 }
 0x3d8   :  { %v11708_v12 = vld [vmem:[#allocation7 + $0x28] sm:$0xf0]  ;;  %8979 = vmatpush.bf16.msra.mxu3 %v12543_v33  ;;  %8954 = vmatpush.bf16.msra.mxu1 %v11999_v20 }
 0x3d9   :  { %v16378_v15 = vld [vmem:[#allocation7 + $0x20c] sm:$0xf]  ;;  %v11711_v28 = vor.u32 %v16314_v11, %v11708_v12 }
 0x3da   :  { %v11964_v16 = vld [vmem:[#allocation7 + $0x228] sm:$0xf0]  ;;  %8967 = vmatpush.bf16.msra.mxu2 %v12255_v14 }
 0x3db   :  { %v16442_v17 = vld [vmem:[#allocation7 + $0x40c] sm:$0xf]  ;;  %v11967_v36 = vor.u32 %v16378_v15, %v11964_v16  ;;  %8942 = vmatpush.bf16.msra.mxu0 %v11711_v28  ;;  %v17418_v15 = vld [vmem:[#allocation8] sm:$0xff] }
 0x3dc   :  { %v12220_v19 = vld [vmem:[#allocation7 + $0x428] sm:$0xf0]  ;;  %8980 = vmatpush.bf16.msra.mxu3 %v12511_v30  ;;  %v3177_v16 = vperm.slane %v17418_v15, 2 }
 0x3dd   :  { %v16506_v9 = vld [vmem:[#allocation7 + $0x60c] sm:$0xf]  ;;  %v12223_v27 = vor.u32 %v16442_v17, %v12220_v19  ;;  %8955 = vmatpush.bf16.msra.mxu1 %v11967_v36 }
 0x3de   :  { %v12476_v21 = vld [vmem:[#allocation7 + $0x628] sm:$0xf0]  ;;  %8943 = vmatmul.bf16.vlgmr.msra.gmra.mxu0 %v17751_v35 }
 0x3df   :  { %v16626_v22 = vld [vmem:[#allocation7 + $0x9cc] sm:$0xf]  ;;  %v12479_v39 = vor.u32 %v16506_v9, %v12476_v21  ;;  %8968 = vmatpush.bf16.msra.mxu2 %v12223_v27 }
 0x3e0   :  { %v12956_v50 = vld [vmem:[#allocation7 + $0x9e8] sm:$0xf0]  ;;  %8956 = vmatmul.bf16.vlgmr.msra.gmra.mxu1 %v17753_v54 }
 0x3e1   :  { %v16690_v25 = vld [vmem:[#allocation7 + $0xbcc] sm:$0xf]  ;;  %v12959_v40 = vor.u32 %v16626_v22, %v12956_v50  ;;  %8981 = vmatpush.bf16.msra.mxu3 %v12479_v39 }
 0x3e2   :  { %v13212_v32 = vld [vmem:[#allocation7 + $0xbe8] sm:$0xf0]  ;;  %8969 = vmatmul.bf16.vlgmr.msra.gmra.mxu2 %v17755_v37 }
 0x3e3   :  { %v16754_v10 = vld [vmem:[#allocation7 + $0xdcc] sm:$0xf]  ;;  %v13215_v48 = vor.u32 %v16690_v25, %v13212_v32  ;;  %8987 = vmatpush.bf16.msrb.mxu0 %v12959_v40  ;;  %v8736_v25 = vpop.f32.mrf.mxu0 }
 0x3e4   :  { %v13468_v29 = vld [vmem:[#allocation7 + $0xde8] sm:$0xf0]  ;;  %8982 = vmatmul.bf16.vlgmr.msra.gmra.mxu3 %v17757_v42 }
 0x3e5   :  { %v16818_v31 = vld [vmem:[#allocation7 + $0xfcc] sm:$0xf]  ;;  %v13471_v41 = vor.u32 %v16754_v10, %v13468_v29  ;;  %9000 = vmatpush.bf16.msrb.mxu1 %v13215_v48  ;;  %v8737_v10 = vadd.f32 %v8736_v25, %v3177_v16  ;;  %v8749_v29 = vpop.f32.mrf.mxu1 }
 0x3e6   :  { %v13724_v46 = vld [vmem:[#allocation7 + $0xfe8] sm:$0xf0] }
 0x3e7   :  { %v16618_v6 = vld [vmem:[#allocation7 + $0x98c] sm:$0xf]  ;;  %v13727_v47 = vor.u32 %v16818_v31, %v13724_v46  ;;  %9013 = vmatpush.bf16.msrb.mxu2 %v13471_v41  ;;  %v8750_v48 = vadd.f32 %v8749_v29, %v8737_v10 }
 0x3e8   :  { %v12924_v38 = vld [vmem:[#allocation7 + $0x9a8] sm:$0xf0] }
 0x3e9   :  { %v16682_v44 = vld [vmem:[#allocation7 + $0xb8c] sm:$0xf]  ;;  %v12927_v59 = vor.u32 %v16618_v6, %v12924_v38  ;;  %9026 = vmatpush.bf16.msrb.mxu3 %v13727_v47 }
 0x3ea   :  { %v13180_v52 = vld [vmem:[#allocation7 + $0xba8] sm:$0xf0] }
 0x3eb   :  { %v16746_v53 = vld [vmem:[#allocation7 + $0xd8c] sm:$0xf]  ;;  %v13183_v61 = vor.u32 %v16682_v44, %v13180_v52  ;;  %8988 = vmatpush.bf16.msrb.mxu0 %v12927_v59 }
 0x3ec   :  { %v13436_v56 = vld [vmem:[#allocation7 + $0xda8] sm:$0xf0] }
 0x3ed   :  { %v16810_v57 = vld [vmem:[#allocation7 + $0xf8c] sm:$0xf]  ;;  %v13439_v33 = vor.u32 %v16746_v53, %v13436_v56  ;;  %9001 = vmatpush.bf16.msrb.mxu1 %v13183_v61 }
 0x3ee   :  { %v13692_v58 = vld [vmem:[#allocation7 + $0xfa8] sm:$0xf0] }
 0x3ef   :  { %v16610_v63 = vld [vmem:[#allocation7 + $0x94c] sm:$0xf]  ;;  %v13695_v3 = vor.u32 %v16810_v57, %v13692_v58  ;;  %9014 = vmatpush.bf16.msrb.mxu2 %v13439_v33 }
 0x3f0   :  { %v12892_v0 = vld [vmem:[#allocation7 + $0x968] sm:$0xf0] }
 0x3f1   :  { %v16674_v23 = vld [vmem:[#allocation7 + $0xb4c] sm:$0xf]  ;;  %v12895_v14 = vor.u32 %v16610_v63, %v12892_v0  ;;  %9027 = vmatpush.bf16.msrb.mxu3 %v13695_v3  ;;  %v8762_v63 = vpop.f32.mrf.mxu2 }
 0x3f2   :  { %v13148_v4 = vld [vmem:[#allocation7 + $0xb68] sm:$0xf0] }
 0x3f3   :  { %v16738_v8 = vld [vmem:[#allocation7 + $0xd4c] sm:$0xf]  ;;  %v13151_v17 = vor.u32 %v16674_v23, %v13148_v4  ;;  %8989 = vmatpush.bf16.msrb.mxu0 %v12895_v14  ;;  %v8763_v4 = vadd.f32 %v8762_v63, %v8750_v48  ;;  %v8751_v14 = vpop.f32.mrf.mxu1 }
 0x3f4   :  { %v13404_v11 = vld [vmem:[#allocation7 + $0xd68] sm:$0xf0] }
 0x3f5   :  { %v16802_v12 = vld [vmem:[#allocation7 + $0xf4c] sm:$0xf]  ;;  %v13407_v30 = vor.u32 %v16738_v8, %v13404_v11  ;;  %9002 = vmatpush.bf16.msrb.mxu1 %v13151_v17  ;;  %v8775_v8 = vpop.f32.mrf.mxu3  ;;  %v8738_v11 = vpop.f32.mrf.mxu0 }
 0x3f6   :  { %v13660_v20 = vld [vmem:[#allocation7 + $0xf68] sm:$0xf0]  ;;  %v17888_v16 = vadd.f32 %v8775_v8, %v8763_v4 }
 0x3f7   :  { %v16602_v18 = vld [vmem:[#allocation7 + $0x90c] sm:$0xf]  ;;  %v13663_v21 = vor.u32 %v16802_v12, %v13660_v20  ;;  %9015 = vmatpush.bf16.msrb.mxu2 %v13407_v30 }
 0x3f8   :  { %v12860_v19 = vld [vmem:[#allocation7 + $0x928] sm:$0xf0] }
 0x3f9   :  { %v16666_v9 = vld [vmem:[#allocation7 + $0xb0c] sm:$0xf]  ;;  %v12863_v36 = vor.u32 %v16602_v18, %v12860_v19  ;;  %9028 = vmatpush.bf16.msrb.mxu3 %v13663_v21  ;;  %v8764_v48 = vpop.f32.mrf.mxu2 }
 0x3fa   :  { %v13116_v7 = vld [vmem:[#allocation7 + $0xb28] sm:$0xf0] }
 0x3fb   :  { %v16730_v22 = vld [vmem:[#allocation7 + $0xd0c] sm:$0xf]  ;;  %v13119_v27 = vor.u32 %v16666_v9, %v13116_v7  ;;  %8990 = vmatpush.bf16.msrb.mxu0 %v12863_v36 }
 0x3fc   :  { %v13372_v50 = vld [vmem:[#allocation7 + $0xd28] sm:$0xf0] }
 0x3fd   :  { %v16794_v28 = vld [vmem:[#allocation7 + $0xf0c] sm:$0xf]  ;;  %v13375_v31 = vor.u32 %v16730_v22, %v13372_v50  ;;  %9003 = vmatpush.bf16.msrb.mxu1 %v13119_v27 }
 0x3fe   :  { %v13628_v32 = vld [vmem:[#allocation7 + $0xf28] sm:$0xf0] }
 0x3ff   :  { %v16594_v46 = vld [vmem:[#allocation7 + $0x8cc] sm:$0xf]  ;;  %v13631_v41 = vor.u32 %v16794_v28, %v13628_v32  ;;  %9016 = vmatpush.bf16.msrb.mxu2 %v13375_v31 }
 0x400   :  { %v12828_v39 = vld [vmem:[#allocation7 + $0x8e8] sm:$0xf0] }
 0x401   :  { %v16658_v40 = vld [vmem:[#allocation7 + $0xacc] sm:$0xf]  ;;  %v12831_v53 = vor.u32 %v16594_v46, %v12828_v39  ;;  %9029 = vmatpush.bf16.msrb.mxu3 %v13631_v41 }
 0x402   :  { %v13084_v6 = vld [vmem:[#allocation7 + $0xae8] sm:$0xf0] }
 0x403   :  { %v16722_v38 = vld [vmem:[#allocation7 + $0xccc] sm:$0xf]  ;;  %v13087_v56 = vor.u32 %v16658_v40, %v13084_v6  ;;  %8991 = vmatpush.bf16.msrb.mxu0 %v12831_v53 }
 0x404   :  { %v13340_v44 = vld [vmem:[#allocation7 + $0xce8] sm:$0xf0] }
 0x405   :  { %v16786_v47 = vld [vmem:[#allocation7 + $0xecc] sm:$0xf]  ;;  %v13343_v57 = vor.u32 %v16722_v38, %v13340_v44  ;;  %9004 = vmatpush.bf16.msrb.mxu1 %v13087_v56  ;;  %v8777_v44 = vpop.f32.mrf.mxu3 }
 0x406   :  { %v13596_v52 = vld [vmem:[#allocation7 + $0xee8] sm:$0xf0] }
 0x407   :  { %v16586_v58 = vld [vmem:[#allocation7 + $0x88c] sm:$0xf]  ;;  %v13599_v33 = vor.u32 %v16786_v47, %v13596_v52  ;;  %9017 = vmatpush.bf16.msrb.mxu2 %v13343_v57 }
 0x408   :  { %v12796_v59 = vld [vmem:[#allocation7 + $0x8a8] sm:$0xf0] }
 0x409   :  { %v16650_v61 = vld [vmem:[#allocation7 + $0xa8c] sm:$0xf]  ;;  %v12799_v15 = vor.u32 %v16586_v58, %v12796_v59  ;;  %9030 = vmatpush.bf16.msrb.mxu3 %v13599_v33 }
 0x40a   :  { %v13052_v0 = vld [vmem:[#allocation7 + $0xaa8] sm:$0xf0] }
 0x40b   :  { %v16714_v23 = vld [vmem:[#allocation7 + $0xc8c] sm:$0xf]  ;;  %v13055_v17 = vor.u32 %v16650_v61, %v13052_v0  ;;  %8992 = vmatpush.bf16.msrb.mxu0 %v12799_v15 }
 0x40c   :  { %v13308_v3 = vld [vmem:[#allocation7 + $0xca8] sm:$0xf0] }
 0x40d   :  { %v16778_v12 = vld [vmem:[#allocation7 + $0xe8c] sm:$0xf]  ;;  %v13311_v30 = vor.u32 %v16714_v23, %v13308_v3  ;;  %9005 = vmatpush.bf16.msrb.mxu1 %v13055_v17 }
 0x40e   :  { %v13564_v20 = vld [vmem:[#allocation7 + $0xea8] sm:$0xf0] }
 0x40f   :  { %v16578_v18 = vld [vmem:[#allocation7 + $0x84c] sm:$0xf]  ;;  %v13567_v21 = vor.u32 %v16778_v12, %v13564_v20  ;;  %9018 = vmatpush.bf16.msrb.mxu2 %v13311_v30 }
 0x410   :  { %v12764_v19 = vld [vmem:[#allocation7 + $0x868] sm:$0xf0] }
 0x411   :  { %v16642_v9 = vld [vmem:[#allocation7 + $0xa4c] sm:$0xf]  ;;  %v12767_v32 = vor.u32 %v16578_v18, %v12764_v19  ;;  %9031 = vmatpush.bf16.msrb.mxu3 %v13567_v21 }
 0x412   :  { %v13020_v7 = vld [vmem:[#allocation7 + $0xa68] sm:$0xf0] }
 0x413   :  { %v16706_v22 = vld [vmem:[#allocation7 + $0xc4c] sm:$0xf]  ;;  %v13023_v36 = vor.u32 %v16642_v9, %v13020_v7  ;;  %8993 = vmatpush.bf16.msrb.mxu0 %v12767_v32 }
 0x414   :  { %v13276_v50 = vld [vmem:[#allocation7 + $0xc68] sm:$0xf0] }
 0x415   :  { %v16770_v25 = vld [vmem:[#allocation7 + $0xe4c] sm:$0xf]  ;;  %v13279_v27 = vor.u32 %v16706_v22, %v13276_v50  ;;  %9006 = vmatpush.bf16.msrb.mxu1 %v13023_v36 }
 0x416   :  { %v13532_v28 = vld [vmem:[#allocation7 + $0xe68] sm:$0xf0] }
 0x417   :  { %v16570_v10 = vld [vmem:[#allocation7 + $0x80c] sm:$0xf]  ;;  %v13535_v40 = vor.u32 %v16770_v25, %v13532_v28  ;;  %9019 = vmatpush.bf16.msrb.mxu2 %v13279_v27 }
 0x418   :  { %v12732_v29 = vld [vmem:[#allocation7 + $0x828] sm:$0xf0] }
 0x419   :  { %v16634_v31 = vld [vmem:[#allocation7 + $0xa0c] sm:$0xf]  ;;  %v12735_v56 = vor.u32 %v16570_v10, %v12732_v29  ;;  %9032 = vmatpush.bf16.msrb.mxu3 %v13535_v40 }
 0x41a   :  { %v12988_v46 = vld [vmem:[#allocation7 + $0xa28] sm:$0xf0] }
 0x41b   :  { %v16698_v39 = vld [vmem:[#allocation7 + $0xc0c] sm:$0xf]  ;;  %v12991_v61 = vor.u32 %v16634_v31, %v12988_v46  ;;  %8994 = vmatpush.bf16.msrb.mxu0 %v12735_v56 }
 0x41c   :  { %v13244_v41 = vld [vmem:[#allocation7 + $0xc28] sm:$0xf0] }
 0x41d   :  { %v16762_v6 = vld [vmem:[#allocation7 + $0xe0c] sm:$0xf]  ;;  %v13247_v33 = vor.u32 %v16698_v39, %v13244_v41  ;;  %9007 = vmatpush.bf16.msrb.mxu1 %v12991_v61 }
 0x41e   :  { %v13500_v38 = vld [vmem:[#allocation7 + $0xe28] sm:$0xf0]  ;;  %8995 = vmatmul.bf16.vlgmr.msrb.gmra.mxu0 %v17777_v51 }
 0x41f   :  { %v16882_v47 = vld [vmem:[#allocation7 + $0x11cc] sm:$0xf]  ;;  %v13503_v23 = vor.u32 %v16762_v6, %v13500_v38  ;;  %9020 = vmatpush.bf16.msrb.mxu2 %v13247_v33 }
 0x420   :  { %v13980_v52 = vld [vmem:[#allocation7 + $0x11e8] sm:$0xf0]  ;;  %9008 = vmatmul.bf16.vlgmr.msrb.gmra.mxu1 %v17779_v43 }
 0x421   :  { %v16946_v53 = vld [vmem:[#allocation7 + $0x13cc] sm:$0xf]  ;;  %v13983_v3 = vor.u32 %v16882_v47, %v13980_v52  ;;  %9033 = vmatpush.bf16.msrb.mxu3 %v13503_v23  ;;  %v8788_v52 = vpop.f32.mrf.mxu0 }
 0x422   :  { %v14236_v57 = vld [vmem:[#allocation7 + $0x13e8] sm:$0xf0]  ;;  %9021 = vmatmul.bf16.vlgmr.msrb.gmra.mxu2 %v17781_v45 }
 0x423   :  { %v17010_v58 = vld [vmem:[#allocation7 + $0x15cc] sm:$0xf]  ;;  %v14239_v4 = vor.u32 %v16946_v53, %v14236_v57  ;;  %9039 = vmatpush.bf16.msra.mxu0 %v13983_v3  ;;  %v8789_v57 = vadd.f32 %v8788_v52, %v17888_v16 }
 0x424   :  { %v14492_v59 = vld [vmem:[#allocation7 + $0x15e8] sm:$0xf0]  ;;  %9034 = vmatmul.bf16.vlgmr.msrb.gmra.mxu3 %v17783_v55 }
 0x425   :  { %v17074_v63 = vld [vmem:[#allocation7 + $0x17cc] sm:$0xf]  ;;  %v14495_v8 = vor.u32 %v17010_v58, %v14492_v59  ;;  %9052 = vmatpush.bf16.msra.mxu1 %v14239_v4  ;;  %v8801_v58 = vpop.f32.mrf.mxu1 }
 0x426   :  { %v14748_v0 = vld [vmem:[#allocation7 + $0x17e8] sm:$0xf0]  ;;  %v8802_v3 = vadd.f32 %v8801_v58, %v8789_v57 }
 0x427   :  { %v16874_v11 = vld [vmem:[#allocation7 + $0x118c] sm:$0xf]  ;;  %v14751_v14 = vor.u32 %v17074_v63, %v14748_v0  ;;  %9065 = vmatpush.bf16.msra.mxu2 %v14495_v8 }
 0x428   :  { %v13948_v12 = vld [vmem:[#allocation7 + $0x11a8] sm:$0xf0] }
 0x429   :  { %v16938_v20 = vld [vmem:[#allocation7 + $0x138c] sm:$0xf]  ;;  %v13951_v9 = vor.u32 %v16874_v11, %v13948_v12  ;;  %9078 = vmatpush.bf16.msra.mxu3 %v14751_v14 }
 0x42a   :  { %v14204_v15 = vld [vmem:[#allocation7 + $0x13a8] sm:$0xf0] }
 0x42b   :  { %v17002_v17 = vld [vmem:[#allocation7 + $0x158c] sm:$0xf]  ;;  %v14207_v21 = vor.u32 %v16938_v20, %v14204_v15  ;;  %9040 = vmatpush.bf16.msra.mxu0 %v13951_v9 }
 0x42c   :  { %v14460_v30 = vld [vmem:[#allocation7 + $0x15a8] sm:$0xf0] }
 0x42d   :  { %v17066_v18 = vld [vmem:[#allocation7 + $0x178c] sm:$0xf]  ;;  %v14463_v7 = vor.u32 %v17002_v17, %v14460_v30  ;;  %9053 = vmatpush.bf16.msra.mxu1 %v14207_v21  ;;  %v8814_v21 = vpop.f32.mrf.mxu2 }
 0x42e   :  { %v14716_v19 = vld [vmem:[#allocation7 + $0x17a8] sm:$0xf0] }
 0x42f   :  { %v16866_v22 = vld [vmem:[#allocation7 + $0x114c] sm:$0xf]  ;;  %v14719_v28 = vor.u32 %v17066_v18, %v14716_v19  ;;  %9066 = vmatpush.bf16.msra.mxu2 %v14463_v7 }
 0x430   :  { %v13916_v50 = vld [vmem:[#allocation7 + $0x1168] sm:$0xf0] }
 0x431   :  { %v16930_v25 = vld [vmem:[#allocation7 + $0x134c] sm:$0xf]  ;;  %v13919_v31 = vor.u32 %v16866_v22, %v13916_v50  ;;  %9079 = vmatpush.bf16.msra.mxu3 %v14719_v28  ;;  %v8827_v28 = vpop.f32.mrf.mxu3 }
 0x432   :  { %v14172_v32 = vld [vmem:[#allocation7 + $0x1368] sm:$0xf0] }
 0x433   :  { %v16994_v10 = vld [vmem:[#allocation7 + $0x154c] sm:$0xf]  ;;  %v14175_v46 = vor.u32 %v16930_v25, %v14172_v32  ;;  %9041 = vmatpush.bf16.msra.mxu0 %v13919_v31  ;;  %v8815_v25 = vadd.f32 %v8814_v21, %v8802_v3  ;;  %v8790_v32 = vpop.f32.mrf.mxu0 }
 0x434   :  { %v14428_v29 = vld [vmem:[#allocation7 + $0x1568] sm:$0xf0] }
 0x435   :  { %v17058_v36 = vld [vmem:[#allocation7 + $0x174c] sm:$0xf]  ;;  %v14431_v39 = vor.u32 %v16994_v10, %v14428_v29  ;;  %9054 = vmatpush.bf16.msra.mxu1 %v14175_v46  ;;  %v17895_v31 = vadd.f32 %v8827_v28, %v8815_v25  ;;  %v8816_v3 = vpop.f32.mrf.mxu2 }
 0x436   :  { %v14684_v27 = vld [vmem:[#allocation7 + $0x1768] sm:$0xf0] }
 0x437   :  { %v16858_v40 = vld [vmem:[#allocation7 + $0x110c] sm:$0xf]  ;;  %v14687_v6 = vor.u32 %v17058_v36, %v14684_v27  ;;  %9067 = vmatpush.bf16.msra.mxu2 %v14431_v39  ;;  %v8803_v36 = vpop.f32.mrf.mxu1 }
 0x438   :  { %v13884_v48 = vld [vmem:[#allocation7 + $0x1128] sm:$0xf0] }
 0x439   :  { %v16922_v41 = vld [vmem:[#allocation7 + $0x130c] sm:$0xf]  ;;  %v13887_v59 = vor.u32 %v16858_v40, %v13884_v48  ;;  %9080 = vmatpush.bf16.msra.mxu3 %v14687_v6 }
 0x43a   :  { %v14140_v38 = vld [vmem:[#allocation7 + $0x1328] sm:$0xf0] }
 0x43b   :  { %v16986_v44 = vld [vmem:[#allocation7 + $0x150c] sm:$0xf]  ;;  %v14143_v61 = vor.u32 %v16922_v41, %v14140_v38  ;;  %9042 = vmatpush.bf16.msra.mxu0 %v13887_v59 }
 0x43c   :  { %v14396_v47 = vld [vmem:[#allocation7 + $0x1528] sm:$0xf0] }
 0x43d   :  { %v17050_v53 = vld [vmem:[#allocation7 + $0x170c] sm:$0xf]  ;;  %v14399_v33 = vor.u32 %v16986_v44, %v14396_v47  ;;  %9055 = vmatpush.bf16.msra.mxu1 %v14143_v61 }
 0x43e   :  { %v14652_v56 = vld [vmem:[#allocation7 + $0x1728] sm:$0xf0] }
 0x43f   :  { %v16850_v63 = vld [vmem:[#allocation7 + $0x10cc] sm:$0xf]  ;;  %v14655_v4 = vor.u32 %v17050_v53, %v14652_v56  ;;  %9068 = vmatpush.bf16.msra.mxu2 %v14399_v33 }
 0x440   :  { %v13852_v0 = vld [vmem:[#allocation7 + $0x10e8] sm:$0xf0] }
 0x441   :  { %v16914_v23 = vld [vmem:[#allocation7 + $0x12cc] sm:$0xf]  ;;  %v13855_v15 = vor.u32 %v16850_v63, %v13852_v0  ;;  %9081 = vmatpush.bf16.msra.mxu3 %v14655_v4 }
 0x442   :  { %v14108_v8 = vld [vmem:[#allocation7 + $0x12e8] sm:$0xf0] }
 0x443   :  { %v16978_v11 = vld [vmem:[#allocation7 + $0x14cc] sm:$0xf]  ;;  %v14111_v16 = vor.u32 %v16914_v23, %v14108_v8  ;;  %9043 = vmatpush.bf16.msra.mxu0 %v13855_v15 }
 0x444   :  { %v14364_v12 = vld [vmem:[#allocation7 + $0x14e8] sm:$0xf0] }
 0x445   :  { %v17042_v20 = vld [vmem:[#allocation7 + $0x16cc] sm:$0xf]  ;;  %v14367_v17 = vor.u32 %v16978_v11, %v14364_v12  ;;  %9056 = vmatpush.bf16.msra.mxu1 %v14111_v16  ;;  %v8829_v12 = vpop.f32.mrf.mxu3 }
 0x446   :  { %v14620_v14 = vld [vmem:[#allocation7 + $0x16e8] sm:$0xf0] }
 0x447   :  { %v16842_v30 = vld [vmem:[#allocation7 + $0x108c] sm:$0xf]  ;;  %v14623_v9 = vor.u32 %v17042_v20, %v14620_v14  ;;  %9069 = vmatpush.bf16.msra.mxu2 %v14367_v17 }
 0x448   :  { %v13820_v18 = vld [vmem:[#allocation7 + $0x10a8] sm:$0xf0] }
 0x449   :  { %v16906_v19 = vld [vmem:[#allocation7 + $0x128c] sm:$0xf]  ;;  %v13823_v27 = vor.u32 %v16842_v30, %v13820_v18  ;;  %9082 = vmatpush.bf16.msra.mxu3 %v14623_v9 }
 0x44a   :  { %v14076_v7 = vld [vmem:[#allocation7 + $0x12a8] sm:$0xf0] }
 0x44b   :  { %v16970_v22 = vld [vmem:[#allocation7 + $0x148c] sm:$0xf]  ;;  %v14079_v46 = vor.u32 %v16906_v19, %v14076_v7  ;;  %9044 = vmatpush.bf16.msra.mxu0 %v13823_v27 }
 0x44c   :  { %v14332_v50 = vld [vmem:[#allocation7 + $0x14a8] sm:$0xf0] }
 0x44d   :  { %v17034_v10 = vld [vmem:[#allocation7 + $0x168c] sm:$0xf]  ;;  %v14335_v39 = vor.u32 %v16970_v22, %v14332_v50  ;;  %9057 = vmatpush.bf16.msra.mxu1 %v14079_v46 }
 0x44e   :  { %v14588_v29 = vld [vmem:[#allocation7 + $0x16a8] sm:$0xf0] }
 0x44f   :  { %v16834_v40 = vld [vmem:[#allocation7 + $0x104c] sm:$0xf]  ;;  %v14591_v6 = vor.u32 %v17034_v10, %v14588_v29  ;;  %9070 = vmatpush.bf16.msra.mxu2 %v14335_v39 }
 0x450   :  { %v13788_v48 = vld [vmem:[#allocation7 + $0x1068] sm:$0xf0] }
 0x451   :  { %v16898_v41 = vld [vmem:[#allocation7 + $0x124c] sm:$0xf]  ;;  %v13791_v56 = vor.u32 %v16834_v40, %v13788_v48  ;;  %9083 = vmatpush.bf16.msra.mxu3 %v14591_v6 }
 0x452   :  { %v14044_v38 = vld [vmem:[#allocation7 + $0x1268] sm:$0xf0] }
 0x453   :  { %v16962_v44 = vld [vmem:[#allocation7 + $0x144c] sm:$0xf]  ;;  %v14047_v59 = vor.u32 %v16898_v41, %v14044_v38  ;;  %9045 = vmatpush.bf16.msra.mxu0 %v13791_v56 }
 0x454   :  { %v14300_v47 = vld [vmem:[#allocation7 + $0x1468] sm:$0xf0] }
 0x455   :  { %v17026_v52 = vld [vmem:[#allocation7 + $0x164c] sm:$0xf]  ;;  %v14303_v61 = vor.u32 %v16962_v44, %v14300_v47  ;;  %9058 = vmatpush.bf16.msra.mxu1 %v14047_v59 }
 0x456   :  { %v14556_v53 = vld [vmem:[#allocation7 + $0x1668] sm:$0xf0] }
 0x457   :  { %v16826_v57 = vld [vmem:[#allocation7 + $0x100c] sm:$0xf]  ;;  %v14559_v23 = vor.u32 %v17026_v52, %v14556_v53  ;;  %9071 = vmatpush.bf16.msra.mxu2 %v14303_v61 }
 0x458   :  { %v13756_v58 = vld [vmem:[#allocation7 + $0x1028] sm:$0xf0] }
 0x459   :  { %v16890_v33 = vld [vmem:[#allocation7 + $0x120c] sm:$0xf]  ;;  %v13759_v16 = vor.u32 %v16826_v57, %v13756_v58  ;;  %9084 = vmatpush.bf16.msra.mxu3 %v14559_v23 }
 0x45a   :  { %v14012_v63 = vld [vmem:[#allocation7 + $0x1228] sm:$0xf0] }
 0x45b   :  { %v16954_v0 = vld [vmem:[#allocation7 + $0x140c] sm:$0xf]  ;;  %v14015_v19 = vor.u32 %v16890_v33, %v14012_v63  ;;  %9046 = vmatpush.bf16.msra.mxu0 %v13759_v16 }
 0x45c   :  { %v14268_v4 = vld [vmem:[#allocation7 + $0x1428] sm:$0xf0] }
 0x45d   :  { %v17018_v8 = vld [vmem:[#allocation7 + $0x160c] sm:$0xf]  ;;  %v14271_v9 = vor.u32 %v16954_v0, %v14268_v4  ;;  %9059 = vmatpush.bf16.msra.mxu1 %v14015_v19 }
 0x45e   :  { %v14524_v11 = vld [vmem:[#allocation7 + $0x1628] sm:$0xf0]  ;;  %9047 = vmatmul.bf16.vlgmr.msra.gmra.mxu0 %v17801_v5 }
 0x45f   :  { %v17138_v20 = vld [vmem:[#allocation7 + $0x19cc] sm:$0xf]  ;;  %v14527_v22 = vor.u32 %v17018_v8, %v14524_v11  ;;  %9072 = vmatpush.bf16.msra.mxu2 %v14271_v9 }
 0x460   :  { %v15004_v14 = vld [vmem:[#allocation7 + $0x19e8] sm:$0xf0]  ;;  %9060 = vmatmul.bf16.vlgmr.msra.gmra.mxu1 %v17805_v2 }
 0x461   :  { %v17202_v15 = vld [vmem:[#allocation7 + $0x1bcc] sm:$0xf]  ;;  %v15007_v50 = vor.u32 %v17138_v20, %v15004_v14  ;;  %9085 = vmatpush.bf16.msra.mxu3 %v14527_v22  ;;  %v8840_v14 = vpop.f32.mrf.mxu0 }
 0x462   :  { %v15260_v17 = vld [vmem:[#allocation7 + $0x1be8] sm:$0xf0]  ;;  %9073 = vmatmul.bf16.vlgmr.msra.gmra.mxu2 %v17799_v62 }
 0x463   :  { %v17266_v30 = vld [vmem:[#allocation7 + $0x1dcc] sm:$0xf]  ;;  %v15263_v25 = vor.u32 %v17202_v15, %v15260_v17  ;;  %9091 = vmatpush.bf16.msrb.mxu0 %v15007_v50  ;;  %v8841_v17 = vadd.f32 %v8840_v14, %v17895_v31 }
 0x464   :  { %v15516_v18 = vld [vmem:[#allocation7 + $0x1de8] sm:$0xf0]  ;;  %9086 = vmatmul.bf16.vlgmr.msra.gmra.mxu3 %v17803_v1 }
 0x465   :  { %v17330_v21 = vld [vmem:[#allocation7 + $0x1fcc] sm:$0xf]  ;;  %v15519_v28 = vor.u32 %v17266_v30, %v15516_v18  ;;  %9104 = vmatpush.bf16.msrb.mxu1 %v15263_v25  ;;  %v8853_v30 = vpop.f32.mrf.mxu1 }
 0x466   :  { %v15772_v7 = vld [vmem:[#allocation7 + $0x1fe8] sm:$0xf0]  ;;  %v8854_v50 = vadd.f32 %v8853_v30, %v8841_v17 }
 0x467   :  { %v17130_v32 = vld [vmem:[#allocation7 + $0x198c] sm:$0xf]  ;;  %v15775_v36 = vor.u32 %v17330_v21, %v15772_v7  ;;  %9117 = vmatpush.bf16.msrb.mxu2 %v15519_v28 }
 0x468   :  { %v14972_v10 = vld [vmem:[#allocation7 + $0x19a8] sm:$0xf0] }
 0x469   :  { %v17194_v29 = vld [vmem:[#allocation7 + $0x1b8c] sm:$0xf]  ;;  %v14975_v41 = vor.u32 %v17130_v32, %v14972_v10  ;;  %9130 = vmatpush.bf16.msrb.mxu3 %v15775_v36 }
 0x46a   :  { %v15228_v27 = vld [vmem:[#allocation7 + $0x1ba8] sm:$0xf0] }
 0x46b   :  { %v17258_v46 = vld [vmem:[#allocation7 + $0x1d8c] sm:$0xf]  ;;  %v15231_v6 = vor.u32 %v17194_v29, %v15228_v27  ;;  %9092 = vmatpush.bf16.msrb.mxu0 %v14975_v41 }
 0x46c   :  { %v15484_v39 = vld [vmem:[#allocation7 + $0x1da8] sm:$0xf0] }
 0x46d   :  { %v17322_v40 = vld [vmem:[#allocation7 + $0x1f8c] sm:$0xf]  ;;  %v15487_v38 = vor.u32 %v17258_v46, %v15484_v39  ;;  %9105 = vmatpush.bf16.msrb.mxu1 %v15231_v6  ;;  %v8866_v6 = vpop.f32.mrf.mxu2 }
 0x46e   :  { %v15740_v48 = vld [vmem:[#allocation7 + $0x1fa8] sm:$0xf0] }
 0x46f   :  { %v17122_v44 = vld [vmem:[#allocation7 + $0x194c] sm:$0xf]  ;;  %v15743_v53 = vor.u32 %v17322_v40, %v15740_v48  ;;  %9118 = vmatpush.bf16.msrb.mxu2 %v15487_v38 }
 0x470   :  { %v14940_v47 = vld [vmem:[#allocation7 + $0x1968] sm:$0xf0] }
 0x471   :  { %v17186_v52 = vld [vmem:[#allocation7 + $0x1b4c] sm:$0xf]  ;;  %v14943_v33 = vor.u32 %v17122_v44, %v14940_v47  ;;  %9131 = vmatpush.bf16.msrb.mxu3 %v15743_v53  ;;  %v8879_v53 = vpop.f32.mrf.mxu3 }
 0x472   :  { %v15196_v56 = vld [vmem:[#allocation7 + $0x1b68] sm:$0xf0] }
 0x473   :  { %v17250_v57 = vld [vmem:[#allocation7 + $0x1d4c] sm:$0xf]  ;;  %v15199_v63 = vor.u32 %v17186_v52, %v15196_v56  ;;  %9093 = vmatpush.bf16.msrb.mxu0 %v14943_v33  ;;  %v8867_v52 = vadd.f32 %v8866_v6, %v8854_v50  ;;  %v8842_v56 = vpop.f32.mrf.mxu0  ;;  %v12706_v6 = vld [vmem:[#allocation7 + $0x7d0] sm:$0xf] }
 0x474   :  { %v15452_v58 = vld [vmem:[#allocation7 + $0x1d68] sm:$0xf0]  ;;  %v11906_v56 = vld [vmem:[#allocation7 + $0x190] sm:$0xf] }
 0x475   :  { %v17314_v59 = vld [vmem:[#allocation7 + $0x1f4c] sm:$0xf]  ;;  %v15455_v0 = vor.u32 %v17250_v57, %v15452_v58  ;;  %9106 = vmatpush.bf16.msrb.mxu1 %v15199_v63  ;;  %v17902_v33 = vadd.f32 %v8879_v53, %v8867_v52  ;;  %v8868_v50 = vpop.f32.mrf.mxu2 }
 0x476   :  { %v15708_v61 = vld [vmem:[#allocation7 + $0x1f68] sm:$0xf0]  ;;  %v16351_v50 = vld [vmem:[#allocation7 + $0x12c] sm:$0xf0] }
 0x477   :  { %v17114_v23 = vld [vmem:[#allocation7 + $0x190c] sm:$0xf]  ;;  %v15711_v8 = vor.u32 %v17314_v59, %v15708_v61  ;;  %9119 = vmatpush.bf16.msrb.mxu2 %v15455_v0  ;;  %v8855_v59 = vpop.f32.mrf.mxu1 }
 0x478   :  { %v14908_v3 = vld [vmem:[#allocation7 + $0x1928] sm:$0xf0] }
 0x479   :  { %v17178_v4 = vld [vmem:[#allocation7 + $0x1b0c] sm:$0xf]  ;;  %v14911_v18 = vor.u32 %v17114_v23, %v14908_v3  ;;  %9132 = vmatpush.bf16.msrb.mxu3 %v15711_v8 }
 0x47a   :  { %v15164_v11 = vld [vmem:[#allocation7 + $0x1b28] sm:$0xf0] }
 0x47b   :  { %v17242_v12 = vld [vmem:[#allocation7 + $0x1d0c] sm:$0xf]  ;;  %v15167_v19 = vor.u32 %v17178_v4, %v15164_v11  ;;  %9094 = vmatpush.bf16.msrb.mxu0 %v14911_v18 }
 0x47c   :  { %v15420_v20 = vld [vmem:[#allocation7 + $0x1d28] sm:$0xf0] }
 0x47d   :  { %v17306_v15 = vld [vmem:[#allocation7 + $0x1f0c] sm:$0xf]  ;;  %v15423_v9 = vor.u32 %v17242_v12, %v15420_v20  ;;  %9107 = vmatpush.bf16.msrb.mxu1 %v15167_v19 }
 0x47e   :  { %v15676_v16 = vld [vmem:[#allocation7 + $0x1f28] sm:$0xf0] }
 0x47f   :  { %v17106_v21 = vld [vmem:[#allocation7 + $0x18cc] sm:$0xf]  ;;  %v15679_v25 = vor.u32 %v17306_v15, %v15676_v16  ;;  %9120 = vmatpush.bf16.msrb.mxu2 %v15423_v9 }
 0x480   :  { %v14876_v7 = vld [vmem:[#allocation7 + $0x18e8] sm:$0xf0] }
 0x481   :  { %v17170_v22 = vld [vmem:[#allocation7 + $0x1acc] sm:$0xf]  ;;  %v14879_v27 = vor.u32 %v17106_v21, %v14876_v7  ;;  %9133 = vmatpush.bf16.msrb.mxu3 %v15679_v25 }
 0x482   :  { %v15132_v28 = vld [vmem:[#allocation7 + $0x1ae8] sm:$0xf0] }
 0x483   :  { %v17234_v32 = vld [vmem:[#allocation7 + $0x1ccc] sm:$0xf]  ;;  %v15135_v31 = vor.u32 %v17170_v22, %v15132_v28  ;;  %9095 = vmatpush.bf16.msrb.mxu0 %v14879_v27  ;;  %v12194_v27 = vld [vmem:[#allocation7 + $0x3d0] sm:$0xf] }
 0x484   :  { %v15388_v10 = vld [vmem:[#allocation7 + $0x1ce8] sm:$0xf0] }
 0x485   :  { %v17298_v29 = vld [vmem:[#allocation7 + $0x1ecc] sm:$0xf]  ;;  %v15391_v46 = vor.u32 %v17234_v32, %v15388_v10  ;;  %9108 = vmatpush.bf16.msrb.mxu1 %v15135_v31  ;;  %v8881_v10 = vpop.f32.mrf.mxu3 }
 0x486   :  { %v15644_v36 = vld [vmem:[#allocation7 + $0x1ee8] sm:$0xf0]  ;;  %v12354_v10 = vld [vmem:[#allocation7 + $0x510] sm:$0xf] }
 0x487   :  { %v17098_v39 = vld [vmem:[#allocation7 + $0x188c] sm:$0xf]  ;;  %v15647_v41 = vor.u32 %v17298_v29, %v15644_v36  ;;  %9121 = vmatpush.bf16.msrb.mxu2 %v15391_v46  ;;  %v11938_v29 = vld [vmem:[#allocation7 + $0x1d0] sm:$0xf] }
 0x488   :  { %v14844_v40 = vld [vmem:[#allocation7 + $0x18a8] sm:$0xf0]  ;;  %v16375_v36 = vld [vmem:[#allocation7 + $0x1ec] sm:$0xf0] }
 0x489   :  { %v17162_v48 = vld [vmem:[#allocation7 + $0x1a8c] sm:$0xf]  ;;  %v14847_v61 = vor.u32 %v17098_v39, %v14844_v40  ;;  %9134 = vmatpush.bf16.msrb.mxu3 %v15647_v41  ;;  %v16439_v46 = vld [vmem:[#allocation7 + $0x3ec] sm:$0xf0] }
 0x48a   :  { %v15100_v38 = vld [vmem:[#allocation7 + $0x1aa8] sm:$0xf0]  ;;  %v12450_v39 = vld [vmem:[#allocation7 + $0x5d0] sm:$0xf]  ;;  %v12195_v52 = vor.u32 %v16439_v46, %v12194_v27 }
 0x48b   :  { %v17226_v44 = vld [vmem:[#allocation7 + $0x1c8c] sm:$0xf]  ;;  %v15103_v63 = vor.u32 %v17162_v48, %v15100_v38  ;;  %9096 = vmatpush.bf16.msrb.mxu0 %v14847_v61  ;;  %v16503_v40 = vld [vmem:[#allocation7 + $0x5ec] sm:$0xf0] }
 0x48c   :  { %v15356_v47 = vld [vmem:[#allocation7 + $0x1ca8] sm:$0xf0]  ;;  %v16567_v38 = vld [vmem:[#allocation7 + $0x7ec] sm:$0xf0]  ;;  %v12451_v53 = vor.u32 %v16503_v40, %v12450_v39  ;;  %v8905_v39 = vpop.f32.mrf.mxu1 }
 0x48d   :  { %v17290_v57 = vld [vmem:[#allocation7 + $0x1e8c] sm:$0xf]  ;;  %v15359_v0 = vor.u32 %v17226_v44, %v15356_v47  ;;  %9109 = vmatpush.bf16.msrb.mxu1 %v15103_v63  ;;  %v11939_v47 = vor.u32 %v16375_v36, %v11938_v29  ;;  %v12707_v59 = vor.u32 %v16567_v38, %v12706_v6  ;;  %v16431_v61 = vld [vmem:[#allocation7 + $0x3ac] sm:$0xf0]  ;;  %v8892_v36 = vpop.f32.mrf.mxu0 }
 0x48e   :  { %v15612_v58 = vld [vmem:[#allocation7 + $0x1ea8] sm:$0xf0]  ;;  %v12418_v63 = vld [vmem:[#allocation7 + $0x590] sm:$0xf]  ;;  %v8893_v46 = vadd.f32 %v8892_v36, %v17902_v33 }
 0x48f   :  { %v17090_v23 = vld [vmem:[#allocation7 + $0x184c] sm:$0xf]  ;;  %v15615_v8 = vor.u32 %v17290_v57, %v15612_v58  ;;  %9122 = vmatpush.bf16.msrb.mxu2 %v15359_v0  ;;  %v16367_v57 = vld [vmem:[#allocation7 + $0x1ac] sm:$0xf0] }
 0x490   :  { %v14812_v3 = vld [vmem:[#allocation7 + $0x1868] sm:$0xf0]  ;;  %v12162_v58 = vld [vmem:[#allocation7 + $0x390] sm:$0xf] }
 0x491   :  { %v17154_v4 = vld [vmem:[#allocation7 + $0x1a4c] sm:$0xf]  ;;  %v14815_v16 = vor.u32 %v17090_v23, %v14812_v3  ;;  %9135 = vmatpush.bf16.msrb.mxu3 %v15615_v8  ;;  %v16495_v0 = vld [vmem:[#allocation7 + $0x5ac] sm:$0xf0]  ;;  %v12163_v8 = vor.u32 %v16431_v61, %v12162_v58 }
 0x492   :  { %v15068_v11 = vld [vmem:[#allocation7 + $0x1a68] sm:$0xf0]  ;;  %v12674_v23 = vld [vmem:[#allocation7 + $0x790] sm:$0xf] }
 0x493   :  { %v17218_v12 = vld [vmem:[#allocation7 + $0x1c4c] sm:$0xf]  ;;  %v15071_v18 = vor.u32 %v17154_v4, %v15068_v11  ;;  %9097 = vmatpush.bf16.msrb.mxu0 %v14815_v16  ;;  %v16559_v3 = vld [vmem:[#allocation7 + $0x7ac] sm:$0xf0]  ;;  %v11907_v4 = vor.u32 %v16367_v57, %v11906_v56  ;;  %v12419_v11 = vor.u32 %v16495_v0, %v12418_v63 }
 0x494   :  { %v15324_v20 = vld [vmem:[#allocation7 + $0x1c68] sm:$0xf0]  ;;  %v16423_v16 = vld [vmem:[#allocation7 + $0x36c] sm:$0xf0] }
 0x495   :  { %v17282_v14 = vld [vmem:[#allocation7 + $0x1e4c] sm:$0xf]  ;;  %v15327_v19 = vor.u32 %v17218_v12, %v15324_v20  ;;  %9110 = vmatpush.bf16.msrb.mxu1 %v15071_v18  ;;  %v11874_v12 = vld [vmem:[#allocation7 + $0x150] sm:$0xf] }
 0x496   :  { %v15580_v15 = vld [vmem:[#allocation7 + $0x1e68] sm:$0xf0]  ;;  %v16359_v20 = vld [vmem:[#allocation7 + $0x16c] sm:$0xf0] }
 0x497   :  { %v17082_v17 = vld [vmem:[#allocation7 + $0x180c] sm:$0xf]  ;;  %v15583_v22 = vor.u32 %v17282_v14, %v15580_v15  ;;  %9123 = vmatpush.bf16.msrb.mxu2 %v15327_v19  ;;  %v12130_v14 = vld [vmem:[#allocation7 + $0x350] sm:$0xf]  ;;  %v12675_v15 = vor.u32 %v16559_v3, %v12674_v23 }
 0x498   :  { %v14780_v30 = vld [vmem:[#allocation7 + $0x1828] sm:$0xf0]  ;;  %v12642_v18 = vld [vmem:[#allocation7 + $0x750] sm:$0xf] }
 0x499   :  { %v17146_v9 = vld [vmem:[#allocation7 + $0x1a0c] sm:$0xf]  ;;  %v14783_v31 = vor.u32 %v17082_v17, %v14780_v30  ;;  %9136 = vmatpush.bf16.msrb.mxu3 %v15583_v22  ;;  %v12386_v17 = vld [vmem:[#allocation7 + $0x550] sm:$0xf] }
 0x49a   :  { %v15036_v21 = vld [vmem:[#allocation7 + $0x1a28] sm:$0xf0]  ;;  %v16487_v30 = vld [vmem:[#allocation7 + $0x56c] sm:$0xf0] }
 0x49b   :  { %v17210_v7 = vld [vmem:[#allocation7 + $0x1c0c] sm:$0xf]  ;;  %v15039_v48 = vor.u32 %v17146_v9, %v15036_v21  ;;  %9098 = vmatpush.bf16.msrb.mxu0 %v14783_v31  ;;  %v16551_v19 = vld [vmem:[#allocation7 + $0x76c] sm:$0xf0]  ;;  %v11875_v9 = vor.u32 %v16359_v20, %v11874_v12  ;;  %v12131_v21 = vor.u32 %v16423_v16, %v12130_v14  ;;  %v8894_v16 = vpop.f32.mrf.mxu0 }
 0x49c   :  { %v15292_v25 = vld [vmem:[#allocation7 + $0x1c28] sm:$0xf0]  ;;  %v11842_v22 = vld [vmem:[#allocation7 + $0x110] sm:$0xf] }
 0x49d   :  { %v17274_v28 = vld [vmem:[#allocation7 + $0x1e0c] sm:$0xf]  ;;  %v15295_v41 = vor.u32 %v17210_v7, %v15292_v25  ;;  %9111 = vmatpush.bf16.msrb.mxu1 %v15039_v48  ;;  %v12387_v7 = vor.u32 %v16487_v30, %v12386_v17  ;;  %v12098_v25 = vld [vmem:[#allocation7 + $0x310] sm:$0xf]  ;;  %v11843_v40 = vor.u32 %v16351_v50, %v11842_v22 }
 0x49e   :  { %v15548_v32 = vld [vmem:[#allocation7 + $0x1e28] sm:$0xf0]  ;;  %9099 = vmatmul.bf16.vlgmr.msrb.gmra.mxu0 %v17813_v34  ;;  %v16479_v29 = vld [vmem:[#allocation7 + $0x52c] sm:$0xf0] }
 0x49f   :  { %v15551_v44 = vor.u32 %v17274_v28, %v15548_v32  ;;  %9124 = vmatpush.bf16.msrb.mxu2 %v15295_v41  ;;  %9143 = vmatpush.bf16.msra.mxu0 %v11939_v47  ;;  %v12643_v28 = vor.u32 %v16551_v19, %v12642_v18  ;;  %v16415_v32 = vld [vmem:[#allocation7 + $0x32c] sm:$0xf0]  ;;  %v12355_v41 = vor.u32 %v16479_v29, %v12354_v10  ;;  %v8907_v18 = vpop.f32.mrf.mxu1 }
 0x4a0   :  { %9112 = vmatmul.bf16.vlgmr.msrb.gmra.mxu1 %v17815_v13  ;;  %v12610_v27 = vld [vmem:[#allocation7 + $0x710] sm:$0xf]  ;;  %v12099_v48 = vor.u32 %v16415_v32, %v12098_v25  ;;  %v8906_v47 = vadd.f32 %v8905_v39, %v8893_v46 }
 0x4a1   :  { %9137 = vmatpush.bf16.msrb.mxu3 %v15551_v44  ;;  %9156 = vmatpush.bf16.msra.mxu1 %v12195_v52  ;;  %v16543_v31 = vld [vmem:[#allocation7 + $0x72c] sm:$0xf0] }
 0x4a2   :  { %9125 = vmatmul.bf16.vlgmr.msrb.gmra.mxu2 %v17821_v26  ;;  %v11810_v6 = vld [vmem:[#allocation7 + $0xd0] sm:$0xf]  ;;  %v12611_v52 = vor.u32 %v16543_v31, %v12610_v27 }
 0x4a3   :  { %9169 = vmatpush.bf16.msra.mxu2 %v12451_v53  ;;  %9144 = vmatpush.bf16.msra.mxu0 %v11907_v4  ;;  %v16343_v38 = vld [vmem:[#allocation7 + $0xec] sm:$0xf0] }
 0x4a4   :  { %9138 = vmatmul.bf16.vlgmr.msrb.gmra.mxu3 %v17824_v49  ;;  %v12066_v44 = vld [vmem:[#allocation7 + $0x2d0] sm:$0xf]  ;;  %v11811_v61 = vor.u32 %v16343_v38, %v11810_v6 }
 0x4a5   :  { %9182 = vmatpush.bf16.msra.mxu3 %v12707_v59  ;;  %9157 = vmatpush.bf16.msra.mxu1 %v12163_v8  ;;  %v16407_v53 = vld [vmem:[#allocation7 + $0x2ec] sm:$0xf0]  ;;  %v8918_v8 = vpop.f32.mrf.mxu2 }
 0x4a6   :  { %v12322_v56 = vld [vmem:[#allocation7 + $0x4d0] sm:$0xf]  ;;  %v12067_v33 = vor.u32 %v16407_v53, %v12066_v44  ;;  %v8919_v14 = vadd.f32 %v8918_v8, %v8906_v47 }
 0x4a7   :  { %9170 = vmatpush.bf16.msra.mxu2 %v12419_v11  ;;  %9145 = vmatpush.bf16.msra.mxu0 %v11875_v9  ;;  %v16471_v57 = vld [vmem:[#allocation7 + $0x4ec] sm:$0xf0] }
 0x4a8   :  { %v12578_v58 = vld [vmem:[#allocation7 + $0x6d0] sm:$0xf]  ;;  %v12323_v63 = vor.u32 %v16471_v57, %v12322_v56 }
 0x4a9   :  { %9183 = vmatpush.bf16.msra.mxu3 %v12675_v15  ;;  %9158 = vmatpush.bf16.msra.mxu1 %v12131_v21  ;;  %v16535_v59 = vld [vmem:[#allocation7 + $0x6ec] sm:$0xf0]  ;;  %v8931_v15 = vpop.f32.mrf.mxu3 }
 0x4aa   :  { %v11778_v0 = vld [vmem:[#allocation7 + $0x90] sm:$0xf]  ;;  %v12579_v4 = vor.u32 %v16535_v59, %v12578_v58  ;;  %v17909_v9 = vadd.f32 %v8931_v15, %v8919_v14 }
 0x4ab   :  { %9171 = vmatpush.bf16.msra.mxu2 %v12387_v7  ;;  %9146 = vmatpush.bf16.msra.mxu0 %v11843_v40  ;;  %v16335_v23 = vld [vmem:[#allocation7 + $0xac] sm:$0xf0] }
 0x4ac   :  { %v12034_v3 = vld [vmem:[#allocation7 + $0x290] sm:$0xf]  ;;  %v11779_v19 = vor.u32 %v16335_v23, %v11778_v0 }
 0x4ad   :  { %9184 = vmatpush.bf16.msra.mxu3 %v12643_v28  ;;  %9159 = vmatpush.bf16.msra.mxu1 %v12099_v48  ;;  %v16399_v11 = vld [vmem:[#allocation7 + $0x2ac] sm:$0xf0]  ;;  %v8920_v47 = vpop.f32.mrf.mxu2 }
 0x4ae   :  { %v12290_v12 = vld [vmem:[#allocation7 + $0x490] sm:$0xf]  ;;  %v12035_v21 = vor.u32 %v16399_v11, %v12034_v3 }
 0x4af   :  { %9172 = vmatpush.bf16.msra.mxu2 %v12355_v41  ;;  %v16463_v20 = vld [vmem:[#allocation7 + $0x4ac] sm:$0xf0]  ;;  %9147 = vmatpush.bf16.msra.mxu0 %v11811_v61 }
 0x4b0   :  { %v12546_v17 = vld [vmem:[#allocation7 + $0x690] sm:$0xf]  ;;  %v12291_v7 = vor.u32 %v16463_v20, %v12290_v12 }
 0x4b1   :  { %9185 = vmatpush.bf16.msra.mxu3 %v12611_v52  ;;  %v16527_v30 = vld [vmem:[#allocation7 + $0x6ac] sm:$0xf0]  ;;  %9160 = vmatpush.bf16.msra.mxu1 %v12067_v33  ;;  %v8933_v57 = vpop.f32.mrf.mxu3 }
 0x4b2   :  { %v11746_v22 = vld [vmem:[#allocation7 + $0x50] sm:$0xf]  ;;  %v12547_v28 = vor.u32 %v16527_v30, %v12546_v17 }
 0x4b3   :  { %9173 = vmatpush.bf16.msra.mxu2 %v12323_v63  ;;  %v16327_v50 = vld [vmem:[#allocation7 + $0x6c] sm:$0xf0]  ;;  %9148 = vmatpush.bf16.msra.mxu0 %v11779_v19 }
 0x4b4   :  { %v12002_v25 = vld [vmem:[#allocation7 + $0x250] sm:$0xf]  ;;  %v11747_v31 = vor.u32 %v16327_v50, %v11746_v22 }
 0x4b5   :  { %9186 = vmatpush.bf16.msra.mxu3 %v12579_v4  ;;  %v16391_v32 = vld [vmem:[#allocation7 + $0x26c] sm:$0xf0]  ;;  %9161 = vmatpush.bf16.msra.mxu1 %v12035_v21 }
 0x4b6   :  { %v12258_v10 = vld [vmem:[#allocation7 + $0x450] sm:$0xf]  ;;  %v12003_v40 = vor.u32 %v16391_v32, %v12002_v25 }
 0x4b7   :  { %v16455_v29 = vld [vmem:[#allocation7 + $0x46c] sm:$0xf0]  ;;  %9174 = vmatpush.bf16.msra.mxu2 %v12291_v7  ;;  %9149 = vmatpush.bf16.msra.mxu0 %v11747_v31 }
 0x4b8   :  { %v12514_v36 = vld [vmem:[#allocation7 + $0x650] sm:$0xf]  ;;  %v12259_v48 = vor.u32 %v16455_v29, %v12258_v10 }
 0x4b9   :  { %v16519_v27 = vld [vmem:[#allocation7 + $0x66c] sm:$0xf0]  ;;  %9187 = vmatpush.bf16.msra.mxu3 %v12547_v28  ;;  %9162 = vmatpush.bf16.msra.mxu1 %v12003_v40 }
 0x4ba   :  { %v11714_v46 = vld [vmem:[#allocation7 + $0x10] sm:$0xf]  ;;  %v12515_v44 = vor.u32 %v16519_v27, %v12514_v36 }
 0x4bb   :  { %v16319_v39 = vld [vmem:[#allocation7 + $0x2c] sm:$0xf0]  ;;  %9175 = vmatpush.bf16.msra.mxu2 %v12259_v48 }
 0x4bc   :  { %v11970_v41 = vld [vmem:[#allocation7 + $0x210] sm:$0xf]  ;;  %v11715_v33 = vor.u32 %v16319_v39, %v11714_v46 }
 0x4bd   :  { %v16383_v6 = vld [vmem:[#allocation7 + $0x22c] sm:$0xf0]  ;;  %9188 = vmatpush.bf16.msra.mxu3 %v12515_v44 }
 0x4be   :  { %v12226_v38 = vld [vmem:[#allocation7 + $0x410] sm:$0xf]  ;;  %v11971_v3 = vor.u32 %v16383_v6, %v11970_v41  ;;  %9150 = vmatpush.bf16.msra.mxu0 %v11715_v33  ;;  %v17419_v6 = vld [vmem:[#allocation8] sm:$0xff]  ;;  %v8944_v33 = vpop.f32.mrf.mxu0 }
 0x4bf   :  { %v16447_v52 = vld [vmem:[#allocation7 + $0x42c] sm:$0xf0] }
 0x4c0   :  { %v12482_v53 = vld [vmem:[#allocation7 + $0x610] sm:$0xf]  ;;  %v12227_v4 = vor.u32 %v16447_v52, %v12226_v38  ;;  %9163 = vmatpush.bf16.msra.mxu1 %v11971_v3  ;;  %v3178_v38 = vperm.slane %v17419_v6, 3  ;;  %v8957_v3 = vpop.f32.mrf.mxu1 }
 0x4c1   :  { %v16511_v56 = vld [vmem:[#allocation7 + $0x62c] sm:$0xf0]  ;;  %9151 = vmatmul.bf16.vlgmr.msra.gmra.mxu0 %v17751_v35 }
 0x4c2   :  { %v12962_v58 = vld [vmem:[#allocation7 + $0x9d0] sm:$0xf]  ;;  %v12483_v12 = vor.u32 %v16511_v56, %v12482_v53  ;;  %9176 = vmatpush.bf16.msra.mxu2 %v12227_v4 }
 0x4c3   :  { %v16631_v59 = vld [vmem:[#allocation7 + $0x9ec] sm:$0xf0]  ;;  %9164 = vmatmul.bf16.vlgmr.msra.gmra.mxu1 %v17753_v54 }
 0x4c4   :  { %v13218_v61 = vld [vmem:[#allocation7 + $0xbd0] sm:$0xf]  ;;  %v12963_v20 = vor.u32 %v16631_v59, %v12962_v58  ;;  %9189 = vmatpush.bf16.msra.mxu3 %v12483_v12 }
 0x4c5   :  { %v16695_v63 = vld [vmem:[#allocation7 + $0xbec] sm:$0xf0]  ;;  %9177 = vmatmul.bf16.vlgmr.msra.gmra.mxu2 %v17755_v37 }
 0x4c6   :  { %v13474_v0 = vld [vmem:[#allocation7 + $0xdd0] sm:$0xf]  ;;  %v13219_v14 = vor.u32 %v16695_v63, %v13218_v61  ;;  %9195 = vmatpush.bf16.msrb.mxu0 %v12963_v20 }
 0x4c7   :  { %v16759_v23 = vld [vmem:[#allocation7 + $0xdec] sm:$0xf0]  ;;  %9190 = vmatmul.bf16.vlgmr.msra.gmra.mxu3 %v17757_v42 }
 0x4c8   :  { %v13730_v8 = vld [vmem:[#allocation7 + $0xfd0] sm:$0xf]  ;;  %v13475_v15 = vor.u32 %v16759_v23, %v13474_v0  ;;  %9208 = vmatpush.bf16.msrb.mxu1 %v13219_v14  ;;  %v8945_v23 = vadd.f32 %v8944_v33, %v3178_v38  ;;  %v8959_v6 = vpop.f32.mrf.mxu1 }
 0x4c9   :  { %v16823_v11 = vld [vmem:[#allocation7 + $0xfec] sm:$0xf0] }
 0x4ca   :  { %v12930_v16 = vld [vmem:[#allocation7 + $0x990] sm:$0xf]  ;;  %v13731_v18 = vor.u32 %v16823_v11, %v13730_v8  ;;  %9221 = vmatpush.bf16.msrb.mxu2 %v13475_v15  ;;  %v8958_v15 = vadd.f32 %v8957_v3, %v8945_v23 }
 0x4cb   :  { %v16623_v17 = vld [vmem:[#allocation7 + $0x9ac] sm:$0xf0] }
 0x4cc   :  { %v13186_v30 = vld [vmem:[#allocation7 + $0xb90] sm:$0xf]  ;;  %v12931_v25 = vor.u32 %v16623_v17, %v12930_v16  ;;  %9234 = vmatpush.bf16.msrb.mxu3 %v13731_v18 }
 0x4cd   :  { %v16687_v19 = vld [vmem:[#allocation7 + $0xbac] sm:$0xf0] }
 0x4ce   :  { %v13442_v21 = vld [vmem:[#allocation7 + $0xd90] sm:$0xf]  ;;  %v13187_v28 = vor.u32 %v16687_v19, %v13186_v30  ;;  %9196 = vmatpush.bf16.msrb.mxu0 %v12931_v25 }
 0x4cf   :  { %v16751_v7 = vld [vmem:[#allocation7 + $0xdac] sm:$0xf0] }
 0x4d0   :  { %v13698_v22 = vld [vmem:[#allocation7 + $0xf90] sm:$0xf]  ;;  %v13443_v32 = vor.u32 %v16751_v7, %v13442_v21  ;;  %9209 = vmatpush.bf16.msrb.mxu1 %v13187_v28 }
 0x4d1   :  { %v16815_v50 = vld [vmem:[#allocation7 + $0xfac] sm:$0xf0] }
 0x4d2   :  { %v12898_v10 = vld [vmem:[#allocation7 + $0x950] sm:$0xf]  ;;  %v13699_v27 = vor.u32 %v16815_v50, %v13698_v22  ;;  %9222 = vmatpush.bf16.msrb.mxu2 %v13443_v32 }
 0x4d3   :  { %v16615_v29 = vld [vmem:[#allocation7 + $0x96c] sm:$0xf0] }
 0x4d4   :  { %v13154_v36 = vld [vmem:[#allocation7 + $0xb50] sm:$0xf]  ;;  %v12899_v41 = vor.u32 %v16615_v29, %v12898_v10  ;;  %9235 = vmatpush.bf16.msrb.mxu3 %v13699_v27  ;;  %v8970_v29 = vpop.f32.mrf.mxu2 }
 0x4d5   :  { %v16679_v31 = vld [vmem:[#allocation7 + $0xb6c] sm:$0xf0] }
 0x4d6   :  { %v13410_v46 = vld [vmem:[#allocation7 + $0xd50] sm:$0xf]  ;;  %v13155_v44 = vor.u32 %v16679_v31, %v13154_v36  ;;  %9197 = vmatpush.bf16.msrb.mxu0 %v12899_v41 }
 0x4d7   :  { %v16743_v39 = vld [vmem:[#allocation7 + $0xd6c] sm:$0xf0] }
 0x4d8   :  { %v13666_v40 = vld [vmem:[#allocation7 + $0xf50] sm:$0xf]  ;;  %v13411_v47 = vor.u32 %v16743_v39, %v13410_v46  ;;  %9210 = vmatpush.bf16.msrb.mxu1 %v13155_v44  ;;  %v8971_v46 = vadd.f32 %v8970_v29, %v8958_v15  ;;  %v8983_v39 = vpop.f32.mrf.mxu3 }
 0x4d9   :  { %v16807_v48 = vld [vmem:[#allocation7 + $0xf6c] sm:$0xf0] }
 0x4da   :  { %v12866_v52 = vld [vmem:[#allocation7 + $0x910] sm:$0xf]  ;;  %v13667_v57 = vor.u32 %v16807_v48, %v13666_v40  ;;  %9223 = vmatpush.bf16.msrb.mxu2 %v13411_v47  ;;  %v8946_v40 = vpop.f32.mrf.mxu0  ;;  %v17915_v44 = vadd.f32 %v8983_v39, %v8971_v46 }
 0x4db   :  { %v16607_v53 = vld [vmem:[#allocation7 + $0x92c] sm:$0xf0] }
 0x4dc   :  { %v13122_v56 = vld [vmem:[#allocation7 + $0xb10] sm:$0xf]  ;;  %v12867_v4 = vor.u32 %v16607_v53, %v12866_v52  ;;  %9236 = vmatpush.bf16.msrb.mxu3 %v13667_v57 }
 0x4dd   :  { %v16671_v58 = vld [vmem:[#allocation7 + $0xb2c] sm:$0xf0] }
 0x4de   :  { %v13378_v59 = vld [vmem:[#allocation7 + $0xd10] sm:$0xf]  ;;  %v13123_v8 = vor.u32 %v16671_v58, %v13122_v56  ;;  %9198 = vmatpush.bf16.msrb.mxu0 %v12867_v4 }
 0x4df   :  { %v16735_v61 = vld [vmem:[#allocation7 + $0xd2c] sm:$0xf0] }
 0x4e0   :  { %v13634_v63 = vld [vmem:[#allocation7 + $0xf10] sm:$0xf]  ;;  %v13379_v11 = vor.u32 %v16735_v61, %v13378_v59  ;;  %9211 = vmatpush.bf16.msrb.mxu1 %v13123_v8 }
 0x4e1   :  { %v16799_v0 = vld [vmem:[#allocation7 + $0xf2c] sm:$0xf0] }
 0x4e2   :  { %v12834_v12 = vld [vmem:[#allocation7 + $0x8d0] sm:$0xf]  ;;  %v13635_v16 = vor.u32 %v16799_v0, %v13634_v63  ;;  %9224 = vmatpush.bf16.msrb.mxu2 %v13379_v11 }
 0x4e3   :  { %v16599_v20 = vld [vmem:[#allocation7 + $0x8ec] sm:$0xf0] }
 0x4e4   :  { %v13090_v14 = vld [vmem:[#allocation7 + $0xad0] sm:$0xf]  ;;  %v12835_v7 = vor.u32 %v16599_v20, %v12834_v12  ;;  %9237 = vmatpush.bf16.msrb.mxu3 %v13635_v16  ;;  %v8972_v16 = vpop.f32.mrf.mxu2 }
 0x4e5   :  { %v16663_v17 = vld [vmem:[#allocation7 + $0xaec] sm:$0xf0] }
 0x4e6   :  { %v13346_v30 = vld [vmem:[#allocation7 + $0xcd0] sm:$0xf]  ;;  %v13091_v22 = vor.u32 %v16663_v17, %v13090_v14  ;;  %9199 = vmatpush.bf16.msrb.mxu0 %v12835_v7 }
 0x4e7   :  { %v16727_v18 = vld [vmem:[#allocation7 + $0xcec] sm:$0xf0] }
 0x4e8   :  { %v13602_v19 = vld [vmem:[#allocation7 + $0xed0] sm:$0xf]  ;;  %v13347_v50 = vor.u32 %v16727_v18, %v13346_v30  ;;  %9212 = vmatpush.bf16.msrb.mxu1 %v13091_v22 }
 0x4e9   :  { %v16791_v21 = vld [vmem:[#allocation7 + $0xeec] sm:$0xf0] }
 0x4ea   :  { %v12802_v25 = vld [vmem:[#allocation7 + $0x890] sm:$0xf]  ;;  %v13603_v10 = vor.u32 %v16791_v21, %v13602_v19  ;;  %9225 = vmatpush.bf16.msrb.mxu2 %v13347_v50  ;;  %v8985_v19 = vpop.f32.mrf.mxu3 }
 0x4eb   :  { %v16591_v28 = vld [vmem:[#allocation7 + $0x8ac] sm:$0xf0] }
 0x4ec   :  { %v13058_v32 = vld [vmem:[#allocation7 + $0xa90] sm:$0xf]  ;;  %v12803_v38 = vor.u32 %v16591_v28, %v12802_v25  ;;  %9238 = vmatpush.bf16.msrb.mxu3 %v13603_v10 }
 0x4ed   :  { %v16655_v36 = vld [vmem:[#allocation7 + $0xaac] sm:$0xf0] }
 0x4ee   :  { %v13314_v27 = vld [vmem:[#allocation7 + $0xc90] sm:$0xf]  ;;  %v13059_v47 = vor.u32 %v16655_v36, %v13058_v32  ;;  %9200 = vmatpush.bf16.msrb.mxu0 %v12803_v38 }
 0x4ef   :  { %v16719_v31 = vld [vmem:[#allocation7 + $0xcac] sm:$0xf0] }
 0x4f0   :  { %v13570_v48 = vld [vmem:[#allocation7 + $0xe90] sm:$0xf]  ;;  %v13315_v52 = vor.u32 %v16719_v31, %v13314_v27  ;;  %9213 = vmatpush.bf16.msrb.mxu1 %v13059_v47 }
 0x4f1   :  { %v16783_v41 = vld [vmem:[#allocation7 + $0xeac] sm:$0xf0] }
 0x4f2   :  { %v12770_v53 = vld [vmem:[#allocation7 + $0x850] sm:$0xf]  ;;  %v13571_v58 = vor.u32 %v16783_v41, %v13570_v48  ;;  %9226 = vmatpush.bf16.msrb.mxu2 %v13315_v52 }
 0x4f3   :  { %v16583_v56 = vld [vmem:[#allocation7 + $0x86c] sm:$0xf0] }
 0x4f4   :  { %v13026_v57 = vld [vmem:[#allocation7 + $0xa50] sm:$0xf]  ;;  %v12771_v23 = vor.u32 %v16583_v56, %v12770_v53  ;;  %9239 = vmatpush.bf16.msrb.mxu3 %v13571_v58 }
 0x4f5   :  { %v16647_v59 = vld [vmem:[#allocation7 + $0xa6c] sm:$0xf0] }
 0x4f6   :  { %v13282_v61 = vld [vmem:[#allocation7 + $0xc50] sm:$0xf]  ;;  %v13027_v8 = vor.u32 %v16647_v59, %v13026_v57  ;;  %9201 = vmatpush.bf16.msrb.mxu0 %v12771_v23 }
 0x4f7   :  { %v16711_v33 = vld [vmem:[#allocation7 + $0xc6c] sm:$0xf0] }
 0x4f8   :  { %v13538_v63 = vld [vmem:[#allocation7 + $0xe50] sm:$0xf]  ;;  %v13283_v11 = vor.u32 %v16711_v33, %v13282_v61  ;;  %9214 = vmatpush.bf16.msrb.mxu1 %v13027_v8 }
 0x4f9   :  { %v16775_v0 = vld [vmem:[#allocation7 + $0xe6c] sm:$0xf0] }
 0x4fa   :  { %v12738_v3 = vld [vmem:[#allocation7 + $0x810] sm:$0xf]  ;;  %v13539_v15 = vor.u32 %v16775_v0, %v13538_v63  ;;  %9227 = vmatpush.bf16.msrb.mxu2 %v13283_v11 }
 0x4fb   :  { %v16575_v4 = vld [vmem:[#allocation7 + $0x82c] sm:$0xf0] }
 0x4fc   :  { %v12994_v12 = vld [vmem:[#allocation7 + $0xa10] sm:$0xf]  ;;  %v12739_v50 = vor.u32 %v16575_v4, %v12738_v3  ;;  %9240 = vmatpush.bf16.msrb.mxu3 %v13539_v15 }
 0x4fd   :  { %v16639_v20 = vld [vmem:[#allocation7 + $0xa2c] sm:$0xf0] }
 0x4fe   :  { %v13250_v14 = vld [vmem:[#allocation7 + $0xc10] sm:$0xf]  ;;  %v12995_v10 = vor.u32 %v16639_v20, %v12994_v12  ;;  %9202 = vmatpush.bf16.msrb.mxu0 %v12739_v50 }
 0x4ff   :  { %v16703_v17 = vld [vmem:[#allocation7 + $0xc2c] sm:$0xf0] }
 0x500   :  { %v13506_v30 = vld [vmem:[#allocation7 + $0xe10] sm:$0xf]  ;;  %v13251_v29 = vor.u32 %v16703_v17, %v13250_v14  ;;  %9215 = vmatpush.bf16.msrb.mxu1 %v12995_v10 }
 0x501   :  { %v16767_v18 = vld [vmem:[#allocation7 + $0xe2c] sm:$0xf0]  ;;  %9203 = vmatmul.bf16.vlgmr.msrb.gmra.mxu0 %v17777_v51 }
 0x502   :  { %v13986_v21 = vld [vmem:[#allocation7 + $0x11d0] sm:$0xf]  ;;  %v13507_v31 = vor.u32 %v16767_v18, %v13506_v30  ;;  %9228 = vmatpush.bf16.msrb.mxu2 %v13251_v29 }
 0x503   :  { %v16887_v7 = vld [vmem:[#allocation7 + $0x11ec] sm:$0xf0]  ;;  %9216 = vmatmul.bf16.vlgmr.msrb.gmra.mxu1 %v17779_v43 }
 0x504   :  { %v14242_v22 = vld [vmem:[#allocation7 + $0x13d0] sm:$0xf]  ;;  %v13987_v46 = vor.u32 %v16887_v7, %v13986_v21  ;;  %9241 = vmatpush.bf16.msrb.mxu3 %v13507_v31 }
 0x505   :  { %v16951_v25 = vld [vmem:[#allocation7 + $0x13ec] sm:$0xf0]  ;;  %9229 = vmatmul.bf16.vlgmr.msrb.gmra.mxu2 %v17781_v45 }
 0x506   :  { %v14498_v28 = vld [vmem:[#allocation7 + $0x15d0] sm:$0xf]  ;;  %v14243_v39 = vor.u32 %v16951_v25, %v14242_v22  ;;  %9247 = vmatpush.bf16.msra.mxu0 %v13987_v46  ;;  %v8996_v22 = vpop.f32.mrf.mxu0 }
 0x507   :  { %v17015_v32 = vld [vmem:[#allocation7 + $0x15ec] sm:$0xf0]  ;;  %9242 = vmatmul.bf16.vlgmr.msrb.gmra.mxu3 %v17783_v55 }
 0x508   :  { %v14754_v36 = vld [vmem:[#allocation7 + $0x17d0] sm:$0xf]  ;;  %v14499_v40 = vor.u32 %v17015_v32, %v14498_v28  ;;  %9260 = vmatpush.bf16.msra.mxu1 %v14243_v39  ;;  %v8997_v28 = vadd.f32 %v8996_v22, %v17915_v44  ;;  %v9009_v32 = vpop.f32.mrf.mxu1 }
 0x509   :  { %v17079_v27 = vld [vmem:[#allocation7 + $0x17ec] sm:$0xf0] }
 0x50a   :  { %v13954_v48 = vld [vmem:[#allocation7 + $0x1190] sm:$0xf]  ;;  %v14755_v38 = vor.u32 %v17079_v27, %v14754_v36  ;;  %9273 = vmatpush.bf16.msra.mxu2 %v14499_v40  ;;  %v9010_v39 = vadd.f32 %v9009_v32, %v8997_v28 }
 0x50b   :  { %v16879_v41 = vld [vmem:[#allocation7 + $0x11ac] sm:$0xf0] }
 0x50c   :  { %v14210_v6 = vld [vmem:[#allocation7 + $0x1390] sm:$0xf]  ;;  %v13955_v58 = vor.u32 %v16879_v41, %v13954_v48  ;;  %9286 = vmatpush.bf16.msra.mxu3 %v14755_v38 }
 0x50d   :  { %v16943_v47 = vld [vmem:[#allocation7 + $0x13ac] sm:$0xf0] }
 0x50e   :  { %v14466_v52 = vld [vmem:[#allocation7 + $0x1590] sm:$0xf]  ;;  %v14211_v59 = vor.u32 %v16943_v47, %v14210_v6  ;;  %9248 = vmatpush.bf16.msra.mxu0 %v13955_v58 }
 0x50f   :  { %v17007_v53 = vld [vmem:[#allocation7 + $0x15ac] sm:$0xf0] }
 0x510   :  { %v14722_v56 = vld [vmem:[#allocation7 + $0x1790] sm:$0xf]  ;;  %v14467_v61 = vor.u32 %v17007_v53, %v14466_v52  ;;  %9261 = vmatpush.bf16.msra.mxu1 %v14211_v59 }
 0x511   :  { %v17071_v57 = vld [vmem:[#allocation7 + $0x17ac] sm:$0xf0] }
 0x512   :  { %v13922_v33 = vld [vmem:[#allocation7 + $0x1150] sm:$0xf]  ;;  %v14723_v23 = vor.u32 %v17071_v57, %v14722_v56  ;;  %9274 = vmatpush.bf16.msra.mxu2 %v14467_v61  ;;  %v9022_v61 = vpop.f32.mrf.mxu2 }
 0x513   :  { %v16871_v63 = vld [vmem:[#allocation7 + $0x116c] sm:$0xf0] }
 0x514   :  { %v14178_v0 = vld [vmem:[#allocation7 + $0x1350] sm:$0xf]  ;;  %v13923_v20 = vor.u32 %v16871_v63, %v13922_v33  ;;  %9287 = vmatpush.bf16.msra.mxu3 %v14723_v23  ;;  %v9023_v23 = vadd.f32 %v9022_v61, %v9010_v39 }
 0x515   :  { %v16935_v3 = vld [vmem:[#allocation7 + $0x136c] sm:$0xf0] }
 0x516   :  { %v14434_v4 = vld [vmem:[#allocation7 + $0x1550] sm:$0xf]  ;;  %v14179_v14 = vor.u32 %v16935_v3, %v14178_v0  ;;  %9249 = vmatpush.bf16.msra.mxu0 %v13923_v20  ;;  %v9035_v3 = vpop.f32.mrf.mxu3 }
 0x517   :  { %v16999_v8 = vld [vmem:[#allocation7 + $0x156c] sm:$0xf0] }
 0x518   :  { %v14690_v11 = vld [vmem:[#allocation7 + $0x1750] sm:$0xf]  ;;  %v14435_v15 = vor.u32 %v16999_v8, %v14434_v4  ;;  %9262 = vmatpush.bf16.msra.mxu1 %v14179_v14  ;;  %v8998_v4 = vpop.f32.mrf.mxu0  ;;  %v17922_v14 = vadd.f32 %v9035_v3, %v9023_v23 }
 0x519   :  { %v17063_v12 = vld [vmem:[#allocation7 + $0x176c] sm:$0xf0] }
 0x51a   :  { %v13890_v16 = vld [vmem:[#allocation7 + $0x1110] sm:$0xf]  ;;  %v14691_v18 = vor.u32 %v17063_v12, %v14690_v11  ;;  %9275 = vmatpush.bf16.msra.mxu2 %v14435_v15  ;;  %v9011_v12 = vpop.f32.mrf.mxu1 }
 0x51b   :  { %v16863_v17 = vld [vmem:[#allocation7 + $0x112c] sm:$0xf0] }
 0x51c   :  { %v14146_v30 = vld [vmem:[#allocation7 + $0x1310] sm:$0xf]  ;;  %v13891_v10 = vor.u32 %v16863_v17, %v13890_v16  ;;  %9288 = vmatpush.bf16.msra.mxu3 %v14691_v18 }
 0x51d   :  { %v16927_v19 = vld [vmem:[#allocation7 + $0x132c] sm:$0xf0] }
 0x51e   :  { %v14402_v21 = vld [vmem:[#allocation7 + $0x1510] sm:$0xf]  ;;  %v14147_v29 = vor.u32 %v16927_v19, %v14146_v30  ;;  %9250 = vmatpush.bf16.msra.mxu0 %v13891_v10 }
 0x51f   :  { %v16991_v7 = vld [vmem:[#allocation7 + $0x152c] sm:$0xf0] }
 0x520   :  { %v14658_v50 = vld [vmem:[#allocation7 + $0x1710] sm:$0xf]  ;;  %v14403_v36 = vor.u32 %v16991_v7, %v14402_v21  ;;  %9263 = vmatpush.bf16.msra.mxu1 %v14147_v29 }
 0x521   :  { %v17055_v25 = vld [vmem:[#allocation7 + $0x172c] sm:$0xf0] }
 0x522   :  { %v13858_v27 = vld [vmem:[#allocation7 + $0x10d0] sm:$0xf]  ;;  %v14659_v40 = vor.u32 %v17055_v25, %v14658_v50  ;;  %9276 = vmatpush.bf16.msra.mxu2 %v14403_v36 }
 0x523   :  { %v16855_v31 = vld [vmem:[#allocation7 + $0x10ec] sm:$0xf0] }
 0x524   :  { %v14114_v46 = vld [vmem:[#allocation7 + $0x12d0] sm:$0xf]  ;;  %v13859_v52 = vor.u32 %v16855_v31, %v13858_v27  ;;  %9289 = vmatpush.bf16.msra.mxu3 %v14659_v40  ;;  %v9024_v40 = vpop.f32.mrf.mxu2 }
 0x525   :  { %v16919_v48 = vld [vmem:[#allocation7 + $0x12ec] sm:$0xf0] }
 0x526   :  { %v14370_v41 = vld [vmem:[#allocation7 + $0x14d0] sm:$0xf]  ;;  %v14115_v44 = vor.u32 %v16919_v48, %v14114_v46  ;;  %9251 = vmatpush.bf16.msra.mxu0 %v13859_v52 }
 0x527   :  { %v16983_v6 = vld [vmem:[#allocation7 + $0x14ec] sm:$0xf0] }
 0x528   :  { %v14626_v38 = vld [vmem:[#allocation7 + $0x16d0] sm:$0xf]  ;;  %v14371_v53 = vor.u32 %v16983_v6, %v14370_v41  ;;  %9264 = vmatpush.bf16.msra.mxu1 %v14115_v44 }
 0x529   :  { %v17047_v47 = vld [vmem:[#allocation7 + $0x16ec] sm:$0xf0] }
 0x52a   :  { %v13826_v56 = vld [vmem:[#allocation7 + $0x1090] sm:$0xf]  ;;  %v14627_v59 = vor.u32 %v17047_v47, %v14626_v38  ;;  %9277 = vmatpush.bf16.msra.mxu2 %v14371_v53  ;;  %v9037_v38 = vpop.f32.mrf.mxu3 }
 0x52b   :  { %v16847_v57 = vld [vmem:[#allocation7 + $0x10ac] sm:$0xf0] }
 0x52c   :  { %v14082_v58 = vld [vmem:[#allocation7 + $0x1290] sm:$0xf]  ;;  %v13827_v20 = vor.u32 %v16847_v57, %v13826_v56  ;;  %9290 = vmatpush.bf16.msra.mxu3 %v14627_v59 }
 0x52d   :  { %v16911_v33 = vld [vmem:[#allocation7 + $0x12ac] sm:$0xf0] }
 0x52e   :  { %v14338_v63 = vld [vmem:[#allocation7 + $0x1490] sm:$0xf]  ;;  %v14083_v15 = vor.u32 %v16911_v33, %v14082_v58  ;;  %9252 = vmatpush.bf16.msra.mxu0 %v13827_v20 }
 0x52f   :  { %v16975_v0 = vld [vmem:[#allocation7 + $0x14ac] sm:$0xf0] }
 0x530   :  { %v14594_v8 = vld [vmem:[#allocation7 + $0x1690] sm:$0xf]  ;;  %v14339_v16 = vor.u32 %v16975_v0, %v14338_v63  ;;  %9265 = vmatpush.bf16.msra.mxu1 %v14083_v15 }
 0x531   :  { %v17039_v11 = vld [vmem:[#allocation7 + $0x16ac] sm:$0xf0] }
 0x532   :  { %v13794_v17 = vld [vmem:[#allocation7 + $0x1050] sm:$0xf]  ;;  %v14595_v19 = vor.u32 %v17039_v11, %v14594_v8  ;;  %9278 = vmatpush.bf16.msra.mxu2 %v14339_v16 }
 0x533   :  { %v16839_v30 = vld [vmem:[#allocation7 + $0x106c] sm:$0xf0] }
 0x534   :  { %v14050_v18 = vld [vmem:[#allocation7 + $0x1250] sm:$0xf]  ;;  %v13795_v28 = vor.u32 %v16839_v30, %v13794_v17  ;;  %9291 = vmatpush.bf16.msra.mxu3 %v14595_v19 }
 0x535   :  { %v16903_v21 = vld [vmem:[#allocation7 + $0x126c] sm:$0xf0] }
 0x536   :  { %v14306_v7 = vld [vmem:[#allocation7 + $0x1450] sm:$0xf]  ;;  %v14051_v29 = vor.u32 %v16903_v21, %v14050_v18  ;;  %9253 = vmatpush.bf16.msra.mxu0 %v13795_v28 }
 0x537   :  { %v16967_v22 = vld [vmem:[#allocation7 + $0x146c] sm:$0xf0] }
 0x538   :  { %v14562_v50 = vld [vmem:[#allocation7 + $0x1650] sm:$0xf]  ;;  %v14307_v36 = vor.u32 %v16967_v22, %v14306_v7  ;;  %9266 = vmatpush.bf16.msra.mxu1 %v14051_v29 }
 0x539   :  { %v17031_v25 = vld [vmem:[#allocation7 + $0x166c] sm:$0xf0] }
 0x53a   :  { %v13762_v32 = vld [vmem:[#allocation7 + $0x1010] sm:$0xf]  ;;  %v14563_v39 = vor.u32 %v17031_v25, %v14562_v50  ;;  %9279 = vmatpush.bf16.msra.mxu2 %v14307_v36 }
 0x53b   :  { %v16831_v10 = vld [vmem:[#allocation7 + $0x102c] sm:$0xf0] }
 0x53c   :  { %v14018_v27 = vld [vmem:[#allocation7 + $0x1210] sm:$0xf]  ;;  %v13763_v53 = vor.u32 %v16831_v10, %v13762_v32  ;;  %9292 = vmatpush.bf16.msra.mxu3 %v14563_v39 }
 0x53d   :  { %v16895_v31 = vld [vmem:[#allocation7 + $0x122c] sm:$0xf0] }
 0x53e   :  { %v14274_v46 = vld [vmem:[#allocation7 + $0x1410] sm:$0xf]  ;;  %v14019_v59 = vor.u32 %v16895_v31, %v14018_v27  ;;  %9254 = vmatpush.bf16.msra.mxu0 %v13763_v53 }
 0x53f   :  { %v16959_v48 = vld [vmem:[#allocation7 + $0x142c] sm:$0xf0] }
 0x540   :  { %v14530_v41 = vld [vmem:[#allocation7 + $0x1610] sm:$0xf]  ;;  %v14275_v61 = vor.u32 %v16959_v48, %v14274_v46  ;;  %9267 = vmatpush.bf16.msra.mxu1 %v14019_v59 }
 0x541   :  { %v17023_v6 = vld [vmem:[#allocation7 + $0x162c] sm:$0xf0]  ;;  %9255 = vmatmul.bf16.vlgmr.msra.gmra.mxu0 %v17801_v5 }
 0x542   :  { %v15010_v47 = vld [vmem:[#allocation7 + $0x19d0] sm:$0xf]  ;;  %v14531_v0 = vor.u32 %v17023_v6, %v14530_v41  ;;  %9280 = vmatpush.bf16.msra.mxu2 %v14275_v61 }
 0x543   :  { %v17143_v52 = vld [vmem:[#allocation7 + $0x19ec] sm:$0xf0]  ;;  %9268 = vmatmul.bf16.vlgmr.msra.gmra.mxu1 %v17805_v2 }
 0x544   :  { %v15266_v44 = vld [vmem:[#allocation7 + $0x1bd0] sm:$0xf]  ;;  %v15011_v23 = vor.u32 %v17143_v52, %v15010_v47  ;;  %9293 = vmatpush.bf16.msra.mxu3 %v14531_v0 }
 0x545   :  { %v17207_v56 = vld [vmem:[#allocation7 + $0x1bec] sm:$0xf0]  ;;  %9281 = vmatmul.bf16.vlgmr.msra.gmra.mxu2 %v17799_v62 }
 0x546   :  { %v15522_v57 = vld [vmem:[#allocation7 + $0x1dd0] sm:$0xf]  ;;  %v15267_v3 = vor.u32 %v17207_v56, %v15266_v44  ;;  %9299 = vmatpush.bf16.msrb.mxu0 %v15011_v23  ;;  %v9048_v44 = vpop.f32.mrf.mxu0 }
 0x547   :  { %v17271_v58 = vld [vmem:[#allocation7 + $0x1dec] sm:$0xf0]  ;;  %9294 = vmatmul.bf16.vlgmr.msra.gmra.mxu3 %v17803_v1 }
 0x548   :  { %v15778_v33 = vld [vmem:[#allocation7 + $0x1fd0] sm:$0xf]  ;;  %v15523_v4 = vor.u32 %v17271_v58, %v15522_v57  ;;  %9312 = vmatpush.bf16.msrb.mxu1 %v15267_v3  ;;  %v9049_v57 = vadd.f32 %v9048_v44, %v17922_v14  ;;  %v9061_v58 = vpop.f32.mrf.mxu1 }
 0x549   :  { %v17335_v63 = vld [vmem:[#allocation7 + $0x1fec] sm:$0xf0] }
 0x54a   :  { %v14978_v8 = vld [vmem:[#allocation7 + $0x1990] sm:$0xf]  ;;  %v15779_v20 = vor.u32 %v17335_v63, %v15778_v33  ;;  %9325 = vmatpush.bf16.msrb.mxu2 %v15523_v4  ;;  %v9062_v3 = vadd.f32 %v9061_v58, %v9049_v57 }
 0x54b   :  { %v17135_v11 = vld [vmem:[#allocation7 + $0x19ac] sm:$0xf0] }
 0x54c   :  { %v15234_v12 = vld [vmem:[#allocation7 + $0x1b90] sm:$0xf]  ;;  %v14979_v19 = vor.u32 %v17135_v11, %v14978_v8  ;;  %9338 = vmatpush.bf16.msrb.mxu3 %v15779_v20 }
 0x54d   :  { %v17199_v15 = vld [vmem:[#allocation7 + $0x1bac] sm:$0xf0] }
 0x54e   :  { %v15490_v16 = vld [vmem:[#allocation7 + $0x1d90] sm:$0xf]  ;;  %v15235_v21 = vor.u32 %v17199_v15, %v15234_v12  ;;  %9300 = vmatpush.bf16.msrb.mxu0 %v14979_v19 }
 0x54f   :  { %v17263_v17 = vld [vmem:[#allocation7 + $0x1dac] sm:$0xf0] }
 0x550   :  { %v15746_v30 = vld [vmem:[#allocation7 + $0x1f90] sm:$0xf]  ;;  %v15491_v7 = vor.u32 %v17263_v17, %v15490_v16  ;;  %9313 = vmatpush.bf16.msrb.mxu1 %v15235_v21 }
 0x551   :  { %v17327_v18 = vld [vmem:[#allocation7 + $0x1fac] sm:$0xf0] }
 0x552   :  { %v14946_v22 = vld [vmem:[#allocation7 + $0x1950] sm:$0xf]  ;;  %v15747_v28 = vor.u32 %v17327_v18, %v15746_v30  ;;  %9326 = vmatpush.bf16.msrb.mxu2 %v15491_v7  ;;  %v9074_v7 = vpop.f32.mrf.mxu2 }
 0x553   :  { %v17127_v50 = vld [vmem:[#allocation7 + $0x196c] sm:$0xf0] }
 0x554   :  { %v15202_v25 = vld [vmem:[#allocation7 + $0x1b50] sm:$0xf]  ;;  %v14947_v31 = vor.u32 %v17127_v50, %v14946_v22  ;;  %9339 = vmatpush.bf16.msrb.mxu3 %v15747_v28  ;;  %v9075_v28 = vadd.f32 %v9074_v7, %v9062_v3 }
 0x555   :  { %v17191_v32 = vld [vmem:[#allocation7 + $0x1b6c] sm:$0xf0] }
 0x556   :  { %v15458_v10 = vld [vmem:[#allocation7 + $0x1d50] sm:$0xf]  ;;  %v15203_v46 = vor.u32 %v17191_v32, %v15202_v25  ;;  %9301 = vmatpush.bf16.msrb.mxu0 %v14947_v31  ;;  %v9087_v32 = vpop.f32.mrf.mxu3 }
 0x557   :  { %v17255_v29 = vld [vmem:[#allocation7 + $0x1d6c] sm:$0xf0] }
 0x558   :  { %v15714_v36 = vld [vmem:[#allocation7 + $0x1f50] sm:$0xf]  ;;  %v15459_v39 = vor.u32 %v17255_v29, %v15458_v10  ;;  %9314 = vmatpush.bf16.msrb.mxu1 %v15203_v46  ;;  %v9050_v10 = vpop.f32.mrf.mxu0  ;;  %v17929_v46 = vadd.f32 %v9087_v32, %v9075_v28 }
 0x559   :  { %v17319_v27 = vld [vmem:[#allocation7 + $0x1f6c] sm:$0xf0] }
 0x55a   :  { %v14914_v40 = vld [vmem:[#allocation7 + $0x1910] sm:$0xf]  ;;  %v15715_v6 = vor.u32 %v17319_v27, %v15714_v36  ;;  %9327 = vmatpush.bf16.msrb.mxu2 %v15459_v39  ;;  %v9063_v27 = vpop.f32.mrf.mxu1 }
 0x55b   :  { %v17119_v48 = vld [vmem:[#allocation7 + $0x192c] sm:$0xf0]  ;;  %v16427_v27 = vld [vmem:[#allocation7 + $0x394] sm:$0xf] }
 0x55c   :  { %v15170_v41 = vld [vmem:[#allocation7 + $0x1b10] sm:$0xf]  ;;  %v14915_v59 = vor.u32 %v17119_v48, %v14914_v40  ;;  %9340 = vmatpush.bf16.msrb.mxu3 %v15715_v6 }
 0x55d   :  { %v17183_v38 = vld [vmem:[#allocation7 + $0x1b2c] sm:$0xf0] }
 0x55e   :  { %v15426_v47 = vld [vmem:[#allocation7 + $0x1d10] sm:$0xf]  ;;  %v15171_v61 = vor.u32 %v17183_v38, %v15170_v41  ;;  %9302 = vmatpush.bf16.msrb.mxu0 %v14915_v59 }
 0x55f   :  { %v17247_v52 = vld [vmem:[#allocation7 + $0x1d2c] sm:$0xf0] }
 0x560   :  { %v15682_v53 = vld [vmem:[#allocation7 + $0x1f10] sm:$0xf]  ;;  %v15427_v33 = vor.u32 %v17247_v52, %v15426_v47  ;;  %9315 = vmatpush.bf16.msrb.mxu1 %v15171_v61 }
 0x561   :  { %v17311_v56 = vld [vmem:[#allocation7 + $0x1f2c] sm:$0xf0] }
 0x562   :  { %v14882_v63 = vld [vmem:[#allocation7 + $0x18d0] sm:$0xf]  ;;  %v15683_v4 = vor.u32 %v17311_v56, %v15682_v53  ;;  %9328 = vmatpush.bf16.msrb.mxu2 %v15427_v33 }
 0x563   :  { %v17111_v0 = vld [vmem:[#allocation7 + $0x18ec] sm:$0xf0] }
 0x564   :  { %v15138_v23 = vld [vmem:[#allocation7 + $0x1ad0] sm:$0xf]  ;;  %v14883_v16 = vor.u32 %v17111_v0, %v14882_v63  ;;  %9341 = vmatpush.bf16.msrb.mxu3 %v15683_v4  ;;  %v9076_v4 = vpop.f32.mrf.mxu2 }
 0x565   :  { %v17175_v8 = vld [vmem:[#allocation7 + $0x1aec] sm:$0xf0]  ;;  %v16347_v4 = vld [vmem:[#allocation7 + $0x114] sm:$0xf] }
 0x566   :  { %v15394_v11 = vld [vmem:[#allocation7 + $0x1cd0] sm:$0xf]  ;;  %v15139_v14 = vor.u32 %v17175_v8, %v15138_v23  ;;  %9303 = vmatpush.bf16.msrb.mxu0 %v14883_v16  ;;  %v11940_v16 = vld [vmem:[#allocation7 + $0x1f0] sm:$0xf0] }
 0x567   :  { %v17239_v12 = vld [vmem:[#allocation7 + $0x1cec] sm:$0xf0] }
 0x568   :  { %v15650_v20 = vld [vmem:[#allocation7 + $0x1ed0] sm:$0xf]  ;;  %v15395_v17 = vor.u32 %v17239_v12, %v15394_v11  ;;  %9316 = vmatpush.bf16.msrb.mxu1 %v15139_v14  ;;  %v16435_v14 = vld [vmem:[#allocation7 + $0x3d4] sm:$0xf] }
 0x569   :  { %v17303_v15 = vld [vmem:[#allocation7 + $0x1eec] sm:$0xf0] }
 0x56a   :  { %v14850_v30 = vld [vmem:[#allocation7 + $0x1890] sm:$0xf]  ;;  %v15651_v21 = vor.u32 %v17303_v15, %v15650_v20  ;;  %9329 = vmatpush.bf16.msrb.mxu2 %v15395_v17  ;;  %v9089_v20 = vpop.f32.mrf.mxu3  ;;  %v16371_v15 = vld [vmem:[#allocation7 + $0x1d4] sm:$0xf] }
 0x56b   :  { %v17103_v18 = vld [vmem:[#allocation7 + $0x18ac] sm:$0xf0]  ;;  %v11943_v28 = vor.u32 %v16371_v15, %v11940_v16  ;;  %v12100_v20 = vld [vmem:[#allocation7 + $0x330] sm:$0xf0] }
 0x56c   :  { %v15106_v19 = vld [vmem:[#allocation7 + $0x1a90] sm:$0xf]  ;;  %v14851_v31 = vor.u32 %v17103_v18, %v14850_v30  ;;  %9342 = vmatpush.bf16.msrb.mxu3 %v15651_v21  ;;  %v12196_v30 = vld [vmem:[#allocation7 + $0x3f0] sm:$0xf0] }
 0x56d   :  { %v17167_v22 = vld [vmem:[#allocation7 + $0x1aac] sm:$0xf0]  ;;  %v16499_v18 = vld [vmem:[#allocation7 + $0x5d4] sm:$0xf]  ;;  %v12199_v32 = vor.u32 %v16435_v14, %v12196_v30  ;;  %v9100_v14 = vpop.f32.mrf.mxu0 }
 0x56e   :  { %v15362_v50 = vld [vmem:[#allocation7 + $0x1c90] sm:$0xf]  ;;  %v15107_v39 = vor.u32 %v17167_v22, %v15106_v19  ;;  %9304 = vmatpush.bf16.msrb.mxu0 %v14851_v31  ;;  %v12452_v19 = vld [vmem:[#allocation7 + $0x5f0] sm:$0xf0] }
 0x56f   :  { %v17231_v25 = vld [vmem:[#allocation7 + $0x1cac] sm:$0xf0]  ;;  %v16563_v22 = vld [vmem:[#allocation7 + $0x7d4] sm:$0xf]  ;;  %v12455_v10 = vor.u32 %v16499_v18, %v12452_v19  ;;  %v9101_v18 = vadd.f32 %v9100_v14, %v17929_v46  ;;  %v9113_v19 = vpop.f32.mrf.mxu1 }
 0x570   :  { %v15618_v29 = vld [vmem:[#allocation7 + $0x1e90] sm:$0xf]  ;;  %v15363_v40 = vor.u32 %v17231_v25, %v15362_v50  ;;  %9317 = vmatpush.bf16.msrb.mxu1 %v15107_v39  ;;  %v12708_v50 = vld [vmem:[#allocation7 + $0x7f0] sm:$0xf0] }
 0x571   :  { %v17295_v36 = vld [vmem:[#allocation7 + $0x1eac] sm:$0xf0]  ;;  %v12711_v31 = vor.u32 %v16563_v22, %v12708_v50  ;;  %v12164_v39 = vld [vmem:[#allocation7 + $0x3b0] sm:$0xf0] }
 0x572   :  { %v14818_v48 = vld [vmem:[#allocation7 + $0x1850] sm:$0xf]  ;;  %v15619_v38 = vor.u32 %v17295_v36, %v15618_v29  ;;  %9330 = vmatpush.bf16.msrb.mxu2 %v15363_v40  ;;  %v16363_v29 = vld [vmem:[#allocation7 + $0x194] sm:$0xf] }
 0x573   :  { %v17095_v41 = vld [vmem:[#allocation7 + $0x186c] sm:$0xf0]  ;;  %v11908_v36 = vld [vmem:[#allocation7 + $0x1b0] sm:$0xf0] }
 0x574   :  { %v15074_v6 = vld [vmem:[#allocation7 + $0x1a50] sm:$0xf]  ;;  %v14819_v57 = vor.u32 %v17095_v41, %v14818_v48  ;;  %9343 = vmatpush.bf16.msrb.mxu3 %v15619_v38  ;;  %v16491_v40 = vld [vmem:[#allocation7 + $0x594] sm:$0xf]  ;;  %v11911_v38 = vor.u32 %v16363_v29, %v11908_v36 }
 0x575   :  { %v17159_v47 = vld [vmem:[#allocation7 + $0x1a6c] sm:$0xf0]  ;;  %v12420_v48 = vld [vmem:[#allocation7 + $0x5b0] sm:$0xf0] }
 0x576   :  { %v15330_v52 = vld [vmem:[#allocation7 + $0x1c50] sm:$0xf]  ;;  %v15075_v61 = vor.u32 %v17159_v47, %v15074_v6  ;;  %9305 = vmatpush.bf16.msrb.mxu0 %v14819_v57  ;;  %v16555_v41 = vld [vmem:[#allocation7 + $0x794] sm:$0xf]  ;;  %v12167_v47 = vor.u32 %v16427_v27, %v12164_v39 }
 0x577   :  { %v17223_v44 = vld [vmem:[#allocation7 + $0x1c6c] sm:$0xf0]  ;;  %v12676_v6 = vld [vmem:[#allocation7 + $0x7b0] sm:$0xf0] }
 0x578   :  { %v15586_v53 = vld [vmem:[#allocation7 + $0x1e50] sm:$0xf]  ;;  %v15331_v33 = vor.u32 %v17223_v44, %v15330_v52  ;;  %9318 = vmatpush.bf16.msrb.mxu1 %v15075_v61  ;;  %v12423_v52 = vor.u32 %v16491_v40, %v12420_v48  ;;  %v16355_v44 = vld [vmem:[#allocation7 + $0x154] sm:$0xf]  ;;  %v12679_v57 = vor.u32 %v16555_v41, %v12676_v6 }
 0x579   :  { %v17287_v56 = vld [vmem:[#allocation7 + $0x1e6c] sm:$0xf0]  ;;  %v12388_v61 = vld [vmem:[#allocation7 + $0x570] sm:$0xf0] }
 0x57a   :  { %v14786_v58 = vld [vmem:[#allocation7 + $0x1810] sm:$0xf]  ;;  %v15587_v3 = vor.u32 %v17287_v56, %v15586_v53  ;;  %9331 = vmatpush.bf16.msrb.mxu2 %v15331_v33  ;;  %v11876_v53 = vld [vmem:[#allocation7 + $0x170] sm:$0xf0] }
 0x57b   :  { %v17087_v59 = vld [vmem:[#allocation7 + $0x182c] sm:$0xf0]  ;;  %v16419_v56 = vld [vmem:[#allocation7 + $0x354] sm:$0xf] }
 0x57c   :  { %v15042_v63 = vld [vmem:[#allocation7 + $0x1a10] sm:$0xf]  ;;  %v14787_v17 = vor.u32 %v17087_v59, %v14786_v58  ;;  %9344 = vmatpush.bf16.msrb.mxu3 %v15587_v3  ;;  %v12132_v58 = vld [vmem:[#allocation7 + $0x370] sm:$0xf0] }
 0x57d   :  { %v17151_v0 = vld [vmem:[#allocation7 + $0x1a2c] sm:$0xf0]  ;;  %v16483_v59 = vld [vmem:[#allocation7 + $0x554] sm:$0xf] }
 0x57e   :  { %v15298_v23 = vld [vmem:[#allocation7 + $0x1c10] sm:$0xf]  ;;  %v15043_v21 = vor.u32 %v17151_v0, %v15042_v63  ;;  %9306 = vmatpush.bf16.msrb.mxu0 %v14787_v17  ;;  %v16547_v33 = vld [vmem:[#allocation7 + $0x754] sm:$0xf]  ;;  %v11879_v0 = vor.u32 %v16355_v44, %v11876_v53  ;;  %v12391_v3 = vor.u32 %v16483_v59, %v12388_v61  ;;  %v9102_v59 = vpop.f32.mrf.mxu0 }
 0x57f   :  { %v17215_v8 = vld [vmem:[#allocation7 + $0x1c2c] sm:$0xf0]  ;;  %v12644_v63 = vld [vmem:[#allocation7 + $0x770] sm:$0xf0] }
 0x580   :  { %v15554_v11 = vld [vmem:[#allocation7 + $0x1e10] sm:$0xf]  ;;  %v15299_v7 = vor.u32 %v17215_v8, %v15298_v23  ;;  %9319 = vmatpush.bf16.msrb.mxu1 %v15043_v21  ;;  %v12135_v23 = vor.u32 %v16419_v56, %v12132_v58  ;;  %v11844_v8 = vld [vmem:[#allocation7 + $0x130] sm:$0xf0]  ;;  %v9139_v58 = vpop.f32.mrf.mxu3 }
 0x581   :  { %v17279_v12 = vld [vmem:[#allocation7 + $0x1e2c] sm:$0xf0]  ;;  %9307 = vmatmul.bf16.vlgmr.msrb.gmra.mxu0 %v17813_v34  ;;  %v16475_v15 = vld [vmem:[#allocation7 + $0x514] sm:$0xf]  ;;  %v11847_v21 = vor.u32 %v16347_v4, %v11844_v8 }
 0x582   :  { %v15555_v25 = vor.u32 %v17279_v12, %v15554_v11  ;;  %9332 = vmatpush.bf16.msrb.mxu2 %v15299_v7  ;;  %9351 = vmatpush.bf16.msra.mxu0 %v11943_v28  ;;  %v16411_v11 = vld [vmem:[#allocation7 + $0x314] sm:$0xf]  ;;  %v12647_v12 = vor.u32 %v16547_v33, %v12644_v63  ;;  %v9115_v63 = vpop.f32.mrf.mxu1 }
 0x583   :  { %9320 = vmatmul.bf16.vlgmr.msrb.gmra.mxu1 %v17815_v13  ;;  %v12356_v16 = vld [vmem:[#allocation7 + $0x530] sm:$0xf0]  ;;  %v12103_v7 = vor.u32 %v16411_v11, %v12100_v20 }
 0x584   :  { %9345 = vmatpush.bf16.msrb.mxu3 %v15555_v25  ;;  %9364 = vmatpush.bf16.msra.mxu1 %v12199_v32  ;;  %v16539_v17 = vld [vmem:[#allocation7 + $0x714] sm:$0xf]  ;;  %v12359_v22 = vor.u32 %v16475_v15, %v12356_v16  ;;  %v9114_v32 = vadd.f32 %v9113_v19, %v9101_v18 }
 0x585   :  { %9333 = vmatmul.bf16.vlgmr.msrb.gmra.mxu2 %v17821_v26  ;;  %v12612_v30 = vld [vmem:[#allocation7 + $0x730] sm:$0xf0] }
 0x586   :  { %9377 = vmatpush.bf16.msra.mxu2 %v12455_v10  ;;  %9352 = vmatpush.bf16.msra.mxu0 %v11911_v38  ;;  %v16339_v50 = vld [vmem:[#allocation7 + $0xd4] sm:$0xf]  ;;  %v12615_v10 = vor.u32 %v16539_v17, %v12612_v30 }
 0x587   :  { %9346 = vmatmul.bf16.vlgmr.msrb.gmra.mxu3 %v17824_v49  ;;  %v11812_v25 = vld [vmem:[#allocation7 + $0xf0] sm:$0xf0] }
 0x588   :  { %9390 = vmatpush.bf16.msra.mxu3 %v12711_v31  ;;  %9365 = vmatpush.bf16.msra.mxu1 %v12167_v47  ;;  %v16403_v28 = vld [vmem:[#allocation7 + $0x2d4] sm:$0xf]  ;;  %v11815_v40 = vor.u32 %v16339_v50, %v11812_v25 }
 0x589   :  { %v12068_v29 = vld [vmem:[#allocation7 + $0x2f0] sm:$0xf0] }
 0x58a   :  { %9378 = vmatpush.bf16.msra.mxu2 %v12423_v52  ;;  %9353 = vmatpush.bf16.msra.mxu0 %v11879_v0  ;;  %v16467_v36 = vld [vmem:[#allocation7 + $0x4d4] sm:$0xf]  ;;  %v12071_v46 = vor.u32 %v16403_v28, %v12068_v29  ;;  %v9126_v52 = vpop.f32.mrf.mxu2 }
 0x58b   :  { %v12324_v27 = vld [vmem:[#allocation7 + $0x4f0] sm:$0xf0] }
 0x58c   :  { %9391 = vmatpush.bf16.msra.mxu3 %v12679_v57  ;;  %9366 = vmatpush.bf16.msra.mxu1 %v12135_v23  ;;  %v16531_v31 = vld [vmem:[#allocation7 + $0x6d4] sm:$0xf]  ;;  %v12327_v48 = vor.u32 %v16467_v36, %v12324_v27  ;;  %v9127_v57 = vadd.f32 %v9126_v52, %v9114_v32 }
 0x58d   :  { %v12580_v39 = vld [vmem:[#allocation7 + $0x6f0] sm:$0xf0] }
 0x58e   :  { %9379 = vmatpush.bf16.msra.mxu2 %v12391_v3  ;;  %9354 = vmatpush.bf16.msra.mxu0 %v11847_v21  ;;  %v16331_v41 = vld [vmem:[#allocation7 + $0x94] sm:$0xf]  ;;  %v12583_v47 = vor.u32 %v16531_v31, %v12580_v39  ;;  %v17936_v23 = vadd.f32 %v9139_v58, %v9127_v57  ;;  %v9141_v31 = vpop.f32.mrf.mxu3 }
 0x58f   :  { %v11780_v6 = vld [vmem:[#allocation7 + $0xb0] sm:$0xf0] }
 0x590   :  { %9392 = vmatpush.bf16.msra.mxu3 %v12647_v12  ;;  %9367 = vmatpush.bf16.msra.mxu1 %v12103_v7  ;;  %v16395_v38 = vld [vmem:[#allocation7 + $0x294] sm:$0xf]  ;;  %v11783_v0 = vor.u32 %v16331_v41, %v11780_v6 }
 0x591   :  { %v12036_v44 = vld [vmem:[#allocation7 + $0x2b0] sm:$0xf0] }
 0x592   :  { %9380 = vmatpush.bf16.msra.mxu2 %v12359_v22  ;;  %v16459_v53 = vld [vmem:[#allocation7 + $0x494] sm:$0xf]  ;;  %9355 = vmatpush.bf16.msra.mxu0 %v11815_v40  ;;  %v12039_v3 = vor.u32 %v16395_v38, %v12036_v44 }
 0x593   :  { %v12292_v56 = vld [vmem:[#allocation7 + $0x4b0] sm:$0xf0] }
 0x594   :  { %9393 = vmatpush.bf16.msra.mxu3 %v12615_v10  ;;  %v16523_v61 = vld [vmem:[#allocation7 + $0x694] sm:$0xf]  ;;  %9368 = vmatpush.bf16.msra.mxu1 %v12071_v46  ;;  %v12295_v4 = vor.u32 %v16459_v53, %v12292_v56  ;;  %v9128_v10 = vpop.f32.mrf.mxu2 }
 0x595   :  { %v12548_v33 = vld [vmem:[#allocation7 + $0x6b0] sm:$0xf0] }
 0x596   :  { %9381 = vmatpush.bf16.msra.mxu2 %v12327_v48  ;;  %v16323_v8 = vld [vmem:[#allocation7 + $0x54] sm:$0xf]  ;;  %v12551_v20 = vor.u32 %v16523_v61, %v12548_v33  ;;  %9356 = vmatpush.bf16.msra.mxu0 %v11783_v0 }
 0x597   :  { %v11748_v11 = vld [vmem:[#allocation7 + $0x70] sm:$0xf0] }
 0x598   :  { %v16387_v12 = vld [vmem:[#allocation7 + $0x254] sm:$0xf]  ;;  %9394 = vmatpush.bf16.msra.mxu3 %v12583_v47  ;;  %v11751_v18 = vor.u32 %v16323_v8, %v11748_v11  ;;  %9369 = vmatpush.bf16.msra.mxu1 %v12039_v3 }
 0x599   :  { %v12004_v15 = vld [vmem:[#allocation7 + $0x270] sm:$0xf0] }
 0x59a   :  { %v16451_v16 = vld [vmem:[#allocation7 + $0x454] sm:$0xf]  ;;  %9382 = vmatpush.bf16.msra.mxu2 %v12295_v4  ;;  %v12007_v7 = vor.u32 %v16387_v12, %v12004_v15  ;;  %9357 = vmatpush.bf16.msra.mxu0 %v11751_v18 }
 0x59b   :  { %v12260_v14 = vld [vmem:[#allocation7 + $0x470] sm:$0xf0] }
 0x59c   :  { %v16515_v17 = vld [vmem:[#allocation7 + $0x654] sm:$0xf]  ;;  %v12263_v22 = vor.u32 %v16451_v16, %v12260_v14  ;;  %9395 = vmatpush.bf16.msra.mxu3 %v12551_v20  ;;  %9370 = vmatpush.bf16.msra.mxu1 %v12007_v7 }
 0x59d   :  { %v12516_v30 = vld [vmem:[#allocation7 + $0x670] sm:$0xf0] }
 0x59e   :  { %v16315_v19 = vld [vmem:[#allocation7 + $0x14] sm:$0xf]  ;;  %v12519_v32 = vor.u32 %v16515_v17, %v12516_v30  ;;  %9383 = vmatpush.bf16.msra.mxu2 %v12263_v22 }
 0x59f   :  { %v11716_v21 = vld [vmem:[#allocation7 + $0x30] sm:$0xf0] }
 0x5a0   :  { %v16379_v50 = vld [vmem:[#allocation7 + $0x214] sm:$0xf]  ;;  %v11719_v48 = vor.u32 %v16315_v19, %v11716_v21  ;;  %9396 = vmatpush.bf16.msra.mxu3 %v12519_v32 }
 0x5a1   :  { %v11972_v25 = vld [vmem:[#allocation7 + $0x230] sm:$0xf0] }
 0x5a2   :  { %v16443_v28 = vld [vmem:[#allocation7 + $0x414] sm:$0xf]  ;;  %v11975_v47 = vor.u32 %v16379_v50, %v11972_v25  ;;  %9358 = vmatpush.bf16.msra.mxu0 %v11719_v48 }
 0x5a3   :  { %v12228_v29 = vld [vmem:[#allocation7 + $0x430] sm:$0xf0] }
 0x5a4   :  { %v16507_v36 = vld [vmem:[#allocation7 + $0x614] sm:$0xf]  ;;  %v12231_v52 = vor.u32 %v16443_v28, %v12228_v29  ;;  %9371 = vmatpush.bf16.msra.mxu1 %v11975_v47  ;;  %v17420_v28 = vld [vmem:[#allocation8] sm:$0xff] }
 0x5a5   :  { %v12484_v27 = vld [vmem:[#allocation7 + $0x630] sm:$0xf0]  ;;  %9359 = vmatmul.bf16.vlgmr.msra.gmra.mxu0 %v17751_v35  ;;  %v3179_v32 = vperm.slane %v17420_v28, 4 }
 0x5a6   :  { %v16627_v39 = vld [vmem:[#allocation7 + $0x9d4] sm:$0xf]  ;;  %v12487_v56 = vor.u32 %v16507_v36, %v12484_v27  ;;  %9384 = vmatpush.bf16.msra.mxu2 %v12231_v52  ;;  %v9165_v52 = vpop.f32.mrf.mxu1 }
 0x5a7   :  { %v12964_v40 = vld [vmem:[#allocation7 + $0x9f0] sm:$0xf0]  ;;  %9372 = vmatmul.bf16.vlgmr.msra.gmra.mxu1 %v17753_v54 }
 0x5a8   :  { %v16691_v46 = vld [vmem:[#allocation7 + $0xbd4] sm:$0xf]  ;;  %v12967_v57 = vor.u32 %v16627_v39, %v12964_v40  ;;  %9397 = vmatpush.bf16.msra.mxu3 %v12487_v56 }
 0x5a9   :  { %v13220_v41 = vld [vmem:[#allocation7 + $0xbf0] sm:$0xf0]  ;;  %9385 = vmatmul.bf16.vlgmr.msra.gmra.mxu2 %v17755_v37 }
 0x5aa   :  { %v16755_v6 = vld [vmem:[#allocation7 + $0xdd4] sm:$0xf]  ;;  %v13223_v58 = vor.u32 %v16691_v46, %v13220_v41  ;;  %9403 = vmatpush.bf16.msrb.mxu0 %v12967_v57  ;;  %v9152_v41 = vpop.f32.mrf.mxu0 }
 0x5ab   :  { %v13476_v38 = vld [vmem:[#allocation7 + $0xdf0] sm:$0xf0]  ;;  %9398 = vmatmul.bf16.vlgmr.msra.gmra.mxu3 %v17757_v42  ;;  %v9153_v47 = vadd.f32 %v9152_v41, %v3179_v32 }
 0x5ac   :  { %v16819_v44 = vld [vmem:[#allocation7 + $0xfd4] sm:$0xf]  ;;  %v13479_v59 = vor.u32 %v16755_v6, %v13476_v38  ;;  %9416 = vmatpush.bf16.msrb.mxu1 %v13223_v58 }
 0x5ad   :  { %v13732_v53 = vld [vmem:[#allocation7 + $0xff0] sm:$0xf0] }
 0x5ae   :  { %v16619_v61 = vld [vmem:[#allocation7 + $0x994] sm:$0xf]  ;;  %v13735_v0 = vor.u32 %v16819_v44, %v13732_v53  ;;  %9429 = vmatpush.bf16.msrb.mxu2 %v13479_v59  ;;  %v9167_v32 = vpop.f32.mrf.mxu1 }
 0x5af   :  { %v12932_v33 = vld [vmem:[#allocation7 + $0x9b0] sm:$0xf0] }
 0x5b0   :  { %v16683_v63 = vld [vmem:[#allocation7 + $0xb94] sm:$0xf]  ;;  %v12935_v20 = vor.u32 %v16619_v61, %v12932_v33  ;;  %9442 = vmatpush.bf16.msrb.mxu3 %v13735_v0  ;;  %v9166_v61 = vadd.f32 %v9165_v52, %v9153_v47 }
 0x5b1   :  { %v13188_v3 = vld [vmem:[#allocation7 + $0xbb0] sm:$0xf0] }
 0x5b2   :  { %v16747_v4 = vld [vmem:[#allocation7 + $0xd94] sm:$0xf]  ;;  %v13191_v15 = vor.u32 %v16683_v63, %v13188_v3  ;;  %9404 = vmatpush.bf16.msrb.mxu0 %v12935_v20 }
 0x5b3   :  { %v13444_v8 = vld [vmem:[#allocation7 + $0xdb0] sm:$0xf0] }
 0x5b4   :  { %v16811_v11 = vld [vmem:[#allocation7 + $0xf94] sm:$0xf]  ;;  %v13447_v16 = vor.u32 %v16747_v4, %v13444_v8  ;;  %9417 = vmatpush.bf16.msrb.mxu1 %v13191_v15 }
 0x5b5   :  { %v13700_v12 = vld [vmem:[#allocation7 + $0xfb0] sm:$0xf0] }
 0x5b6   :  { %v16611_v14 = vld [vmem:[#allocation7 + $0x954] sm:$0xf]  ;;  %v13703_v18 = vor.u32 %v16811_v11, %v13700_v12  ;;  %9430 = vmatpush.bf16.msrb.mxu2 %v13447_v16 }
 0x5b7   :  { %v12900_v17 = vld [vmem:[#allocation7 + $0x970] sm:$0xf0] }
 0x5b8   :  { %v16675_v30 = vld [vmem:[#allocation7 + $0xb54] sm:$0xf]  ;;  %v12903_v25 = vor.u32 %v16611_v14, %v12900_v17  ;;  %9443 = vmatpush.bf16.msrb.mxu3 %v13703_v18 }
 0x5b9   :  { %v13156_v19 = vld [vmem:[#allocation7 + $0xb70] sm:$0xf0] }
 0x5ba   :  { %v16739_v21 = vld [vmem:[#allocation7 + $0xd54] sm:$0xf]  ;;  %v13159_v10 = vor.u32 %v16675_v30, %v13156_v19  ;;  %9405 = vmatpush.bf16.msrb.mxu0 %v12903_v25  ;;  %v9178_v30 = vpop.f32.mrf.mxu2 }
 0x5bb   :  { %v13412_v7 = vld [vmem:[#allocation7 + $0xd70] sm:$0xf0] }
 0x5bc   :  { %v16803_v22 = vld [vmem:[#allocation7 + $0xf54] sm:$0xf]  ;;  %v13415_v29 = vor.u32 %v16739_v21, %v13412_v7  ;;  %9418 = vmatpush.bf16.msrb.mxu1 %v13159_v10  ;;  %v9179_v7 = vadd.f32 %v9178_v30, %v9166_v61 }
 0x5bd   :  { %v13668_v50 = vld [vmem:[#allocation7 + $0xf70] sm:$0xf0] }
 0x5be   :  { %v16603_v36 = vld [vmem:[#allocation7 + $0x914] sm:$0xf]  ;;  %v13671_v39 = vor.u32 %v16803_v22, %v13668_v50  ;;  %9431 = vmatpush.bf16.msrb.mxu2 %v13415_v29  ;;  %v9191_v22 = vpop.f32.mrf.mxu3  ;;  %v9154_v50 = vpop.f32.mrf.mxu0 }
 0x5bf   :  { %v12868_v27 = vld [vmem:[#allocation7 + $0x930] sm:$0xf0]  ;;  %v17942_v29 = vadd.f32 %v9191_v22, %v9179_v7 }
 0x5c0   :  { %v16667_v31 = vld [vmem:[#allocation7 + $0xb14] sm:$0xf]  ;;  %v12871_v44 = vor.u32 %v16603_v36, %v12868_v27  ;;  %9444 = vmatpush.bf16.msrb.mxu3 %v13671_v39 }
 0x5c1   :  { %v13124_v40 = vld [vmem:[#allocation7 + $0xb30] sm:$0xf0] }
 0x5c2   :  { %v16731_v46 = vld [vmem:[#allocation7 + $0xd14] sm:$0xf]  ;;  %v13127_v53 = vor.u32 %v16667_v31, %v13124_v40  ;;  %9406 = vmatpush.bf16.msrb.mxu0 %v12871_v44 }
 0x5c3   :  { %v13380_v48 = vld [vmem:[#allocation7 + $0xd30] sm:$0xf0] }
 0x5c4   :  { %v16795_v6 = vld [vmem:[#allocation7 + $0xf14] sm:$0xf]  ;;  %v13383_v56 = vor.u32 %v16731_v46, %v13380_v48  ;;  %9419 = vmatpush.bf16.msrb.mxu1 %v13127_v53 }
 0x5c5   :  { %v13636_v38 = vld [vmem:[#allocation7 + $0xf30] sm:$0xf0] }
 0x5c6   :  { %v16595_v57 = vld [vmem:[#allocation7 + $0x8d4] sm:$0xf]  ;;  %v13639_v33 = vor.u32 %v16795_v6, %v13636_v38  ;;  %9432 = vmatpush.bf16.msrb.mxu2 %v13383_v56 }
 0x5c7   :  { %v12836_v58 = vld [vmem:[#allocation7 + $0x8f0] sm:$0xf0] }
 0x5c8   :  { %v16659_v59 = vld [vmem:[#allocation7 + $0xad4] sm:$0xf]  ;;  %v12839_v11 = vor.u32 %v16595_v57, %v12836_v58  ;;  %9445 = vmatpush.bf16.msrb.mxu3 %v13639_v33 }
 0x5c9   :  { %v13092_v63 = vld [vmem:[#allocation7 + $0xaf0] sm:$0xf0] }
 0x5ca   :  { %v16723_v0 = vld [vmem:[#allocation7 + $0xcd4] sm:$0xf]  ;;  %v13095_v12 = vor.u32 %v16659_v59, %v13092_v63  ;;  %9407 = vmatpush.bf16.msrb.mxu0 %v12839_v11  ;;  %v9180_v63 = vpop.f32.mrf.mxu2 }
 0x5cb   :  { %v13348_v3 = vld [vmem:[#allocation7 + $0xcf0] sm:$0xf0] }
 0x5cc   :  { %v16787_v4 = vld [vmem:[#allocation7 + $0xed4] sm:$0xf]  ;;  %v13351_v20 = vor.u32 %v16723_v0, %v13348_v3  ;;  %9420 = vmatpush.bf16.msrb.mxu1 %v13095_v12 }
 0x5cd   :  { %v13604_v8 = vld [vmem:[#allocation7 + $0xef0] sm:$0xf0] }
 0x5ce   :  { %v16587_v15 = vld [vmem:[#allocation7 + $0x894] sm:$0xf]  ;;  %v13607_v17 = vor.u32 %v16787_v4, %v13604_v8  ;;  %9433 = vmatpush.bf16.msrb.mxu2 %v13351_v20  ;;  %v9193_v8 = vpop.f32.mrf.mxu3 }
 0x5cf   :  { %v12804_v16 = vld [vmem:[#allocation7 + $0x8b0] sm:$0xf0] }
 0x5d0   :  { %v16651_v14 = vld [vmem:[#allocation7 + $0xa94] sm:$0xf]  ;;  %v12807_v10 = vor.u32 %v16587_v15, %v12804_v16  ;;  %9446 = vmatpush.bf16.msrb.mxu3 %v13607_v17 }
 0x5d1   :  { %v13060_v18 = vld [vmem:[#allocation7 + $0xab0] sm:$0xf0] }
 0x5d2   :  { %v16715_v19 = vld [vmem:[#allocation7 + $0xc94] sm:$0xf]  ;;  %v13063_v36 = vor.u32 %v16651_v14, %v13060_v18  ;;  %9408 = vmatpush.bf16.msrb.mxu0 %v12807_v10 }
 0x5d3   :  { %v13316_v21 = vld [vmem:[#allocation7 + $0xcb0] sm:$0xf0] }
 0x5d4   :  { %v16779_v25 = vld [vmem:[#allocation7 + $0xe94] sm:$0xf]  ;;  %v13319_v27 = vor.u32 %v16715_v19, %v13316_v21  ;;  %9421 = vmatpush.bf16.msrb.mxu1 %v13063_v36 }
 0x5d5   :  { %v13572_v28 = vld [vmem:[#allocation7 + $0xeb0] sm:$0xf0] }
 0x5d6   :  { %v16579_v31 = vld [vmem:[#allocation7 + $0x854] sm:$0xf]  ;;  %v13575_v46 = vor.u32 %v16779_v25, %v13572_v28  ;;  %9434 = vmatpush.bf16.msrb.mxu2 %v13319_v27 }
 0x5d7   :  { %v12772_v39 = vld [vmem:[#allocation7 + $0x870] sm:$0xf0] }
 0x5d8   :  { %v16643_v40 = vld [vmem:[#allocation7 + $0xa54] sm:$0xf]  ;;  %v12775_v52 = vor.u32 %v16579_v31, %v12772_v39  ;;  %9447 = vmatpush.bf16.msrb.mxu3 %v13575_v46 }
 0x5d9   :  { %v13028_v48 = vld [vmem:[#allocation7 + $0xa70] sm:$0xf0] }
 0x5da   :  { %v16707_v41 = vld [vmem:[#allocation7 + $0xc54] sm:$0xf]  ;;  %v13031_v56 = vor.u32 %v16643_v40, %v13028_v48  ;;  %9409 = vmatpush.bf16.msrb.mxu0 %v12775_v52 }
 0x5db   :  { %v13284_v6 = vld [vmem:[#allocation7 + $0xc70] sm:$0xf0] }
 0x5dc   :  { %v16771_v38 = vld [vmem:[#allocation7 + $0xe54] sm:$0xf]  ;;  %v13287_v57 = vor.u32 %v16707_v41, %v13284_v6  ;;  %9422 = vmatpush.bf16.msrb.mxu1 %v13031_v56 }
 0x5dd   :  { %v13540_v47 = vld [vmem:[#allocation7 + $0xe70] sm:$0xf0] }
 0x5de   :  { %v16571_v44 = vld [vmem:[#allocation7 + $0x814] sm:$0xf]  ;;  %v13543_v33 = vor.u32 %v16771_v38, %v13540_v47  ;;  %9435 = vmatpush.bf16.msrb.mxu2 %v13287_v57 }
 0x5df   :  { %v12740_v53 = vld [vmem:[#allocation7 + $0x830] sm:$0xf0] }
 0x5e0   :  { %v16635_v58 = vld [vmem:[#allocation7 + $0xa14] sm:$0xf]  ;;  %v12743_v15 = vor.u32 %v16571_v44, %v12740_v53  ;;  %9448 = vmatpush.bf16.msrb.mxu3 %v13543_v33 }
 0x5e1   :  { %v12996_v59 = vld [vmem:[#allocation7 + $0xa30] sm:$0xf0] }
 0x5e2   :  { %v16699_v61 = vld [vmem:[#allocation7 + $0xc14] sm:$0xf]  ;;  %v12999_v30 = vor.u32 %v16635_v58, %v12996_v59  ;;  %9410 = vmatpush.bf16.msrb.mxu0 %v12743_v15  ;;  %v9204_v15 = vpop.f32.mrf.mxu0 }
 0x5e3   :  { %v13252_v0 = vld [vmem:[#allocation7 + $0xc30] sm:$0xf0] }
 0x5e4   :  { %v16763_v3 = vld [vmem:[#allocation7 + $0xe14] sm:$0xf]  ;;  %v13255_v18 = vor.u32 %v16699_v61, %v13252_v0  ;;  %9423 = vmatpush.bf16.msrb.mxu1 %v12999_v30  ;;  %v9217_v30 = vpop.f32.mrf.mxu1 }
 0x5e5   :  { %v13508_v4 = vld [vmem:[#allocation7 + $0xe30] sm:$0xf0]  ;;  %9411 = vmatmul.bf16.vlgmr.msrb.gmra.mxu0 %v17777_v51 }
 0x5e6   :  { %v16883_v11 = vld [vmem:[#allocation7 + $0x11d4] sm:$0xf]  ;;  %v13511_v7 = vor.u32 %v16763_v3, %v13508_v4  ;;  %9436 = vmatpush.bf16.msrb.mxu2 %v13255_v18 }
 0x5e7   :  { %v13988_v12 = vld [vmem:[#allocation7 + $0x11f0] sm:$0xf0]  ;;  %9424 = vmatmul.bf16.vlgmr.msrb.gmra.mxu1 %v17779_v43 }
 0x5e8   :  { %v16947_v20 = vld [vmem:[#allocation7 + $0x13d4] sm:$0xf]  ;;  %v13991_v22 = vor.u32 %v16883_v11, %v13988_v12  ;;  %9449 = vmatpush.bf16.msrb.mxu3 %v13511_v7 }
 0x5e9   :  { %v14244_v16 = vld [vmem:[#allocation7 + $0x13f0] sm:$0xf0]  ;;  %9437 = vmatmul.bf16.vlgmr.msrb.gmra.mxu2 %v17781_v45 }
 0x5ea   :  { %v17011_v14 = vld [vmem:[#allocation7 + $0x15d4] sm:$0xf]  ;;  %v14247_v50 = vor.u32 %v16947_v20, %v14244_v16  ;;  %9455 = vmatpush.bf16.msra.mxu0 %v13991_v22 }
 0x5eb   :  { %v14500_v17 = vld [vmem:[#allocation7 + $0x15f0] sm:$0xf0]  ;;  %9450 = vmatmul.bf16.vlgmr.msrb.gmra.mxu3 %v17783_v55 }
 0x5ec   :  { %v17075_v19 = vld [vmem:[#allocation7 + $0x17d4] sm:$0xf]  ;;  %v14503_v25 = vor.u32 %v17011_v14, %v14500_v17  ;;  %9468 = vmatpush.bf16.msra.mxu1 %v14247_v50  ;;  %v9205_v17 = vadd.f32 %v9204_v15, %v17942_v29 }
 0x5ed   :  { %v14756_v21 = vld [vmem:[#allocation7 + $0x17f0] sm:$0xf0] }
 0x5ee   :  { %v16875_v28 = vld [vmem:[#allocation7 + $0x1194] sm:$0xf]  ;;  %v14759_v36 = vor.u32 %v17075_v19, %v14756_v21  ;;  %9481 = vmatpush.bf16.msra.mxu2 %v14503_v25  ;;  %v9218_v25 = vadd.f32 %v9217_v30, %v9205_v17 }
 0x5ef   :  { %v13956_v32 = vld [vmem:[#allocation7 + $0x11b0] sm:$0xf0] }
 0x5f0   :  { %v16939_v10 = vld [vmem:[#allocation7 + $0x1394] sm:$0xf]  ;;  %v13959_v48 = vor.u32 %v16875_v28, %v13956_v32  ;;  %9494 = vmatpush.bf16.msra.mxu3 %v14759_v36 }
 0x5f1   :  { %v14212_v27 = vld [vmem:[#allocation7 + $0x13b0] sm:$0xf0] }
 0x5f2   :  { %v17003_v31 = vld [vmem:[#allocation7 + $0x1594] sm:$0xf]  ;;  %v14215_v41 = vor.u32 %v16939_v10, %v14212_v27  ;;  %9456 = vmatpush.bf16.msra.mxu0 %v13959_v48 }
 0x5f3   :  { %v14468_v39 = vld [vmem:[#allocation7 + $0x15b0] sm:$0xf0] }
 0x5f4   :  { %v17067_v40 = vld [vmem:[#allocation7 + $0x1794] sm:$0xf]  ;;  %v14471_v6 = vor.u32 %v17003_v31, %v14468_v39  ;;  %9469 = vmatpush.bf16.msra.mxu1 %v14215_v41 }
 0x5f5   :  { %v14724_v46 = vld [vmem:[#allocation7 + $0x17b0] sm:$0xf0] }
 0x5f6   :  { %v16867_v38 = vld [vmem:[#allocation7 + $0x1154] sm:$0xf]  ;;  %v14727_v44 = vor.u32 %v17067_v40, %v14724_v46  ;;  %9482 = vmatpush.bf16.msra.mxu2 %v14471_v6 }
 0x5f7   :  { %v13924_v47 = vld [vmem:[#allocation7 + $0x1170] sm:$0xf0] }
 0x5f8   :  { %v16931_v52 = vld [vmem:[#allocation7 + $0x1354] sm:$0xf]  ;;  %v13927_v61 = vor.u32 %v16867_v38, %v13924_v47  ;;  %9495 = vmatpush.bf16.msra.mxu3 %v14727_v44  ;;  %v9230_v38 = vpop.f32.mrf.mxu2 }
 0x5f9   :  { %v14180_v53 = vld [vmem:[#allocation7 + $0x1370] sm:$0xf0] }
 0x5fa   :  { %v16995_v56 = vld [vmem:[#allocation7 + $0x1554] sm:$0xf]  ;;  %v14183_v33 = vor.u32 %v16931_v52, %v14180_v53  ;;  %9457 = vmatpush.bf16.msra.mxu0 %v13927_v61  ;;  %v9231_v53 = vadd.f32 %v9230_v38, %v9218_v25  ;;  %v9219_v61 = vpop.f32.mrf.mxu1 }
 0x5fb   :  { %v14436_v57 = vld [vmem:[#allocation7 + $0x1570] sm:$0xf0] }
 0x5fc   :  { %v17059_v58 = vld [vmem:[#allocation7 + $0x1754] sm:$0xf]  ;;  %v14439_v63 = vor.u32 %v16995_v56, %v14436_v57  ;;  %9470 = vmatpush.bf16.msra.mxu1 %v14183_v33  ;;  %v9243_v56 = vpop.f32.mrf.mxu3  ;;  %v9206_v57 = vpop.f32.mrf.mxu0 }
 0x5fd   :  { %v14692_v59 = vld [vmem:[#allocation7 + $0x1770] sm:$0xf0] }
 0x5fe   :  { %v16859_v0 = vld [vmem:[#allocation7 + $0x1114] sm:$0xf]  ;;  %v14695_v8 = vor.u32 %v17059_v58, %v14692_v59  ;;  %9483 = vmatpush.bf16.msra.mxu2 %v14439_v63  ;;  %v17949_v63 = vadd.f32 %v9243_v56, %v9231_v53 }
 0x5ff   :  { %v13892_v3 = vld [vmem:[#allocation7 + $0x1130] sm:$0xf0] }
 0x600   :  { %v16923_v4 = vld [vmem:[#allocation7 + $0x1314] sm:$0xf]  ;;  %v13895_v18 = vor.u32 %v16859_v0, %v13892_v3  ;;  %9496 = vmatpush.bf16.msra.mxu3 %v14695_v8 }
 0x601   :  { %v14148_v11 = vld [vmem:[#allocation7 + $0x1330] sm:$0xf0] }
 0x602   :  { %v16987_v12 = vld [vmem:[#allocation7 + $0x1514] sm:$0xf]  ;;  %v14151_v19 = vor.u32 %v16923_v4, %v14148_v11  ;;  %9458 = vmatpush.bf16.msra.mxu0 %v13895_v18 }
 0x603   :  { %v14404_v20 = vld [vmem:[#allocation7 + $0x1530] sm:$0xf0] }
 0x604   :  { %v17051_v16 = vld [vmem:[#allocation7 + $0x1714] sm:$0xf]  ;;  %v14407_v21 = vor.u32 %v16987_v12, %v14404_v20  ;;  %9471 = vmatpush.bf16.msra.mxu1 %v14151_v19 }
 0x605   :  { %v14660_v14 = vld [vmem:[#allocation7 + $0x1730] sm:$0xf0] }
 0x606   :  { %v16851_v7 = vld [vmem:[#allocation7 + $0x10d4] sm:$0xf]  ;;  %v14663_v28 = vor.u32 %v17051_v16, %v14660_v14  ;;  %9484 = vmatpush.bf16.msra.mxu2 %v14407_v21 }
 0x607   :  { %v13860_v22 = vld [vmem:[#allocation7 + $0x10f0] sm:$0xf0] }
 0x608   :  { %v16915_v50 = vld [vmem:[#allocation7 + $0x12d4] sm:$0xf]  ;;  %v13863_v39 = vor.u32 %v16851_v7, %v13860_v22  ;;  %9497 = vmatpush.bf16.msra.mxu3 %v14663_v28 }
 0x609   :  { %v14116_v32 = vld [vmem:[#allocation7 + $0x12f0] sm:$0xf0] }
 0x60a   :  { %v16979_v10 = vld [vmem:[#allocation7 + $0x14d4] sm:$0xf]  ;;  %v14119_v29 = vor.u32 %v16915_v50, %v14116_v32  ;;  %9459 = vmatpush.bf16.msra.mxu0 %v13863_v39  ;;  %v9232_v32 = vpop.f32.mrf.mxu2 }
 0x60b   :  { %v14372_v36 = vld [vmem:[#allocation7 + $0x14f0] sm:$0xf0] }
 0x60c   :  { %v17043_v27 = vld [vmem:[#allocation7 + $0x16d4] sm:$0xf]  ;;  %v14375_v40 = vor.u32 %v16979_v10, %v14372_v36  ;;  %9472 = vmatpush.bf16.msra.mxu1 %v14119_v29 }
 0x60d   :  { %v14628_v31 = vld [vmem:[#allocation7 + $0x16f0] sm:$0xf0] }
 0x60e   :  { %v16843_v46 = vld [vmem:[#allocation7 + $0x1094] sm:$0xf]  ;;  %v14631_v6 = vor.u32 %v17043_v27, %v14628_v31  ;;  %9485 = vmatpush.bf16.msra.mxu2 %v14375_v40  ;;  %v9245_v31 = vpop.f32.mrf.mxu3 }
 0x60f   :  { %v13828_v48 = vld [vmem:[#allocation7 + $0x10b0] sm:$0xf0] }
 0x610   :  { %v16907_v41 = vld [vmem:[#allocation7 + $0x1294] sm:$0xf]  ;;  %v13831_v33 = vor.u32 %v16843_v46, %v13828_v48  ;;  %9498 = vmatpush.bf16.msra.mxu3 %v14631_v6 }
 0x611   :  { %v14084_v47 = vld [vmem:[#allocation7 + $0x12b0] sm:$0xf0] }
 0x612   :  { %v16971_v52 = vld [vmem:[#allocation7 + $0x1494] sm:$0xf]  ;;  %v14087_v0 = vor.u32 %v16907_v41, %v14084_v47  ;;  %9460 = vmatpush.bf16.msra.mxu0 %v13831_v33 }
 0x613   :  { %v14340_v44 = vld [vmem:[#allocation7 + $0x14b0] sm:$0xf0] }
 0x614   :  { %v17035_v58 = vld [vmem:[#allocation7 + $0x1694] sm:$0xf]  ;;  %v14343_v3 = vor.u32 %v16971_v52, %v14340_v44  ;;  %9473 = vmatpush.bf16.msra.mxu1 %v14087_v0 }
 0x615   :  { %v14596_v59 = vld [vmem:[#allocation7 + $0x16b0] sm:$0xf0] }
 0x616   :  { %v16835_v4 = vld [vmem:[#allocation7 + $0x1054] sm:$0xf]  ;;  %v14599_v12 = vor.u32 %v17035_v58, %v14596_v59  ;;  %9486 = vmatpush.bf16.msra.mxu2 %v14343_v3 }
 0x617   :  { %v13796_v8 = vld [vmem:[#allocation7 + $0x1070] sm:$0xf0] }
 0x618   :  { %v16899_v11 = vld [vmem:[#allocation7 + $0x1254] sm:$0xf]  ;;  %v13799_v30 = vor.u32 %v16835_v4, %v13796_v8  ;;  %9499 = vmatpush.bf16.msra.mxu3 %v14599_v12 }
 0x619   :  { %v14052_v20 = vld [vmem:[#allocation7 + $0x1270] sm:$0xf0] }
 0x61a   :  { %v16963_v15 = vld [vmem:[#allocation7 + $0x1454] sm:$0xf]  ;;  %v14055_v21 = vor.u32 %v16899_v11, %v14052_v20  ;;  %9461 = vmatpush.bf16.msra.mxu0 %v13799_v30 }
 0x61b   :  { %v14308_v16 = vld [vmem:[#allocation7 + $0x1470] sm:$0xf0] }
 0x61c   :  { %v17027_v14 = vld [vmem:[#allocation7 + $0x1654] sm:$0xf]  ;;  %v14311_v7 = vor.u32 %v16963_v15, %v14308_v16  ;;  %9474 = vmatpush.bf16.msra.mxu1 %v14055_v21 }
 0x61d   :  { %v14564_v17 = vld [vmem:[#allocation7 + $0x1670] sm:$0xf0] }
 0x61e   :  { %v16827_v18 = vld [vmem:[#allocation7 + $0x1014] sm:$0xf]  ;;  %v14567_v28 = vor.u32 %v17027_v14, %v14564_v17  ;;  %9487 = vmatpush.bf16.msra.mxu2 %v14311_v7 }
 0x61f   :  { %v13764_v19 = vld [vmem:[#allocation7 + $0x1030] sm:$0xf0] }
 0x620   :  { %v16891_v22 = vld [vmem:[#allocation7 + $0x1214] sm:$0xf]  ;;  %v13767_v46 = vor.u32 %v16827_v18, %v13764_v19  ;;  %9500 = vmatpush.bf16.msra.mxu3 %v14567_v28 }
 0x621   :  { %v14020_v50 = vld [vmem:[#allocation7 + $0x1230] sm:$0xf0] }
 0x622   :  { %v16955_v25 = vld [vmem:[#allocation7 + $0x1414] sm:$0xf]  ;;  %v14023_v38 = vor.u32 %v16891_v22, %v14020_v50  ;;  %9462 = vmatpush.bf16.msra.mxu0 %v13767_v46  ;;  %v9256_v46 = vpop.f32.mrf.mxu0 }
 0x623   :  { %v14276_v10 = vld [vmem:[#allocation7 + $0x1430] sm:$0xf0] }
 0x624   :  { %v17019_v36 = vld [vmem:[#allocation7 + $0x1614] sm:$0xf]  ;;  %v14279_v47 = vor.u32 %v16955_v25, %v14276_v10  ;;  %9475 = vmatpush.bf16.msra.mxu1 %v14023_v38  ;;  %v9269_v38 = vpop.f32.mrf.mxu1 }
 0x625   :  { %v14532_v27 = vld [vmem:[#allocation7 + $0x1630] sm:$0xf0]  ;;  %9463 = vmatmul.bf16.vlgmr.msra.gmra.mxu0 %v17801_v5 }
 0x626   :  { %v17139_v39 = vld [vmem:[#allocation7 + $0x19d4] sm:$0xf]  ;;  %v14535_v53 = vor.u32 %v17019_v36, %v14532_v27  ;;  %9488 = vmatpush.bf16.msra.mxu2 %v14279_v47 }
 0x627   :  { %v15012_v29 = vld [vmem:[#allocation7 + $0x19f0] sm:$0xf0]  ;;  %9476 = vmatmul.bf16.vlgmr.msra.gmra.mxu1 %v17805_v2 }
 0x628   :  { %v17203_v40 = vld [vmem:[#allocation7 + $0x1bd4] sm:$0xf]  ;;  %v15015_v56 = vor.u32 %v17139_v39, %v15012_v29  ;;  %9501 = vmatpush.bf16.msra.mxu3 %v14535_v53 }
 0x629   :  { %v15268_v48 = vld [vmem:[#allocation7 + $0x1bf0] sm:$0xf0]  ;;  %9489 = vmatmul.bf16.vlgmr.msra.gmra.mxu2 %v17799_v62 }
 0x62a   :  { %v17267_v41 = vld [vmem:[#allocation7 + $0x1dd4] sm:$0xf]  ;;  %v15271_v57 = vor.u32 %v17203_v40, %v15268_v48  ;;  %9507 = vmatpush.bf16.msrb.mxu0 %v15015_v56 }
 0x62b   :  { %v15524_v6 = vld [vmem:[#allocation7 + $0x1df0] sm:$0xf0]  ;;  %9502 = vmatmul.bf16.vlgmr.msra.gmra.mxu3 %v17803_v1 }
 0x62c   :  { %v17331_v52 = vld [vmem:[#allocation7 + $0x1fd4] sm:$0xf]  ;;  %v15527_v58 = vor.u32 %v17267_v41, %v15524_v6  ;;  %9520 = vmatpush.bf16.msrb.mxu1 %v15271_v57  ;;  %v9257_v6 = vadd.f32 %v9256_v46, %v17949_v63 }
 0x62d   :  { %v15780_v44 = vld [vmem:[#allocation7 + $0x1ff0] sm:$0xf0] }
 0x62e   :  { %v17131_v59 = vld [vmem:[#allocation7 + $0x1994] sm:$0xf]  ;;  %v15783_v0 = vor.u32 %v17331_v52, %v15780_v44  ;;  %9533 = vmatpush.bf16.msrb.mxu2 %v15527_v58  ;;  %v9270_v58 = vadd.f32 %v9269_v38, %v9257_v6 }
 0x62f   :  { %v14980_v61 = vld [vmem:[#allocation7 + $0x19b0] sm:$0xf0] }
 0x630   :  { %v17195_v33 = vld [vmem:[#allocation7 + $0x1b94] sm:$0xf]  ;;  %v14983_v20 = vor.u32 %v17131_v59, %v14980_v61  ;;  %9546 = vmatpush.bf16.msrb.mxu3 %v15783_v0 }
 0x631   :  { %v15236_v3 = vld [vmem:[#allocation7 + $0x1bb0] sm:$0xf0] }
 0x632   :  { %v17259_v4 = vld [vmem:[#allocation7 + $0x1d94] sm:$0xf]  ;;  %v15239_v15 = vor.u32 %v17195_v33, %v15236_v3  ;;  %9508 = vmatpush.bf16.msrb.mxu0 %v14983_v20 }
 0x633   :  { %v15492_v8 = vld [vmem:[#allocation7 + $0x1db0] sm:$0xf0] }
 0x634   :  { %v17323_v11 = vld [vmem:[#allocation7 + $0x1f94] sm:$0xf]  ;;  %v15495_v16 = vor.u32 %v17259_v4, %v15492_v8  ;;  %9521 = vmatpush.bf16.msrb.mxu1 %v15239_v15 }
 0x635   :  { %v15748_v12 = vld [vmem:[#allocation7 + $0x1fb0] sm:$0xf0] }
 0x636   :  { %v17123_v14 = vld [vmem:[#allocation7 + $0x1954] sm:$0xf]  ;;  %v15751_v18 = vor.u32 %v17323_v11, %v15748_v12  ;;  %9534 = vmatpush.bf16.msrb.mxu2 %v15495_v16 }
 0x637   :  { %v14948_v17 = vld [vmem:[#allocation7 + $0x1970] sm:$0xf0] }
 0x638   :  { %v17187_v30 = vld [vmem:[#allocation7 + $0x1b54] sm:$0xf]  ;;  %v14951_v25 = vor.u32 %v17123_v14, %v14948_v17  ;;  %9547 = vmatpush.bf16.msrb.mxu3 %v15751_v18  ;;  %v9282_v14 = vpop.f32.mrf.mxu2 }
 0x639   :  { %v15204_v19 = vld [vmem:[#allocation7 + $0x1b70] sm:$0xf0] }
 0x63a   :  { %v17251_v21 = vld [vmem:[#allocation7 + $0x1d54] sm:$0xf]  ;;  %v15207_v28 = vor.u32 %v17187_v30, %v15204_v19  ;;  %9509 = vmatpush.bf16.msrb.mxu0 %v14951_v25  ;;  %v9283_v19 = vadd.f32 %v9282_v14, %v9270_v58  ;;  %v9271_v25 = vpop.f32.mrf.mxu1 }
 0x63b   :  { %v15460_v7 = vld [vmem:[#allocation7 + $0x1d70] sm:$0xf0]  ;;  %v16368_v25 = vld [vmem:[#allocation7 + $0x1b4] sm:$0xf0] }
 0x63c   :  { %v17315_v22 = vld [vmem:[#allocation7 + $0x1f54] sm:$0xf]  ;;  %v15463_v32 = vor.u32 %v17251_v21, %v15460_v7  ;;  %9522 = vmatpush.bf16.msrb.mxu1 %v15207_v28  ;;  %v9295_v21 = vpop.f32.mrf.mxu3  ;;  %v9258_v7 = vpop.f32.mrf.mxu0 }
 0x63d   :  { %v15716_v50 = vld [vmem:[#allocation7 + $0x1f70] sm:$0xf0] }
 0x63e   :  { %v17115_v10 = vld [vmem:[#allocation7 + $0x1914] sm:$0xf]  ;;  %v15719_v31 = vor.u32 %v17315_v22, %v15716_v50  ;;  %9535 = vmatpush.bf16.msrb.mxu2 %v15463_v32  ;;  %v17956_v32 = vadd.f32 %v9295_v21, %v9283_v19 }
 0x63f   :  { %v14916_v36 = vld [vmem:[#allocation7 + $0x1930] sm:$0xf0] }
 0x640   :  { %v17179_v27 = vld [vmem:[#allocation7 + $0x1b14] sm:$0xf]  ;;  %v14919_v47 = vor.u32 %v17115_v10, %v14916_v36  ;;  %9548 = vmatpush.bf16.msrb.mxu3 %v15719_v31 }
 0x641   :  { %v15172_v39 = vld [vmem:[#allocation7 + $0x1b30] sm:$0xf0] }
 0x642   :  { %v17243_v29 = vld [vmem:[#allocation7 + $0x1d14] sm:$0xf]  ;;  %v15175_v52 = vor.u32 %v17179_v27, %v15172_v39  ;;  %9510 = vmatpush.bf16.msrb.mxu0 %v14919_v47 }
 0x643   :  { %v15428_v40 = vld [vmem:[#allocation7 + $0x1d30] sm:$0xf0] }
 0x644   :  { %v17307_v48 = vld [vmem:[#allocation7 + $0x1f14] sm:$0xf]  ;;  %v15431_v44 = vor.u32 %v17243_v29, %v15428_v40  ;;  %9523 = vmatpush.bf16.msrb.mxu1 %v15175_v52 }
 0x645   :  { %v15684_v41 = vld [vmem:[#allocation7 + $0x1f30] sm:$0xf0] }
 0x646   :  { %v17107_v53 = vld [vmem:[#allocation7 + $0x18d4] sm:$0xf]  ;;  %v15687_v59 = vor.u32 %v17307_v48, %v15684_v41  ;;  %9536 = vmatpush.bf16.msrb.mxu2 %v15431_v44 }
 0x647   :  { %v14884_v56 = vld [vmem:[#allocation7 + $0x18f0] sm:$0xf0] }
 0x648   :  { %v17171_v57 = vld [vmem:[#allocation7 + $0x1ad4] sm:$0xf]  ;;  %v14887_v8 = vor.u32 %v17107_v53, %v14884_v56  ;;  %9549 = vmatpush.bf16.msrb.mxu3 %v15687_v59 }
 0x649   :  { %v15140_v61 = vld [vmem:[#allocation7 + $0x1af0] sm:$0xf0] }
 0x64a   :  { %v17235_v33 = vld [vmem:[#allocation7 + $0x1cd4] sm:$0xf]  ;;  %v15143_v63 = vor.u32 %v17171_v57, %v15140_v61  ;;  %9511 = vmatpush.bf16.msrb.mxu0 %v14887_v8  ;;  %v9284_v61 = vpop.f32.mrf.mxu2  ;;  %v11946_v8 = vld [vmem:[#allocation7 + $0x1d8] sm:$0xf] }
 0x64b   :  { %v15396_v0 = vld [vmem:[#allocation7 + $0x1cf0] sm:$0xf0] }
 0x64c   :  { %v17299_v3 = vld [vmem:[#allocation7 + $0x1ed4] sm:$0xf]  ;;  %v15399_v11 = vor.u32 %v17235_v33, %v15396_v0  ;;  %9524 = vmatpush.bf16.msrb.mxu1 %v15143_v63  ;;  %v16376_v63 = vld [vmem:[#allocation7 + $0x1f4] sm:$0xf0] }
 0x64d   :  { %v15652_v4 = vld [vmem:[#allocation7 + $0x1ef0] sm:$0xf0]  ;;  %v11947_v21 = vor.u32 %v16376_v63, %v11946_v8  ;;  %v16416_v8 = vld [vmem:[#allocation7 + $0x334] sm:$0xf0] }
 0x64e   :  { %v17099_v12 = vld [vmem:[#allocation7 + $0x1894] sm:$0xf]  ;;  %v15655_v16 = vor.u32 %v17299_v3, %v15652_v4  ;;  %9537 = vmatpush.bf16.msrb.mxu2 %v15399_v11  ;;  %v9297_v4 = vpop.f32.mrf.mxu3  ;;  %v12202_v11 = vld [vmem:[#allocation7 + $0x3d8] sm:$0xf] }
 0x64f   :  { %v14852_v20 = vld [vmem:[#allocation7 + $0x18b0] sm:$0xf0]  ;;  %v12362_v63 = vld [vmem:[#allocation7 + $0x518] sm:$0xf] }
 0x650   :  { %v17163_v15 = vld [vmem:[#allocation7 + $0x1a94] sm:$0xf]  ;;  %v14855_v28 = vor.u32 %v17099_v12, %v14852_v20  ;;  %9550 = vmatpush.bf16.msrb.mxu3 %v15655_v16  ;;  %v16440_v20 = vld [vmem:[#allocation7 + $0x3f4] sm:$0xf0] }
 0x651   :  { %v15108_v17 = vld [vmem:[#allocation7 + $0x1ab0] sm:$0xf0]  ;;  %v16504_v16 = vld [vmem:[#allocation7 + $0x5f4] sm:$0xf0]  ;;  %v12203_v7 = vor.u32 %v16440_v20, %v12202_v11 }
 0x652   :  { %v17227_v30 = vld [vmem:[#allocation7 + $0x1c94] sm:$0xf]  ;;  %v15111_v10 = vor.u32 %v17163_v15, %v15108_v17  ;;  %9512 = vmatpush.bf16.msrb.mxu0 %v14855_v28  ;;  %v12458_v15 = vld [vmem:[#allocation7 + $0x5d8] sm:$0xf] }
 0x653   :  { %v15364_v18 = vld [vmem:[#allocation7 + $0x1cb0] sm:$0xf0]  ;;  %v12170_v28 = vld [vmem:[#allocation7 + $0x398] sm:$0xf] }
 0x654   :  { %v17291_v22 = vld [vmem:[#allocation7 + $0x1e94] sm:$0xf]  ;;  %v15367_v36 = vor.u32 %v17227_v30, %v15364_v18  ;;  %9525 = vmatpush.bf16.msrb.mxu1 %v15111_v10  ;;  %v12714_v30 = vld [vmem:[#allocation7 + $0x7d8] sm:$0xf] }
 0x655   :  { %v15620_v50 = vld [vmem:[#allocation7 + $0x1eb0] sm:$0xf0]  ;;  %v16568_v18 = vld [vmem:[#allocation7 + $0x7f4] sm:$0xf0] }
 0x656   :  { %v17091_v27 = vld [vmem:[#allocation7 + $0x1854] sm:$0xf]  ;;  %v15623_v29 = vor.u32 %v17291_v22, %v15620_v50  ;;  %9538 = vmatpush.bf16.msrb.mxu2 %v15367_v36  ;;  %v12459_v22 = vor.u32 %v16504_v16, %v12458_v15  ;;  %v11914_v50 = vld [vmem:[#allocation7 + $0x198] sm:$0xf]  ;;  %v12715_v10 = vor.u32 %v16568_v18, %v12714_v30 }
 0x657   :  { %v14820_v31 = vld [vmem:[#allocation7 + $0x1870] sm:$0xf0]  ;;  %v16432_v36 = vld [vmem:[#allocation7 + $0x3b4] sm:$0xf0] }
 0x658   :  { %v17155_v39 = vld [vmem:[#allocation7 + $0x1a54] sm:$0xf]  ;;  %v14823_v38 = vor.u32 %v17091_v27, %v14820_v31  ;;  %9551 = vmatpush.bf16.msrb.mxu3 %v15623_v29  ;;  %v12426_v27 = vld [vmem:[#allocation7 + $0x598] sm:$0xf] }
 0x659   :  { %v15076_v40 = vld [vmem:[#allocation7 + $0x1a70] sm:$0xf0]  ;;  %v16496_v31 = vld [vmem:[#allocation7 + $0x5b4] sm:$0xf0] }
 0x65a   :  { %v17219_v46 = vld [vmem:[#allocation7 + $0x1c54] sm:$0xf]  ;;  %v15079_v44 = vor.u32 %v17155_v39, %v15076_v40  ;;  %9513 = vmatpush.bf16.msrb.mxu0 %v14823_v38  ;;  %v12682_v39 = vld [vmem:[#allocation7 + $0x798] sm:$0xf]  ;;  %v11915_v40 = vor.u32 %v16368_v25, %v11914_v50 }
 0x65b   :  { %v15332_v48 = vld [vmem:[#allocation7 + $0x1c70] sm:$0xf0]  ;;  %v16560_v29 = vld [vmem:[#allocation7 + $0x7b4] sm:$0xf0] }
 0x65c   :  { %v17283_v41 = vld [vmem:[#allocation7 + $0x1e54] sm:$0xf]  ;;  %v15335_v53 = vor.u32 %v17219_v46, %v15332_v48  ;;  %9526 = vmatpush.bf16.msrb.mxu1 %v15079_v44  ;;  %v12171_v46 = vor.u32 %v16432_v36, %v12170_v28  ;;  %v12427_v48 = vor.u32 %v16496_v31, %v12426_v27  ;;  %v12138_v38 = vld [vmem:[#allocation7 + $0x358] sm:$0xf] }
 0x65d   :  { %v15588_v6 = vld [vmem:[#allocation7 + $0x1e70] sm:$0xf0]  ;;  %v12394_v44 = vld [vmem:[#allocation7 + $0x558] sm:$0xf] }
 0x65e   :  { %v17083_v47 = vld [vmem:[#allocation7 + $0x1814] sm:$0xf]  ;;  %v15591_v59 = vor.u32 %v17283_v41, %v15588_v6  ;;  %9539 = vmatpush.bf16.msrb.mxu2 %v15335_v53  ;;  %v11882_v41 = vld [vmem:[#allocation7 + $0x158] sm:$0xf] }
 0x65f   :  { %v14788_v52 = vld [vmem:[#allocation7 + $0x1830] sm:$0xf0]  ;;  %v16360_v6 = vld [vmem:[#allocation7 + $0x174] sm:$0xf0] }
 0x660   :  { %v17147_v56 = vld [vmem:[#allocation7 + $0x1a14] sm:$0xf]  ;;  %v14791_v12 = vor.u32 %v17083_v47, %v14788_v52  ;;  %9552 = vmatpush.bf16.msrb.mxu3 %v15591_v59  ;;  %v12683_v47 = vor.u32 %v16560_v29, %v12682_v39  ;;  %v16424_v52 = vld [vmem:[#allocation7 + $0x374] sm:$0xf0] }
 0x661   :  { %v15044_v57 = vld [vmem:[#allocation7 + $0x1a30] sm:$0xf0]  ;;  %v16488_v53 = vld [vmem:[#allocation7 + $0x574] sm:$0xf0]  ;;  %v12139_v59 = vor.u32 %v16424_v52, %v12138_v38 }
 0x662   :  { %v17211_v58 = vld [vmem:[#allocation7 + $0x1c14] sm:$0xf]  ;;  %v15047_v14 = vor.u32 %v17147_v56, %v15044_v57  ;;  %9514 = vmatpush.bf16.msrb.mxu0 %v14791_v12  ;;  %v12650_v56 = vld [vmem:[#allocation7 + $0x758] sm:$0xf]  ;;  %v12395_v61 = vor.u32 %v16488_v53, %v12394_v44  ;;  %v9308_v12 = vpop.f32.mrf.mxu0  ;;  %v9347_v44 = vpop.f32.mrf.mxu3 }
 0x663   :  { %v15300_v33 = vld [vmem:[#allocation7 + $0x1c30] sm:$0xf0]  ;;  %v16552_v57 = vld [vmem:[#allocation7 + $0x774] sm:$0xf0]  ;;  %v9309_v16 = vadd.f32 %v9308_v12, %v17956_v32 }
 0x664   :  { %v17275_v0 = vld [vmem:[#allocation7 + $0x1e14] sm:$0xf]  ;;  %v15303_v17 = vor.u32 %v17211_v58, %v15300_v33  ;;  %9527 = vmatpush.bf16.msrb.mxu1 %v15047_v14  ;;  %v11883_v58 = vor.u32 %v16360_v6, %v11882_v41  ;;  %v11850_v33 = vld [vmem:[#allocation7 + $0x118] sm:$0xf]  ;;  %v12651_v4 = vor.u32 %v16552_v57, %v12650_v56  ;;  %v9321_v14 = vpop.f32.mrf.mxu1  ;;  %v9334_v41 = vpop.f32.mrf.mxu2 }
 0x665   :  { %v15556_v3 = vld [vmem:[#allocation7 + $0x1e30] sm:$0xf0]  ;;  %9515 = vmatmul.bf16.vlgmr.msrb.gmra.mxu0 %v17813_v34  ;;  %v16480_v11 = vld [vmem:[#allocation7 + $0x534] sm:$0xf0] }
 0x666   :  { %v15559_v19 = vor.u32 %v17275_v0, %v15556_v3  ;;  %9540 = vmatpush.bf16.msrb.mxu2 %v15303_v17  ;;  %9559 = vmatpush.bf16.msra.mxu0 %v11947_v21  ;;  %v16352_v0 = vld [vmem:[#allocation7 + $0x134] sm:$0xf0]  ;;  %v12363_v18 = vor.u32 %v16480_v11, %v12362_v63 }
 0x667   :  { %9528 = vmatmul.bf16.vlgmr.msrb.gmra.mxu1 %v17815_v13  ;;  %v12106_v3 = vld [vmem:[#allocation7 + $0x318] sm:$0xf]  ;;  %v11851_v17 = vor.u32 %v16352_v0, %v11850_v33 }
 0x668   :  { %9553 = vmatpush.bf16.msrb.mxu3 %v15559_v19  ;;  %9572 = vmatpush.bf16.msra.mxu1 %v12203_v7  ;;  %v12618_v20 = vld [vmem:[#allocation7 + $0x718] sm:$0xf]  ;;  %v12107_v30 = vor.u32 %v16416_v8, %v12106_v3 }
 0x669   :  { %9541 = vmatmul.bf16.vlgmr.msrb.gmra.mxu2 %v17821_v26  ;;  %v16544_v15 = vld [vmem:[#allocation7 + $0x734] sm:$0xf0] }
 0x66a   :  { %9585 = vmatpush.bf16.msra.mxu2 %v12459_v22  ;;  %9560 = vmatpush.bf16.msra.mxu0 %v11915_v40  ;;  %v11818_v19 = vld [vmem:[#allocation7 + $0xd8] sm:$0xf]  ;;  %v9322_v22 = vadd.f32 %v9321_v14, %v9309_v16  ;;  %v12619_v50 = vor.u32 %v16544_v15, %v12618_v20  ;;  %v9310_v53 = vpop.f32.mrf.mxu0 }
 0x66b   :  { %9554 = vmatmul.bf16.vlgmr.msrb.gmra.mxu3 %v17824_v49  ;;  %v16344_v21 = vld [vmem:[#allocation7 + $0xf4] sm:$0xf0] }
 0x66c   :  { %9598 = vmatpush.bf16.msra.mxu3 %v12715_v10  ;;  %9573 = vmatpush.bf16.msra.mxu1 %v12171_v46  ;;  %v12074_v7 = vld [vmem:[#allocation7 + $0x2d8] sm:$0xf]  ;;  %v11819_v31 = vor.u32 %v16344_v21, %v11818_v19  ;;  %v9335_v52 = vadd.f32 %v9334_v41, %v9322_v22 }
 0x66d   :  { %v16408_v25 = vld [vmem:[#allocation7 + $0x2f4] sm:$0xf0] }
 0x66e   :  { %9586 = vmatpush.bf16.msra.mxu2 %v12427_v48  ;;  %9561 = vmatpush.bf16.msra.mxu0 %v11883_v58  ;;  %v12330_v28 = vld [vmem:[#allocation7 + $0x4d8] sm:$0xf]  ;;  %v12075_v32 = vor.u32 %v16408_v25, %v12074_v7  ;;  %v9323_v58 = vpop.f32.mrf.mxu1  ;;  %v9336_v25 = vpop.f32.mrf.mxu2 }
 0x66f   :  { %v16472_v10 = vld [vmem:[#allocation7 + $0x4f4] sm:$0xf0] }
 0x670   :  { %9599 = vmatpush.bf16.msra.mxu3 %v12683_v47  ;;  %9574 = vmatpush.bf16.msra.mxu1 %v12139_v59  ;;  %v12586_v36 = vld [vmem:[#allocation7 + $0x6d8] sm:$0xf]  ;;  %v12331_v39 = vor.u32 %v16472_v10, %v12330_v28 }
 0x671   :  { %v16536_v27 = vld [vmem:[#allocation7 + $0x6f4] sm:$0xf0] }
 0x672   :  { %9587 = vmatpush.bf16.msra.mxu2 %v12395_v61  ;;  %9562 = vmatpush.bf16.msra.mxu0 %v11851_v17  ;;  %v11786_v29 = vld [vmem:[#allocation7 + $0x98] sm:$0xf]  ;;  %v12587_v48 = vor.u32 %v16536_v27, %v12586_v36  ;;  %v17963_v61 = vadd.f32 %v9347_v44, %v9335_v52  ;;  %v9349_v27 = vpop.f32.mrf.mxu3 }
 0x673   :  { %v16336_v40 = vld [vmem:[#allocation7 + $0xb4] sm:$0xf0] }
 0x674   :  { %9600 = vmatpush.bf16.msra.mxu3 %v12651_v4  ;;  %9575 = vmatpush.bf16.msra.mxu1 %v12107_v30  ;;  %v12042_v46 = vld [vmem:[#allocation7 + $0x298] sm:$0xf]  ;;  %v11787_v59 = vor.u32 %v16336_v40, %v11786_v29 }
 0x675   :  { %v16400_v6 = vld [vmem:[#allocation7 + $0x2b4] sm:$0xf0] }
 0x676   :  { %9588 = vmatpush.bf16.msra.mxu2 %v12363_v18  ;;  %v12298_v38 = vld [vmem:[#allocation7 + $0x498] sm:$0xf]  ;;  %9563 = vmatpush.bf16.msra.mxu0 %v11819_v31  ;;  %v12043_v33 = vor.u32 %v16400_v6, %v12042_v46 }
 0x677   :  { %v16464_v47 = vld [vmem:[#allocation7 + $0x4b4] sm:$0xf0] }
 0x678   :  { %9601 = vmatpush.bf16.msra.mxu3 %v12619_v50  ;;  %v12554_v56 = vld [vmem:[#allocation7 + $0x698] sm:$0xf]  ;;  %9576 = vmatpush.bf16.msra.mxu1 %v12075_v32  ;;  %v12299_v0 = vor.u32 %v16464_v47, %v12298_v38 }
 0x679   :  { %v16528_v57 = vld [vmem:[#allocation7 + $0x6b4] sm:$0xf0] }
 0x67a   :  { %9589 = vmatpush.bf16.msra.mxu2 %v12331_v39  ;;  %v11754_v3 = vld [vmem:[#allocation7 + $0x58] sm:$0xf]  ;;  %v12555_v63 = vor.u32 %v16528_v57, %v12554_v56  ;;  %9564 = vmatpush.bf16.msra.mxu0 %v11787_v59 }
 0x67b   :  { %v16328_v4 = vld [vmem:[#allocation7 + $0x74] sm:$0xf0] }
 0x67c   :  { %v12010_v8 = vld [vmem:[#allocation7 + $0x258] sm:$0xf]  ;;  %9602 = vmatpush.bf16.msra.mxu3 %v12587_v48  ;;  %v11755_v14 = vor.u32 %v16328_v4, %v11754_v3  ;;  %9577 = vmatpush.bf16.msra.mxu1 %v12043_v33 }
 0x67d   :  { %v16392_v11 = vld [vmem:[#allocation7 + $0x274] sm:$0xf0] }
 0x67e   :  { %v12266_v12 = vld [vmem:[#allocation7 + $0x458] sm:$0xf]  ;;  %9590 = vmatpush.bf16.msra.mxu2 %v12299_v0  ;;  %v12011_v18 = vor.u32 %v16392_v11, %v12010_v8  ;;  %9565 = vmatpush.bf16.msra.mxu0 %v11755_v14 }
 0x67f   :  { %v16456_v20 = vld [vmem:[#allocation7 + $0x474] sm:$0xf0] }
 0x680   :  { %v12522_v15 = vld [vmem:[#allocation7 + $0x658] sm:$0xf]  ;;  %v12267_v19 = vor.u32 %v16456_v20, %v12266_v12  ;;  %9603 = vmatpush.bf16.msra.mxu3 %v12555_v63  ;;  %9578 = vmatpush.bf16.msra.mxu1 %v12011_v18 }
 0x681   :  { %v16520_v16 = vld [vmem:[#allocation7 + $0x674] sm:$0xf0] }
 0x682   :  { %v11722_v17 = vld [vmem:[#allocation7 + $0x18] sm:$0xf]  ;;  %v12523_v50 = vor.u32 %v16520_v16, %v12522_v15  ;;  %9591 = vmatpush.bf16.msra.mxu2 %v12267_v19 }
 0x683   :  { %v16320_v30 = vld [vmem:[#allocation7 + $0x34] sm:$0xf0] }
 0x684   :  { %v11978_v21 = vld [vmem:[#allocation7 + $0x218] sm:$0xf]  ;;  %v11723_v29 = vor.u32 %v16320_v30, %v11722_v17  ;;  %9604 = vmatpush.bf16.msra.mxu3 %v12523_v50  ;;  %v17421_v50 = vld [vmem:[#allocation8] sm:$0xff] }
 0x685   :  { %v16384_v7 = vld [vmem:[#allocation7 + $0x234] sm:$0xf0]  ;;  %v3180_v25 = vperm.slane %v17421_v50, 5 }
 0x686   :  { %v12234_v22 = vld [vmem:[#allocation7 + $0x418] sm:$0xf]  ;;  %v11979_v41 = vor.u32 %v16384_v7, %v11978_v21  ;;  %9566 = vmatpush.bf16.msra.mxu0 %v11723_v29 }
 0x687   :  { %v16448_v28 = vld [vmem:[#allocation7 + $0x434] sm:$0xf0] }
 0x688   :  { %v12490_v10 = vld [vmem:[#allocation7 + $0x618] sm:$0xf]  ;;  %v12235_v6 = vor.u32 %v16448_v28, %v12234_v22  ;;  %9579 = vmatpush.bf16.msra.mxu1 %v11979_v41 }
 0x689   :  { %v16512_v36 = vld [vmem:[#allocation7 + $0x634] sm:$0xf0]  ;;  %9567 = vmatmul.bf16.vlgmr.msra.gmra.mxu0 %v17751_v35 }
 0x68a   :  { %v12970_v31 = vld [vmem:[#allocation7 + $0x9d8] sm:$0xf]  ;;  %v12491_v52 = vor.u32 %v16512_v36, %v12490_v10  ;;  %9592 = vmatpush.bf16.msra.mxu2 %v12235_v6 }
 0x68b   :  { %v16632_v32 = vld [vmem:[#allocation7 + $0x9f4] sm:$0xf0]  ;;  %9580 = vmatmul.bf16.vlgmr.msra.gmra.mxu1 %v17753_v54 }
 0x68c   :  { %v13226_v39 = vld [vmem:[#allocation7 + $0xbd8] sm:$0xf]  ;;  %v12971_v44 = vor.u32 %v16632_v32, %v12970_v31  ;;  %9605 = vmatpush.bf16.msra.mxu3 %v12491_v52 }
 0x68d   :  { %v16696_v40 = vld [vmem:[#allocation7 + $0xbf4] sm:$0xf0]  ;;  %9593 = vmatmul.bf16.vlgmr.msra.gmra.mxu2 %v17755_v37 }
 0x68e   :  { %v13482_v46 = vld [vmem:[#allocation7 + $0xdd8] sm:$0xf]  ;;  %v13227_v53 = vor.u32 %v16696_v40, %v13226_v39  ;;  %9611 = vmatpush.bf16.msrb.mxu0 %v12971_v44 }
 0x68f   :  { %v16760_v48 = vld [vmem:[#allocation7 + $0xdf4] sm:$0xf0]  ;;  %9606 = vmatmul.bf16.vlgmr.msra.gmra.mxu3 %v17757_v42 }
 0x690   :  { %v13738_v38 = vld [vmem:[#allocation7 + $0xfd8] sm:$0xf]  ;;  %v13483_v56 = vor.u32 %v16760_v48, %v13482_v46  ;;  %9624 = vmatpush.bf16.msrb.mxu1 %v13227_v53  ;;  %v9360_v46 = vpop.f32.mrf.mxu0 }
 0x691   :  { %v16824_v47 = vld [vmem:[#allocation7 + $0xff4] sm:$0xf0]  ;;  %v9361_v6 = vadd.f32 %v9360_v46, %v3180_v25 }
 0x692   :  { %v12938_v57 = vld [vmem:[#allocation7 + $0x998] sm:$0xf]  ;;  %v13739_v33 = vor.u32 %v16824_v47, %v13738_v38  ;;  %9637 = vmatpush.bf16.msrb.mxu2 %v13483_v56  ;;  %v9373_v38 = vpop.f32.mrf.mxu1 }
 0x693   :  { %v16624_v58 = vld [vmem:[#allocation7 + $0x9b4] sm:$0xf0] }
 0x694   :  { %v13194_v59 = vld [vmem:[#allocation7 + $0xb98] sm:$0xf]  ;;  %v12939_v11 = vor.u32 %v16624_v58, %v12938_v57  ;;  %9650 = vmatpush.bf16.msrb.mxu3 %v13739_v33  ;;  %v9374_v58 = vadd.f32 %v9373_v38, %v9361_v6 }
 0x695   :  { %v16688_v0 = vld [vmem:[#allocation7 + $0xbb4] sm:$0xf0] }
 0x696   :  { %v13450_v3 = vld [vmem:[#allocation7 + $0xd98] sm:$0xf]  ;;  %v13195_v12 = vor.u32 %v16688_v0, %v13194_v59  ;;  %9612 = vmatpush.bf16.msrb.mxu0 %v12939_v11 }
 0x697   :  { %v16752_v4 = vld [vmem:[#allocation7 + $0xdb4] sm:$0xf0] }
 0x698   :  { %v13706_v8 = vld [vmem:[#allocation7 + $0xf98] sm:$0xf]  ;;  %v13451_v20 = vor.u32 %v16752_v4, %v13450_v3  ;;  %9625 = vmatpush.bf16.msrb.mxu1 %v13195_v12 }
 0x699   :  { %v16816_v63 = vld [vmem:[#allocation7 + $0xfb4] sm:$0xf0] }
 0x69a   :  { %v12906_v15 = vld [vmem:[#allocation7 + $0x958] sm:$0xf]  ;;  %v13707_v17 = vor.u32 %v16816_v63, %v13706_v8  ;;  %9638 = vmatpush.bf16.msrb.mxu2 %v13451_v20 }
 0x69b   :  { %v16616_v16 = vld [vmem:[#allocation7 + $0x974] sm:$0xf0] }
 0x69c   :  { %v13162_v14 = vld [vmem:[#allocation7 + $0xb58] sm:$0xf]  ;;  %v12907_v22 = vor.u32 %v16616_v16, %v12906_v15  ;;  %9651 = vmatpush.bf16.msrb.mxu3 %v13707_v17  ;;  %v9386_v17 = vpop.f32.mrf.mxu2 }
 0x69d   :  { %v16680_v30 = vld [vmem:[#allocation7 + $0xb74] sm:$0xf0] }
 0x69e   :  { %v13418_v18 = vld [vmem:[#allocation7 + $0xd58] sm:$0xf]  ;;  %v13163_v28 = vor.u32 %v16680_v30, %v13162_v14  ;;  %9613 = vmatpush.bf16.msrb.mxu0 %v12907_v22  ;;  %v9362_v22 = vpop.f32.mrf.mxu0 }
 0x69f   :  { %v16744_v19 = vld [vmem:[#allocation7 + $0xd74] sm:$0xf0] }
 0x6a0   :  { %v13674_v21 = vld [vmem:[#allocation7 + $0xf58] sm:$0xf]  ;;  %v13419_v10 = vor.u32 %v16744_v19, %v13418_v18  ;;  %9626 = vmatpush.bf16.msrb.mxu1 %v13163_v28  ;;  %v9375_v28 = vpop.f32.mrf.mxu1 }
 0x6a1   :  { %v16808_v7 = vld [vmem:[#allocation7 + $0xf74] sm:$0xf0] }
 0x6a2   :  { %v12874_v36 = vld [vmem:[#allocation7 + $0x918] sm:$0xf]  ;;  %v13675_v32 = vor.u32 %v16808_v7, %v13674_v21  ;;  %9639 = vmatpush.bf16.msrb.mxu2 %v13419_v10  ;;  %v9387_v21 = vadd.f32 %v9386_v17, %v9374_v58  ;;  %v9399_v7 = vpop.f32.mrf.mxu3 }
 0x6a3   :  { %v16608_v27 = vld [vmem:[#allocation7 + $0x934] sm:$0xf0] }
 0x6a4   :  { %v13130_v31 = vld [vmem:[#allocation7 + $0xb18] sm:$0xf]  ;;  %v12875_v47 = vor.u32 %v16608_v27, %v12874_v36  ;;  %9652 = vmatpush.bf16.msrb.mxu3 %v13675_v32  ;;  %v17969_v36 = vadd.f32 %v9399_v7, %v9387_v21 }
 0x6a5   :  { %v16672_v39 = vld [vmem:[#allocation7 + $0xb34] sm:$0xf0] }
 0x6a6   :  { %v13386_v29 = vld [vmem:[#allocation7 + $0xd18] sm:$0xf]  ;;  %v13131_v52 = vor.u32 %v16672_v39, %v13130_v31  ;;  %9614 = vmatpush.bf16.msrb.mxu0 %v12875_v47 }
 0x6a7   :  { %v16736_v40 = vld [vmem:[#allocation7 + $0xd34] sm:$0xf0] }
 0x6a8   :  { %v13642_v48 = vld [vmem:[#allocation7 + $0xf18] sm:$0xf]  ;;  %v13387_v44 = vor.u32 %v16736_v40, %v13386_v29  ;;  %9627 = vmatpush.bf16.msrb.mxu1 %v13131_v52 }
 0x6a9   :  { %v16800_v41 = vld [vmem:[#allocation7 + $0xf34] sm:$0xf0] }
 0x6aa   :  { %v12842_v53 = vld [vmem:[#allocation7 + $0x8d8] sm:$0xf]  ;;  %v13643_v59 = vor.u32 %v16800_v41, %v13642_v48  ;;  %9640 = vmatpush.bf16.msrb.mxu2 %v13387_v44 }
 0x6ab   :  { %v16600_v56 = vld [vmem:[#allocation7 + $0x8f4] sm:$0xf0] }
 0x6ac   :  { %v13098_v57 = vld [vmem:[#allocation7 + $0xad8] sm:$0xf]  ;;  %v12843_v63 = vor.u32 %v16600_v56, %v12842_v53  ;;  %9653 = vmatpush.bf16.msrb.mxu3 %v13643_v59 }
 0x6ad   :  { %v16664_v33 = vld [vmem:[#allocation7 + $0xaf4] sm:$0xf0] }
 0x6ae   :  { %v13354_v0 = vld [vmem:[#allocation7 + $0xcd8] sm:$0xf]  ;;  %v13099_v11 = vor.u32 %v16664_v33, %v13098_v57  ;;  %9615 = vmatpush.bf16.msrb.mxu0 %v12843_v63  ;;  %v9401_v63 = vpop.f32.mrf.mxu3 }
 0x6af   :  { %v16728_v3 = vld [vmem:[#allocation7 + $0xcf4] sm:$0xf0] }
 0x6b0   :  { %v13610_v4 = vld [vmem:[#allocation7 + $0xed8] sm:$0xf]  ;;  %v13355_v12 = vor.u32 %v16728_v3, %v13354_v0  ;;  %9628 = vmatpush.bf16.msrb.mxu1 %v13099_v11  ;;  %v9388_v0 = vpop.f32.mrf.mxu2 }
 0x6b1   :  { %v16792_v8 = vld [vmem:[#allocation7 + $0xef4] sm:$0xf0] }
 0x6b2   :  { %v12810_v20 = vld [vmem:[#allocation7 + $0x898] sm:$0xf]  ;;  %v13611_v14 = vor.u32 %v16792_v8, %v13610_v4  ;;  %9641 = vmatpush.bf16.msrb.mxu2 %v13355_v12 }
 0x6b3   :  { %v16592_v15 = vld [vmem:[#allocation7 + $0x8b4] sm:$0xf0] }
 0x6b4   :  { %v13066_v16 = vld [vmem:[#allocation7 + $0xa98] sm:$0xf]  ;;  %v12811_v10 = vor.u32 %v16592_v15, %v12810_v20  ;;  %9654 = vmatpush.bf16.msrb.mxu3 %v13611_v14 }
 0x6b5   :  { %v16656_v30 = vld [vmem:[#allocation7 + $0xab4] sm:$0xf0] }
 0x6b6   :  { %v13322_v18 = vld [vmem:[#allocation7 + $0xc98] sm:$0xf]  ;;  %v13067_v27 = vor.u32 %v16656_v30, %v13066_v16  ;;  %9616 = vmatpush.bf16.msrb.mxu0 %v12811_v10 }
 0x6b7   :  { %v16720_v19 = vld [vmem:[#allocation7 + $0xcb4] sm:$0xf0] }
 0x6b8   :  { %v13578_v50 = vld [vmem:[#allocation7 + $0xe98] sm:$0xf]  ;;  %v13323_v31 = vor.u32 %v16720_v19, %v13322_v18  ;;  %9629 = vmatpush.bf16.msrb.mxu1 %v13067_v27 }
 0x6b9   :  { %v16784_v25 = vld [vmem:[#allocation7 + $0xeb4] sm:$0xf0] }
 0x6ba   :  { %v12778_v32 = vld [vmem:[#allocation7 + $0x858] sm:$0xf]  ;;  %v13579_v40 = vor.u32 %v16784_v25, %v13578_v50  ;;  %9642 = vmatpush.bf16.msrb.mxu2 %v13323_v31 }
 0x6bb   :  { %v16584_v39 = vld [vmem:[#allocation7 + $0x874] sm:$0xf0] }
 0x6bc   :  { %v13034_v29 = vld [vmem:[#allocation7 + $0xa58] sm:$0xf]  ;;  %v12779_v47 = vor.u32 %v16584_v39, %v12778_v32  ;;  %9655 = vmatpush.bf16.msrb.mxu3 %v13579_v40 }
 0x6bd   :  { %v16648_v46 = vld [vmem:[#allocation7 + $0xa74] sm:$0xf0] }
 0x6be   :  { %v13290_v48 = vld [vmem:[#allocation7 + $0xc58] sm:$0xf]  ;;  %v13035_v53 = vor.u32 %v16648_v46, %v13034_v29  ;;  %9617 = vmatpush.bf16.msrb.mxu0 %v12779_v47 }
 0x6bf   :  { %v16712_v41 = vld [vmem:[#allocation7 + $0xc74] sm:$0xf0] }
 0x6c0   :  { %v13546_v6 = vld [vmem:[#allocation7 + $0xe58] sm:$0xf]  ;;  %v13291_v56 = vor.u32 %v16712_v41, %v13290_v48  ;;  %9630 = vmatpush.bf16.msrb.mxu1 %v13035_v53 }
 0x6c1   :  { %v16776_v38 = vld [vmem:[#allocation7 + $0xe74] sm:$0xf0] }
 0x6c2   :  { %v12746_v52 = vld [vmem:[#allocation7 + $0x818] sm:$0xf]  ;;  %v13547_v33 = vor.u32 %v16776_v38, %v13546_v6  ;;  %9643 = vmatpush.bf16.msrb.mxu2 %v13291_v56 }
 0x6c3   :  { %v16576_v44 = vld [vmem:[#allocation7 + $0x834] sm:$0xf0] }
 0x6c4   :  { %v13002_v57 = vld [vmem:[#allocation7 + $0xa18] sm:$0xf]  ;;  %v12747_v15 = vor.u32 %v16576_v44, %v12746_v52  ;;  %9656 = vmatpush.bf16.msrb.mxu3 %v13547_v33 }
 0x6c5   :  { %v16640_v58 = vld [vmem:[#allocation7 + $0xa34] sm:$0xf0] }
 0x6c6   :  { %v13258_v59 = vld [vmem:[#allocation7 + $0xc18] sm:$0xf]  ;;  %v13003_v30 = vor.u32 %v16640_v58, %v13002_v57  ;;  %9618 = vmatpush.bf16.msrb.mxu0 %v12747_v15 }
 0x6c7   :  { %v16704_v3 = vld [vmem:[#allocation7 + $0xc34] sm:$0xf0] }
 0x6c8   :  { %v13514_v4 = vld [vmem:[#allocation7 + $0xe18] sm:$0xf]  ;;  %v13259_v18 = vor.u32 %v16704_v3, %v13258_v59  ;;  %9631 = vmatpush.bf16.msrb.mxu1 %v13003_v30 }
 0x6c9   :  { %v16768_v8 = vld [vmem:[#allocation7 + $0xe34] sm:$0xf0]  ;;  %9619 = vmatmul.bf16.vlgmr.msrb.gmra.mxu0 %v17777_v51 }
 0x6ca   :  { %v13994_v11 = vld [vmem:[#allocation7 + $0x11d8] sm:$0xf]  ;;  %v13515_v7 = vor.u32 %v16768_v8, %v13514_v4  ;;  %9644 = vmatpush.bf16.msrb.mxu2 %v13259_v18  ;;  %v9425_v18 = vpop.f32.mrf.mxu1 }
 0x6cb   :  { %v16888_v12 = vld [vmem:[#allocation7 + $0x11f4] sm:$0xf0]  ;;  %9632 = vmatmul.bf16.vlgmr.msrb.gmra.mxu1 %v17779_v43 }
 0x6cc   :  { %v14250_v20 = vld [vmem:[#allocation7 + $0x13d8] sm:$0xf]  ;;  %v13995_v22 = vor.u32 %v16888_v12, %v13994_v11  ;;  %9657 = vmatpush.bf16.msrb.mxu3 %v13515_v7 }
 0x6cd   :  { %v16952_v16 = vld [vmem:[#allocation7 + $0x13f4] sm:$0xf0]  ;;  %9645 = vmatmul.bf16.vlgmr.msrb.gmra.mxu2 %v17781_v45 }
 0x6ce   :  { %v14506_v14 = vld [vmem:[#allocation7 + $0x15d8] sm:$0xf]  ;;  %v14251_v50 = vor.u32 %v16952_v16, %v14250_v20  ;;  %9663 = vmatpush.bf16.msra.mxu0 %v13995_v22  ;;  %v9412_v16 = vpop.f32.mrf.mxu0 }
 0x6cf   :  { %v17016_v17 = vld [vmem:[#allocation7 + $0x15f4] sm:$0xf0]  ;;  %9658 = vmatmul.bf16.vlgmr.msrb.gmra.mxu3 %v17783_v55  ;;  %v9413_v30 = vadd.f32 %v9412_v16, %v17969_v36 }
 0x6d0   :  { %v14762_v19 = vld [vmem:[#allocation7 + $0x17d8] sm:$0xf]  ;;  %v14507_v25 = vor.u32 %v17016_v17, %v14506_v14  ;;  %9676 = vmatpush.bf16.msra.mxu1 %v14251_v50 }
 0x6d1   :  { %v17080_v21 = vld [vmem:[#allocation7 + $0x17f4] sm:$0xf0] }
 0x6d2   :  { %v13962_v28 = vld [vmem:[#allocation7 + $0x1198] sm:$0xf]  ;;  %v14763_v31 = vor.u32 %v17080_v21, %v14762_v19  ;;  %9689 = vmatpush.bf16.msra.mxu2 %v14507_v25 }
 0x6d3   :  { %v16880_v10 = vld [vmem:[#allocation7 + $0x11b4] sm:$0xf0] }
 0x6d4   :  { %v14218_v27 = vld [vmem:[#allocation7 + $0x1398] sm:$0xf]  ;;  %v13963_v48 = vor.u32 %v16880_v10, %v13962_v28  ;;  %9702 = vmatpush.bf16.msra.mxu3 %v14763_v31  ;;  %v9426_v28 = vadd.f32 %v9425_v18, %v9413_v30 }
 0x6d5   :  { %v16944_v32 = vld [vmem:[#allocation7 + $0x13b4] sm:$0xf0] }
 0x6d6   :  { %v14474_v39 = vld [vmem:[#allocation7 + $0x1598] sm:$0xf]  ;;  %v14219_v41 = vor.u32 %v16944_v32, %v14218_v27  ;;  %9664 = vmatpush.bf16.msra.mxu0 %v13963_v48 }
 0x6d7   :  { %v17008_v29 = vld [vmem:[#allocation7 + $0x15b4] sm:$0xf0] }
 0x6d8   :  { %v14730_v40 = vld [vmem:[#allocation7 + $0x1798] sm:$0xf]  ;;  %v14475_v6 = vor.u32 %v17008_v29, %v14474_v39  ;;  %9677 = vmatpush.bf16.msra.mxu1 %v14219_v41 }
 0x6d9   :  { %v17072_v46 = vld [vmem:[#allocation7 + $0x17b4] sm:$0xf0] }
 0x6da   :  { %v13930_v38 = vld [vmem:[#allocation7 + $0x1158] sm:$0xf]  ;;  %v14731_v44 = vor.u32 %v17072_v46, %v14730_v40  ;;  %9690 = vmatpush.bf16.msra.mxu2 %v14475_v6 }
 0x6db   :  { %v16872_v47 = vld [vmem:[#allocation7 + $0x1174] sm:$0xf0] }
 0x6dc   :  { %v14186_v52 = vld [vmem:[#allocation7 + $0x1358] sm:$0xf]  ;;  %v13931_v33 = vor.u32 %v16872_v47, %v13930_v38  ;;  %9703 = vmatpush.bf16.msra.mxu3 %v14731_v44  ;;  %v9438_v47 = vpop.f32.mrf.mxu2 }
 0x6dd   :  { %v16936_v53 = vld [vmem:[#allocation7 + $0x1374] sm:$0xf0] }
 0x6de   :  { %v14442_v56 = vld [vmem:[#allocation7 + $0x1558] sm:$0xf]  ;;  %v14187_v0 = vor.u32 %v16936_v53, %v14186_v52  ;;  %9665 = vmatpush.bf16.msra.mxu0 %v13931_v33 }
 0x6df   :  { %v17000_v57 = vld [vmem:[#allocation7 + $0x1574] sm:$0xf0] }
 0x6e0   :  { %v14698_v58 = vld [vmem:[#allocation7 + $0x1758] sm:$0xf]  ;;  %v14443_v3 = vor.u32 %v17000_v57, %v14442_v56  ;;  %9678 = vmatpush.bf16.msra.mxu1 %v14187_v0  ;;  %v9439_v56 = vadd.f32 %v9438_v47, %v9426_v28  ;;  %v9451_v57 = vpop.f32.mrf.mxu3  ;;  %v9427_v0 = vpop.f32.mrf.mxu1 }
 0x6e1   :  { %v17064_v59 = vld [vmem:[#allocation7 + $0x1774] sm:$0xf0] }
 0x6e2   :  { %v13898_v4 = vld [vmem:[#allocation7 + $0x1118] sm:$0xf]  ;;  %v14699_v11 = vor.u32 %v17064_v59, %v14698_v58  ;;  %9691 = vmatpush.bf16.msra.mxu2 %v14443_v3  ;;  %v9414_v58 = vpop.f32.mrf.mxu0 }
 0x6e3   :  { %v16864_v8 = vld [vmem:[#allocation7 + $0x1134] sm:$0xf0] }
 0x6e4   :  { %v14154_v63 = vld [vmem:[#allocation7 + $0x1318] sm:$0xf]  ;;  %v13899_v19 = vor.u32 %v16864_v8, %v13898_v4  ;;  %9704 = vmatpush.bf16.msra.mxu3 %v14699_v11  ;;  %v17976_v4 = vadd.f32 %v9451_v57, %v9439_v56 }
 0x6e5   :  { %v16928_v12 = vld [vmem:[#allocation7 + $0x1334] sm:$0xf0] }
 0x6e6   :  { %v14410_v20 = vld [vmem:[#allocation7 + $0x1518] sm:$0xf]  ;;  %v14155_v21 = vor.u32 %v16928_v12, %v14154_v63  ;;  %9666 = vmatpush.bf16.msra.mxu0 %v13899_v19 }
 0x6e7   :  { %v16992_v15 = vld [vmem:[#allocation7 + $0x1534] sm:$0xf0] }
 0x6e8   :  { %v14666_v14 = vld [vmem:[#allocation7 + $0x1718] sm:$0xf]  ;;  %v14411_v7 = vor.u32 %v16992_v15, %v14410_v20  ;;  %9679 = vmatpush.bf16.msra.mxu1 %v14155_v21 }
 0x6e9   :  { %v17056_v17 = vld [vmem:[#allocation7 + $0x1734] sm:$0xf0] }
 0x6ea   :  { %v13866_v22 = vld [vmem:[#allocation7 + $0x10d8] sm:$0xf]  ;;  %v14667_v10 = vor.u32 %v17056_v17, %v14666_v14  ;;  %9692 = vmatpush.bf16.msra.mxu2 %v14411_v7 }
 0x6eb   :  { %v16856_v50 = vld [vmem:[#allocation7 + $0x10f4] sm:$0xf0] }
 0x6ec   :  { %v14122_v25 = vld [vmem:[#allocation7 + $0x12d8] sm:$0xf]  ;;  %v13867_v40 = vor.u32 %v16856_v50, %v13866_v22  ;;  %9705 = vmatpush.bf16.msra.mxu3 %v14667_v10 }
 0x6ed   :  { %v16920_v27 = vld [vmem:[#allocation7 + $0x12f4] sm:$0xf0] }
 0x6ee   :  { %v14378_v31 = vld [vmem:[#allocation7 + $0x14d8] sm:$0xf]  ;;  %v14123_v36 = vor.u32 %v16920_v27, %v14122_v25  ;;  %9667 = vmatpush.bf16.msra.mxu0 %v13867_v40  ;;  %v9453_v40 = vpop.f32.mrf.mxu3 }
 0x6ef   :  { %v16984_v32 = vld [vmem:[#allocation7 + $0x14f4] sm:$0xf0] }
 0x6f0   :  { %v14634_v39 = vld [vmem:[#allocation7 + $0x16d8] sm:$0xf]  ;;  %v14379_v46 = vor.u32 %v16984_v32, %v14378_v31  ;;  %9680 = vmatpush.bf16.msra.mxu1 %v14123_v36  ;;  %v9440_v31 = vpop.f32.mrf.mxu2 }
 0x6f1   :  { %v17048_v29 = vld [vmem:[#allocation7 + $0x16f4] sm:$0xf0] }
 0x6f2   :  { %v13834_v48 = vld [vmem:[#allocation7 + $0x1098] sm:$0xf]  ;;  %v14635_v38 = vor.u32 %v17048_v29, %v14634_v39  ;;  %9693 = vmatpush.bf16.msra.mxu2 %v14379_v46 }
 0x6f3   :  { %v16848_v41 = vld [vmem:[#allocation7 + $0x10b4] sm:$0xf0] }
 0x6f4   :  { %v14090_v6 = vld [vmem:[#allocation7 + $0x1298] sm:$0xf]  ;;  %v13835_v3 = vor.u32 %v16848_v41, %v13834_v48  ;;  %9706 = vmatpush.bf16.msra.mxu3 %v14635_v38 }
 0x6f5   :  { %v16912_v52 = vld [vmem:[#allocation7 + $0x12b4] sm:$0xf0] }
 0x6f6   :  { %v14346_v44 = vld [vmem:[#allocation7 + $0x1498] sm:$0xf]  ;;  %v14091_v8 = vor.u32 %v16912_v52, %v14090_v6  ;;  %9668 = vmatpush.bf16.msra.mxu0 %v13835_v3 }
 0x6f7   :  { %v16976_v53 = vld [vmem:[#allocation7 + $0x14b4] sm:$0xf0] }
 0x6f8   :  { %v14602_v59 = vld [vmem:[#allocation7 + $0x1698] sm:$0xf]  ;;  %v14347_v63 = vor.u32 %v16976_v53, %v14346_v44  ;;  %9681 = vmatpush.bf16.msra.mxu1 %v14091_v8 }
 0x6f9   :  { %v17040_v33 = vld [vmem:[#allocation7 + $0x16b4] sm:$0xf0] }
 0x6fa   :  { %v13802_v11 = vld [vmem:[#allocation7 + $0x1058] sm:$0xf]  ;;  %v14603_v15 = vor.u32 %v17040_v33, %v14602_v59  ;;  %9694 = vmatpush.bf16.msra.mxu2 %v14347_v63 }
 0x6fb   :  { %v16840_v12 = vld [vmem:[#allocation7 + $0x1074] sm:$0xf0] }
 0x6fc   :  { %v14058_v20 = vld [vmem:[#allocation7 + $0x1258] sm:$0xf]  ;;  %v13803_v19 = vor.u32 %v16840_v12, %v13802_v11  ;;  %9707 = vmatpush.bf16.msra.mxu3 %v14603_v15 }
 0x6fd   :  { %v16904_v16 = vld [vmem:[#allocation7 + $0x1274] sm:$0xf0] }
 0x6fe   :  { %v14314_v14 = vld [vmem:[#allocation7 + $0x1458] sm:$0xf]  ;;  %v14059_v22 = vor.u32 %v16904_v16, %v14058_v20  ;;  %9669 = vmatpush.bf16.msra.mxu0 %v13803_v19 }
 0x6ff   :  { %v16968_v17 = vld [vmem:[#allocation7 + $0x1474] sm:$0xf0] }
 0x700   :  { %v14570_v30 = vld [vmem:[#allocation7 + $0x1658] sm:$0xf]  ;;  %v14315_v50 = vor.u32 %v16968_v17, %v14314_v14  ;;  %9682 = vmatpush.bf16.msra.mxu1 %v14059_v22 }
 0x701   :  { %v17032_v18 = vld [vmem:[#allocation7 + $0x1674] sm:$0xf0] }
 0x702   :  { %v13770_v21 = vld [vmem:[#allocation7 + $0x1018] sm:$0xf]  ;;  %v14571_v27 = vor.u32 %v17032_v18, %v14570_v30  ;;  %9695 = vmatpush.bf16.msra.mxu2 %v14315_v50 }
 0x703   :  { %v16832_v7 = vld [vmem:[#allocation7 + $0x1034] sm:$0xf0] }
 0x704   :  { %v14026_v25 = vld [vmem:[#allocation7 + $0x1218] sm:$0xf]  ;;  %v13771_v41 = vor.u32 %v16832_v7, %v13770_v21  ;;  %9708 = vmatpush.bf16.msra.mxu3 %v14571_v27 }
 0x705   :  { %v16896_v28 = vld [vmem:[#allocation7 + $0x1234] sm:$0xf0] }
 0x706   :  { %v14282_v10 = vld [vmem:[#allocation7 + $0x1418] sm:$0xf]  ;;  %v14027_v52 = vor.u32 %v16896_v28, %v14026_v25  ;;  %9670 = vmatpush.bf16.msra.mxu0 %v13771_v41 }
 0x707   :  { %v16960_v32 = vld [vmem:[#allocation7 + $0x1434] sm:$0xf0] }
 0x708   :  { %v14538_v39 = vld [vmem:[#allocation7 + $0x1618] sm:$0xf]  ;;  %v14283_v44 = vor.u32 %v16960_v32, %v14282_v10  ;;  %9683 = vmatpush.bf16.msra.mxu1 %v14027_v52 }
 0x709   :  { %v17024_v29 = vld [vmem:[#allocation7 + $0x1634] sm:$0xf0]  ;;  %9671 = vmatmul.bf16.vlgmr.msra.gmra.mxu0 %v17801_v5 }
 0x70a   :  { %v15018_v36 = vld [vmem:[#allocation7 + $0x19d8] sm:$0xf]  ;;  %v14539_v57 = vor.u32 %v17024_v29, %v14538_v39  ;;  %9696 = vmatpush.bf16.msra.mxu2 %v14283_v44  ;;  %v9477_v44 = vpop.f32.mrf.mxu1 }
 0x70b   :  { %v17144_v46 = vld [vmem:[#allocation7 + $0x19f4] sm:$0xf0]  ;;  %9684 = vmatmul.bf16.vlgmr.msra.gmra.mxu1 %v17805_v2 }
 0x70c   :  { %v15274_v48 = vld [vmem:[#allocation7 + $0x1bd8] sm:$0xf]  ;;  %v15019_v58 = vor.u32 %v17144_v46, %v15018_v36  ;;  %9709 = vmatpush.bf16.msra.mxu3 %v14539_v57 }
 0x70d   :  { %v17208_v6 = vld [vmem:[#allocation7 + $0x1bf4] sm:$0xf0]  ;;  %9697 = vmatmul.bf16.vlgmr.msra.gmra.mxu2 %v17799_v62 }
 0x70e   :  { %v15530_v38 = vld [vmem:[#allocation7 + $0x1dd8] sm:$0xf]  ;;  %v15275_v59 = vor.u32 %v17208_v6, %v15274_v48  ;;  %9715 = vmatpush.bf16.msrb.mxu0 %v15019_v58  ;;  %v9464_v6 = vpop.f32.mrf.mxu0 }
 0x70f   :  { %v17272_v47 = vld [vmem:[#allocation7 + $0x1df4] sm:$0xf0]  ;;  %9710 = vmatmul.bf16.vlgmr.msra.gmra.mxu3 %v17803_v1  ;;  %v9465_v52 = vadd.f32 %v9464_v6, %v17976_v4 }
 0x710   :  { %v15786_v53 = vld [vmem:[#allocation7 + $0x1fd8] sm:$0xf]  ;;  %v15531_v33 = vor.u32 %v17272_v47, %v15530_v38  ;;  %9728 = vmatpush.bf16.msrb.mxu1 %v15275_v59 }
 0x711   :  { %v17336_v56 = vld [vmem:[#allocation7 + $0x1ff4] sm:$0xf0] }
 0x712   :  { %v14986_v0 = vld [vmem:[#allocation7 + $0x1998] sm:$0xf]  ;;  %v15787_v63 = vor.u32 %v17336_v56, %v15786_v53  ;;  %9741 = vmatpush.bf16.msrb.mxu2 %v15531_v33 }
 0x713   :  { %v17136_v3 = vld [vmem:[#allocation7 + $0x19b4] sm:$0xf0] }
 0x714   :  { %v15242_v8 = vld [vmem:[#allocation7 + $0x1b98] sm:$0xf]  ;;  %v14987_v14 = vor.u32 %v17136_v3, %v14986_v0  ;;  %9754 = vmatpush.bf16.msrb.mxu3 %v15787_v63  ;;  %v9478_v0 = vadd.f32 %v9477_v44, %v9465_v52 }
 0x715   :  { %v17200_v11 = vld [vmem:[#allocation7 + $0x1bb4] sm:$0xf0] }
 0x716   :  { %v15498_v12 = vld [vmem:[#allocation7 + $0x1d98] sm:$0xf]  ;;  %v15243_v17 = vor.u32 %v17200_v11, %v15242_v8  ;;  %9716 = vmatpush.bf16.msrb.mxu0 %v14987_v14 }
 0x717   :  { %v17264_v20 = vld [vmem:[#allocation7 + $0x1db4] sm:$0xf0] }
 0x718   :  { %v15754_v15 = vld [vmem:[#allocation7 + $0x1f98] sm:$0xf]  ;;  %v15499_v30 = vor.u32 %v17264_v20, %v15498_v12  ;;  %9729 = vmatpush.bf16.msrb.mxu1 %v15243_v17 }
 0x719   :  { %v17328_v16 = vld [vmem:[#allocation7 + $0x1fb4] sm:$0xf0] }
 0x71a   :  { %v14954_v18 = vld [vmem:[#allocation7 + $0x1958] sm:$0xf]  ;;  %v15755_v7 = vor.u32 %v17328_v16, %v15754_v15  ;;  %9742 = vmatpush.bf16.msrb.mxu2 %v15499_v30 }
 0x71b   :  { %v17128_v19 = vld [vmem:[#allocation7 + $0x1974] sm:$0xf0] }
 0x71c   :  { %v15210_v21 = vld [vmem:[#allocation7 + $0x1b58] sm:$0xf]  ;;  %v14955_v27 = vor.u32 %v17128_v19, %v14954_v18  ;;  %9755 = vmatpush.bf16.msrb.mxu3 %v15755_v7  ;;  %v9490_v19 = vpop.f32.mrf.mxu2 }
 0x71d   :  { %v17192_v22 = vld [vmem:[#allocation7 + $0x1b74] sm:$0xf0] }
 0x71e   :  { %v15466_v50 = vld [vmem:[#allocation7 + $0x1d58] sm:$0xf]  ;;  %v15211_v31 = vor.u32 %v17192_v22, %v15210_v21  ;;  %9717 = vmatpush.bf16.msrb.mxu0 %v14955_v27 }
 0x71f   :  { %v17256_v25 = vld [vmem:[#allocation7 + $0x1d74] sm:$0xf0] }
 0x720   :  { %v15722_v28 = vld [vmem:[#allocation7 + $0x1f58] sm:$0xf]  ;;  %v15467_v32 = vor.u32 %v17256_v25, %v15466_v50  ;;  %9730 = vmatpush.bf16.msrb.mxu1 %v15211_v31  ;;  %v9491_v50 = vadd.f32 %v9490_v19, %v9478_v0  ;;  %v9503_v25 = vpop.f32.mrf.mxu3  ;;  %v9479_v31 = vpop.f32.mrf.mxu1  ;;  %v12460_v19 = vld [vmem:[#allocation7 + $0x5f8] sm:$0xf0] }
 0x721   :  { %v17320_v10 = vld [vmem:[#allocation7 + $0x1f74] sm:$0xf0]  ;;  %v16364_v31 = vld [vmem:[#allocation7 + $0x19c] sm:$0xf] }
 0x722   :  { %v14922_v39 = vld [vmem:[#allocation7 + $0x1918] sm:$0xf]  ;;  %v15723_v36 = vor.u32 %v17320_v10, %v15722_v28  ;;  %9743 = vmatpush.bf16.msrb.mxu2 %v15467_v32  ;;  %v9466_v28 = vpop.f32.mrf.mxu0 }
 0x723   :  { %v17120_v29 = vld [vmem:[#allocation7 + $0x1934] sm:$0xf0] }
 0x724   :  { %v15178_v40 = vld [vmem:[#allocation7 + $0x1b18] sm:$0xf]  ;;  %v14923_v53 = vor.u32 %v17120_v29, %v14922_v39  ;;  %9756 = vmatpush.bf16.msrb.mxu3 %v15723_v36  ;;  %v17983_v39 = vadd.f32 %v9503_v25, %v9491_v50  ;;  %v12716_v50 = vld [vmem:[#allocation7 + $0x7f8] sm:$0xf0] }
 0x725   :  { %v17184_v46 = vld [vmem:[#allocation7 + $0x1b34] sm:$0xf0] }
 0x726   :  { %v15434_v48 = vld [vmem:[#allocation7 + $0x1d18] sm:$0xf]  ;;  %v15179_v56 = vor.u32 %v17184_v46, %v15178_v40  ;;  %9718 = vmatpush.bf16.msrb.mxu0 %v14923_v53 }
 0x727   :  { %v17248_v41 = vld [vmem:[#allocation7 + $0x1d34] sm:$0xf0] }
 0x728   :  { %v15690_v38 = vld [vmem:[#allocation7 + $0x1f18] sm:$0xf]  ;;  %v15435_v57 = vor.u32 %v17248_v41, %v15434_v48  ;;  %9731 = vmatpush.bf16.msrb.mxu1 %v15179_v56 }
 0x729   :  { %v17312_v47 = vld [vmem:[#allocation7 + $0x1f34] sm:$0xf0] }
 0x72a   :  { %v14890_v58 = vld [vmem:[#allocation7 + $0x18d8] sm:$0xf]  ;;  %v15691_v3 = vor.u32 %v17312_v47, %v15690_v38  ;;  %9744 = vmatpush.bf16.msrb.mxu2 %v15435_v57 }
 0x72b   :  { %v17112_v59 = vld [vmem:[#allocation7 + $0x18f4] sm:$0xf0] }
 0x72c   :  { %v15146_v33 = vld [vmem:[#allocation7 + $0x1ad8] sm:$0xf]  ;;  %v14891_v15 = vor.u32 %v17112_v59, %v14890_v58  ;;  %9757 = vmatpush.bf16.msrb.mxu3 %v15691_v3 }
 0x72d   :  { %v17176_v8 = vld [vmem:[#allocation7 + $0x1af4] sm:$0xf0] }
 0x72e   :  { %v15402_v63 = vld [vmem:[#allocation7 + $0x1cd8] sm:$0xf]  ;;  %v15147_v4 = vor.u32 %v17176_v8, %v15146_v33  ;;  %9719 = vmatpush.bf16.msrb.mxu0 %v14891_v15  ;;  %v9505_v15 = vpop.f32.mrf.mxu3 }
 0x72f   :  { %v17240_v11 = vld [vmem:[#allocation7 + $0x1cf4] sm:$0xf0]  ;;  %v16412_v15 = vld [vmem:[#allocation7 + $0x31c] sm:$0xf] }
 0x730   :  { %v15658_v12 = vld [vmem:[#allocation7 + $0x1ed8] sm:$0xf]  ;;  %v15403_v16 = vor.u32 %v17240_v11, %v15402_v63  ;;  %9732 = vmatpush.bf16.msrb.mxu1 %v15147_v4  ;;  %v9492_v63 = vpop.f32.mrf.mxu2  ;;  %v16372_v4 = vld [vmem:[#allocation7 + $0x1dc] sm:$0xf] }
 0x731   :  { %v17304_v20 = vld [vmem:[#allocation7 + $0x1ef4] sm:$0xf0] }
 0x732   :  { %v14858_v14 = vld [vmem:[#allocation7 + $0x1898] sm:$0xf]  ;;  %v15659_v18 = vor.u32 %v17304_v20, %v15658_v12  ;;  %9745 = vmatpush.bf16.msrb.mxu2 %v15403_v16  ;;  %v11948_v16 = vld [vmem:[#allocation7 + $0x1f8] sm:$0xf0] }
 0x733   :  { %v17104_v17 = vld [vmem:[#allocation7 + $0x18b4] sm:$0xf0]  ;;  %v11951_v28 = vor.u32 %v16372_v4, %v11948_v16  ;;  %v12108_v16 = vld [vmem:[#allocation7 + $0x338] sm:$0xf0] }
 0x734   :  { %v15114_v30 = vld [vmem:[#allocation7 + $0x1a98] sm:$0xf]  ;;  %v14859_v32 = vor.u32 %v17104_v17, %v14858_v14  ;;  %9758 = vmatpush.bf16.msrb.mxu3 %v15659_v18  ;;  %v16436_v14 = vld [vmem:[#allocation7 + $0x3dc] sm:$0xf] }
 0x735   :  { %v17168_v21 = vld [vmem:[#allocation7 + $0x1ab4] sm:$0xf0]  ;;  %v16500_v18 = vld [vmem:[#allocation7 + $0x5dc] sm:$0xf] }
 0x736   :  { %v15370_v7 = vld [vmem:[#allocation7 + $0x1c98] sm:$0xf]  ;;  %v15115_v29 = vor.u32 %v17168_v21, %v15114_v30  ;;  %9720 = vmatpush.bf16.msrb.mxu0 %v14859_v32  ;;  %v12204_v30 = vld [vmem:[#allocation7 + $0x3f8] sm:$0xf0] }
 0x737   :  { %v17232_v22 = vld [vmem:[#allocation7 + $0x1cb4] sm:$0xf0]  ;;  %v11916_v32 = vld [vmem:[#allocation7 + $0x1b8] sm:$0xf0] }
 0x738   :  { %v15626_v10 = vld [vmem:[#allocation7 + $0x1e98] sm:$0xf]  ;;  %v15371_v40 = vor.u32 %v17232_v22, %v15370_v7  ;;  %9733 = vmatpush.bf16.msrb.mxu1 %v15115_v29  ;;  %v16564_v22 = vld [vmem:[#allocation7 + $0x7dc] sm:$0xf] }
 0x739   :  { %v17296_v27 = vld [vmem:[#allocation7 + $0x1eb4] sm:$0xf0]  ;;  %v16428_v29 = vld [vmem:[#allocation7 + $0x39c] sm:$0xf] }
 0x73a   :  { %v14826_v36 = vld [vmem:[#allocation7 + $0x1858] sm:$0xf]  ;;  %v15627_v41 = vor.u32 %v17296_v27, %v15626_v10  ;;  %9746 = vmatpush.bf16.msrb.mxu2 %v15371_v40  ;;  %v12207_v10 = vor.u32 %v16436_v14, %v12204_v30  ;;  %v12463_v27 = vor.u32 %v16500_v18, %v12460_v19  ;;  %v12719_v40 = vor.u32 %v16564_v22, %v12716_v50  ;;  %v16476_v14 = vld [vmem:[#allocation7 + $0x51c] sm:$0xf]  ;;  %v9516_v30 = vpop.f32.mrf.mxu0 }
 0x73b   :  { %v17096_v46 = vld [vmem:[#allocation7 + $0x1874] sm:$0xf0]  ;;  %v16540_v18 = vld [vmem:[#allocation7 + $0x71c] sm:$0xf]  ;;  %v12111_v50 = vor.u32 %v16412_v15, %v12108_v16 }
 0x73c   :  { %v15082_v48 = vld [vmem:[#allocation7 + $0x1a58] sm:$0xf]  ;;  %v14827_v53 = vor.u32 %v17096_v46, %v14826_v36  ;;  %9759 = vmatpush.bf16.msrb.mxu3 %v15627_v41  ;;  %v12172_v36 = vld [vmem:[#allocation7 + $0x3b8] sm:$0xf0] }
 0x73d   :  { %v17160_v6 = vld [vmem:[#allocation7 + $0x1a74] sm:$0xf0]  ;;  %v16492_v46 = vld [vmem:[#allocation7 + $0x59c] sm:$0xf] }
 0x73e   :  { %v15338_v38 = vld [vmem:[#allocation7 + $0x1c58] sm:$0xf]  ;;  %v15083_v58 = vor.u32 %v17160_v6, %v15082_v48  ;;  %9721 = vmatpush.bf16.msrb.mxu0 %v14827_v53  ;;  %v12428_v48 = vld [vmem:[#allocation7 + $0x5b8] sm:$0xf0] }
 0x73f   :  { %v17224_v47 = vld [vmem:[#allocation7 + $0x1c74] sm:$0xf0]  ;;  %v16556_v41 = vld [vmem:[#allocation7 + $0x79c] sm:$0xf] }
 0x740   :  { %v15594_v52 = vld [vmem:[#allocation7 + $0x1e58] sm:$0xf]  ;;  %v15339_v59 = vor.u32 %v17224_v47, %v15338_v38  ;;  %9734 = vmatpush.bf16.msrb.mxu1 %v15083_v58  ;;  %v12684_v6 = vld [vmem:[#allocation7 + $0x7b8] sm:$0xf0]  ;;  %v11919_v38 = vor.u32 %v16364_v31, %v11916_v32  ;;  %v12175_v47 = vor.u32 %v16428_v29, %v12172_v36 }
 0x741   :  { %v17288_v44 = vld [vmem:[#allocation7 + $0x1e74] sm:$0xf0]  ;;  %v11884_v53 = vld [vmem:[#allocation7 + $0x178] sm:$0xf0] }
 0x742   :  { %v14794_v56 = vld [vmem:[#allocation7 + $0x1818] sm:$0xf]  ;;  %v15595_v8 = vor.u32 %v17288_v44, %v15594_v52  ;;  %9747 = vmatpush.bf16.msrb.mxu2 %v15339_v59  ;;  %v12431_v52 = vor.u32 %v16492_v46, %v12428_v48  ;;  %v16356_v44 = vld [vmem:[#allocation7 + $0x15c] sm:$0xf] }
 0x743   :  { %v17088_v57 = vld [vmem:[#allocation7 + $0x1834] sm:$0xf0]  ;;  %v12140_v58 = vld [vmem:[#allocation7 + $0x378] sm:$0xf0] }
 0x744   :  { %v15050_v33 = vld [vmem:[#allocation7 + $0x1a18] sm:$0xf]  ;;  %v14795_v17 = vor.u32 %v17088_v57, %v14794_v56  ;;  %9760 = vmatpush.bf16.msrb.mxu3 %v15595_v8  ;;  %v16420_v56 = vld [vmem:[#allocation7 + $0x35c] sm:$0xf]  ;;  %v12687_v57 = vor.u32 %v16556_v41, %v12684_v6  ;;  %v11887_v8 = vor.u32 %v16356_v44, %v11884_v53  ;;  %v9542_v53 = vpop.f32.mrf.mxu2 }
 0x745   :  { %v17152_v0 = vld [vmem:[#allocation7 + $0x1a34] sm:$0xf0]  ;;  %v16484_v59 = vld [vmem:[#allocation7 + $0x55c] sm:$0xf]  ;;  %v12143_v63 = vor.u32 %v16420_v56, %v12140_v58 }
 0x746   :  { %v15306_v3 = vld [vmem:[#allocation7 + $0x1c18] sm:$0xf]  ;;  %v15051_v21 = vor.u32 %v17152_v0, %v15050_v33  ;;  %9722 = vmatpush.bf16.msrb.mxu0 %v14795_v17  ;;  %v12396_v33 = vld [vmem:[#allocation7 + $0x578] sm:$0xf0] }
 0x747   :  { %v17216_v11 = vld [vmem:[#allocation7 + $0x1c34] sm:$0xf0]  ;;  %v16548_v0 = vld [vmem:[#allocation7 + $0x75c] sm:$0xf] }
 0x748   :  { %v15562_v12 = vld [vmem:[#allocation7 + $0x1e18] sm:$0xf]  ;;  %v15307_v7 = vor.u32 %v17216_v11, %v15306_v3  ;;  %9735 = vmatpush.bf16.msrb.mxu1 %v15051_v21  ;;  %v12652_v3 = vld [vmem:[#allocation7 + $0x778] sm:$0xf0]  ;;  %v12399_v11 = vor.u32 %v16484_v59, %v12396_v33  ;;  %v9517_v21 = vadd.f32 %v9516_v30, %v17983_v39  ;;  %v9555_v33 = vpop.f32.mrf.mxu3 }
 0x749   :  { %v17280_v20 = vld [vmem:[#allocation7 + $0x1e34] sm:$0xf0]  ;;  %9723 = vmatmul.bf16.vlgmr.msrb.gmra.mxu0 %v17813_v34  ;;  %v12655_v4 = vor.u32 %v16548_v0, %v12652_v3  ;;  %v12364_v17 = vld [vmem:[#allocation7 + $0x538] sm:$0xf0]  ;;  %v9518_v0 = vpop.f32.mrf.mxu0 }
 0x74a   :  { %v15563_v25 = vor.u32 %v17280_v20, %v15562_v12  ;;  %9748 = vmatpush.bf16.msrb.mxu2 %v15307_v7  ;;  %9767 = vmatpush.bf16.msra.mxu0 %v11951_v28  ;;  %v16348_v12 = vld [vmem:[#allocation7 + $0x11c] sm:$0xf]  ;;  %v9529_v7 = vpop.f32.mrf.mxu1 }
 0x74b   :  { %9736 = vmatmul.bf16.vlgmr.msrb.gmra.mxu1 %v17815_v13  ;;  %v11852_v20 = vld [vmem:[#allocation7 + $0x138] sm:$0xf0]  ;;  %v9530_v31 = vadd.f32 %v9529_v7, %v9517_v21 }
 0x74c   :  { %9761 = vmatpush.bf16.msrb.mxu3 %v15563_v25  ;;  %9780 = vmatpush.bf16.msra.mxu1 %v12207_v10  ;;  %v12620_v19 = vld [vmem:[#allocation7 + $0x738] sm:$0xf0]  ;;  %v11855_v22 = vor.u32 %v16348_v12, %v11852_v20  ;;  %v12367_v25 = vor.u32 %v16476_v14, %v12364_v17 }
 0x74d   :  { %9749 = vmatmul.bf16.vlgmr.msrb.gmra.mxu2 %v17821_v26  ;;  %v16340_v28 = vld [vmem:[#allocation7 + $0xdc] sm:$0xf]  ;;  %v12623_v32 = vor.u32 %v16540_v18, %v12620_v19  ;;  %v9543_v59 = vadd.f32 %v9542_v53, %v9530_v31 }
 0x74e   :  { %9793 = vmatpush.bf16.msra.mxu2 %v12463_v27  ;;  %9768 = vmatpush.bf16.msra.mxu0 %v11919_v38  ;;  %v11820_v10 = vld [vmem:[#allocation7 + $0xf8] sm:$0xf0] }
 0x74f   :  { %9762 = vmatmul.bf16.vlgmr.msrb.gmra.mxu3 %v17824_v49  ;;  %v16404_v27 = vld [vmem:[#allocation7 + $0x2dc] sm:$0xf]  ;;  %v11823_v41 = vor.u32 %v16340_v28, %v11820_v10  ;;  %v17990_v12 = vadd.f32 %v9555_v33, %v9543_v59 }
 0x750   :  { %9806 = vmatpush.bf16.msra.mxu3 %v12719_v40  ;;  %9781 = vmatpush.bf16.msra.mxu1 %v12175_v47  ;;  %v12076_v29 = vld [vmem:[#allocation7 + $0x2f8] sm:$0xf0] }
 0x751   :  { %v16468_v40 = vld [vmem:[#allocation7 + $0x4dc] sm:$0xf]  ;;  %v12079_v39 = vor.u32 %v16404_v27, %v12076_v29 }
 0x752   :  { %9794 = vmatpush.bf16.msra.mxu2 %v12431_v52  ;;  %9769 = vmatpush.bf16.msra.mxu0 %v11887_v8  ;;  %v12332_v36 = vld [vmem:[#allocation7 + $0x4f8] sm:$0xf0] }
 0x753   :  { %v16532_v46 = vld [vmem:[#allocation7 + $0x6dc] sm:$0xf]  ;;  %v12335_v6 = vor.u32 %v16468_v40, %v12332_v36  ;;  %v9544_v40 = vpop.f32.mrf.mxu2 }
 0x754   :  { %9807 = vmatpush.bf16.msra.mxu3 %v12687_v57  ;;  %9782 = vmatpush.bf16.msra.mxu1 %v12143_v63  ;;  %v12588_v48 = vld [vmem:[#allocation7 + $0x6f8] sm:$0xf0]  ;;  %v9531_v63 = vpop.f32.mrf.mxu1  ;;  %v17996_v40 = vld [vmem:[#allocation8] sm:$0xff] }
 0x755   :  { %v16332_v38 = vld [vmem:[#allocation7 + $0x9c] sm:$0xf]  ;;  %v12591_v44 = vor.u32 %v16532_v46, %v12588_v48 }
 0x756   :  { %9795 = vmatpush.bf16.msra.mxu2 %v12399_v11  ;;  %9770 = vmatpush.bf16.msra.mxu0 %v11855_v22  ;;  %v11788_v47 = vld [vmem:[#allocation7 + $0xb8] sm:$0xf0] }
 0x757   :  { %v16396_v52 = vld [vmem:[#allocation7 + $0x29c] sm:$0xf]  ;;  %v11791_v11 = vor.u32 %v16332_v38, %v11788_v47 }
 0x758   :  { %9808 = vmatpush.bf16.msra.mxu3 %v12655_v4  ;;  %9783 = vmatpush.bf16.msra.mxu1 %v12111_v50  ;;  %v12044_v56 = vld [vmem:[#allocation7 + $0x2b8] sm:$0xf0] }
 0x759   :  { %v16460_v57 = vld [vmem:[#allocation7 + $0x49c] sm:$0xf]  ;;  %v12047_v20 = vor.u32 %v16396_v52, %v12044_v56 }
 0x75a   :  { %9796 = vmatpush.bf16.msra.mxu2 %v12367_v25  ;;  %v12300_v58 = vld [vmem:[#allocation7 + $0x4b8] sm:$0xf0]  ;;  %9771 = vmatpush.bf16.msra.mxu0 %v11823_v41  ;;  %v9557_v41 = vpop.f32.mrf.mxu3 }
 0x75b   :  { %v16524_v3 = vld [vmem:[#allocation7 + $0x69c] sm:$0xf]  ;;  %v12303_v15 = vor.u32 %v16460_v57, %v12300_v58 }
 0x75c   :  { %9809 = vmatpush.bf16.msra.mxu3 %v12623_v32  ;;  %v12556_v8 = vld [vmem:[#allocation7 + $0x6b8] sm:$0xf0]  ;;  %9784 = vmatpush.bf16.msra.mxu1 %v12079_v39 }
 0x75d   :  { %v16324_v4 = vld [vmem:[#allocation7 + $0x5c] sm:$0xf]  ;;  %v12559_v17 = vor.u32 %v16524_v3, %v12556_v8 }
 0x75e   :  { %9797 = vmatpush.bf16.msra.mxu2 %v12335_v6  ;;  %v11756_v16 = vld [vmem:[#allocation7 + $0x78] sm:$0xf0]  ;;  %9772 = vmatpush.bf16.msra.mxu0 %v11791_v11 }
 0x75f   :  { %v16388_v14 = vld [vmem:[#allocation7 + $0x25c] sm:$0xf]  ;;  %v11759_v22 = vor.u32 %v16324_v4, %v11756_v16 }
 0x760   :  { %9810 = vmatpush.bf16.msra.mxu3 %v12591_v44  ;;  %v12012_v30 = vld [vmem:[#allocation7 + $0x278] sm:$0xf0]  ;;  %9785 = vmatpush.bf16.msra.mxu1 %v12047_v20 }
 0x761   :  { %v16452_v18 = vld [vmem:[#allocation7 + $0x45c] sm:$0xf]  ;;  %v12015_v28 = vor.u32 %v16388_v14, %v12012_v30 }
 0x762   :  { %v12268_v19 = vld [vmem:[#allocation7 + $0x478] sm:$0xf0]  ;;  %9798 = vmatpush.bf16.msra.mxu2 %v12303_v15  ;;  %9773 = vmatpush.bf16.msra.mxu0 %v11759_v22 }
 0x763   :  { %v16516_v21 = vld [vmem:[#allocation7 + $0x65c] sm:$0xf]  ;;  %v12271_v10 = vor.u32 %v16452_v18, %v12268_v19 }
 0x764   :  { %v12524_v7 = vld [vmem:[#allocation7 + $0x678] sm:$0xf0]  ;;  %9811 = vmatpush.bf16.msra.mxu3 %v12559_v17  ;;  %9786 = vmatpush.bf16.msra.mxu1 %v12015_v28 }
 0x765   :  { %v16316_v50 = vld [vmem:[#allocation7 + $0x1c] sm:$0xf]  ;;  %v12527_v29 = vor.u32 %v16516_v21, %v12524_v7 }
 0x766   :  { %v11724_v25 = vld [vmem:[#allocation7 + $0x38] sm:$0xf0]  ;;  %9799 = vmatpush.bf16.msra.mxu2 %v12271_v10 }
 0x767   :  { %v16380_v27 = vld [vmem:[#allocation7 + $0x21c] sm:$0xf]  ;;  %v11727_v47 = vor.u32 %v16316_v50, %v11724_v25 }
 0x768   :  { %v11980_v31 = vld [vmem:[#allocation7 + $0x238] sm:$0xf0]  ;;  %9812 = vmatpush.bf16.msra.mxu3 %v12527_v29 }
 0x769   :  { %v16444_v32 = vld [vmem:[#allocation7 + $0x41c] sm:$0xf]  ;;  %v11983_v56 = vor.u32 %v16380_v27, %v11980_v31  ;;  %9774 = vmatpush.bf16.msra.mxu0 %v11727_v47  ;;  %v9568_v47 = vpop.f32.mrf.mxu0 }
 0x76a   :  { %v12236_v36 = vld [vmem:[#allocation7 + $0x438] sm:$0xf0] }
 0x76b   :  { %v16508_v46 = vld [vmem:[#allocation7 + $0x61c] sm:$0xf]  ;;  %v12239_v57 = vor.u32 %v16444_v32, %v12236_v36  ;;  %9787 = vmatpush.bf16.msra.mxu1 %v11983_v56  ;;  %v3181_v36 = vperm.slane %v17996_v40, 6 }
 0x76c   :  { %v12492_v48 = vld [vmem:[#allocation7 + $0x638] sm:$0xf0]  ;;  %9775 = vmatmul.bf16.vlgmr.msra.gmra.mxu0 %v17751_v35 }
 0x76d   :  { %v16628_v39 = vld [vmem:[#allocation7 + $0x9dc] sm:$0xf]  ;;  %v12495_v33 = vor.u32 %v16508_v46, %v12492_v48  ;;  %9800 = vmatpush.bf16.msra.mxu2 %v12239_v57 }
 0x76e   :  { %v12972_v6 = vld [vmem:[#allocation7 + $0x9f8] sm:$0xf0]  ;;  %9788 = vmatmul.bf16.vlgmr.msra.gmra.mxu1 %v17753_v54 }
 0x76f   :  { %v16692_v38 = vld [vmem:[#allocation7 + $0xbdc] sm:$0xf]  ;;  %v12975_v0 = vor.u32 %v16628_v39, %v12972_v6  ;;  %9813 = vmatpush.bf16.msra.mxu3 %v12495_v33 }
 0x770   :  { %v13228_v52 = vld [vmem:[#allocation7 + $0xbf8] sm:$0xf0]  ;;  %9801 = vmatmul.bf16.vlgmr.msra.gmra.mxu2 %v17755_v37 }
 0x771   :  { %v16756_v44 = vld [vmem:[#allocation7 + $0xddc] sm:$0xf]  ;;  %v13231_v3 = vor.u32 %v16692_v38, %v13228_v52  ;;  %9819 = vmatpush.bf16.msrb.mxu0 %v12975_v0 }
 0x772   :  { %v13484_v53 = vld [vmem:[#allocation7 + $0xdf8] sm:$0xf0]  ;;  %9814 = vmatmul.bf16.vlgmr.msra.gmra.mxu3 %v17757_v42 }
 0x773   :  { %v16820_v58 = vld [vmem:[#allocation7 + $0xfdc] sm:$0xf]  ;;  %v13487_v8 = vor.u32 %v16756_v44, %v13484_v53  ;;  %9832 = vmatpush.bf16.msrb.mxu1 %v13231_v3  ;;  %v9569_v44 = vadd.f32 %v9568_v47, %v3181_v36  ;;  %v9581_v53 = vpop.f32.mrf.mxu1 }
 0x774   :  { %v13740_v59 = vld [vmem:[#allocation7 + $0xff8] sm:$0xf0] }
 0x775   :  { %v16620_v63 = vld [vmem:[#allocation7 + $0x99c] sm:$0xf]  ;;  %v13743_v15 = vor.u32 %v16820_v58, %v13740_v59  ;;  %9845 = vmatpush.bf16.msrb.mxu2 %v13487_v8  ;;  %v9582_v3 = vadd.f32 %v9581_v53, %v9569_v44 }
 0x776   :  { %v12940_v11 = vld [vmem:[#allocation7 + $0x9b8] sm:$0xf0] }
 0x777   :  { %v16684_v20 = vld [vmem:[#allocation7 + $0xb9c] sm:$0xf]  ;;  %v12943_v18 = vor.u32 %v16620_v63, %v12940_v11  ;;  %9858 = vmatpush.bf16.msrb.mxu3 %v13743_v15 }
 0x778   :  { %v13196_v4 = vld [vmem:[#allocation7 + $0xbb8] sm:$0xf0] }
 0x779   :  { %v16748_v16 = vld [vmem:[#allocation7 + $0xd9c] sm:$0xf]  ;;  %v13199_v19 = vor.u32 %v16684_v20, %v13196_v4  ;;  %9820 = vmatpush.bf16.msrb.mxu0 %v12943_v18 }
 0x77a   :  { %v13452_v14 = vld [vmem:[#allocation7 + $0xdb8] sm:$0xf0] }
 0x77b   :  { %v16812_v17 = vld [vmem:[#allocation7 + $0xf9c] sm:$0xf]  ;;  %v13455_v21 = vor.u32 %v16748_v16, %v13452_v14  ;;  %9833 = vmatpush.bf16.msrb.mxu1 %v13199_v19 }
 0x77c   :  { %v13708_v30 = vld [vmem:[#allocation7 + $0xfb8] sm:$0xf0] }
 0x77d   :  { %v16612_v7 = vld [vmem:[#allocation7 + $0x95c] sm:$0xf]  ;;  %v13711_v25 = vor.u32 %v16812_v17, %v13708_v30  ;;  %9846 = vmatpush.bf16.msrb.mxu2 %v13455_v21 }
 0x77e   :  { %v12908_v22 = vld [vmem:[#allocation7 + $0x978] sm:$0xf0] }
 0x77f   :  { %v16676_v50 = vld [vmem:[#allocation7 + $0xb5c] sm:$0xf]  ;;  %v12911_v29 = vor.u32 %v16612_v7, %v12908_v22  ;;  %9859 = vmatpush.bf16.msrb.mxu3 %v13711_v25  ;;  %v9594_v7 = vpop.f32.mrf.mxu2 }
 0x780   :  { %v13164_v28 = vld [vmem:[#allocation7 + $0xb78] sm:$0xf0] }
 0x781   :  { %v16740_v10 = vld [vmem:[#allocation7 + $0xd5c] sm:$0xf]  ;;  %v13167_v35 = vor.u32 %v16676_v50, %v13164_v28  ;;  %9821 = vmatpush.bf16.msrb.mxu0 %v12911_v29  ;;  %v9595_v28 = vadd.f32 %v9594_v7, %v9582_v3  ;;  %v9583_v29 = vpop.f32.mrf.mxu1 }
 0x782   :  { %v13420_v27 = vld [vmem:[#allocation7 + $0xd78] sm:$0xf0] }
 0x783   :  { %v16804_v31 = vld [vmem:[#allocation7 + $0xf5c] sm:$0xf]  ;;  %v13423_v46 = vor.u32 %v16740_v10, %v13420_v27  ;;  %9834 = vmatpush.bf16.msrb.mxu1 %v13167_v35  ;;  %v9607_v10 = vpop.f32.mrf.mxu3  ;;  %v9570_v27 = vpop.f32.mrf.mxu0 }
 0x784   :  { %v13676_v32 = vld [vmem:[#allocation7 + $0xf78] sm:$0xf0]  ;;  %v17999_v35 = vadd.f32 %v9607_v10, %v9595_v28 }
 0x785   :  { %v16604_v48 = vld [vmem:[#allocation7 + $0x91c] sm:$0xf]  ;;  %v13679_v54 = vor.u32 %v16804_v31, %v13676_v32  ;;  %9847 = vmatpush.bf16.msrb.mxu2 %v13423_v46 }
 0x786   :  { %v12876_v41 = vld [vmem:[#allocation7 + $0x938] sm:$0xf0] }
 0x787   :  { %v16668_v39 = vld [vmem:[#allocation7 + $0xb1c] sm:$0xf]  ;;  %v12879_v56 = vor.u32 %v16604_v48, %v12876_v41  ;;  %9860 = vmatpush.bf16.msrb.mxu3 %v13679_v54 }
 0x788   :  { %v13132_v37 = vld [vmem:[#allocation7 + $0xb38] sm:$0xf0] }
 0x789   :  { %v16732_v6 = vld [vmem:[#allocation7 + $0xd1c] sm:$0xf]  ;;  %v13135_v57 = vor.u32 %v16668_v39, %v13132_v37  ;;  %9822 = vmatpush.bf16.msrb.mxu0 %v12879_v56 }
 0x78a   :  { %v13388_v38 = vld [vmem:[#allocation7 + $0xd38] sm:$0xf0] }
 0x78b   :  { %v16796_v42 = vld [vmem:[#allocation7 + $0xf1c] sm:$0xf]  ;;  %v13391_v58 = vor.u32 %v16732_v6, %v13388_v38  ;;  %9835 = vmatpush.bf16.msrb.mxu1 %v13135_v57 }
 0x78c   :  { %v13644_v52 = vld [vmem:[#allocation7 + $0xf38] sm:$0xf0] }
 0x78d   :  { %v16596_v59 = vld [vmem:[#allocation7 + $0x8dc] sm:$0xf]  ;;  %v13647_v8 = vor.u32 %v16796_v42, %v13644_v52  ;;  %9848 = vmatpush.bf16.msrb.mxu2 %v13391_v58 }
 0x78e   :  { %v12844_v33 = vld [vmem:[#allocation7 + $0x8f8] sm:$0xf0] }
 0x78f   :  { %v16660_v0 = vld [vmem:[#allocation7 + $0xadc] sm:$0xf]  ;;  %v12847_v16 = vor.u32 %v16596_v59, %v12844_v33  ;;  %9861 = vmatpush.bf16.msrb.mxu3 %v13647_v8  ;;  %v9596_v8 = vpop.f32.mrf.mxu2 }
 0x790   :  { %v13100_v63 = vld [vmem:[#allocation7 + $0xaf8] sm:$0xf0] }
 0x791   :  { %v16724_v11 = vld [vmem:[#allocation7 + $0xcdc] sm:$0xf]  ;;  %v13103_v14 = vor.u32 %v16660_v0, %v13100_v63  ;;  %9823 = vmatpush.bf16.msrb.mxu0 %v12847_v16 }
 0x792   :  { %v13356_v20 = vld [vmem:[#allocation7 + $0xcf8] sm:$0xf0] }
 0x793   :  { %v16788_v15 = vld [vmem:[#allocation7 + $0xedc] sm:$0xf]  ;;  %v13359_v17 = vor.u32 %v16724_v11, %v13356_v20  ;;  %9836 = vmatpush.bf16.msrb.mxu1 %v13103_v14 }
 0x794   :  { %v13612_v4 = vld [vmem:[#allocation7 + $0xef8] sm:$0xf0] }
 0x795   :  { %v16588_v30 = vld [vmem:[#allocation7 + $0x89c] sm:$0xf]  ;;  %v13615_v21 = vor.u32 %v16788_v15, %v13612_v4  ;;  %9849 = vmatpush.bf16.msrb.mxu2 %v13359_v17  ;;  %v9609_v15 = vpop.f32.mrf.mxu3 }
 0x796   :  { %v12812_v18 = vld [vmem:[#allocation7 + $0x8b8] sm:$0xf0] }
 0x797   :  { %v16652_v19 = vld [vmem:[#allocation7 + $0xa9c] sm:$0xf]  ;;  %v12815_v36 = vor.u32 %v16588_v30, %v12812_v18  ;;  %9862 = vmatpush.bf16.msrb.mxu3 %v13615_v21 }
 0x798   :  { %v13068_v22 = vld [vmem:[#allocation7 + $0xab8] sm:$0xf0] }
 0x799   :  { %v16716_v50 = vld [vmem:[#allocation7 + $0xc9c] sm:$0xf]  ;;  %v13071_v46 = vor.u32 %v16652_v19, %v13068_v22  ;;  %9824 = vmatpush.bf16.msrb.mxu0 %v12815_v36 }
 0x79a   :  { %v13324_v25 = vld [vmem:[#allocation7 + $0xcb8] sm:$0xf0] }
 0x79b   :  { %v16780_v31 = vld [vmem:[#allocation7 + $0xe9c] sm:$0xf]  ;;  %v13327_v48 = vor.u32 %v16716_v50, %v13324_v25  ;;  %9837 = vmatpush.bf16.msrb.mxu1 %v13071_v46 }
 0x79c   :  { %v13580_v32 = vld [vmem:[#allocation7 + $0xeb8] sm:$0xf0] }
 0x79d   :  { %v16580_v41 = vld [vmem:[#allocation7 + $0x85c] sm:$0xf]  ;;  %v13583_v37 = vor.u32 %v16780_v31, %v13580_v32  ;;  %9850 = vmatpush.bf16.msrb.mxu2 %v13327_v48 }
 0x79e   :  { %v12780_v39 = vld [vmem:[#allocation7 + $0x878] sm:$0xf0] }
 0x79f   :  { %v16644_v54 = vld [vmem:[#allocation7 + $0xa5c] sm:$0xf]  ;;  %v12783_v44 = vor.u32 %v16580_v41, %v12780_v39  ;;  %9863 = vmatpush.bf16.msrb.mxu3 %v13583_v37 }
 0x7a0   :  { %v13036_v6 = vld [vmem:[#allocation7 + $0xa78] sm:$0xf0] }
 0x7a1   :  { %v16708_v38 = vld [vmem:[#allocation7 + $0xc5c] sm:$0xf]  ;;  %v13039_v57 = vor.u32 %v16644_v54, %v13036_v6  ;;  %9825 = vmatpush.bf16.msrb.mxu0 %v12783_v44 }
 0x7a2   :  { %v13292_v47 = vld [vmem:[#allocation7 + $0xc78] sm:$0xf0] }
 0x7a3   :  { %v16772_v42 = vld [vmem:[#allocation7 + $0xe5c] sm:$0xf]  ;;  %v13295_v58 = vor.u32 %v16708_v38, %v13292_v47  ;;  %9838 = vmatpush.bf16.msrb.mxu1 %v13039_v57 }
 0x7a4   :  { %v13548_v52 = vld [vmem:[#allocation7 + $0xe78] sm:$0xf0] }
 0x7a5   :  { %v16572_v53 = vld [vmem:[#allocation7 + $0x81c] sm:$0xf]  ;;  %v13551_v3 = vor.u32 %v16772_v42, %v13548_v52  ;;  %9851 = vmatpush.bf16.msrb.mxu2 %v13295_v58 }
 0x7a6   :  { %v12748_v56 = vld [vmem:[#allocation7 + $0x838] sm:$0xf0] }
 0x7a7   :  { %v16636_v59 = vld [vmem:[#allocation7 + $0xa1c] sm:$0xf]  ;;  %v12751_v17 = vor.u32 %v16572_v53, %v12748_v56  ;;  %9864 = vmatpush.bf16.msrb.mxu3 %v13551_v3 }
 0x7a8   :  { %v13004_v33 = vld [vmem:[#allocation7 + $0xa38] sm:$0xf0] }
 0x7a9   :  { %v16700_v0 = vld [vmem:[#allocation7 + $0xc1c] sm:$0xf]  ;;  %v13007_v21 = vor.u32 %v16636_v59, %v13004_v33  ;;  %9826 = vmatpush.bf16.msrb.mxu0 %v12751_v17 }
 0x7aa   :  { %v13260_v63 = vld [vmem:[#allocation7 + $0xc38] sm:$0xf0] }
 0x7ab   :  { %v16764_v11 = vld [vmem:[#allocation7 + $0xe1c] sm:$0xf]  ;;  %v13263_v7 = vor.u32 %v16700_v0, %v13260_v63  ;;  %9839 = vmatpush.bf16.msrb.mxu1 %v13007_v21 }
 0x7ac   :  { %v13516_v20 = vld [vmem:[#allocation7 + $0xe38] sm:$0xf0]  ;;  %9827 = vmatmul.bf16.vlgmr.msrb.gmra.mxu0 %v17777_v51 }
 0x7ad   :  { %v16884_v4 = vld [vmem:[#allocation7 + $0x11dc] sm:$0xf]  ;;  %v13519_v25 = vor.u32 %v16764_v11, %v13516_v20  ;;  %9852 = vmatpush.bf16.msrb.mxu2 %v13263_v7 }
 0x7ae   :  { %v13996_v16 = vld [vmem:[#allocation7 + $0x11f8] sm:$0xf0]  ;;  %9840 = vmatmul.bf16.vlgmr.msrb.gmra.mxu1 %v17779_v43 }
 0x7af   :  { %v16948_v14 = vld [vmem:[#allocation7 + $0x13dc] sm:$0xf]  ;;  %v13999_v28 = vor.u32 %v16884_v4, %v13996_v16  ;;  %9865 = vmatpush.bf16.msrb.mxu3 %v13519_v25  ;;  %v9620_v4 = vpop.f32.mrf.mxu0 }
 0x7b0   :  { %v14252_v30 = vld [vmem:[#allocation7 + $0x13f8] sm:$0xf0]  ;;  %9853 = vmatmul.bf16.vlgmr.msrb.gmra.mxu2 %v17781_v45 }
 0x7b1   :  { %v17012_v18 = vld [vmem:[#allocation7 + $0x15dc] sm:$0xf]  ;;  %v14255_v10 = vor.u32 %v16948_v14, %v14252_v30  ;;  %9871 = vmatpush.bf16.msra.mxu0 %v13999_v28  ;;  %v9633_v14 = vpop.f32.mrf.mxu1 }
 0x7b2   :  { %v14508_v19 = vld [vmem:[#allocation7 + $0x15f8] sm:$0xf0]  ;;  %9866 = vmatmul.bf16.vlgmr.msrb.gmra.mxu3 %v17783_v55  ;;  %v9621_v55 = vadd.f32 %v9620_v4, %v17999_v35 }
 0x7b3   :  { %v17076_v22 = vld [vmem:[#allocation7 + $0x17dc] sm:$0xf]  ;;  %v14511_v27 = vor.u32 %v17012_v18, %v14508_v19  ;;  %9884 = vmatpush.bf16.msra.mxu1 %v14255_v10 }
 0x7b4   :  { %v14764_v50 = vld [vmem:[#allocation7 + $0x17f8] sm:$0xf0] }
 0x7b5   :  { %v16876_v31 = vld [vmem:[#allocation7 + $0x119c] sm:$0xf]  ;;  %v14767_v36 = vor.u32 %v17076_v22, %v14764_v50  ;;  %9897 = vmatpush.bf16.msra.mxu2 %v14511_v27  ;;  %v9634_v22 = vadd.f32 %v9633_v14, %v9621_v55 }
 0x7b6   :  { %v13964_v32 = vld [vmem:[#allocation7 + $0x11b8] sm:$0xf0] }
 0x7b7   :  { %v16940_v29 = vld [vmem:[#allocation7 + $0x139c] sm:$0xf]  ;;  %v13967_v37 = vor.u32 %v16876_v31, %v13964_v32  ;;  %9910 = vmatpush.bf16.msra.mxu3 %v14767_v36 }
 0x7b8   :  { %v14220_v46 = vld [vmem:[#allocation7 + $0x13b8] sm:$0xf0] }
 0x7b9   :  { %v17004_v48 = vld [vmem:[#allocation7 + $0x159c] sm:$0xf]  ;;  %v14223_v6 = vor.u32 %v16940_v29, %v14220_v46  ;;  %9872 = vmatpush.bf16.msra.mxu0 %v13967_v37 }
 0x7ba   :  { %v14476_v41 = vld [vmem:[#allocation7 + $0x15b8] sm:$0xf0] }
 0x7bb   :  { %v17068_v39 = vld [vmem:[#allocation7 + $0x179c] sm:$0xf]  ;;  %v14479_v38 = vor.u32 %v17004_v48, %v14476_v41  ;;  %9885 = vmatpush.bf16.msra.mxu1 %v14223_v6 }
 0x7bc   :  { %v14732_v54 = vld [vmem:[#allocation7 + $0x17b8] sm:$0xf0] }
 0x7bd   :  { %v16868_v47 = vld [vmem:[#allocation7 + $0x115c] sm:$0xf]  ;;  %v14735_v44 = vor.u32 %v17068_v39, %v14732_v54  ;;  %9898 = vmatpush.bf16.msra.mxu2 %v14479_v38  ;;  %v9646_v39 = vpop.f32.mrf.mxu2 }
 0x7be   :  { %v13932_v42 = vld [vmem:[#allocation7 + $0x1178] sm:$0xf0]  ;;  %v9647_v38 = vadd.f32 %v9646_v39, %v9634_v22 }
 0x7bf   :  { %v16932_v52 = vld [vmem:[#allocation7 + $0x135c] sm:$0xf]  ;;  %v13935_v33 = vor.u32 %v16868_v47, %v13932_v42  ;;  %9911 = vmatpush.bf16.msra.mxu3 %v14735_v44  ;;  %v9659_v47 = vpop.f32.mrf.mxu3  ;;  %v9622_v42 = vpop.f32.mrf.mxu0 }
 0x7c0   :  { %v14188_v53 = vld [vmem:[#allocation7 + $0x1378] sm:$0xf0] }
 0x7c1   :  { %v16996_v56 = vld [vmem:[#allocation7 + $0x155c] sm:$0xf]  ;;  %v14191_v0 = vor.u32 %v16932_v52, %v14188_v53  ;;  %9873 = vmatpush.bf16.msra.mxu0 %v13935_v33  ;;  %v9635_v53 = vpop.f32.mrf.mxu1 }
 0x7c2   :  { %v14444_v57 = vld [vmem:[#allocation7 + $0x1578] sm:$0xf0] }
 0x7c3   :  { %v17060_v58 = vld [vmem:[#allocation7 + $0x175c] sm:$0xf]  ;;  %v14447_v3 = vor.u32 %v16996_v56, %v14444_v57  ;;  %9886 = vmatpush.bf16.msra.mxu1 %v14191_v0  ;;  %v18006_v57 = vadd.f32 %v9659_v47, %v9647_v38 }
 0x7c4   :  { %v14700_v59 = vld [vmem:[#allocation7 + $0x1778] sm:$0xf0] }
 0x7c5   :  { %v16860_v8 = vld [vmem:[#allocation7 + $0x111c] sm:$0xf]  ;;  %v14703_v11 = vor.u32 %v17060_v58, %v14700_v59  ;;  %9899 = vmatpush.bf16.msra.mxu2 %v14447_v3 }
 0x7c6   :  { %v13900_v51 = vld [vmem:[#allocation7 + $0x1138] sm:$0xf0] }
 0x7c7   :  { %v16924_v63 = vld [vmem:[#allocation7 + $0x131c] sm:$0xf]  ;;  %v13903_v17 = vor.u32 %v16860_v8, %v13900_v51  ;;  %9912 = vmatpush.bf16.msra.mxu3 %v14703_v11 }
 0x7c8   :  { %v14156_v20 = vld [vmem:[#allocation7 + $0x1338] sm:$0xf0] }
 0x7c9   :  { %v16988_v15 = vld [vmem:[#allocation7 + $0x151c] sm:$0xf]  ;;  %v14159_v30 = vor.u32 %v16924_v63, %v14156_v20  ;;  %9874 = vmatpush.bf16.msra.mxu0 %v13903_v17 }
 0x7ca   :  { %v14412_v43 = vld [vmem:[#allocation7 + $0x1538] sm:$0xf0] }
 0x7cb   :  { %v17052_v45 = vld [vmem:[#allocation7 + $0x171c] sm:$0xf]  ;;  %v14415_v18 = vor.u32 %v16988_v15, %v14412_v43  ;;  %9887 = vmatpush.bf16.msra.mxu1 %v14159_v30 }
 0x7cc   :  { %v14668_v16 = vld [vmem:[#allocation7 + $0x1738] sm:$0xf0] }
 0x7cd   :  { %v16852_v19 = vld [vmem:[#allocation7 + $0x10dc] sm:$0xf]  ;;  %v14671_v50 = vor.u32 %v17052_v45, %v14668_v16  ;;  %9900 = vmatpush.bf16.msra.mxu2 %v14415_v18 }
 0x7ce   :  { %v13868_v21 = vld [vmem:[#allocation7 + $0x10f8] sm:$0xf0] }
 0x7cf   :  { %v16916_v7 = vld [vmem:[#allocation7 + $0x12dc] sm:$0xf]  ;;  %v13871_v32 = vor.u32 %v16852_v19, %v13868_v21  ;;  %9913 = vmatpush.bf16.msra.mxu3 %v14671_v50  ;;  %v9648_v19 = vpop.f32.mrf.mxu2  ;;  %v9661_v50 = vpop.f32.mrf.mxu3 }
 0x7d0   :  { %v14124_v25 = vld [vmem:[#allocation7 + $0x12f8] sm:$0xf0] }
 0x7d1   :  { %v16980_v28 = vld [vmem:[#allocation7 + $0x14dc] sm:$0xf]  ;;  %v14127_v35 = vor.u32 %v16916_v7, %v14124_v25  ;;  %9875 = vmatpush.bf16.msra.mxu0 %v13871_v32 }
 0x7d2   :  { %v14380_v10 = vld [vmem:[#allocation7 + $0x14f8] sm:$0xf0] }
 0x7d3   :  { %v17044_v27 = vld [vmem:[#allocation7 + $0x16dc] sm:$0xf]  ;;  %v14383_v29 = vor.u32 %v16980_v28, %v14380_v10  ;;  %9888 = vmatpush.bf16.msra.mxu1 %v14127_v35 }
 0x7d4   :  { %v14636_v31 = vld [vmem:[#allocation7 + $0x16f8] sm:$0xf0] }
 0x7d5   :  { %v16844_v36 = vld [vmem:[#allocation7 + $0x109c] sm:$0xf]  ;;  %v14639_v41 = vor.u32 %v17044_v27, %v14636_v31  ;;  %9901 = vmatpush.bf16.msra.mxu2 %v14383_v29 }
 0x7d6   :  { %v13836_v46 = vld [vmem:[#allocation7 + $0x10b8] sm:$0xf0] }
 0x7d7   :  { %v16908_v48 = vld [vmem:[#allocation7 + $0x129c] sm:$0xf]  ;;  %v13839_v56 = vor.u32 %v16844_v36, %v13836_v46  ;;  %9914 = vmatpush.bf16.msra.mxu3 %v14639_v41 }
 0x7d8   :  { %v14092_v54 = vld [vmem:[#allocation7 + $0x12b8] sm:$0xf0] }
 0x7d9   :  { %v16972_v37 = vld [vmem:[#allocation7 + $0x149c] sm:$0xf]  ;;  %v14095_v58 = vor.u32 %v16908_v48, %v14092_v54  ;;  %9876 = vmatpush.bf16.msra.mxu0 %v13839_v56 }
 0x7da   :  { %v14348_v6 = vld [vmem:[#allocation7 + $0x14b8] sm:$0xf0] }
 0x7db   :  { %v17036_v52 = vld [vmem:[#allocation7 + $0x169c] sm:$0xf]  ;;  %v14351_v59 = vor.u32 %v16972_v37, %v14348_v6  ;;  %9889 = vmatpush.bf16.msra.mxu1 %v14095_v58 }
 0x7dc   :  { %v14604_v44 = vld [vmem:[#allocation7 + $0x16b8] sm:$0xf0] }
 0x7dd   :  { %v16836_v33 = vld [vmem:[#allocation7 + $0x105c] sm:$0xf]  ;;  %v14607_v8 = vor.u32 %v17036_v52, %v14604_v44  ;;  %9902 = vmatpush.bf16.msra.mxu2 %v14351_v59 }
 0x7de   :  { %v13804_v0 = vld [vmem:[#allocation7 + $0x1078] sm:$0xf0] }
 0x7df   :  { %v16900_v3 = vld [vmem:[#allocation7 + $0x125c] sm:$0xf]  ;;  %v13807_v43 = vor.u32 %v16836_v33, %v13804_v0  ;;  %9915 = vmatpush.bf16.msra.mxu3 %v14607_v8 }
 0x7e0   :  { %v14060_v51 = vld [vmem:[#allocation7 + $0x1278] sm:$0xf0] }
 0x7e1   :  { %v16964_v63 = vld [vmem:[#allocation7 + $0x145c] sm:$0xf]  ;;  %v14063_v16 = vor.u32 %v16900_v3, %v14060_v51  ;;  %9877 = vmatpush.bf16.msra.mxu0 %v13807_v43 }
 0x7e2   :  { %v14316_v11 = vld [vmem:[#allocation7 + $0x1478] sm:$0xf0] }
 0x7e3   :  { %v17028_v20 = vld [vmem:[#allocation7 + $0x165c] sm:$0xf]  ;;  %v14319_v55 = vor.u32 %v16964_v63, %v14316_v11  ;;  %9890 = vmatpush.bf16.msra.mxu1 %v14063_v16 }
 0x7e4   :  { %v14572_v15 = vld [vmem:[#allocation7 + $0x1678] sm:$0xf0] }
 0x7e5   :  { %v16828_v4 = vld [vmem:[#allocation7 + $0x101c] sm:$0xf]  ;;  %v14575_v18 = vor.u32 %v17028_v20, %v14572_v15  ;;  %9903 = vmatpush.bf16.msra.mxu2 %v14319_v55 }
 0x7e6   :  { %v13772_v45 = vld [vmem:[#allocation7 + $0x1038] sm:$0xf0] }
 0x7e7   :  { %v16892_v14 = vld [vmem:[#allocation7 + $0x121c] sm:$0xf]  ;;  %v13775_v27 = vor.u32 %v16828_v4, %v13772_v45  ;;  %9916 = vmatpush.bf16.msra.mxu3 %v14575_v18 }
 0x7e8   :  { %v14028_v17 = vld [vmem:[#allocation7 + $0x1238] sm:$0xf0] }
 0x7e9   :  { %v16956_v30 = vld [vmem:[#allocation7 + $0x141c] sm:$0xf]  ;;  %v14031_v29 = vor.u32 %v16892_v14, %v14028_v17  ;;  %9878 = vmatpush.bf16.msra.mxu0 %v13775_v27 }
 0x7ea   :  { %v14284_v21 = vld [vmem:[#allocation7 + $0x1438] sm:$0xf0] }
 0x7eb   :  { %v17020_v7 = vld [vmem:[#allocation7 + $0x161c] sm:$0xf]  ;;  %v14287_v36 = vor.u32 %v16956_v30, %v14284_v21  ;;  %9891 = vmatpush.bf16.msra.mxu1 %v14031_v29  ;;  %v9672_v21 = vpop.f32.mrf.mxu0 }
 0x7ec   :  { %v14540_v22 = vld [vmem:[#allocation7 + $0x1638] sm:$0xf0]  ;;  %9879 = vmatmul.bf16.vlgmr.msra.gmra.mxu0 %v17801_v5 }
 0x7ed   :  { %v17140_v25 = vld [vmem:[#allocation7 + $0x19dc] sm:$0xf]  ;;  %v14543_v41 = vor.u32 %v17020_v7, %v14540_v22  ;;  %9904 = vmatpush.bf16.msra.mxu2 %v14287_v36  ;;  %v9685_v22 = vpop.f32.mrf.mxu1 }
 0x7ee   :  { %v15020_v28 = vld [vmem:[#allocation7 + $0x19f8] sm:$0xf0]  ;;  %9892 = vmatmul.bf16.vlgmr.msra.gmra.mxu1 %v17805_v2 }
 0x7ef   :  { %v17204_v10 = vld [vmem:[#allocation7 + $0x1bdc] sm:$0xf]  ;;  %v15023_v39 = vor.u32 %v17140_v25, %v15020_v28  ;;  %9917 = vmatpush.bf16.msra.mxu3 %v14543_v41 }
 0x7f0   :  { %v15276_v31 = vld [vmem:[#allocation7 + $0x1bf8] sm:$0xf0]  ;;  %9905 = vmatmul.bf16.vlgmr.msra.gmra.mxu2 %v17799_v62 }
 0x7f1   :  { %v17268_v32 = vld [vmem:[#allocation7 + $0x1ddc] sm:$0xf]  ;;  %v15279_v54 = vor.u32 %v17204_v10, %v15276_v31  ;;  %9923 = vmatpush.bf16.msrb.mxu0 %v15023_v39 }
 0x7f2   :  { %v15532_v35 = vld [vmem:[#allocation7 + $0x1df8] sm:$0xf0]  ;;  %9918 = vmatmul.bf16.vlgmr.msra.gmra.mxu3 %v17803_v1  ;;  %v9673_v1 = vadd.f32 %v9672_v21, %v18006_v57 }
 0x7f3   :  { %v17332_v46 = vld [vmem:[#allocation7 + $0x1fdc] sm:$0xf]  ;;  %v15535_v37 = vor.u32 %v17268_v32, %v15532_v35  ;;  %9936 = vmatpush.bf16.msrb.mxu1 %v15279_v54 }
 0x7f4   :  { %v15788_v48 = vld [vmem:[#allocation7 + $0x1ff8] sm:$0xf0]  ;;  %v18013_v32 = vadd.f32 %v9685_v22, %v9673_v1 }
 0x7f5   :  { %v17132_v6 = vld [vmem:[#allocation7 + $0x199c] sm:$0xf]  ;;  %v15791_v42 = vor.u32 %v17332_v46, %v15788_v48  ;;  %9949 = vmatpush.bf16.msrb.mxu2 %v15535_v37 }
 0x7f6   :  { %v14988_v38 = vld [vmem:[#allocation7 + $0x19b8] sm:$0xf0] }
 0x7f7   :  { %v17196_v47 = vld [vmem:[#allocation7 + $0x1b9c] sm:$0xf]  ;;  %v14991_v59 = vor.u32 %v17132_v6, %v14988_v38  ;;  %9962 = vmatpush.bf16.msrb.mxu3 %v15791_v42  ;;  %v18015_v42 = vpop.f32.mrf.mxu2 }
 0x7f8   :  { %v15244_v52 = vld [vmem:[#allocation7 + $0x1bb8] sm:$0xf0] }
 0x7f9   :  { %v17260_v44 = vld [vmem:[#allocation7 + $0x1d9c] sm:$0xf]  ;;  %v15247_v33 = vor.u32 %v17196_v47, %v15244_v52  ;;  %9924 = vmatpush.bf16.msrb.mxu0 %v14991_v59 }
 0x7fa   :  { %v15500_v53 = vld [vmem:[#allocation7 + $0x1db8] sm:$0xf0] }
 0x7fb   :  { %v17324_v56 = vld [vmem:[#allocation7 + $0x1f9c] sm:$0xf]  ;;  %v15503_v0 = vor.u32 %v17260_v44, %v15500_v53  ;;  %9937 = vmatpush.bf16.msrb.mxu1 %v15247_v33 }
 0x7fc   :  { %v15756_v58 = vld [vmem:[#allocation7 + $0x1fb8] sm:$0xf0] }
 0x7fd   :  { %v17124_v3 = vld [vmem:[#allocation7 + $0x195c] sm:$0xf]  ;;  %v15759_v63 = vor.u32 %v17324_v56, %v15756_v58  ;;  %9950 = vmatpush.bf16.msrb.mxu2 %v15503_v0  ;;  %v18017_v56 = vpop.f32.mrf.mxu3  ;;  %v9674_v58 = vpop.f32.mrf.mxu0 }
 0x7fe   :  { %v14956_v8 = vld [vmem:[#allocation7 + $0x1978] sm:$0xf0]  ;;  %v9687_v0 = vpop.f32.mrf.mxu1  ;;  %v17356_v58 = vld [vmem:[%s18251_s5 + $0x98] sm:$0xff] }
 0x7ff   :  { %v17188_v51 = vld [vmem:[#allocation7 + $0x1b5c] sm:$0xf]  ;;  %v14959_v45 = vor.u32 %v17124_v3, %v14956_v8  ;;  %9963 = vmatpush.bf16.msrb.mxu3 %v15759_v63  ;;  %v9700_v21 = vpop.f32.mrf.mxu2 }
 0x800   :  { %v15212_v11 = vld [vmem:[#allocation7 + $0x1b78] sm:$0xf0]  ;;  %v9977_v21 = vmax.f32 %v17909_v9, 0.0 }
 0x801   :  { %v17252_v20 = vld [vmem:[#allocation7 + $0x1d5c] sm:$0xf]  ;;  %v15215_v16 = vor.u32 %v17188_v51, %v15212_v11  ;;  %9925 = vmatpush.bf16.msrb.mxu0 %v14959_v45 }
 0x802   :  { %v15468_v15 = vld [vmem:[#allocation7 + $0x1d78] sm:$0xf0] }
 0x803   :  { %v17316_v43 = vld [vmem:[#allocation7 + $0x1f5c] sm:$0xf]  ;;  %v15471_v55 = vor.u32 %v17252_v20, %v15468_v15  ;;  %9938 = vmatpush.bf16.msrb.mxu1 %v15215_v16 }
 0x804   :  { %v15724_v4 = vld [vmem:[#allocation7 + $0x1f78] sm:$0xf0] }
 0x805   :  { %v17116_v14 = vld [vmem:[#allocation7 + $0x191c] sm:$0xf]  ;;  %v15727_v30 = vor.u32 %v17316_v43, %v15724_v4  ;;  %9951 = vmatpush.bf16.msrb.mxu2 %v15471_v55  ;;  %v9713_v22 = vpop.f32.mrf.mxu3 }
 0x806   :  { %v14924_v5 = vld [vmem:[#allocation7 + $0x1938] sm:$0xf0] }
 0x807   :  { %v17180_v17 = vld [vmem:[#allocation7 + $0x1b1c] sm:$0xf]  ;;  %v14927_v50 = vor.u32 %v17116_v14, %v14924_v5  ;;  %9964 = vmatpush.bf16.msrb.mxu3 %v15727_v30 }
 0x808   :  { %v15180_v18 = vld [vmem:[#allocation7 + $0x1b38] sm:$0xf0] }
 0x809   :  { %v17244_v19 = vld [vmem:[#allocation7 + $0x1d1c] sm:$0xf]  ;;  %v15183_v25 = vor.u32 %v17180_v17, %v15180_v18  ;;  %9926 = vmatpush.bf16.msrb.mxu0 %v14927_v50 }
 0x80a   :  { %v15436_v2 = vld [vmem:[#allocation7 + $0x1d38] sm:$0xf0] }
 0x80b   :  { %v17308_v62 = vld [vmem:[#allocation7 + $0x1f1c] sm:$0xf]  ;;  %v15439_v28 = vor.u32 %v17244_v19, %v15436_v2  ;;  %9939 = vmatpush.bf16.msrb.mxu1 %v15183_v25 }
 0x80c   :  { %v15692_v7 = vld [vmem:[#allocation7 + $0x1f38] sm:$0xf0] }
 0x80d   :  { %v17108_v10 = vld [vmem:[#allocation7 + $0x18dc] sm:$0xf]  ;;  %v15695_v35 = vor.u32 %v17308_v62, %v15692_v7  ;;  %9952 = vmatpush.bf16.msrb.mxu2 %v15439_v28  ;;  %v18089_v0 = vpop.f32.mrf.mxu3 }
 0x80e   :  { %v14892_v27 = vld [vmem:[#allocation7 + $0x18f8] sm:$0xf0] }
 0x80f   :  { %v17172_v31 = vld [vmem:[#allocation7 + $0x1adc] sm:$0xf]  ;;  %v14895_v57 = vor.u32 %v17108_v10, %v14892_v27  ;;  %9965 = vmatpush.bf16.msrb.mxu3 %v15695_v35  ;;  %v17344_v35 = vld [vmem:[%s18251_s5 + $0x38] sm:$0xff] }
 0x810   :  { %v15148_v29 = vld [vmem:[#allocation7 + $0x1af8] sm:$0xf0] }
 0x811   :  { %v17236_v36 = vld [vmem:[#allocation7 + $0x1cdc] sm:$0xf]  ;;  %v15151_v39 = vor.u32 %v17172_v31, %v15148_v29  ;;  %9927 = vmatpush.bf16.msrb.mxu0 %v14895_v57  ;;  %v17352_v29 = vld [vmem:[%s18251_s5 + $0x78] sm:$0xff] }
 0x812   :  { %v15404_v46 = vld [vmem:[#allocation7 + $0x1cf8] sm:$0xf0] }
 0x813   :  { %v17300_v48 = vld [vmem:[#allocation7 + $0x1edc] sm:$0xf]  ;;  %v15407_v54 = vor.u32 %v17236_v36, %v15404_v46  ;;  %9940 = vmatpush.bf16.msrb.mxu1 %v15151_v39  ;;  %v17360_v36 = vld [vmem:[%s18251_s5 + $0xb8] sm:$0xff] }
 0x814   :  { %v15660_v41 = vld [vmem:[#allocation7 + $0x1ef8] sm:$0xf0]  ;;  %v17368_v46 = vld [vmem:[%s18251_s5 + $0xf8] sm:$0xff] }
 0x815   :  { %v17100_v37 = vld [vmem:[#allocation7 + $0x189c] sm:$0xf]  ;;  %v15663_v47 = vor.u32 %v17300_v48, %v15660_v41  ;;  %9953 = vmatpush.bf16.msrb.mxu2 %v15407_v54  ;;  %v17342_v54 = vld [vmem:[%s18251_s5 + $0x28] sm:$0xff] }
 0x816   :  { %v14860_v6 = vld [vmem:[#allocation7 + $0x18b8] sm:$0xf0] }
 0x817   :  { %v17164_v38 = vld [vmem:[#allocation7 + $0x1a9c] sm:$0xf]  ;;  %v14863_v3 = vor.u32 %v17100_v37, %v14860_v6  ;;  %9966 = vmatpush.bf16.msrb.mxu3 %v15663_v47  ;;  %v17358_v37 = vld [vmem:[%s18251_s5 + $0xa8] sm:$0xff]  ;;  %v17341_v6 = vld [vmem:[%s18251_s5 + $0x20] sm:$0xff] }
 0x818   :  { %v15116_v52 = vld [vmem:[#allocation7 + $0x1ab8] sm:$0xf0]  ;;  %v17357_v47 = vld [vmem:[%s18251_s5 + $0xa0] sm:$0xff] }
 0x819   :  { %v17228_v44 = vld [vmem:[#allocation7 + $0x1c9c] sm:$0xf]  ;;  %v15119_v8 = vor.u32 %v17164_v38, %v15116_v52  ;;  %9928 = vmatpush.bf16.msrb.mxu0 %v14863_v3  ;;  %v17349_v38 = vld [vmem:[%s18251_s5 + $0x60] sm:$0xff] }
 0x81a   :  { %v15372_v53 = vld [vmem:[#allocation7 + $0x1cb8] sm:$0xf0]  ;;  %v17365_v52 = vld [vmem:[%s18251_s5 + $0xe0] sm:$0xff] }
 0x81b   :  { %v17292_v59 = vld [vmem:[#allocation7 + $0x1e9c] sm:$0xf]  ;;  %v15375_v51 = vor.u32 %v17228_v44, %v15372_v53  ;;  %9941 = vmatpush.bf16.msrb.mxu1 %v15119_v8  ;;  %v17340_v44 = vld [vmem:[%s18251_s5 + $0x18] sm:$0xff] }
 0x81c   :  { %v15628_v33 = vld [vmem:[#allocation7 + $0x1eb8] sm:$0xf0]  ;;  %v17348_v53 = vld [vmem:[%s18251_s5 + $0x58] sm:$0xff] }
 0x81d   :  { %v17092_v63 = vld [vmem:[#allocation7 + $0x185c] sm:$0xf]  ;;  %v15631_v15 = vor.u32 %v17292_v59, %v15628_v33  ;;  %9954 = vmatpush.bf16.msrb.mxu2 %v15375_v51  ;;  %v17364_v59 = vld [vmem:[%s18251_s5 + $0xd8] sm:$0xff]  ;;  %v18087_v33 = vpop.f32.mrf.mxu2 }
 0x81e   :  { %v14828_v11 = vld [vmem:[#allocation7 + $0x1878] sm:$0xf0] }
 0x81f   :  { %v17156_v20 = vld [vmem:[#allocation7 + $0x1a5c] sm:$0xf]  ;;  %v14831_v14 = vor.u32 %v17092_v63, %v14828_v11  ;;  %9967 = vmatpush.bf16.msrb.mxu3 %v15631_v15  ;;  %v17338_v15 = vld [vmem:[%s18251_s5 + $0x8] sm:$0xff] }
 0x820   :  { %v15084_v43 = vld [vmem:[#allocation7 + $0x1a78] sm:$0xf0] }
 0x821   :  { %v17220_v4 = vld [vmem:[#allocation7 + $0x1c5c] sm:$0xf]  ;;  %v15087_v5 = vor.u32 %v17156_v20, %v15084_v43  ;;  %9929 = vmatpush.bf16.msrb.mxu0 %v14831_v14  ;;  %v17346_v43 = vld [vmem:[%s18251_s5 + $0x48] sm:$0xff]  ;;  %v17337_v14 = vld [vmem:[%s18251_s5] sm:$0xff] }
 0x822   :  { %v15340_v45 = vld [vmem:[#allocation7 + $0x1c78] sm:$0xf0] }
 0x823   :  { %v17284_v16 = vld [vmem:[#allocation7 + $0x1e5c] sm:$0xf]  ;;  %v15343_v17 = vor.u32 %v17220_v4, %v15340_v45  ;;  %9942 = vmatpush.bf16.msrb.mxu1 %v15087_v5  ;;  %v17354_v4 = vld [vmem:[%s18251_s5 + $0x88] sm:$0xff]  ;;  %v17345_v5 = vld [vmem:[%s18251_s5 + $0x40] sm:$0xff] }
 0x824   :  { %v15596_v55 = vld [vmem:[#allocation7 + $0x1e78] sm:$0xf0]  ;;  %v17362_v45 = vld [vmem:[%s18251_s5 + $0xc8] sm:$0xff] }
 0x825   :  { %v17084_v30 = vld [vmem:[#allocation7 + $0x181c] sm:$0xf]  ;;  %v15599_v2 = vor.u32 %v17284_v16, %v15596_v55  ;;  %9955 = vmatpush.bf16.msrb.mxu2 %v15343_v17  ;;  %v9752_v16 = vpop.f32.mrf.mxu2  ;;  %v9765_v55 = vpop.f32.mrf.mxu3  ;;  %v17353_v17 = vld [vmem:[%s18251_s5 + $0x80] sm:$0xff] }
 0x826   :  { %v14796_v18 = vld [vmem:[#allocation7 + $0x1838] sm:$0xf0] }
 0x827   :  { %v17148_v19 = vld [vmem:[#allocation7 + $0x1a1c] sm:$0xf]  ;;  %v14799_v28 = vor.u32 %v17084_v30, %v14796_v18  ;;  %9968 = vmatpush.bf16.msrb.mxu3 %v15599_v2  ;;  %v9975_v30 = vmax.f32 %v17859_v60, 0.0  ;;  %v9976_v18 = vmax.f32 %v17882_v24, 0.0  ;;  %v17376_v2 = vld [vmem:[%s18251_s5 + $0x138] sm:$0xff] }
 0x828   :  { %v15052_v62 = vld [vmem:[#allocation7 + $0x1a38] sm:$0xf0]  ;;  %v17392_v60 = vld [vmem:[%s18251_s5 + $0x1b8] sm:$0xff] }
 0x829   :  { %v17212_v7 = vld [vmem:[#allocation7 + $0x1c1c] sm:$0xf]  ;;  %v15055_v10 = vor.u32 %v17148_v19, %v15052_v62  ;;  %9930 = vmatpush.bf16.msrb.mxu0 %v14799_v28  ;;  %v17361_v19 = vld [vmem:[%s18251_s5 + $0xc0] sm:$0xff]  ;;  %v9978_v62 = vmax.f32 %v17936_v23, 0.0  ;;  %v9983_v24 = vpack.c.bf16 %v9975_v30, %v9975_v30  ;;  %v9985_v23 = vpack.c.bf16 %v9977_v21, %v9977_v21  ;;  %v17374_v28 = vld [vmem:[%s18251_s5 + $0x128] sm:$0xff] }
 0x82a   :  { %v15308_v1 = vld [vmem:[#allocation7 + $0x1c38] sm:$0xf0]  ;;  %v17400_v30 = vld [vmem:[%s18251_s5 + $0x1f8] sm:$0xff]  ;;  %v17398_v21 = vld [vmem:[%s18251_s5 + $0x1e8] sm:$0xff] }
 0x82b   :  { %v17276_v50 = vld [vmem:[#allocation7 + $0x1e1c] sm:$0xf]  ;;  %v15311_v27 = vor.u32 %v17212_v7, %v15308_v1  ;;  %9943 = vmatpush.bf16.msrb.mxu1 %v15055_v10  ;;  %v17384_v7 = vld [vmem:[%s18251_s5 + $0x178] sm:$0xff]  ;;  %v9984_v1 = vpack.c.bf16 %v9976_v18, %v9976_v18  ;;  %v9986_v22 = vpack.c.bf16 %v9978_v62, %v9978_v62  ;;  %v3182_v10 = vperm.slane %v17996_v40, 7  ;;  %v17373_v40 = vld [vmem:[%s18251_s5 + $0x120] sm:$0xff] }
 0x82c   :  { %v15564_v25 = vld [vmem:[#allocation7 + $0x1e38] sm:$0xf0]  ;;  %9931 = vmatmul.bf16.vlgmr.msrb.gmra.mxu0 %v17813_v34  ;;  %v17350_v34 = vld [vmem:[%s18251_s5 + $0x68] sm:$0xff]  ;;  %v17397_v62 = vld [vmem:[%s18251_s5 + $0x1e0] sm:$0xff] }
 0x82d   :  { %v15567_v31 = vor.u32 %v17276_v50, %v15564_v25  ;;  %9956 = vmatpush.bf16.msrb.mxu2 %v15311_v27  ;;  %10507 = vmatpush.bf16.msra.mxu0 %v17344_v35  ;;  %v17343_v48 = vld [vmem:[%s18251_s5 + $0x30] sm:$0xff]  ;;  %v17382_v27 = vld [vmem:[%s18251_s5 + $0x168] sm:$0xff]  ;;  %v9699_v35 = vadd.f32 %v18015_v42, %v18013_v32 }
 0x82e   :  { %v17351_v41 = vld [vmem:[%s18251_s5 + $0x70] sm:$0xff]  ;;  %9944 = vmatmul.bf16.vlgmr.msrb.gmra.mxu1 %v17815_v13  ;;  %v17366_v13 = vld [vmem:[%s18251_s5 + $0xe8] sm:$0xff] }
 0x82f   :  { %9969 = vmatpush.bf16.msrb.mxu3 %v15567_v31  ;;  %10520 = vmatpush.bf16.msra.mxu1 %v17352_v29  ;;  %v17359_v57 = vld [vmem:[%s18251_s5 + $0xb0] sm:$0xff]  ;;  %v17390_v31 = vld [vmem:[%s18251_s5 + $0x1a8] sm:$0xff]  ;;  %v9712_v32 = vadd.f32 %v18017_v56, %v9699_v35 }
 0x830   :  { %v17367_v39 = vld [vmem:[%s18251_s5 + $0xf0] sm:$0xff]  ;;  %9957 = vmatmul.bf16.vlgmr.msrb.gmra.mxu2 %v17821_v26  ;;  %v18059_v26 = vpop.f32.mrf.mxu0 }
 0x831   :  { %10533 = vmatpush.bf16.msra.mxu2 %v17360_v36  ;;  %10508 = vmatpush.bf16.msra.mxu0 %v17343_v48  ;;  %v17339_v51 = vld [vmem:[%s18251_s5 + $0x10] sm:$0xff]  ;;  %v17381_v48 = vld [vmem:[%s18251_s5 + $0x160] sm:$0xff] }
 0x832   :  { %9970 = vmatmul.bf16.vlgmr.msrb.gmra.mxu3 %v17824_v49  ;;  %v18061_v49 = vpop.f32.mrf.mxu1  ;;  %v17347_v63 = vld [vmem:[%s18251_s5 + $0x50] sm:$0xff] }
 0x833   :  { %10546 = vmatpush.bf16.msra.mxu3 %v17368_v46  ;;  %10521 = vmatpush.bf16.msra.mxu1 %v17351_v41  ;;  %v17355_v11 = vld [vmem:[%s18251_s5 + $0x90] sm:$0xff]  ;;  %v17389_v41 = vld [vmem:[%s18251_s5 + $0x1a0] sm:$0xff] }
 0x834   :  { %v17363_v20 = vld [vmem:[%s18251_s5 + $0xd0] sm:$0xff] }
 0x835   :  { %10534 = vmatpush.bf16.msra.mxu2 %v17359_v57  ;;  %10509 = vmatpush.bf16.msra.mxu0 %v17342_v54  ;;  %v17375_v9 = vld [vmem:[%s18251_s5 + $0x130] sm:$0xff]  ;;  %v9725_v57 = vadd.f32 %v18059_v26, %v9712_v32  ;;  %v17380_v54 = vld [vmem:[%s18251_s5 + $0x158] sm:$0xff] }
 0x836   :  { %v17383_v50 = vld [vmem:[%s18251_s5 + $0x170] sm:$0xff] }
 0x837   :  { %10547 = vmatpush.bf16.msra.mxu3 %v17367_v39  ;;  %10522 = vmatpush.bf16.msra.mxu1 %v17350_v34  ;;  %v17391_v25 = vld [vmem:[%s18251_s5 + $0x1b0] sm:$0xff]  ;;  %v17372_v39 = vld [vmem:[%s18251_s5 + $0x118] sm:$0xff]  ;;  %v9738_v26 = vadd.f32 %v18061_v49, %v9725_v57  ;;  %v17370_v49 = vld [vmem:[%s18251_s5 + $0x108] sm:$0xff] }
 0x838   :  { %v9726_v3 = vpop.f32.mrf.mxu0  ;;  %v17388_v34 = vld [vmem:[%s18251_s5 + $0x198] sm:$0xff]  ;;  %v17399_v18 = vld [vmem:[%s18251_s5 + $0x1f0] sm:$0xff] }
 0x839   :  { %10535 = vmatpush.bf16.msra.mxu2 %v17358_v37  ;;  %10510 = vmatpush.bf16.msra.mxu0 %v17341_v6  ;;  %v9802_v37 = vpop.f32.mrf.mxu2  ;;  %v17386_v3 = vld [vmem:[%s18251_s5 + $0x188] sm:$0xff] }
 0x83a   :  { %v9739_v8 = vpop.f32.mrf.mxu1 }
 0x83b   :  { %10548 = vmatpush.bf16.msra.mxu3 %v17366_v13  ;;  %10523 = vmatpush.bf16.msra.mxu1 %v17349_v38  ;;  %v9815_v13 = vpop.f32.mrf.mxu3 }
 0x83d   :  { %10536 = vmatpush.bf16.msra.mxu2 %v17357_v47  ;;  %10511 = vmatpush.bf16.msra.mxu0 %v17340_v44  ;;  %v17371_v47 = vld [vmem:[%s18251_s5 + $0x110] sm:$0xff] }
 0x83e   :  { %v17379_v44 = vld [vmem:[%s18251_s5 + $0x150] sm:$0xff] }
 0x83f   :  { %10549 = vmatpush.bf16.msra.mxu3 %v17365_v52  ;;  %10524 = vmatpush.bf16.msra.mxu1 %v17348_v53  ;;  %v17387_v53 = vld [vmem:[%s18251_s5 + $0x190] sm:$0xff] }
 0x840   :  { %v9776_v29 = vpop.f32.mrf.mxu0 }
 0x841   :  { %10537 = vmatpush.bf16.msra.mxu2 %v17356_v58  ;;  %10512 = vmatpush.bf16.msra.mxu0 %v17339_v51  ;;  %v9777_v36 = vadd.f32 %v9776_v29, %v3182_v10  ;;  %v9751_v58 = vadd.f32 %v18087_v33, %v9738_v26  ;;  %v9804_v51 = vpop.f32.mrf.mxu2  ;;  %v17369_v33 = vld [vmem:[%s18251_s5 + $0x100] sm:$0xff] }
 0x842   :  { %v9789_v46 = vpop.f32.mrf.mxu1  ;;  %v17393_v10 = vld [vmem:[%s18251_s5 + $0x1c0] sm:$0xff] }
 0x843   :  { %10550 = vmatpush.bf16.msra.mxu3 %v17364_v59  ;;  %10525 = vmatpush.bf16.msra.mxu1 %v17347_v63  ;;  %v9790_v42 = vadd.f32 %v9789_v46, %v9777_v36  ;;  %v17378_v59 = vld [vmem:[%s18251_s5 + $0x148] sm:$0xff]  ;;  %v9764_v8 = vadd.f32 %v18089_v0, %v9751_v58  ;;  %v9817_v63 = vpop.f32.mrf.mxu3  ;;  %v9980_v0 = vmax.f32 %v17990_v12, 0.0 }
 0x845   :  { %10538 = vmatpush.bf16.msra.mxu2 %v17355_v11  ;;  %10513 = vmatpush.bf16.msra.mxu0 %v17338_v15  ;;  %v9803_v56 = vadd.f32 %v9802_v37, %v9790_v42  ;;  %v9979_v11 = vmax.f32 %v17963_v61, 0.0  ;;  %v17385_v15 = vld [vmem:[%s18251_s5 + $0x180] sm:$0xff] }
 0x847   :  { %10551 = vmatpush.bf16.msra.mxu3 %v17363_v20  ;;  %10526 = vmatpush.bf16.msra.mxu1 %v17346_v43  ;;  %v9816_v52 = vadd.f32 %v9815_v13, %v9803_v56  ;;  %v17377_v20 = vld [vmem:[%s18251_s5 + $0x140] sm:$0xff]  ;;  %v9981_v43 = vmax.f32 %v9764_v8, 0.0 }
 0x848   :  { %v9778_v6 = vpop.f32.mrf.mxu0 }
 0x849   :  { %10539 = vmatpush.bf16.msra.mxu2 %v17354_v4  ;;  %10514 = vmatpush.bf16.msra.mxu0 %v17337_v14  ;;  %v9987_v4 = vpack.c.bf16 %v9979_v11, %v9979_v11  ;;  %v9989_v16 = vpack.c.bf16 %v9981_v43, %v9981_v43  ;;  %v9854_v14 = vpop.f32.mrf.mxu2 }
 0x84a   :  { %v9791_v38 = vpop.f32.mrf.mxu1 }
 0x84b   :  { %10552 = vmatpush.bf16.msra.mxu3 %v17362_v45  ;;  %10527 = vmatpush.bf16.msra.mxu1 %v17345_v5  ;;  %v9988_v45 = vpack.c.bf16 %v9980_v0, %v9980_v0  ;;  %v9867_v5 = vpop.f32.mrf.mxu3 }
 0x84c   :  { %10515 = vmatmul.bf16.vlgmr.msra.gmra.mxu0 %v9983_v24 }
 0x84d   :  { %10540 = vmatpush.bf16.msra.mxu2 %v17353_v17  ;;  %10559 = vmatpush.bf16.msrb.mxu0 %v17376_v2 }
 0x84e   :  { %10528 = vmatmul.bf16.vlgmr.msra.gmra.mxu1 %v9984_v1  ;;  %v17395_v1 = vld [vmem:[%s18251_s5 + $0x1d0] sm:$0xff] }
 0x84f   :  { %10553 = vmatpush.bf16.msra.mxu3 %v17361_v19  ;;  %10572 = vmatpush.bf16.msrb.mxu1 %v17384_v7  ;;  %v17396_v7 = vld [vmem:[%s18251_s5 + $0x1d8] sm:$0xff] }
 0x850   :  { %10541 = vmatmul.bf16.vlgmr.msra.gmra.mxu2 %v9985_v23  ;;  %v9828_v61 = vpop.f32.mrf.mxu0 }
 0x851   :  { %10585 = vmatpush.bf16.msrb.mxu2 %v17392_v60  ;;  %10560 = vmatpush.bf16.msrb.mxu0 %v17375_v9  ;;  %v9856_v19 = vpop.f32.mrf.mxu2  ;;  %v17394_v9 = vld [vmem:[%s18251_s5 + $0x1c8] sm:$0xff] }
 0x852   :  { %10554 = vmatmul.bf16.vlgmr.msra.gmra.mxu3 %v9986_v22  ;;  %v9841_v55 = vpop.f32.mrf.mxu1  ;;  %v9829_v22 = vadd.f32 %v9828_v61, %v9816_v52 }
 0x853   :  { %10573 = vmatpush.bf16.msrb.mxu1 %v17383_v50  ;;  %10598 = vmatpush.bf16.msrb.mxu3 %v17400_v30  ;;  %v9869_v2 = vpop.f32.mrf.mxu3 }
 0x855   :  { %10586 = vmatpush.bf16.msrb.mxu2 %v17391_v25  ;;  %10561 = vmatpush.bf16.msrb.mxu0 %v17374_v28 }
 0x857   :  { %10574 = vmatpush.bf16.msrb.mxu1 %v17382_v27  ;;  %10599 = vmatpush.bf16.msrb.mxu3 %v17399_v18  ;;  %v9842_v27 = vadd.f32 %v9841_v55, %v9829_v22 }
 0x858   :  { %v9830_v17 = vpop.f32.mrf.mxu0 }
 0x859   :  { %10587 = vmatpush.bf16.msrb.mxu2 %v17390_v31  ;;  %10562 = vmatpush.bf16.msrb.mxu0 %v17373_v40  ;;  %v9855_v31 = vadd.f32 %v9854_v14, %v9842_v27 }
 0x85a   :  { %v9843_v12 = vpop.f32.mrf.mxu1 }
 0x85b   :  { %10575 = vmatpush.bf16.msrb.mxu1 %v17381_v48  ;;  %10600 = vmatpush.bf16.msrb.mxu3 %v17398_v21  ;;  %v9868_v36 = vadd.f32 %v9867_v5, %v9855_v31 }
 0x85d   :  { %10588 = vmatpush.bf16.msrb.mxu2 %v17389_v41  ;;  %10563 = vmatpush.bf16.msrb.mxu0 %v17372_v39 }
 0x85f   :  { %10576 = vmatpush.bf16.msrb.mxu1 %v17380_v54  ;;  %10601 = vmatpush.bf16.msrb.mxu3 %v17397_v62  ;;  %v17415_v62 = vld [vmem:[#allocation11] ss:$0 sm:$0xff] }
 0x861   :  { %10589 = vmatpush.bf16.msrb.mxu2 %v17388_v34  ;;  %10564 = vmatpush.bf16.msrb.mxu0 %v17371_v47 }
 0x863   :  { %10577 = vmatpush.bf16.msrb.mxu1 %v17379_v44  ;;  %10602 = vmatpush.bf16.msrb.mxu3 %v17396_v7  ;;  %v17414_v44 = vld [vmem:[#allocation10] ss:$0 sm:$0xff] }
 0x865   :  { %10590 = vmatpush.bf16.msrb.mxu2 %v17387_v53  ;;  %10565 = vmatpush.bf16.msrb.mxu0 %v17370_v49 }
 0x867   :  { %10578 = vmatpush.bf16.msrb.mxu1 %v17378_v59  ;;  %10603 = vmatpush.bf16.msrb.mxu3 %v17395_v1 }
 0x869   :  { %10591 = vmatpush.bf16.msrb.mxu2 %v17386_v3  ;;  %10566 = vmatpush.bf16.msrb.mxu0 %v17369_v33  ;;  %v9880_v60 = vpop.f32.mrf.mxu0 }
 0x86a   :  { %v9881_v46 = vadd.f32 %v9880_v60, %v9868_v36 }
 0x86b   :  { %10579 = vmatpush.bf16.msrb.mxu1 %v17377_v20  ;;  %v9893_v24 = vpop.f32.mrf.mxu1  ;;  %10604 = vmatpush.bf16.msrb.mxu3 %v17394_v9  ;;  %v17402_v20 = vld [vmem:[%s18253_s7 + $0x8] sm:$0xff] }
 0x86c   :  { %10567 = vmatmul.bf16.vlgmr.msrb.gmra.mxu0 %v9987_v4  ;;  %v9894_v40 = vadd.f32 %v9893_v24, %v9881_v46 }
 0x86d   :  { %10592 = vmatpush.bf16.msrb.mxu2 %v17385_v15  ;;  %10643 = vmatpush.bf16.msra.mxu0 %v17402_v20  ;;  %v17401_v15 = vld [vmem:[%s18253_s7] sm:$0xff]  ;;  %s17611_s7 = smov [#allocation13]  }
 0x86e   :  { %10580 = vmatmul.bf16.vlgmr.msrb.gmra.mxu1 %v9988_v45  ;;  %s10657_s12 = sshll.u32 %s17611_s7, 4  ;;  %s10658_s12 = int_to_ptr.vmem [resolvable:$true] %s10657_s12 }
 0x86f   :  { %10605 = vmatpush.bf16.msrb.mxu3 %v17393_v10 }
 0x870   :  { %10593 = vmatmul.bf16.vlgmr.msrb.gmra.mxu2 %v9989_v16 }
 0x871   :  { %v9882_v25 = vpop.f32.mrf.mxu0  ;;  %10644 = vmatpush.bf16.msra.mxu0 %v17401_v15 }
 0x873   :  { %v9906_v23 = vpop.f32.mrf.mxu2  ;;  %v9895_v28 = vpop.f32.mrf.mxu1 }
 0x874   :  { %v9907_v48 = vadd.f32 %v9906_v23, %v9894_v40 }
 0x875   :  { %v9919_v50 = vpop.f32.mrf.mxu3 }
 0x876   :  { %v9920_v41 = vadd.f32 %v9919_v50, %v9907_v48 }
 0x87b   :  { %v9908_v35 = vpop.f32.mrf.mxu2 }
 0x87d   :  { %v9921_v29 = vpop.f32.mrf.mxu3 }
 0x8a9   :  { %v9932_v32 = vpop.f32.mrf.mxu0 }
 0x8aa   :  { %v9933_v57 = vadd.f32 %v9932_v32, %v9920_v41 }
 0x8ab   :  { %v9945_v42 = vpop.f32.mrf.mxu1 }
 0x8ac   :  { %v9946_v39 = vadd.f32 %v9945_v42, %v9933_v57 }
 0x8b1   :  { %v9934_v56 = vpop.f32.mrf.mxu0 }
 0x8b3   :  { %v9958_v54 = vpop.f32.mrf.mxu2  ;;  %v9947_v13 = vpop.f32.mrf.mxu1 }
 0x8b4   :  { %v9959_v34 = vadd.f32 %v9958_v54, %v9946_v39 }
 0x8b5   :  { %v9971_v37 = vpop.f32.mrf.mxu3 }
 0x8b6   :  { %v9972_v6 = vadd.f32 %v9971_v37, %v9959_v34 }
 0x8b8   :  { %v9982_v26 = vmax.f32 %v9972_v6, 0.0 }
 0x8ba   :  { %v9990_v38 = vpack.c.bf16 %v9982_v26, %v9982_v26 }
 0x8bb   :  { %v9960_v47 = vpop.f32.mrf.mxu2 }
 0x8bc   :  { %10606 = vmatmul.bf16.vlgmr.msrb.gmra.mxu3 %v9990_v38 }
 0x8bd   :  { %v9973_v52 = vpop.f32.mrf.mxu3 }
 0x8c9   :  { %v10516_v53 = vpop.f32.mrf.mxu0 }
 0x8ca   :  { %v10517_v49 = vadd.f32 %v17414_v44, %v10516_v53 }
 0x8cb   :  { %v10529_v58 = vpop.f32.mrf.mxu1 }
 0x8cc   :  { %v10530_v59 = vadd.f32 %v10529_v58, %v10517_v49 }
 0x8d1   :  { %v10518_v63 = vpop.f32.mrf.mxu0 }
 0x8d3   :  { %v10542_v3 = vpop.f32.mrf.mxu2  ;;  %v10531_v33 = vpop.f32.mrf.mxu1 }
 0x8d4   :  { %v10543_v51 = vadd.f32 %v10542_v3, %v10530_v59 }
 0x8d5   :  { %v10555_v8 = vpop.f32.mrf.mxu3 }
 0x8d6   :  { %v10556_v11 = vadd.f32 %v10555_v8, %v10543_v51 }
 0x8db   :  { %v10544_v0 = vpop.f32.mrf.mxu2 }
 0x8dd   :  { %v10557_v43 = vpop.f32.mrf.mxu3 }
 0x8e9   :  { %v10568_v4 = vpop.f32.mrf.mxu0 }
 0x8ea   :  { %v10569_v45 = vadd.f32 %v10568_v4, %v10556_v11 }
 0x8eb   :  { %v10581_v16 = vpop.f32.mrf.mxu1 }
 0x8ec   :  { %v10582_v61 = vadd.f32 %v10581_v16, %v10569_v45 }
 0x8f1   :  { %v10570_v5 = vpop.f32.mrf.mxu0 }
 0x8f3   :  { %v10594_v55 = vpop.f32.mrf.mxu2  ;;  %v10583_v17 = vpop.f32.mrf.mxu1 }
 0x8f4   :  { %v10595_v14 = vadd.f32 %v10594_v55, %v10582_v61 }
 0x8fb   :  { %v10596_v30 = vpop.f32.mrf.mxu2 }
 0x93f   :  { %v10607_v12 = vpop.f32.mrf.mxu3 }
 0x940   :  { %v10608_v18 = vadd.f32 %v10607_v12, %v10595_v14 }
 0x942   :  { %v10611_v19 = vmax.f32 %v10608_v18, 0.0 }
 0x944   :  { %v10612_v2 = vpack.c.bf16 %v10611_v19, %v10611_v19 }
 0x946   :  { %16056 = vmatmul.msk.bf16.vlgmr.msra.gmra.mxu0 %vm10633_vm0, %v10612_v2 }
 0x947   :  { %v10609_v21 = vpop.f32.mrf.mxu3 }
 0x9c3   :  { %v10646_v7 = vpop.f32.mrf.mxu0 }
 0x9c4   :  { %v10647_v60 = vadd.f32 %v17415_v62, %v10646_v7 }
 0x9c6   :  { %10651 = vst.msk [vmem:[#allocation13] sm:$0x3] %vm10650_vm1, %v10647_v60 }
 0x9c7   :  { %10662 = dma.vmem_to_hbm [thread:$0]  %s10658_s12, 32, %s10660_s3, [#allocation4]  }
 0x9cb   :  { %v10648_v24 = vpop.f32.mrf.mxu0 }
 0x9cc   :  { %17599 = dma.done.wait [#allocation4], 32  }
 0x9cd   :  { %17600 = vsyncadd [#allocation4], 4294967264 }
 0x9ce   :  { %10667 = vsyncpa [#allocation3], 1 }
 0x9cf   :  { %10668 = vsyncpa [#allocation6], 1 }
 0x9d0   :  { %10669 = vsyncpa [#allocation9], 1 }
 0x9d1   :  { %10670 = vsyncpa [#allocation12], 1 }
 0x9d2   :  { %10671 = vsyncpa [#allocation4], 1 }

</bundles_post_ra>
